<compile_context>
chip_gen: v7x
topology: tpu7x:2x2x1
jax: 0.10.0
libtpu: 0.0.40
codegen_flags: <defaults>
</compile_context>

<pallas_src>
import functools

import jax
import jax.numpy as jnp
from jax.experimental import pallas as pl
from jax.experimental.pallas import tpu as pltpu

NEG_INF = -1e30  # finite "-inf": masked (padded) instances get softmax weight 0


# ---------------------------------------------------------------------------
# Kernel 1: attention logits  s_i = Ww^T (tanh(Wv h_i) * sigmoid(Wu h_i)) + bw
#   Wv / Wu are packed column-wise into one matrix so the instance tile makes
#   a single pass through the MXU for both projections.
# ---------------------------------------------------------------------------
def _attn_logits_kernel(L_pad, n_ref, h_ref, wvu_ref, bvu_ref, ww_ref, bw_ref,
                        s_ref):
    h = h_ref[...]                                                   # (tile_n, M)
    act = jnp.dot(h, wvu_ref[...],
                  preferred_element_type=jnp.float32) + bvu_ref[...]  # (tile_n, 2*L_pad)
    gated = jnp.tanh(act[:, :L_pad]) * jax.nn.sigmoid(act[:, L_pad:])
    s = jnp.dot(gated, ww_ref[...],
                preferred_element_type=jnp.float32) + bw_ref[...]     # (tile_n, 1)

    # Mask padded rows so the downstream softmax assigns them zero weight.
    tile_n = s.shape[0]
    row = pl.program_id(0) * tile_n + jax.lax.broadcasted_iota(
        jnp.int32, s.shape, 0)
    s_ref[...] = jnp.where(row < n_ref[0], s, NEG_INF).astype(s_ref.dtype)


# ---------------------------------------------------------------------------
# Kernel 2: softmax over instances, attention pooling Z = A @ H, classifier.
# ---------------------------------------------------------------------------
def _pool_classify_kernel(s_full_ref, s_tile_ref, h_ref, wc_ref, bc_ref,
                          a_ref, z_ref, y_ref, m_sc, l_sc):
    i = pl.program_id(0)

    @pl.when(i == 0)
    def _():
        s_full = s_full_ref[...]                                     # (1, N_pad)
        m = jnp.max(s_full, axis=1, keepdims=True)                   # (1, 1)
        m_sc[...] = m
        l_sc[...] = jnp.sum(jnp.exp(s_full - m), axis=1, keepdims=True)
        z_ref[...] = jnp.zeros_like(z_ref)

    # Normalized attention weights for this tile (padded entries exp -> 0).
    inv_l = 1.0 / l_sc[...]
    a = jnp.exp(s_tile_ref[...] - m_sc[...]) * inv_l                 # (1, tile_n)
    a_ref[...] = a.astype(a_ref.dtype)
    # Accumulate the attention-weighted bag embedding into the resident output.
    z_ref[...] += jnp.dot(a, h_ref[...], preferred_element_type=jnp.float32)

    @pl.when(i == pl.num_programs(0) - 1)
    def _():
        y = jnp.dot(z_ref[...], wc_ref[...],
                    preferred_element_type=jnp.float32) + bc_ref[...]
        y_ref[...] = y.astype(y_ref.dtype)


def abmil_head(H, params, *, tile_n=256):
    """ABMIL gated-attention head. H: (N, M) float32 bag of instance features.

    Returns (Y_prob, A, Z) matching the PyTorch module:
      Y_prob: (n_classes,), A: (1, N), Z: (1, M).
    """
    N, M = H.shape
    L = params["w_v"].shape[1]
    n_cls = params["w_c"].shape[1]
    assert tile_n % 128 == 0, "tile_n must be a multiple of 128"
    f32 = jnp.float32

    # Pad the instance axis to a tile boundary (arbitrary N supported).
    num_tiles = pl.cdiv(N, tile_n)
    n_pad = num_tiles * tile_n
    H_pad = jnp.pad(H, ((0, n_pad - N), (0, 0))) if n_pad != N else H
    n_arr = jnp.array([N], dtype=jnp.int32)

    # Pack V/U projection weights column-wise (pad L to a lane multiple so the
    # in-kernel split lands on a 128-lane boundary).  Padded columns produce
    # tanh(0)*sigmoid(0) = 0 and padded Ww rows are zero, so they contribute 0.
    L_pad = ((L + 127) // 128) * 128
    w_vu = jnp.zeros((M, 2 * L_pad), f32)
    w_vu = w_vu.at[:, :L].set(params["w_v"]).at[:, L_pad:L_pad + L].set(params["w_u"])
    b_vu = jnp.zeros((1, 2 * L_pad), f32)
    b_vu = b_vu.at[0, :L].set(params["b_v"]).at[0, L_pad:L_pad + L].set(params["b_u"])
    w_w = jnp.zeros((L_pad, 1), f32).at[:L].set(params["w_w"])
    b_w = params["b_w"].reshape(1, 1).astype(f32)
    b_c = params["b_c"].reshape(1, n_cls).astype(f32)

    const2d = lambda arr: pl.BlockSpec(arr.shape, lambda i, n: (0, 0))

    # ---- Kernel 1: attention logits (parallel over instance tiles) ----------
    logits = pl.pallas_call(
        functools.partial(_attn_logits_kernel, L_pad),
        out_shape=jax.ShapeDtypeStruct((n_pad, 1), jnp.float32),
        grid_spec=pltpu.PrefetchScalarGridSpec(
            num_scalar_prefetch=1,
            grid=(num_tiles,),
            in_specs=[
                pl.BlockSpec((tile_n, M), lambda i, n: (i, 0)),   # H tile
                const2d(w_vu), const2d(b_vu),                     # resident weights
                const2d(w_w), const2d(b_w),
            ],
            out_specs=pl.BlockSpec((tile_n, 1), lambda i, n: (i, 0)),
        ),
        compiler_params=pltpu.CompilerParams(
            dimension_semantics=("parallel",)),
    )(n_arr, H_pad, w_vu, b_vu, w_w, b_w)

    logits_row = logits.reshape(1, n_pad)   # lane-dense layout for kernel 2

    # ---- Kernel 2: softmax + attention pooling + classifier (sequential) ----
    A_full, Z, Y2d = pl.pallas_call(
        _pool_classify_kernel,
        out_shape=(
            jax.ShapeDtypeStruct((1, n_pad), jnp.float32),   # A (attention)
            jax.ShapeDtypeStruct((1, M), jnp.float32),       # Z (bag embedding)
            jax.ShapeDtypeStruct((1, n_cls), jnp.float32),   # Y logits
        ),
        grid_spec=pltpu.PrefetchScalarGridSpec(
            num_scalar_prefetch=0,
            grid=(num_tiles,),
            in_specs=[
                pl.BlockSpec((1, n_pad), lambda i: (0, 0)),      # all logits (resident)
                pl.BlockSpec((1, tile_n), lambda i: (0, i)),     # logits tile
                pl.BlockSpec((tile_n, M), lambda i: (i, 0)),     # H tile
                pl.BlockSpec((M, n_cls), lambda i: (0, 0)),      # classifier W
                pl.BlockSpec((1, n_cls), lambda i: (0, 0)),      # classifier b
            ],
            out_specs=(
                pl.BlockSpec((1, tile_n), lambda i: (0, i)),
                pl.BlockSpec((1, M), lambda i: (0, 0)),
                pl.BlockSpec((1, n_cls), lambda i: (0, 0)),
            ),
            scratch_shapes=[
                pltpu.VMEM((1, 1), jnp.float32),   # softmax max
                pltpu.VMEM((1, 1), jnp.float32),   # softmax denom
            ],
        ),
        compiler_params=pltpu.CompilerParams(
            dimension_semantics=("arbitrary",)),
    )(logits_row, logits_row, H_pad, params["w_c"], b_c)

    A = A_full[:, :N]          # drop padded instances (their weight is exactly 0)
    Y = Y2d[0]                 # squeeze -> (n_classes,)
    return Y, A, Z


# ---------------------------------------------------------------------------
# Parameter init matching nn.Linear (U(-1/sqrt(fan_in), 1/sqrt(fan_in))).
# Weights stored as (in_dim, out_dim) so the kernel computes x @ W + b.
# ---------------------------------------------------------------------------
def init_params(key, M=512, L=512, n_classes=2):
    keys = jax.random.split(key, 8)

    def linear(kw, kb, fan_in, fan_out):
        bound = float(1.0 / (fan_in ** 0.5))
        w = jax.random.uniform(kw, (fan_in, fan_out), jnp.float32, -bound, bound)
        b = jax.random.uniform(kb, (fan_out,), jnp.float32, -bound, bound)
        return w, b

    w_v, b_v = linear(keys[0], keys[1], M, L)
    w_u, b_u = linear(keys[2], keys[3], M, L)
    w_w, b_w = linear(keys[4], keys[5], L, 1)
    w_c, b_c = linear(keys[6], keys[7], M, n_classes)
    return dict(w_v=w_v, b_v=b_v, w_u=w_u, b_u=b_u,
                w_w=w_w, b_w=b_w, w_c=w_c, b_c=b_c)


def reference(H, params):
    a_v = jnp.tanh(H @ params["w_v"] + params["b_v"])
    a_u = jax.nn.sigmoid(H @ params["w_u"] + params["b_u"])
    s = (a_v * a_u) @ params["w_w"] + params["b_w"]      # (N, 1)
    A = jax.nn.softmax(s.T, axis=1)                      # (1, N)
    Z = A @ H                                            # (1, M)
    Y = (Z @ params["w_c"] + params["b_c"]).squeeze()    # (n_classes,)
    return Y, A, Z


if __name__ == "__main__":
    key = jax.random.PRNGKey(0)
    k_h, k_p = jax.random.split(key)

    N, M, L = 300, 512, 512          # bag of 300 instances, module defaults M=L=512
    H = jax.random.normal(k_h, (N, M), dtype=jnp.float32)
    params = init_params(k_p, M=M, L=L)

    Y, A, Z = abmil_head(H, params, tile_n=256)   # N=300 -> 2 tiles, masked padding
    (Y, A, Z) = jax.block_until_ready((Y, A, Z))

    Y_ref, A_ref, Z_ref = reference(H, params)

    assert Y.shape == (2,) and A.shape == (1, N) and Z.shape == (1, M)
    assert jnp.allclose(jnp.sum(A), 1.0, atol=1e-4), "attention weights not normalized"
    assert jnp.allclose(A, A_ref, atol=5e-3, rtol=5e-3), "A mismatch vs reference"
    assert jnp.allclose(Z, Z_ref, atol=5e-3, rtol=5e-3), "Z mismatch vs reference"
    assert jnp.allclose(Y, Y_ref, atol=5e-3, rtol=5e-3), "Y mismatch vs reference"

    print("KERNEL_OK")
</pallas_src>

<mosaic_0001>
module attributes {stable_mosaic.version = 11 : i64} {
  func.func @_attn_logits_kernel(%arg0: i32, %arg1: memref<1xi32, #tpu.memory_space<smem>>, %arg2: memref<256x512xf32, #tpu.memory_space<vmem>>, %arg3: memref<512x1024xf32, #tpu.memory_space<vmem>>, %arg4: memref<1x1024xf32, #tpu.memory_space<vmem>>, %arg5: memref<512x1xf32, #tpu.memory_space<vmem>>, %arg6: memref<1x1xf32, #tpu.memory_space<vmem>>, %arg7: memref<256x1xf32, #tpu.memory_space<vmem>>) attributes {dimension_semantics = [#tpu.dimension_semantics<parallel>], iteration_bounds = array<i64: 2>, scalar_prefetch = 1 : i64, scratch_operands = 0 : i64, tpu.core_type = #tpu.core_type<tc>, window_params = [{transform_indices = @transform_0, window_bounds = array<i64: 256, 512>}, {pipeline_mode = #tpu.pipeline_mode<synchronous>, transform_indices = @transform_1, window_bounds = array<i64: 512, 1024>}, {pipeline_mode = #tpu.pipeline_mode<synchronous>, transform_indices = @transform_2, window_bounds = array<i64: 1, 1024>}, {pipeline_mode = #tpu.pipeline_mode<synchronous>, transform_indices = @transform_3, window_bounds = array<i64: 512, 1>}, {pipeline_mode = #tpu.pipeline_mode<synchronous>, transform_indices = @transform_4, window_bounds = array<i64: 1, 1>}, {transform_indices = @transform_5, window_bounds = array<i64: 256, 1>}]} {
    %c0 = arith.constant 0 : index
    %c0_0 = arith.constant 0 : index
    %0 = vector.load %arg2[%c0, %c0_0] : memref<256x512xf32, #tpu.memory_space<vmem>>, vector<256x512xf32>
    %c0_1 = arith.constant 0 : index
    %c0_2 = arith.constant 0 : index
    %1 = vector.load %arg3[%c0_1, %c0_2] : memref<512x1024xf32, #tpu.memory_space<vmem>>, vector<512x1024xf32>
    %cst = arith.constant dense<0.000000e+00> : vector<256x1024xf32>
    %2 = tpu.matmul %0, %1, %cst {dimension_numbers = #tpu.dot_dimension_numbers<[1], [0], [0], [1], [0, 0, 1, 1], [], []>} : vector<256x512xf32>, vector<512x1024xf32>, vector<256x1024xf32> -> vector<256x1024xf32>
    %c0_3 = arith.constant 0 : index
    %c0_4 = arith.constant 0 : index
    %3 = vector.load %arg4[%c0_3, %c0_4] : memref<1x1024xf32, #tpu.memory_space<vmem>>, vector<1x1024xf32>
    %4 = vector.broadcast %3 : vector<1x1024xf32> to vector<256x1024xf32>
    %5 = arith.addf %2, %4 : vector<256x1024xf32>
    %6 = vector.extract_strided_slice %5 {offsets = [0, 0], sizes = [256, 512], strides = [1, 1]} : vector<256x1024xf32> to vector<256x512xf32>
    %7 = math.tanh %6 : vector<256x512xf32>
    %8 = vector.extract_strided_slice %5 {offsets = [0, 512], sizes = [256, 512], strides = [1, 1]} : vector<256x1024xf32> to vector<256x512xf32>
    %9 = arith.negf %8 : vector<256x512xf32>
    %10 = math.exp %9 : vector<256x512xf32>
    %cst_5 = arith.constant 1.000000e+00 : f32
    %11 = vector.broadcast %cst_5 : f32 to vector<256x512xf32>
    %12 = arith.addf %11, %10 : vector<256x512xf32>
    %13 = arith.divf %11, %12 : vector<256x512xf32>
    %14 = arith.mulf %7, %13 : vector<256x512xf32>
    %c0_6 = arith.constant 0 : index
    %c0_7 = arith.constant 0 : index
    %15 = vector.load %arg5[%c0_6, %c0_7] : memref<512x1xf32, #tpu.memory_space<vmem>>, vector<512x1xf32>
    %cst_8 = arith.constant dense<0.000000e+00> : vector<256x1xf32>
    %16 = tpu.matmul %14, %15, %cst_8 {dimension_numbers = #tpu.dot_dimension_numbers<[1], [0], [0], [1], [0, 0, 1, 1], [], []>} : vector<256x512xf32>, vector<512x1xf32>, vector<256x1xf32> -> vector<256x1xf32>
    %c0_9 = arith.constant 0 : index
    %c0_10 = arith.constant 0 : index
    %17 = vector.load %arg6[%c0_9, %c0_10] : memref<1x1xf32, #tpu.memory_space<vmem>>, vector<1x1xf32>
    %18 = vector.broadcast %17 : vector<1x1xf32> to vector<256x1xf32>
    %19 = arith.addf %16, %18 : vector<256x1xf32>
    %c256_i32 = arith.constant 256 : i32
    %20 = arith.muli %arg0, %c256_i32 : i32
    %21 = tpu.iota {dimensions = array<i32: 0>} : vector<256x1xi32>
    %22 = vector.broadcast %20 : i32 to vector<256x1xi32>
    %23 = arith.addi %22, %21 : vector<256x1xi32>
    %c0_11 = arith.constant 0 : index
    %24 = memref.load %arg1[%c0_11] : memref<1xi32, #tpu.memory_space<smem>>
    %25 = vector.broadcast %24 : i32 to vector<256x1xi32>
    %26 = arith.cmpi slt, %23, %25 : vector<256x1xi32>
    %cst_12 = arith.constant -1.000000e+30 : f32
    %27 = vector.broadcast %cst_12 : f32 to vector<256x1xf32>
    %28 = arith.select %26, %19, %27 : vector<256x1xi1>, vector<256x1xf32>
    %c0_13 = arith.constant 0 : index
    %c0_14 = arith.constant 0 : index
    %29 = vector.load %arg7[%c0_13, %c0_14] : memref<256x1xf32, #tpu.memory_space<vmem>>, vector<256x1xf32>
    tpu.vector_store %arg7[%c0_13, %c0_14], %28 {strides = array<i32>} : memref<256x1xf32, #tpu.memory_space<vmem>>, vector<256x1xf32>,
    return
  }
  func.func @transform_0(%arg0: i32, %arg1: memref<1xi32, #tpu.memory_space<smem>>) -> (i32, i32) {
    %c0_i32 = arith.constant 0 : i32
    %c0_i32_0 = arith.constant 0 : i32
    return %arg0, %c0_i32 : i32, i32
  }
  func.func @transform_1(%arg0: i32, %arg1: memref<1xi32, #tpu.memory_space<smem>>) -> (i32, i32) {
    %c0_i32 = arith.constant 0 : i32
    %c0_i32_0 = arith.constant 0 : i32
    %c0_i32_1 = arith.constant 0 : i32
    return %c0_i32, %c0_i32_0 : i32, i32
  }
  func.func @transform_2(%arg0: i32, %arg1: memref<1xi32, #tpu.memory_space<smem>>) -> (i32, i32) {
    %c0_i32 = arith.constant 0 : i32
    %c0_i32_0 = arith.constant 0 : i32
    %c0_i32_1 = arith.constant 0 : i32
    return %c0_i32, %c0_i32_0 : i32, i32
  }
  func.func @transform_3(%arg0: i32, %arg1: memref<1xi32, #tpu.memory_space<smem>>) -> (i32, i32) {
    %c0_i32 = arith.constant 0 : i32
    %c0_i32_0 = arith.constant 0 : i32
    %c0_i32_1 = arith.constant 0 : i32
    return %c0_i32, %c0_i32_0 : i32, i32
  }
  func.func @transform_4(%arg0: i32, %arg1: memref<1xi32, #tpu.memory_space<smem>>) -> (i32, i32) {
    %c0_i32 = arith.constant 0 : i32
    %c0_i32_0 = arith.constant 0 : i32
    %c0_i32_1 = arith.constant 0 : i32
    return %c0_i32, %c0_i32_0 : i32, i32
  }
  func.func @transform_5(%arg0: i32, %arg1: memref<1xi32, #tpu.memory_space<smem>>) -> (i32, i32) {
    %c0_i32 = arith.constant 0 : i32
    %c0_i32_0 = arith.constant 0 : i32
    return %arg0, %c0_i32 : i32, i32
  }
}

</mosaic_0001>

<bundles_post_ra>
// kernel: tpu_custom_call.1
= control target key start
LH: loop header
LB: loop body
LE: loop exit
PB: predicated region body
PF: predicated region fallthrough
CT: control target
= control target key end

     0   :  { %s9543_s0 = inlined_call_operand.<no memory space> [shape: s32[1], index: 0, kind: input, shape index: {}]   ;;  %s9544_s1 = inlined_call_operand.hbm [shape: f32[512,512], index: 1, kind: input, shape index: {}]   ;;  %s9545_s2 = inlined_call_operand.hbm [shape: f32[512,1024], index: 2, kind: input, shape index: {}]   ;;  %s9546_s3 = inlined_call_operand.hbm [shape: f32[1,1024], index: 3, kind: input, shape index: {}]   ;;  %s9547_s4 = inlined_call_operand.vmem [shape: f32[512,1], index: 4, kind: input, shape index: {}]   ;;  %s9548_s5 = inlined_call_operand.<no memory space> [shape: f32[1,1], index: 5, kind: input, shape index: {}]   ;;  %s9549_s6 = inlined_call_operand.vmem [shape: f32[512,1], index: 6, kind: output, shape index: {}]  }
   0x1   :  { %11 = sst [smem:[#allocation3]] %s9543_s0  ;;  %v12_v0 = vstv %s9548_s5 }
   0x2   :  { %13 = vst [vmem:[#allocation4] sm:$0x1] %v12_v0 }
   0x3   :  { %14 = vsyncpa [#allocation6], 0 }
   0x4   :  { %16 = vsyncpa [#allocation6 + $0x1], 0 }
   0x5   :  { %17 = vsyncpa [#allocation8], 0  ;;  %s7406_s25 = smov 0   ;;  %s7408_s26 = smov 0  }
   0x6   :  { %s7410_s27 = smov 0   ;;  %s7412_s28 = smov 0  }
   0x7 LB: > { %s7425_s0 = sadd.s32 4294967295, %s7355_s28   ;;  %p43_p0 = scmp.ne.s32.totalorder %s7347_s26, %s7343_s25  ;;  %s7355_s28 = sphi %s7412_s28, %s9759_s28   ;;  %s7351_s27 = sphi %s7410_s27, %s9758_s27   ;;  %s7347_s26 = sphi %s7408_s26, %s9757_s26   ;;  %s7343_s25 = sphi %s7406_s25, %s9756_s25  }
   0x8   : > { %p9550_p1 = scmp.eq.s32.totalorder %s7425_s0, 0  ;;  %p4816_p2 = scmp.ge.s32.totalorder %s7355_s28, 1 }
   0x9   : > { %p164_p3 = scmp.lt.s32.totalorder %s7355_s28, 3  ;;  %s7357_s30 = smov [#allocation7]  }
   0xa   : > { %p7433_p4 = por %p9550_p1, %p43_p0  ;;  %s176_s7 = sshll.u32 %s7357_s30, 4  ;;  %s177_s7 = int_to_ptr.vmem [resolvable:$true] %s176_s7 }
   0xb   : > { %p7437_p5 = pnand %p4816_p2, %p164_p3  ;;  %s7358_s9 = smov [#allocation9]  }
   0xc   : > { %s9566_s5 = scalar_select %p7433_p4, 1, 0 }
   0xd   : > { %s9567_s29 = scalar_select %p7437_p5, 1, 0 }
   0xe   : > { %p6190_p6 = pneg %p7437_p5  ;;  %s190_s10 = sshll.u32 %s7358_s9, 4  ;;  %s7449_s10 = int_to_ptr.vmem [resolvable:$true] %s190_s10 }
   0xf   : > { %s7231_s13 = scalar_lea.hbm %s9545_s2, 65536 }
  0x10   : > { %p7445_p7 = pnand %p6190_p6, %p9550_p1  ;;  %p7232_p8 = scmp.ne.s32.totalorder %s9545_s2, %s7231_s13 }
  0x11   : > { %p7238_p12 = scmp.lt.u32.totalorder %s7231_s13, %s9545_s2 }
  0x12   : > { %p7233_p9 = pneg %p7445_p7 }
  0x14   : > { %p7234_p10 = pnand %p7233_p9, %p7232_p8 }
  0x16   : > { %p7235_p11 = pneg %p7234_p10 }
  0x18   : > { %p7240_p13 = pnand %p7238_p12, %p7235_p11 }
  0x1a   : > { %7243 = shalt.err (!%p7240_p13)
}
  0x1b   : > { %s7244_s18 = scalar_lea.vmem %s177_s7, 65536  ;;  %p7252_p6 = scmp.lt.s32.totalorder %s177_s7, %s177_s7 }
  0x1c   : > { %p7245_p0 = scmp.ne.s32.totalorder %s177_s7, %s7244_s18  ;;  %p7253_p1 = scmp.lt.s32.totalorder %s7244_s18, %s7244_s18 }
  0x1e   : > { %p7247_p2 = pnand %p7245_p0, %p7233_p9  ;;  %p7254_p4 = por %p7253_p1, %p7252_p6 }
  0x20   : > { %p7248_p3 = pneg %p7247_p2 }
  0x22   : > { %p7255_p5 = pnand %p7254_p4, %p7248_p3 }
  0x24   : > { %7258 = shalt.err (!%p7255_p5)
}
  0x25   : > { %s7359_s19 = smov 1024   ;;  %s7360_s20 = smov 64  }
  0x26   : > { %6193 = dma.hbm_to_vmem [thread:$0]  (!%p7445_p7), %s9545_s2, 65536, %s177_s7, [#allocation8], %s7359_s19, %s7359_s19, %s7360_s20  }
  0x27   : > { %s7259_s25 = scalar_lea.hbm %s9546_s3, 128 }
  0x28   : > { %p7260_p8 = scmp.ne.s32.totalorder %s9546_s3, %s7259_s25  ;;  %p7266_p5 = scmp.lt.u32.totalorder %s7259_s25, %s9546_s3 }
  0x2a   : > { %p7262_p1 = pnand %p7260_p8, %p7233_p9 }
  0x2c   : > { %p7263_p4 = pneg %p7262_p1 }
  0x2e   : > { %p7268_p10 = pnand %p7266_p5, %p7263_p4 }
  0x30   : > { %7271 = shalt.err (!%p7268_p10)
}
  0x31   : > { %s7272_s7 = scalar_lea.vmem %s7449_s10, 128  ;;  %p7280_p0 = scmp.lt.s32.totalorder %s7449_s10, %s7449_s10 }
  0x32   : > { %p7273_p11 = scmp.ne.s32.totalorder %s7449_s10, %s7272_s7  ;;  %p7281_p2 = scmp.lt.s32.totalorder %s7272_s7, %s7272_s7 }
  0x34   : > { %p7275_p12 = pnand %p7273_p11, %p7233_p9  ;;  %p7282_p3 = por %p7281_p2, %p7280_p0 }
  0x36   : > { %p7276_p13 = pneg %p7275_p12 }
  0x38   : > { %p7283_p6 = pnand %p7282_p3, %p7276_p13 }
  0x3a   : > { %7286 = shalt.err (!%p7283_p6)
}
  0x3b   : > { %6196 = dma.hbm_to_vmem [thread:$0]  (!%p7445_p7), %s9546_s3, 128, %s7449_s10, [#allocation8]  }
  0x3c   : > { %s7499_s15 = sadd.s32 1, %s7355_s28   ;;  %s30_s16 = sadd.s32 1, %s7351_s27 }
  0x3d   : > { %s27_s8 = ssub.s32 %s7355_s28, %s7499_s15  ;;  %p37_p9 = scmp.ne.s32.totalorder %s7351_s27, %s7347_s26 }
  0x3e   : > { %p28_p8 = scmp.eq.s32.totalorder %s27_s8, 0  ;;  %p38_p1 = scmp.eq.s32.totalorder %s7355_s28, 0 }
  0x3f   : > { %p6203_p4 = scmp.lt.s32.totalorder %s7355_s28, 2  ;;  %s207_s17 = sand.u32 1, %s7351_s27  }
  0x40   : > { %s7510_s18 = scalar_select %p28_p8, %s7351_s27, %s30_s16  }
  0x41   : > { %p39_p5 = por %p38_p1, %p37_p9  ;;  %s4820_s19 = sshll.u32 %s207_s17, 10 }
  0x42   : > { %s4963_s20 = sshll.u32 %s7355_s28, 14  ;;  %s211_s10 = scalar_lea.vmem [#allocation5], %s4820_s19 }
  0x43   : > { %s7516_s23 = scalar_lea.hbm %s9544_s1, %s4963_s20  ;;  %s219_s24 = sshll.u32 %s211_s10, 4  ;;  %s7522_s24 = int_to_ptr.vmem [resolvable:$true] %s219_s24 }
  0x44   : > { %p7518_p7 = pnand %p6203_p4, %p39_p5  ;;  %s7524_s28 = scalar_lea.sflag [#allocation6], %s207_s17 }
  0x45   : > { %s7287_s30 = scalar_lea.hbm %s7516_s23, 16384  ;;  %s7292_s12 = scalar_lea.hbm %s9544_s1, 32768 }
  0x46   : > { %p7288_p10 = scmp.ne.s32.totalorder %s7516_s23, %s7287_s30  ;;  %p7289_p11 = pneg %p7518_p7 }
  0x47   : > { %p7293_p0 = scmp.lt.u32.totalorder %s7516_s23, %s9544_s1  ;;  %p7294_p2 = scmp.lt.u32.totalorder %s7292_s12, %s7287_s30 }
  0x48   : > { %p7290_p12 = pnand %p7289_p11, %p7288_p10  ;;  %p7296_p6 = scmp.lt.u32.totalorder %s7287_s30, %s7516_s23 }
  0x49   : > { %p7295_p3 = por %p7294_p2, %p7293_p0 }
  0x4a   : > { %p7291_p13 = pneg %p7290_p12 }
  0x4b   : > { %p7297_p9 = por %p7296_p6, %p7295_p3 }
  0x4d   : > { %p7298_p8 = pnand %p7297_p9, %p7291_p13 }
  0x4f   : > { %7301 = shalt.err (!%p7298_p8)
}
  0x50   : > { %s7302_s14 = scalar_lea.vmem %s7522_s24, 16384  ;;  %s7361_s16 = smov [#allocation5]  }
  0x51   : > { %p7303_p1 = scmp.ne.s32.totalorder %s7522_s24, %s7302_s14  ;;  %s7307_s8 = sshll.u32 %s7361_s16, 4  ;;  %s7308_s8 = int_to_ptr.vmem [resolvable:$false] %s7307_s8 }
  0x52   : > { %s7309_s17 = scalar_lea.vmem %s7308_s8, 32768  ;;  %p7310_p10 = scmp.lt.s32.totalorder %s7522_s24, %s7308_s8 }
  0x53   : > { %p7305_p4 = pnand %p7303_p1, %p7289_p11  ;;  %p7311_p12 = scmp.lt.s32.totalorder %s7309_s17, %s7302_s14 }
  0x55   : > { %p7306_p5 = pneg %p7305_p4  ;;  %p7312_p0 = por %p7311_p12, %p7310_p10 }
  0x57   : > { %p7313_p2 = pnand %p7312_p0, %p7306_p5 }
  0x59   : > { %7316 = shalt.err (!%p7313_p2)
}
  0x5a   : > { %s7362_s19 = smov 512   ;;  %s7363_s20 = smov 32  }
  0x5b   : > { %6200 = dma.hbm_to_vmem [thread:$0]  (!%p7518_p7), %s7516_s23, 16384, %s7522_s24, %s7524_s28, %s7362_s19, %s7362_s19, %s7363_s20  }
  0x5c   : > { %p9570_p11 = scmp.ne.s32.totalorder %s9567_s29, 0 }
  0x5e   : > { %231 = sbr.rel (%p9570_p11) target bundleno = 1276 (0x4fc), region = 40 }
  0x65   : > { %s233_s21 = sand.u32 1, %s7347_s26   ;;  %p9571_p13 = scmp.ne.s32.totalorder %s9566_s5, 0 }
  0x66   : > { %s4825_s22 = sshll.u32 %s233_s21, 10  ;;  %s234_s10 = scalar_lea.sflag [#allocation6], %s233_s21 }
  0x67   : > { %s7555_s30 = scalar_lea.vmem [#allocation5], %s4825_s22 }
  0x68   : > { %7334 = dma.done.wait (%p9571_p13), %s234_s10, 16384  }
  0x69   : > { %7336 = vsyncadd (%p9571_p13), %s234_s10, 4294950912  ;;  %p9572_p3 = scmp.eq.s32.totalorder %s7425_s0, 0 }
  0x6b   : > { %7338 = dma.done.wait (%p9572_p3), [#allocation8], 65664   ;;  %p9573_p7 = pmov %p9572_p3 }
  0x6c   : > { %v408_v1 = vld [vmem:[#allocation7 + $0x8] sm:$0xff]  ;;  %v407_v6 = vld [vmem:[#allocation7] sm:$0xff]  ;;  %s4828_s11 = sshll.u32 %s7425_s0, 5  ;;  %s4629_s12 = sld [smem:[#allocation3]]  ;;  %vm4695_vm1 = vcmask 7168  }
  0x6d   : > { %7340 = vsyncadd (%p9573_p7), [#allocation8], 4294901632  ;;  %v416_v2 = vld [vmem:[#allocation7 + $0x48] sm:$0xff]  ;;  %v415_v7 = vld [vmem:[#allocation7 + $0x40] sm:$0xff]  ;;  %p274_p6 = scmp.lt.s32.totalorder %s4828_s11, 63  ;;  %s4959_s7 = sshll.u32 %s7425_s0, 8 }
  0x6e   : > { %v664_v3 = vld [vmem:[#allocation7 + $0x808] sm:$0xff]  ;;  %v4964_v4 = vpack.c.bf16 %v416_v2, %v408_v1  ;;  %v4966_v9 = vpack.c.bf16 %v415_v7, %v407_v6  ;;  %v663_v10 = vld [vmem:[#allocation7 + $0x800] sm:$0xff] }
  0x6f   : > { %v672_v5 = vld [vmem:[#allocation7 + $0x848] sm:$0xff]  ;;  %v671_v11 = vld [vmem:[#allocation7 + $0x840] sm:$0xff]  ;;  %s9761_s11 = smov (!%p274_p6, %s4828_s11), 63 }
  0x70   : > { %v5028_v8 = vpack.c.bf16 %v672_v5, %v664_v3  ;;  %v424_v12 = vld [vmem:[#allocation7 + $0x88] sm:$0xff]  ;;  %4965 = vmatprep.subr.bf16.mxu1 %v4964_v4  ;;  %v5030_v13 = vpack.c.bf16 %v671_v11, %v663_v10  ;;  %v423_v19 = vld [vmem:[#allocation7 + $0x80] sm:$0xff]  ;;  %s4829_s13 = sshll.u32 %s9761_s11, 3 }
  0x71   : > { %v432_v14 = vld [vmem:[#allocation7 + $0xc8] sm:$0xff]  ;;  %4967 = vmatpush1.bf16.msra.mxu1 %v4966_v9  ;;  %v431_v20 = vld [vmem:[#allocation7 + $0xc0] sm:$0xff]  ;;  %s9342_s16 = scalar_lea.vmem %s9549_s6, %s4829_s13 }
  0x72   : > { %v680_v15 = vld [vmem:[#allocation7 + $0x888] sm:$0xff]  ;;  %5029 = vmatprep.subr.bf16.mxu0 %v5028_v8  ;;  %v4968_v17 = vpack.c.bf16 %v432_v14, %v424_v12  ;;  %v679_v21 = vld [vmem:[#allocation7 + $0x880] sm:$0xff]  ;;  %v4970_v22 = vpack.c.bf16 %v431_v20, %v423_v19 }
  0x73   : > { %v688_v16 = vld [vmem:[#allocation7 + $0x8c8] sm:$0xff]  ;;  %5031 = vmatpush1.bf16.msra.mxu0 %v5030_v13  ;;  %v687_v23 = vld [vmem:[#allocation7 + $0x8c0] sm:$0xff] }
  0x74   : > { %v5032_v18 = vpack.c.bf16 %v688_v16, %v680_v15  ;;  %v440_v24 = vld [vmem:[#allocation7 + $0x108] sm:$0xff]  ;;  %4969 = vmatprep.subr.bf16.mxu1 %v4968_v17  ;;  %v5034_v26 = vpack.c.bf16 %v687_v23, %v679_v21  ;;  %v439_v30 = vld [vmem:[#allocation7 + $0x100] sm:$0xff] }
  0x75   : > { %v448_v25 = vld [vmem:[#allocation7 + $0x148] sm:$0xff]  ;;  %v447_v32 = vld [vmem:[#allocation7 + $0x140] sm:$0xff]  ;;  %4971 = vmatpush1.bf16.msra.mxu1 %v4970_v22 }
  0x76   : > { %5033 = vmatprep.subr.bf16.mxu0 %v5032_v18  ;;  %v4972_v27 = vpack.c.bf16 %v448_v25, %v440_v24  ;;  %v696_v28 = vld [vmem:[#allocation7 + $0x908] sm:$0xff]  ;;  %v695_v33 = vld [vmem:[#allocation7 + $0x900] sm:$0xff]  ;;  %v4974_v35 = vpack.c.bf16 %v447_v32, %v439_v30 }
  0x77   : > { %v704_v29 = vld [vmem:[#allocation7 + $0x948] sm:$0xff]  ;;  %v703_v34 = vld [vmem:[#allocation7 + $0x940] sm:$0xff]  ;;  %5035 = vmatpush1.bf16.msra.mxu0 %v5034_v26 }
  0x78   : > { %v5036_v31 = vpack.c.bf16 %v704_v29, %v696_v28  ;;  %v456_v36 = vld [vmem:[#allocation7 + $0x188] sm:$0xff]  ;;  %4973 = vmatprep.subr.bf16.mxu1 %v4972_v27  ;;  %v5038_v39 = vpack.c.bf16 %v703_v34, %v695_v33  ;;  %v455_v42 = vld [vmem:[#allocation7 + $0x180] sm:$0xff] }
  0x79   : > { %v464_v37 = vld [vmem:[#allocation7 + $0x1c8] sm:$0xff]  ;;  %v463_v43 = vld [vmem:[#allocation7 + $0x1c0] sm:$0xff]  ;;  %4975 = vmatpush1.bf16.msra.mxu1 %v4974_v35 }
  0x7a   : > { %v712_v38 = vld [vmem:[#allocation7 + $0x988] sm:$0xff]  ;;  %v4976_v40 = vpack.c.bf16 %v464_v37, %v456_v36  ;;  %5037 = vmatprep.subr.bf16.mxu0 %v5036_v31  ;;  %v711_v45 = vld [vmem:[#allocation7 + $0x980] sm:$0xff]  ;;  %v4978_v51 = vpack.c.bf16 %v463_v43, %v455_v42 }
  0x7b   : > { %v720_v41 = vld [vmem:[#allocation7 + $0x9c8] sm:$0xff]  ;;  %v719_v46 = vld [vmem:[#allocation7 + $0x9c0] sm:$0xff]  ;;  %5039 = vmatpush1.bf16.msra.mxu0 %v5038_v39 }
  0x7c   : > { %v5040_v44 = vpack.c.bf16 %v720_v41, %v712_v38  ;;  %v472_v47 = vld [vmem:[#allocation7 + $0x208] sm:$0xff]  ;;  %4977 = vmatprep.subr.bf16.mxu1 %v4976_v40  ;;  %v5042_v52 = vpack.c.bf16 %v719_v46, %v711_v45  ;;  %v471_v54 = vld [vmem:[#allocation7 + $0x200] sm:$0xff] }
  0x7d   : > { %v480_v48 = vld [vmem:[#allocation7 + $0x248] sm:$0xff]  ;;  %v479_v55 = vld [vmem:[#allocation7 + $0x240] sm:$0xff]  ;;  %4979 = vmatpush1.bf16.msra.mxu1 %v4978_v51 }
  0x7e   : > { %v728_v49 = vld [vmem:[#allocation7 + $0xa08] sm:$0xff]  ;;  %v4980_v53 = vpack.c.bf16 %v480_v48, %v472_v47  ;;  %v727_v56 = vld [vmem:[#allocation7 + $0xa00] sm:$0xff]  ;;  %5041 = vmatprep.subr.bf16.mxu0 %v5040_v44  ;;  %v4982_v63 = vpack.c.bf16 %v479_v55, %v471_v54 }
  0x7f   : > { %v736_v50 = vld [vmem:[#allocation7 + $0xa48] sm:$0xff]  ;;  %v735_v58 = vld [vmem:[#allocation7 + $0xa40] sm:$0xff]  ;;  %5043 = vmatpush1.bf16.msra.mxu0 %v5042_v52 }
  0x80   : > { %v5044_v57 = vpack.c.bf16 %v736_v50, %v728_v49  ;;  %v488_v59 = vld [vmem:[#allocation7 + $0x288] sm:$0xff]  ;;  %4981 = vmatprep.subr.bf16.mxu1 %v4980_v53  ;;  %v5046_v0 = vpack.c.bf16 %v735_v58, %v727_v56  ;;  %v487_v2 = vld [vmem:[#allocation7 + $0x280] sm:$0xff] }
  0x81   : > { %v496_v60 = vld [vmem:[#allocation7 + $0x2c8] sm:$0xff]  ;;  %v495_v3 = vld [vmem:[#allocation7 + $0x2c0] sm:$0xff]  ;;  %4983 = vmatpush1.bf16.msra.mxu1 %v4982_v63 }
  0x82   : > { %v744_v61 = vld [vmem:[#allocation7 + $0xa88] sm:$0xff]  ;;  %v4984_v1 = vpack.c.bf16 %v496_v60, %v488_v59  ;;  %v743_v4 = vld [vmem:[#allocation7 + $0xa80] sm:$0xff]  ;;  %5045 = vmatprep.subr.bf16.mxu0 %v5044_v57  ;;  %v4986_v11 = vpack.c.bf16 %v495_v3, %v487_v2 }
  0x83   : > { %v752_v62 = vld [vmem:[#allocation7 + $0xac8] sm:$0xff]  ;;  %v751_v6 = vld [vmem:[#allocation7 + $0xac0] sm:$0xff]  ;;  %5047 = vmatpush1.bf16.msra.mxu0 %v5046_v0 }
  0x84   : > { %v5048_v5 = vpack.c.bf16 %v752_v62, %v744_v61  ;;  %v504_v7 = vld [vmem:[#allocation7 + $0x308] sm:$0xff]  ;;  %4985 = vmatprep.subr.bf16.mxu1 %v4984_v1  ;;  %v5050_v12 = vpack.c.bf16 %v751_v6, %v743_v4  ;;  %v503_v14 = vld [vmem:[#allocation7 + $0x300] sm:$0xff] }
  0x85   : > { %v512_v8 = vld [vmem:[#allocation7 + $0x348] sm:$0xff]  ;;  %v511_v15 = vld [vmem:[#allocation7 + $0x340] sm:$0xff]  ;;  %4987 = vmatpush1.bf16.msra.mxu1 %v4986_v11 }
  0x86   : > { %v760_v9 = vld [vmem:[#allocation7 + $0xb08] sm:$0xff]  ;;  %v4988_v13 = vpack.c.bf16 %v512_v8, %v504_v7  ;;  %v759_v16 = vld [vmem:[#allocation7 + $0xb00] sm:$0xff]  ;;  %5049 = vmatprep.subr.bf16.mxu0 %v5048_v5  ;;  %v4990_v23 = vpack.c.bf16 %v511_v15, %v503_v14 }
  0x87   : > { %v768_v10 = vld [vmem:[#allocation7 + $0xb48] sm:$0xff]  ;;  %v767_v18 = vld [vmem:[#allocation7 + $0xb40] sm:$0xff]  ;;  %5051 = vmatpush1.bf16.msra.mxu0 %v5050_v12 }
  0x88   : > { %v5052_v17 = vpack.c.bf16 %v768_v10, %v760_v9  ;;  %v520_v19 = vld [vmem:[#allocation7 + $0x388] sm:$0xff]  ;;  %4989 = vmatprep.subr.bf16.mxu1 %v4988_v13  ;;  %v5054_v24 = vpack.c.bf16 %v767_v18, %v759_v16  ;;  %v519_v26 = vld [vmem:[#allocation7 + $0x380] sm:$0xff] }
  0x89   : > { %v528_v20 = vld [vmem:[#allocation7 + $0x3c8] sm:$0xff]  ;;  %v527_v27 = vld [vmem:[#allocation7 + $0x3c0] sm:$0xff]  ;;  %4991 = vmatpush1.bf16.msra.mxu1 %v4990_v23 }
  0x8a   : > { %v776_v21 = vld [vmem:[#allocation7 + $0xb88] sm:$0xff]  ;;  %v4992_v25 = vpack.c.bf16 %v528_v20, %v520_v19  ;;  %v775_v28 = vld [vmem:[#allocation7 + $0xb80] sm:$0xff]  ;;  %5053 = vmatprep.subr.bf16.mxu0 %v5052_v17  ;;  %v4994_v35 = vpack.c.bf16 %v527_v27, %v519_v26  ;;  %v282_v20 = vld [vmem:[%s7555_s30 + $0x18] sm:$0xff] }
  0x8b   : > { %v784_v22 = vld [vmem:[#allocation7 + $0xbc8] sm:$0xff]  ;;  %v783_v30 = vld [vmem:[#allocation7 + $0xbc0] sm:$0xff]  ;;  %5055 = vmatpush1.bf16.msra.mxu0 %v5054_v24  ;;  %1282 = vmatprep.mubr.f32.mxu0 %v282_v20 }
  0x8c   : > { %v5056_v29 = vpack.c.bf16 %v784_v22, %v776_v21  ;;  %v536_v31 = vld [vmem:[#allocation7 + $0x408] sm:$0xff]  ;;  %4993 = vmatprep.subr.bf16.mxu1 %v4992_v25  ;;  %v5058_v36 = vpack.c.bf16 %v783_v30, %v775_v28  ;;  %v535_v38 = vld [vmem:[#allocation7 + $0x400] sm:$0xff] }
  0x8d   : > { %v544_v32 = vld [vmem:[#allocation7 + $0x448] sm:$0xff]  ;;  %v543_v39 = vld [vmem:[#allocation7 + $0x440] sm:$0xff]  ;;  %4995 = vmatpush1.bf16.msra.mxu1 %v4994_v35 }
  0x8e   : > { %v792_v33 = vld [vmem:[#allocation7 + $0xc08] sm:$0xff]  ;;  %v4996_v37 = vpack.c.bf16 %v544_v32, %v536_v31  ;;  %v791_v40 = vld [vmem:[#allocation7 + $0xc00] sm:$0xff]  ;;  %5057 = vmatprep.subr.bf16.mxu0 %v5056_v29  ;;  %v4998_v47 = vpack.c.bf16 %v543_v39, %v535_v38 }
  0x8f   : > { %v800_v34 = vld [vmem:[#allocation7 + $0xc48] sm:$0xff]  ;;  %v799_v42 = vld [vmem:[#allocation7 + $0xc40] sm:$0xff]  ;;  %5059 = vmatpush1.bf16.msra.mxu0 %v5058_v36 }
  0x90   : > { %v5060_v41 = vpack.c.bf16 %v800_v34, %v792_v33  ;;  %v552_v43 = vld [vmem:[#allocation7 + $0x488] sm:$0xff]  ;;  %4997 = vmatprep.subr.bf16.mxu1 %v4996_v37  ;;  %v5062_v48 = vpack.c.bf16 %v799_v42, %v791_v40  ;;  %v551_v50 = vld [vmem:[#allocation7 + $0x480] sm:$0xff] }
  0x91   : > { %v560_v44 = vld [vmem:[#allocation7 + $0x4c8] sm:$0xff]  ;;  %v559_v51 = vld [vmem:[#allocation7 + $0x4c0] sm:$0xff]  ;;  %4999 = vmatpush1.bf16.msra.mxu1 %v4998_v47 }
  0x92   : > { %v808_v45 = vld [vmem:[#allocation7 + $0xc88] sm:$0xff]  ;;  %v5000_v49 = vpack.c.bf16 %v560_v44, %v552_v43  ;;  %v807_v52 = vld [vmem:[#allocation7 + $0xc80] sm:$0xff]  ;;  %5061 = vmatprep.subr.bf16.mxu0 %v5060_v41  ;;  %v5002_v59 = vpack.c.bf16 %v559_v51, %v551_v50 }
  0x93   : > { %v816_v46 = vld [vmem:[#allocation7 + $0xcc8] sm:$0xff]  ;;  %v815_v54 = vld [vmem:[#allocation7 + $0xcc0] sm:$0xff]  ;;  %5063 = vmatpush1.bf16.msra.mxu0 %v5062_v48 }
  0x94   : > { %v5064_v53 = vpack.c.bf16 %v816_v46, %v808_v45  ;;  %v568_v55 = vld [vmem:[#allocation7 + $0x508] sm:$0xff]  ;;  %5001 = vmatprep.subr.bf16.mxu1 %v5000_v49  ;;  %v5066_v60 = vpack.c.bf16 %v815_v54, %v807_v52  ;;  %v567_v62 = vld [vmem:[#allocation7 + $0x500] sm:$0xff] }
  0x95   : > { %v576_v56 = vld [vmem:[#allocation7 + $0x548] sm:$0xff]  ;;  %v575_v63 = vld [vmem:[#allocation7 + $0x540] sm:$0xff]  ;;  %5003 = vmatpush1.bf16.msra.mxu1 %v5002_v59 }
  0x96   : > { %v824_v57 = vld [vmem:[#allocation7 + $0xd08] sm:$0xff]  ;;  %v5004_v61 = vpack.c.bf16 %v576_v56, %v568_v55  ;;  %v823_v0 = vld [vmem:[#allocation7 + $0xd00] sm:$0xff]  ;;  %5065 = vmatprep.subr.bf16.mxu0 %v5064_v53  ;;  %v5006_v7 = vpack.c.bf16 %v575_v63, %v567_v62 }
  0x97   : > { %v832_v58 = vld [vmem:[#allocation7 + $0xd48] sm:$0xff]  ;;  %v831_v2 = vld [vmem:[#allocation7 + $0xd40] sm:$0xff]  ;;  %5067 = vmatpush1.bf16.msra.mxu0 %v5066_v60 }
  0x98   : > { %v5068_v1 = vpack.c.bf16 %v832_v58, %v824_v57  ;;  %v584_v3 = vld [vmem:[#allocation7 + $0x588] sm:$0xff]  ;;  %v583_v8 = vld [vmem:[#allocation7 + $0x580] sm:$0xff]  ;;  %5005 = vmatprep.subr.bf16.mxu1 %v5004_v61  ;;  %v5070_v9 = vpack.c.bf16 %v831_v2, %v823_v0  ;;  %v418_v2 = vld [vmem:[#allocation7 + $0x58] sm:$0xff] }
  0x99   : > { %v592_v4 = vld [vmem:[#allocation7 + $0x5c8] sm:$0xff]  ;;  %v591_v11 = vld [vmem:[#allocation7 + $0x5c0] sm:$0xff]  ;;  %5007 = vmatpush1.bf16.msra.mxu1 %v5006_v7  ;;  %v417_v7 = vld [vmem:[#allocation7 + $0x50] sm:$0xff] }
  0x9a   : > { %v840_v5 = vld [vmem:[#allocation7 + $0xd88] sm:$0xff]  ;;  %v5008_v10 = vpack.c.bf16 %v592_v4, %v584_v3  ;;  %v839_v12 = vld [vmem:[#allocation7 + $0xd80] sm:$0xff]  ;;  %5069 = vmatprep.subr.bf16.mxu0 %v5068_v1  ;;  %v5010_v21 = vpack.c.bf16 %v591_v11, %v583_v8  ;;  %v410_v1 = vld [vmem:[#allocation7 + $0x18] sm:$0xff] }
  0x9b   : > { %v848_v6 = vld [vmem:[#allocation7 + $0xdc8] sm:$0xff]  ;;  %v847_v13 = vld [vmem:[#allocation7 + $0xdc0] sm:$0xff]  ;;  %5071 = vmatpush1.bf16.msra.mxu0 %v5070_v9  ;;  %v426_v8 = vld [vmem:[#allocation7 + $0x98] sm:$0xff] }
  0x9c   : > { %v5072_v14 = vpack.c.bf16 %v848_v6, %v840_v5  ;;  %v600_v15 = vld [vmem:[#allocation7 + $0x608] sm:$0xff]  ;;  %5009 = vmatprep.subr.bf16.mxu1 %v5008_v10  ;;  %v5074_v22 = vpack.c.bf16 %v847_v13, %v839_v12  ;;  %v599_v24 = vld [vmem:[#allocation7 + $0x600] sm:$0xff]  ;;  %v5092_v5 = vpack.c.bf16 %v418_v2, %v410_v1  ;;  %v409_v6 = vld [vmem:[#allocation7 + $0x10] sm:$0xff] }
  0x9d   : > { %v608_v16 = vld [vmem:[#allocation7 + $0x648] sm:$0xff]  ;;  %v607_v25 = vld [vmem:[#allocation7 + $0x640] sm:$0xff]  ;;  %5011 = vmatpush1.bf16.msra.mxu1 %v5010_v21  ;;  %v434_v9 = vld [vmem:[#allocation7 + $0xd8] sm:$0xff]  ;;  %v5094_v11 = vpack.c.bf16 %v417_v7, %v409_v6 }
  0x9e   : > { %v280_v17 = vld [vmem:[%s7555_s30 + $0x8] sm:$0xff]  ;;  %v5012_v23 = vpack.c.bf16 %v608_v16, %v600_v15  ;;  %v855_v26 = vld [vmem:[#allocation7 + $0xe00] sm:$0xff]  ;;  %5073 = vmatprep.subr.bf16.mxu0 %v5072_v14  ;;  %v5014_v33 = vpack.c.bf16 %v607_v25, %v599_v24  ;;  %v281_v12 = vld [vmem:[%s7555_s30 + $0x10] sm:$0xff]  ;;  %v5096_v15 = vpack.c.bf16 %v434_v9, %v426_v8 }
  0x9f   : > { %v856_v18 = vld [vmem:[#allocation7 + $0xe08] sm:$0xff]  ;;  %1025 = vmatprep.mubr.f32.mxu1 %v280_v17  ;;  %v863_v28 = vld [vmem:[#allocation7 + $0xe40] sm:$0xff]  ;;  %5075 = vmatpush1.bf16.msra.mxu0 %v5074_v22  ;;  %v286_v14 = vld [vmem:[%s7555_s30 + $0x38] sm:$0xff] }
  0xa0   : > { %v864_v19 = vld [vmem:[#allocation7 + $0xe48] sm:$0xff]  ;;  %5013 = vmatprep.subr.bf16.mxu1 %v5012_v23  ;;  %v5078_v34 = vpack.c.bf16 %v863_v28, %v855_v26  ;;  %v615_v36 = vld [vmem:[#allocation7 + $0x680] sm:$0xff]  ;;  %v425_v16 = vld [vmem:[#allocation7 + $0x90] sm:$0xff] }
  0xa1   : > { %v5076_v27 = vpack.c.bf16 %v864_v19, %v856_v18  ;;  %v616_v29 = vld [vmem:[#allocation7 + $0x688] sm:$0xff]  ;;  %v623_v37 = vld [vmem:[#allocation7 + $0x6c0] sm:$0xff]  ;;  %5015 = vmatpush1.bf16.msra.mxu1 %v5014_v33  ;;  %v433_v17 = vld [vmem:[#allocation7 + $0xd0] sm:$0xff] }
  0xa2   : > { %v624_v30 = vld [vmem:[#allocation7 + $0x6c8] sm:$0xff]  ;;  %v871_v38 = vld [vmem:[#allocation7 + $0xe80] sm:$0xff]  ;;  %v5018_v45 = vpack.c.bf16 %v623_v37, %v615_v36  ;;  %v442_v18 = vld [vmem:[#allocation7 + $0x118] sm:$0xff]  ;;  %v5098_v23 = vpack.c.bf16 %v433_v17, %v425_v16 }
  0xa3   : > { %v872_v31 = vld [vmem:[#allocation7 + $0xe88] sm:$0xff]  ;;  %v5016_v35 = vpack.c.bf16 %v624_v30, %v616_v29  ;;  %5077 = vmatprep.subr.bf16.mxu0 %v5076_v27  ;;  %v879_v40 = vld [vmem:[#allocation7 + $0xec0] sm:$0xff]  ;;  %v450_v19 = vld [vmem:[#allocation7 + $0x158] sm:$0xff] }
  0xa4   : > { %v880_v32 = vld [vmem:[#allocation7 + $0xec8] sm:$0xff]  ;;  %5079 = vmatpush1.bf16.msra.mxu0 %v5078_v34  ;;  %v5082_v46 = vpack.c.bf16 %v879_v40, %v871_v38  ;;  %v631_v48 = vld [vmem:[#allocation7 + $0x700] sm:$0xff]  ;;  %v285_v21 = vld [vmem:[%s7555_s30 + $0x30] sm:$0xff]  ;;  %v5100_v25 = vpack.c.bf16 %v450_v19, %v442_v18 }
  0xa5   : > { %v5080_v39 = vpack.c.bf16 %v880_v32, %v872_v31  ;;  %v632_v41 = vld [vmem:[#allocation7 + $0x708] sm:$0xff]  ;;  %5017 = vmatprep.subr.bf16.mxu1 %v5016_v35  ;;  %v639_v49 = vld [vmem:[#allocation7 + $0x740] sm:$0xff]  ;;  %v290_v24 = vld [vmem:[%s7555_s30 + $0x58] sm:$0xff] }
  0xa6   : > { %v640_v42 = vld [vmem:[#allocation7 + $0x748] sm:$0xff]  ;;  %v887_v50 = vld [vmem:[#allocation7 + $0xf00] sm:$0xff]  ;;  %5019 = vmatpush1.bf16.msra.mxu1 %v5018_v45  ;;  %v5022_v57 = vpack.c.bf16 %v639_v49, %v631_v48  ;;  %v441_v26 = vld [vmem:[#allocation7 + $0x110] sm:$0xff] }
  0xa7   : > { %v888_v43 = vld [vmem:[#allocation7 + $0xf08] sm:$0xff]  ;;  %v5020_v47 = vpack.c.bf16 %v640_v42, %v632_v41  ;;  %5081 = vmatprep.subr.bf16.mxu0 %v5080_v39  ;;  %v895_v52 = vld [vmem:[#allocation7 + $0xf40] sm:$0xff]  ;;  %v449_v27 = vld [vmem:[#allocation7 + $0x150] sm:$0xff] }
  0xa8   : > { %v896_v44 = vld [vmem:[#allocation7 + $0xf48] sm:$0xff]  ;;  %5083 = vmatpush1.bf16.msra.mxu0 %v5082_v46  ;;  %v5086_v58 = vpack.c.bf16 %v895_v52, %v887_v50  ;;  %v647_v60 = vld [vmem:[#allocation7 + $0x780] sm:$0xff]  ;;  %v458_v28 = vld [vmem:[#allocation7 + $0x198] sm:$0xff]  ;;  %v5102_v33 = vpack.c.bf16 %v449_v27, %v441_v26 }
  0xa9   : > { %v5084_v51 = vpack.c.bf16 %v896_v44, %v888_v43  ;;  %v648_v53 = vld [vmem:[#allocation7 + $0x788] sm:$0xff]  ;;  %5021 = vmatprep.subr.bf16.mxu1 %v5020_v47  ;;  %v655_v61 = vld [vmem:[#allocation7 + $0x7c0] sm:$0xff]  ;;  %v466_v29 = vld [vmem:[#allocation7 + $0x1d8] sm:$0xff] }
  0xaa   : > { %v656_v54 = vld [vmem:[#allocation7 + $0x7c8] sm:$0xff]  ;;  %v903_v62 = vld [vmem:[#allocation7 + $0xf80] sm:$0xff]  ;;  %5023 = vmatpush1.bf16.msra.mxu1 %v5022_v57  ;;  %v5026_v3 = vpack.c.bf16 %v655_v61, %v647_v60  ;;  %v289_v31 = vld [vmem:[%s7555_s30 + $0x50] sm:$0xff]  ;;  %v5104_v35 = vpack.c.bf16 %v466_v29, %v458_v28 }
  0xab   : > { %v904_v55 = vld [vmem:[#allocation7 + $0xf88] sm:$0xff]  ;;  %v5024_v59 = vpack.c.bf16 %v656_v54, %v648_v53  ;;  %5085 = vmatprep.subr.bf16.mxu0 %v5084_v51  ;;  %v911_v0 = vld [vmem:[#allocation7 + $0xfc0] sm:$0xff]  ;;  %v294_v34 = vld [vmem:[%s7555_s30 + $0x78] sm:$0xff] }
  0xac   : > { %v912_v56 = vld [vmem:[#allocation7 + $0xfc8] sm:$0xff]  ;;  %5087 = vmatpush1.bf16.msra.mxu0 %v5086_v58  ;;  %v5090_v4 = vpack.c.bf16 %v911_v0, %v903_v62  ;;  %v279_v10 = vld [vmem:[%s7555_s30] sm:$0xff]  ;;  %v457_v36 = vld [vmem:[#allocation7 + $0x190] sm:$0xff] }
  0xad   : > { %v5088_v63 = vpack.c.bf16 %v912_v56, %v904_v55  ;;  %5025 = vmatprep.subr.bf16.mxu1 %v5024_v59  ;;  %v284_v13 = vld [vmem:[%s7555_s30 + $0x28] sm:$0xff]  ;;  %v283_v20 = vld [vmem:[%s7555_s30 + $0x20] sm:$0xff]  ;;  %v465_v37 = vld [vmem:[#allocation7 + $0x1d0] sm:$0xff] }
  0xae   : > { %5027 = vmatpush1.bf16.msra.mxu1 %v5026_v3  ;;  %v288_v22 = vld [vmem:[%s7555_s30 + $0x48] sm:$0xff]  ;;  %v287_v30 = vld [vmem:[%s7555_s30 + $0x40] sm:$0xff]  ;;  %v474_v39 = vld [vmem:[#allocation7 + $0x218] sm:$0xff]  ;;  %v5106_v45 = vpack.c.bf16 %v465_v37, %v457_v36 }
  0xaf   : > { %5089 = vmatprep.subr.bf16.mxu0 %v5088_v63  ;;  %5093 = vmatprep.subr.bf16.mxu1 %v5092_v5  ;;  %v292_v32 = vld [vmem:[%s7555_s30 + $0x68] sm:$0xff]  ;;  %v291_v38 = vld [vmem:[%s7555_s30 + $0x60] sm:$0xff]  ;;  %v482_v40 = vld [vmem:[#allocation7 + $0x258] sm:$0xff] }
  0xb0   : > { %5091 = vmatpush1.bf16.msra.mxu0 %v5090_v4  ;;  %v293_v41 = vld [vmem:[%s7555_s30 + $0x70] sm:$0xff]  ;;  %v296_v42 = vld [vmem:[%s7555_s30 + $0x88] sm:$0xff]  ;;  %v298_v44 = vld [vmem:[%s7555_s30 + $0x98] sm:$0xff]  ;;  %v5108_v49 = vpack.c.bf16 %v482_v40, %v474_v39 }
  0xb1   : > { %1026 = vmatmul.mubr.f32.vlgmr.msra.gmra.mrb[0].mxu1 %v279_v10  ;;  %v412_v43 = vld [vmem:[#allocation7 + $0x28] sm:$0xff]  ;;  %v473_v46 = vld [vmem:[#allocation7 + $0x210] sm:$0xff]  ;;  %v295_v48 = vld [vmem:[%s7555_s30 + $0x80] sm:$0xff] }
  0xb2   : > { %5095 = vmatpush1.bf16.msra.mxu1 %v5094_v11  ;;  %1031 = vmatprep.mubr.f32.mxu1 %v284_v13  ;;  %v420_v47 = vld [vmem:[#allocation7 + $0x68] sm:$0xff]  ;;  %v481_v50 = vld [vmem:[#allocation7 + $0x250] sm:$0xff]  ;;  %v411_v52 = vld [vmem:[#allocation7 + $0x20] sm:$0xff] }
  0xb3   : > { %1283 = vmatmul.mubr.f32.vlgmr.msra.gmra.mrb[0].mxu0 %v281_v12  ;;  %5097 = vmatprep.subr.bf16.mxu1 %v5096_v15  ;;  %v5220_v51 = vpack.c.bf16 %v420_v47, %v412_v43  ;;  %v419_v53 = vld [vmem:[#allocation7 + $0x60] sm:$0xff]  ;;  %v297_v54 = vld [vmem:[%s7555_s30 + $0x90] sm:$0xff]  ;;  %v490_v55 = vld [vmem:[#allocation7 + $0x298] sm:$0xff]  ;;  %v5110_v63 = vpack.c.bf16 %v481_v50, %v473_v46 }
  0xb4   : > { %1288 = vmatprep.mubr.f32.mxu0 %v286_v14  ;;  %v498_v56 = vld [vmem:[#allocation7 + $0x2d8] sm:$0xff]  ;;  %v5222_v57 = vpack.c.bf16 %v419_v53, %v411_v52  ;;  %v428_v58 = vld [vmem:[#allocation7 + $0xa8] sm:$0xff]  ;;  %v427_v60 = vld [vmem:[#allocation7 + $0xa0] sm:$0xff] }
  0xb5   : > { %1032 = vmatmul.mubr.f32.gmra.mrb[2].mxu1 %v283_v20  ;;  %v436_v59 = vld [vmem:[#allocation7 + $0xe8] sm:$0xff]  ;;  %v302_v62 = vld [vmem:[%s7555_s30 + $0xb8] sm:$0xff]  ;;  %v435_v0 = vld [vmem:[#allocation7 + $0xe0] sm:$0xff]  ;;  %v5112_v1 = vpack.c.bf16 %v498_v56, %v490_v55  ;;  %5221 = vmatprep.subr.bf16.mxu0 %v5220_v51 }
  0xb6   : > { %1037 = vmatprep.mubr.f32.mxu1 %v288_v22  ;;  %5099 = vmatpush1.bf16.msra.mxu1 %v5098_v23  ;;  %v300_v61 = vld [vmem:[%s7555_s30 + $0xa8] sm:$0xff]  ;;  %v489_v2 = vld [vmem:[#allocation7 + $0x290] sm:$0xff]  ;;  %v506_v4 = vld [vmem:[#allocation7 + $0x318] sm:$0xff]  ;;  %v5224_v5 = vpack.c.bf16 %v436_v59, %v428_v58  ;;  %v5226_v7 = vpack.c.bf16 %v435_v0, %v427_v60 }
  0xb7   : > { %1289 = vmatmul.mubr.f32.gmra.mrb[2].mxu0 %v285_v21  ;;  %5101 = vmatprep.subr.bf16.mxu1 %v5100_v25  ;;  %v497_v3 = vld [vmem:[#allocation7 + $0x2d0] sm:$0xff]  ;;  %v514_v6 = vld [vmem:[#allocation7 + $0x358] sm:$0xff]  ;;  %v444_v8 = vld [vmem:[#allocation7 + $0x128] sm:$0xff] }
  0xb8   : > { %1294 = vmatprep.mubr.f32.mxu0 %v290_v24  ;;  %5223 = vmatpush1.bf16.msra.mxu0 %v5222_v57  ;;  %v452_v9 = vld [vmem:[#allocation7 + $0x168] sm:$0xff]  ;;  %v299_v10 = vld [vmem:[%s7555_s30 + $0xa0] sm:$0xff]  ;;  %v301_v11 = vld [vmem:[%s7555_s30 + $0xb0] sm:$0xff]  ;;  %v5114_v15 = vpack.c.bf16 %v497_v3, %v489_v2  ;;  %v5116_v17 = vpack.c.bf16 %v514_v6, %v506_v4 }
  0xb9   : > { %1038 = vmatmul.mubr.f32.gmra.mrb[4].mxu1 %v287_v30  ;;  %v443_v12 = vld [vmem:[#allocation7 + $0x120] sm:$0xff]  ;;  %v304_v13 = vld [vmem:[%s7555_s30 + $0xc8] sm:$0xff]  ;;  %v306_v14 = vld [vmem:[%s7555_s30 + $0xd8] sm:$0xff]  ;;  %5225 = vmatprep.subr.bf16.mxu0 %v5224_v5  ;;  %v5228_v21 = vpack.c.bf16 %v452_v9, %v444_v8 }
  0xba   : > { %1043 = vmatprep.mubr.f32.mxu1 %v292_v32  ;;  %5103 = vmatpush1.bf16.msra.mxu1 %v5102_v33  ;;  %v451_v16 = vld [vmem:[#allocation7 + $0x160] sm:$0xff]  ;;  %v505_v18 = vld [vmem:[#allocation7 + $0x310] sm:$0xff]  ;;  %v522_v20 = vld [vmem:[#allocation7 + $0x398] sm:$0xff] }
  0xbb   : > { %1295 = vmatmul.mubr.f32.gmra.mrb[4].mxu0 %v289_v31  ;;  %5105 = vmatprep.subr.bf16.mxu1 %v5104_v35  ;;  %v513_v19 = vld [vmem:[#allocation7 + $0x350] sm:$0xff]  ;;  %v530_v22 = vld [vmem:[#allocation7 + $0x3d8] sm:$0xff]  ;;  %v5230_v23 = vpack.c.bf16 %v451_v16, %v443_v12  ;;  %v460_v24 = vld [vmem:[#allocation7 + $0x1a8] sm:$0xff] }
  0xbc   : > { %1300 = vmatprep.mubr.f32.mxu0 %v294_v34  ;;  %5227 = vmatpush1.bf16.msra.mxu0 %v5226_v7  ;;  %v468_v25 = vld [vmem:[#allocation7 + $0x1e8] sm:$0xff]  ;;  %v303_v26 = vld [vmem:[%s7555_s30 + $0xc0] sm:$0xff]  ;;  %v305_v29 = vld [vmem:[%s7555_s30 + $0xd0] sm:$0xff]  ;;  %v5118_v32 = vpack.c.bf16 %v513_v19, %v505_v18  ;;  %v5120_v33 = vpack.c.bf16 %v530_v22, %v522_v20 }
  0xbd   : > { %1044 = vmatmul.mubr.f32.gmra.mrb[6].mxu1 %v291_v38  ;;  %v459_v27 = vld [vmem:[#allocation7 + $0x1a0] sm:$0xff]  ;;  %v308_v30 = vld [vmem:[%s7555_s30 + $0xe8] sm:$0xff]  ;;  %v310_v31 = vld [vmem:[%s7555_s30 + $0xf8] sm:$0xff]  ;;  %5229 = vmatprep.subr.bf16.mxu0 %v5228_v21  ;;  %v5232_v37 = vpack.c.bf16 %v468_v25, %v460_v24 }
  0xbe   : > { %1049 = vmatprep.mubr.f32.mxu1 %v296_v42  ;;  %5107 = vmatpush1.bf16.msra.mxu1 %v5106_v45  ;;  %v467_v28 = vld [vmem:[#allocation7 + $0x1e0] sm:$0xff]  ;;  %v521_v34 = vld [vmem:[#allocation7 + $0x390] sm:$0xff]  ;;  %v538_v36 = vld [vmem:[#allocation7 + $0x418] sm:$0xff] }
  0xbf   : > { %1301 = vmatmul.mubr.f32.gmra.mrb[6].mxu0 %v293_v41  ;;  %5109 = vmatprep.subr.bf16.mxu1 %v5108_v49  ;;  %v529_v35 = vld [vmem:[#allocation7 + $0x3d0] sm:$0xff]  ;;  %v546_v38 = vld [vmem:[#allocation7 + $0x458] sm:$0xff]  ;;  %v5234_v39 = vpack.c.bf16 %v467_v28, %v459_v27  ;;  %v476_v40 = vld [vmem:[#allocation7 + $0x228] sm:$0xff] }
  0xc0   : > { %1306 = vmatprep.mubr.f32.mxu0 %v298_v44  ;;  %5231 = vmatpush1.bf16.msra.mxu0 %v5230_v23  ;;  %v484_v41 = vld [vmem:[#allocation7 + $0x268] sm:$0xff]  ;;  %v307_v42 = vld [vmem:[%s7555_s30 + $0xe0] sm:$0xff]  ;;  %v309_v45 = vld [vmem:[%s7555_s30 + $0xf0] sm:$0xff]  ;;  %v5124_v49 = vpack.c.bf16 %v546_v38, %v538_v36 }
  0xc1   : > { %1050 = vmatmul.mubr.f32.gmra.mrb[8].mxu1 %v295_v48  ;;  %v475_v43 = vld [vmem:[#allocation7 + $0x220] sm:$0xff]  ;;  %v312_v46 = vld [vmem:[%s7555_s30 + $0x108] sm:$0xff]  ;;  %v314_v47 = vld [vmem:[%s7555_s30 + $0x118] sm:$0xff]  ;;  %v5122_v48 = vpack.c.bf16 %v529_v35, %v521_v34  ;;  %5233 = vmatprep.subr.bf16.mxu0 %v5232_v37  ;;  %v5236_v53 = vpack.c.bf16 %v484_v41, %v476_v40 }
  0xc2   : > { %1055 = vmatprep.mubr.f32.mxu1 %v300_v61  ;;  %5111 = vmatpush1.bf16.msra.mxu1 %v5110_v63  ;;  %v483_v44 = vld [vmem:[#allocation7 + $0x260] sm:$0xff]  ;;  %v537_v50 = vld [vmem:[#allocation7 + $0x410] sm:$0xff]  ;;  %v554_v52 = vld [vmem:[#allocation7 + $0x498] sm:$0xff] }
  0xc3   : > { %1307 = vmatmul.mubr.f32.gmra.mrb[8].mxu0 %v297_v54  ;;  %5113 = vmatprep.subr.bf16.mxu1 %v5112_v1  ;;  %v545_v51 = vld [vmem:[#allocation7 + $0x450] sm:$0xff]  ;;  %v562_v54 = vld [vmem:[#allocation7 + $0x4d8] sm:$0xff]  ;;  %v5238_v55 = vpack.c.bf16 %v483_v44, %v475_v43  ;;  %v492_v56 = vld [vmem:[#allocation7 + $0x2a8] sm:$0xff] }
  0xc4   : > { %1312 = vmatprep.mubr.f32.mxu0 %v302_v62  ;;  %5235 = vmatpush1.bf16.msra.mxu0 %v5234_v39  ;;  %v500_v57 = vld [vmem:[#allocation7 + $0x2e8] sm:$0xff]  ;;  %v311_v58 = vld [vmem:[%s7555_s30 + $0x100] sm:$0xff]  ;;  %v313_v61 = vld [vmem:[%s7555_s30 + $0x110] sm:$0xff]  ;;  %v5126_v0 = vpack.c.bf16 %v545_v51, %v537_v50  ;;  %v5128_v1 = vpack.c.bf16 %v562_v54, %v554_v52 }
  0xc5   : > { %1056 = vmatmul.mubr.f32.gmra.mrb[10].mxu1 %v299_v10  ;;  %v491_v59 = vld [vmem:[#allocation7 + $0x2a0] sm:$0xff]  ;;  %v316_v62 = vld [vmem:[%s7555_s30 + $0x128] sm:$0xff]  ;;  %v318_v63 = vld [vmem:[%s7555_s30 + $0x138] sm:$0xff]  ;;  %5237 = vmatprep.subr.bf16.mxu0 %v5236_v53  ;;  %v5240_v5 = vpack.c.bf16 %v500_v57, %v492_v56 }
  0xc6   : > { %1061 = vmatprep.mubr.f32.mxu1 %v304_v13  ;;  %5115 = vmatpush1.bf16.msra.mxu1 %v5114_v15  ;;  %v499_v60 = vld [vmem:[#allocation7 + $0x2e0] sm:$0xff]  ;;  %v553_v2 = vld [vmem:[#allocation7 + $0x490] sm:$0xff]  ;;  %v570_v4 = vld [vmem:[#allocation7 + $0x518] sm:$0xff] }
  0xc7   : > { %1313 = vmatmul.mubr.f32.gmra.mrb[10].mxu0 %v301_v11  ;;  %5117 = vmatprep.subr.bf16.mxu1 %v5116_v17  ;;  %v561_v3 = vld [vmem:[#allocation7 + $0x4d0] sm:$0xff]  ;;  %v578_v6 = vld [vmem:[#allocation7 + $0x558] sm:$0xff]  ;;  %v5242_v7 = vpack.c.bf16 %v499_v60, %v491_v59  ;;  %v508_v8 = vld [vmem:[#allocation7 + $0x328] sm:$0xff] }
  0xc8   : > { %1318 = vmatprep.mubr.f32.mxu0 %v306_v14  ;;  %5239 = vmatpush1.bf16.msra.mxu0 %v5238_v55  ;;  %v516_v9 = vld [vmem:[#allocation7 + $0x368] sm:$0xff]  ;;  %v315_v10 = vld [vmem:[%s7555_s30 + $0x120] sm:$0xff]  ;;  %v317_v13 = vld [vmem:[%s7555_s30 + $0x130] sm:$0xff]  ;;  %v5130_v16 = vpack.c.bf16 %v561_v3, %v553_v2  ;;  %v5132_v17 = vpack.c.bf16 %v578_v6, %v570_v4 }
  0xc9   : > { %1062 = vmatmul.mubr.f32.gmra.mrb[12].mxu1 %v303_v26  ;;  %v507_v11 = vld [vmem:[#allocation7 + $0x320] sm:$0xff]  ;;  %v320_v14 = vld [vmem:[%s7555_s30 + $0x148] sm:$0xff]  ;;  %v322_v15 = vld [vmem:[%s7555_s30 + $0x158] sm:$0xff]  ;;  %5241 = vmatprep.subr.bf16.mxu0 %v5240_v5  ;;  %v5244_v21 = vpack.c.bf16 %v516_v9, %v508_v8 }
  0xca   : > { %1067 = vmatprep.mubr.f32.mxu1 %v308_v30  ;;  %5119 = vmatpush1.bf16.msra.mxu1 %v5118_v32  ;;  %v515_v12 = vld [vmem:[#allocation7 + $0x360] sm:$0xff]  ;;  %v569_v18 = vld [vmem:[#allocation7 + $0x510] sm:$0xff]  ;;  %v586_v20 = vld [vmem:[#allocation7 + $0x598] sm:$0xff] }
  0xcb   : > { %1319 = vmatmul.mubr.f32.gmra.mrb[12].mxu0 %v305_v29  ;;  %5121 = vmatprep.subr.bf16.mxu1 %v5120_v33  ;;  %v577_v19 = vld [vmem:[#allocation7 + $0x550] sm:$0xff]  ;;  %v594_v22 = vld [vmem:[#allocation7 + $0x5d8] sm:$0xff]  ;;  %v5246_v23 = vpack.c.bf16 %v515_v12, %v507_v11  ;;  %v524_v24 = vld [vmem:[#allocation7 + $0x3a8] sm:$0xff] }
  0xcc   : > { %1324 = vmatprep.mubr.f32.mxu0 %v310_v31  ;;  %5243 = vmatpush1.bf16.msra.mxu0 %v5242_v7  ;;  %v532_v25 = vld [vmem:[#allocation7 + $0x3e8] sm:$0xff]  ;;  %v7608_v26 = vld [vmem:[%s7555_s30 + $0x140] sm:$0xff]  ;;  %v321_v29 = vld [vmem:[%s7555_s30 + $0x150] sm:$0xff]  ;;  %v5134_v32 = vpack.c.bf16 %v577_v19, %v569_v18  ;;  %v5136_v33 = vpack.c.bf16 %v594_v22, %v586_v20 }
  0xcd   : > { %1068 = vmatmul.mubr.f32.gmra.mrb[14].mxu1 %v307_v42  ;;  %v523_v27 = vld [vmem:[#allocation7 + $0x3a0] sm:$0xff]  ;;  %v324_v30 = vld [vmem:[%s7555_s30 + $0x168] sm:$0xff]  ;;  %v326_v31 = vld [vmem:[%s7555_s30 + $0x178] sm:$0xff]  ;;  %5245 = vmatprep.subr.bf16.mxu0 %v5244_v21  ;;  %v5248_v36 = vpack.c.bf16 %v532_v25, %v524_v24 }
  0xce   : > { %1073 = vmatprep.mubr.f32.mxu1 %v312_v46  ;;  %5123 = vmatpush1.bf16.msra.mxu1 %v5122_v48  ;;  %v531_v28 = vld [vmem:[#allocation7 + $0x3e0] sm:$0xff]  ;;  %v585_v34 = vld [vmem:[#allocation7 + $0x590] sm:$0xff]  ;;  %v602_v37 = vld [vmem:[#allocation7 + $0x618] sm:$0xff] }
  0xcf   : > { %1325 = vmatmul.mubr.f32.gmra.mrb[14].mxu0 %v309_v45  ;;  %5125 = vmatprep.subr.bf16.mxu1 %v5124_v49  ;;  %v593_v35 = vld [vmem:[#allocation7 + $0x5d0] sm:$0xff]  ;;  %v5250_v38 = vpack.c.bf16 %v531_v28, %v523_v27  ;;  %v610_v39 = vld [vmem:[#allocation7 + $0x658] sm:$0xff]  ;;  %v540_v40 = vld [vmem:[#allocation7 + $0x428] sm:$0xff] }
  0xd0   : > { %1330 = vmatprep.mubr.f32.mxu0 %v314_v47  ;;  %5247 = vmatpush1.bf16.msra.mxu0 %v5246_v23  ;;  %v548_v41 = vld [vmem:[#allocation7 + $0x468] sm:$0xff]  ;;  %v7615_v42 = vld [vmem:[%s7555_s30 + $0x160] sm:$0xff]  ;;  %v325_v45 = vld [vmem:[%s7555_s30 + $0x170] sm:$0xff]  ;;  %v5138_v48 = vpack.c.bf16 %v593_v35, %v585_v34  ;;  %v5140_v49 = vpack.c.bf16 %v610_v39, %v602_v37 }
  0xd1   : > { %1074 = vmatmul.mubr.f32.gmra.mrb[16].mxu1 %v311_v58  ;;  %v539_v43 = vld [vmem:[#allocation7 + $0x420] sm:$0xff]  ;;  %v7619_v46 = vld [vmem:[%s7555_s30 + $0x188] sm:$0xff]  ;;  %v330_v47 = vld [vmem:[%s7555_s30 + $0x198] sm:$0xff]  ;;  %5249 = vmatprep.subr.bf16.mxu0 %v5248_v36  ;;  %v5252_v50 = vpack.c.bf16 %v548_v41, %v540_v40 }
  0xd2   : > { %1079 = vmatprep.mubr.f32.mxu1 %v316_v62  ;;  %5127 = vmatpush1.bf16.msra.mxu1 %v5126_v0  ;;  %v547_v44 = vld [vmem:[#allocation7 + $0x460] sm:$0xff]  ;;  %v601_v51 = vld [vmem:[#allocation7 + $0x610] sm:$0xff]  ;;  %v556_v53 = vld [vmem:[#allocation7 + $0x4a8] sm:$0xff] }
  0xd3   : > { %1331 = vmatmul.mubr.f32.gmra.mrb[16].mxu0 %v313_v61  ;;  %5129 = vmatprep.subr.bf16.mxu1 %v5128_v1  ;;  %v609_v52 = vld [vmem:[#allocation7 + $0x650] sm:$0xff]  ;;  %v5254_v54 = vpack.c.bf16 %v547_v44, %v539_v43  ;;  %v564_v55 = vld [vmem:[#allocation7 + $0x4e8] sm:$0xff]  ;;  %v618_v56 = vld [vmem:[#allocation7 + $0x698] sm:$0xff] }
  0xd4   : > { %1336 = vmatprep.mubr.f32.mxu0 %v318_v63  ;;  %5251 = vmatpush1.bf16.msra.mxu0 %v5250_v38  ;;  %v626_v57 = vld [vmem:[#allocation7 + $0x6d8] sm:$0xff]  ;;  %v7625_v58 = vld [vmem:[%s7555_s30 + $0x180] sm:$0xff]  ;;  %v329_v61 = vld [vmem:[%s7555_s30 + $0x190] sm:$0xff]  ;;  %v5142_v63 = vpack.c.bf16 %v609_v52, %v601_v51  ;;  %v5256_v1 = vpack.c.bf16 %v564_v55, %v556_v53 }
  0xd5   : > { %1080 = vmatmul.mubr.f32.gmra.mrb[18].mxu1 %v315_v10  ;;  %v555_v59 = vld [vmem:[#allocation7 + $0x4a0] sm:$0xff]  ;;  %v7629_v62 = vld [vmem:[%s7555_s30 + $0x1a8] sm:$0xff]  ;;  %v334_v0 = vld [vmem:[%s7555_s30 + $0x1b8] sm:$0xff]  ;;  %5253 = vmatprep.subr.bf16.mxu0 %v5252_v50  ;;  %v5144_v2 = vpack.c.bf16 %v626_v57, %v618_v56 }
  0xd6   : > { %1085 = vmatprep.mubr.f32.mxu1 %v320_v14  ;;  %5131 = vmatpush1.bf16.msra.mxu1 %v5130_v16  ;;  %v563_v60 = vld [vmem:[#allocation7 + $0x4e0] sm:$0xff]  ;;  %v572_v3 = vld [vmem:[#allocation7 + $0x528] sm:$0xff]  ;;  %v617_v6 = vld [vmem:[#allocation7 + $0x690] sm:$0xff] }
  0xd7   : > { %1337 = vmatmul.mubr.f32.gmra.mrb[18].mxu0 %v317_v13  ;;  %5133 = vmatprep.subr.bf16.mxu1 %v5132_v17  ;;  %v580_v4 = vld [vmem:[#allocation7 + $0x568] sm:$0xff]  ;;  %v5258_v5 = vpack.c.bf16 %v563_v60, %v555_v59  ;;  %v625_v7 = vld [vmem:[#allocation7 + $0x6d0] sm:$0xff]  ;;  %v7635_v8 = vld [vmem:[%s7555_s30 + $0x1a0] sm:$0xff] }
  0xd8   : > { %1342 = vmatprep.mubr.f32.mxu0 %v322_v15  ;;  %5255 = vmatpush1.bf16.msra.mxu0 %v5254_v54  ;;  %v571_v9 = vld [vmem:[#allocation7 + $0x520] sm:$0xff]  ;;  %v333_v11 = vld [vmem:[%s7555_s30 + $0x1b0] sm:$0xff]  ;;  %v7639_v12 = vld [vmem:[%s7555_s30 + $0x1c8] sm:$0xff]  ;;  %v5260_v13 = vpack.c.bf16 %v580_v4, %v572_v3  ;;  %v5146_v15 = vpack.c.bf16 %v625_v7, %v617_v6 }
  0xd9   : > { %1086 = vmatmul.mubr.f32.gmra.mrb[20].mxu1 %v7608_v26  ;;  %v579_v10 = vld [vmem:[#allocation7 + $0x560] sm:$0xff]  ;;  %v338_v14 = vld [vmem:[%s7555_s30 + $0x1d8] sm:$0xff]  ;;  %5257 = vmatprep.subr.bf16.mxu0 %v5256_v1  ;;  %v588_v16 = vld [vmem:[#allocation7 + $0x5a8] sm:$0xff] }
  0xda   : > { %1091 = vmatprep.mubr.f32.mxu1 %v324_v30  ;;  %5135 = vmatpush1.bf16.msra.mxu1 %v5134_v32  ;;  %v596_v17 = vld [vmem:[#allocation7 + $0x5e8] sm:$0xff]  ;;  %v5262_v18 = vpack.c.bf16 %v579_v10, %v571_v9  ;;  %v634_v19 = vld [vmem:[#allocation7 + $0x718] sm:$0xff]  ;;  %v7645_v21 = vld [vmem:[%s7555_s30 + $0x1c0] sm:$0xff] }
  0xdb   : > { %1343 = vmatmul.mubr.f32.gmra.mrb[20].mxu0 %v321_v29  ;;  %5137 = vmatprep.subr.bf16.mxu1 %v5136_v33  ;;  %v642_v20 = vld [vmem:[#allocation7 + $0x758] sm:$0xff]  ;;  %v587_v22 = vld [vmem:[#allocation7 + $0x5a0] sm:$0xff]  ;;  %v337_v24 = vld [vmem:[%s7555_s30 + $0x1d0] sm:$0xff]  ;;  %v5264_v27 = vpack.c.bf16 %v596_v17, %v588_v16 }
  0xdc   : > { %1348 = vmatprep.mubr.f32.mxu0 %v326_v31  ;;  %5259 = vmatpush1.bf16.msra.mxu0 %v5258_v5  ;;  %v595_v23 = vld [vmem:[#allocation7 + $0x5e0] sm:$0xff]  ;;  %v7649_v25 = vld [vmem:[%s7555_s30 + $0x1e8] sm:$0xff]  ;;  %v342_v28 = vld [vmem:[%s7555_s30 + $0x1f8] sm:$0xff]  ;;  %v5148_v29 = vpack.c.bf16 %v642_v20, %v634_v19 }
  0xdd   : > { %1092 = vmatmul.mubr.f32.gmra.mrb[22].mxu1 %v7615_v42  ;;  %5261 = vmatprep.subr.bf16.mxu0 %v5260_v13  ;;  %v604_v30 = vld [vmem:[#allocation7 + $0x628] sm:$0xff]  ;;  %v5266_v32 = vpack.c.bf16 %v595_v23, %v587_v22  ;;  %v633_v33 = vld [vmem:[#allocation7 + $0x710] sm:$0xff]  ;;  %v7655_v35 = vld [vmem:[%s7555_s30 + $0x1e0] sm:$0xff] }
  0xde   : > { %1097 = vmatprep.mubr.f32.mxu1 %v7619_v46  ;;  %5139 = vmatpush1.bf16.msra.mxu1 %v5138_v48  ;;  %v612_v31 = vld [vmem:[#allocation7 + $0x668] sm:$0xff]  ;;  %v641_v34 = vld [vmem:[#allocation7 + $0x750] sm:$0xff]  ;;  %v603_v36 = vld [vmem:[#allocation7 + $0x620] sm:$0xff] }
  0xdf   : > { %1349 = vmatmul.mubr.f32.gmra.mrb[22].mxu0 %v325_v45  ;;  %5141 = vmatprep.subr.bf16.mxu1 %v5140_v49  ;;  %v611_v37 = vld [vmem:[#allocation7 + $0x660] sm:$0xff]  ;;  %v341_v38 = vld [vmem:[%s7555_s30 + $0x1f0] sm:$0xff]  ;;  %v7659_v39 = vld [vmem:[%s7555_s30 + $0x208] sm:$0xff]  ;;  %v5268_v40 = vpack.c.bf16 %v612_v31, %v604_v30  ;;  %v5150_v43 = vpack.c.bf16 %v641_v34, %v633_v33 }
  0xe0   : > { %1354 = vmatprep.mubr.f32.mxu0 %v330_v47  ;;  %5263 = vmatpush1.bf16.msra.mxu0 %v5262_v18  ;;  %v346_v41 = vld [vmem:[%s7555_s30 + $0x218] sm:$0xff]  ;;  %v620_v44 = vld [vmem:[#allocation7 + $0x6a8] sm:$0xff]  ;;  %v5270_v47 = vpack.c.bf16 %v611_v37, %v603_v36  ;;  %v7665_v50 = vld [vmem:[%s7555_s30 + $0x200] sm:$0xff] }
  0xe1   : > { %1098 = vmatmul.mubr.f32.gmra.mrb[24].mxu1 %v7625_v58  ;;  %5265 = vmatprep.subr.bf16.mxu0 %v5264_v27  ;;  %v628_v45 = vld [vmem:[#allocation7 + $0x6e8] sm:$0xff]  ;;  %v650_v48 = vld [vmem:[#allocation7 + $0x798] sm:$0xff]  ;;  %v619_v51 = vld [vmem:[#allocation7 + $0x6a0] sm:$0xff] }
  0xe2   : > { %1103 = vmatprep.mubr.f32.mxu1 %v7629_v62  ;;  %5143 = vmatpush1.bf16.msra.mxu1 %v5142_v63  ;;  %v658_v49 = vld [vmem:[#allocation7 + $0x7d8] sm:$0xff]  ;;  %v627_v52 = vld [vmem:[#allocation7 + $0x6e0] sm:$0xff]  ;;  %v345_v53 = vld [vmem:[%s7555_s30 + $0x210] sm:$0xff]  ;;  %v5272_v55 = vpack.c.bf16 %v628_v45, %v620_v44 }
  0xe3   : > { %1355 = vmatmul.mubr.f32.gmra.mrb[24].mxu0 %v329_v61  ;;  %5145 = vmatprep.subr.bf16.mxu1 %v5144_v2  ;;  %v7669_v54 = vld [vmem:[%s7555_s30 + $0x228] sm:$0xff]  ;;  %v350_v56 = vld [vmem:[%s7555_s30 + $0x238] sm:$0xff]  ;;  %v5152_v57 = vpack.c.bf16 %v658_v49, %v650_v48  ;;  %v5274_v61 = vpack.c.bf16 %v627_v52, %v619_v51  ;;  %v649_v63 = vld [vmem:[#allocation7 + $0x790] sm:$0xff] }
  0xe4   : > { %1360 = vmatprep.mubr.f32.mxu0 %v334_v0  ;;  %5267 = vmatpush1.bf16.msra.mxu0 %v5266_v32  ;;  %v636_v59 = vld [vmem:[#allocation7 + $0x728] sm:$0xff]  ;;  %v657_v0 = vld [vmem:[#allocation7 + $0x7d0] sm:$0xff]  ;;  %v7675_v1 = vld [vmem:[%s7555_s30 + $0x220] sm:$0xff] }
  0xe5   : > { %1104 = vmatmul.mubr.f32.gmra.mrb[26].mxu1 %v7635_v8  ;;  %5269 = vmatprep.subr.bf16.mxu0 %v5268_v40  ;;  %v644_v60 = vld [vmem:[#allocation7 + $0x768] sm:$0xff]  ;;  %v635_v2 = vld [vmem:[#allocation7 + $0x720] sm:$0xff]  ;;  %v349_v4 = vld [vmem:[%s7555_s30 + $0x230] sm:$0xff]  ;;  %v5154_v9 = vpack.c.bf16 %v657_v0, %v649_v63 }
  0xe6   : > { %1109 = vmatprep.mubr.f32.mxu1 %v7639_v12  ;;  %5147 = vmatpush1.bf16.msra.mxu1 %v5146_v15  ;;  %v643_v3 = vld [vmem:[#allocation7 + $0x760] sm:$0xff]  ;;  %v7679_v5 = vld [vmem:[%s7555_s30 + $0x248] sm:$0xff]  ;;  %v5276_v6 = vpack.c.bf16 %v644_v60, %v636_v59  ;;  %v354_v7 = vld [vmem:[%s7555_s30 + $0x258] sm:$0xff] }
  0xe7   : > { %1361 = vmatmul.mubr.f32.gmra.mrb[26].mxu0 %v333_v11  ;;  %5149 = vmatprep.subr.bf16.mxu1 %v5148_v29  ;;  %v652_v10 = vld [vmem:[#allocation7 + $0x7a8] sm:$0xff]  ;;  %v5278_v13 = vpack.c.bf16 %v643_v3, %v635_v2  ;;  %v674_v15 = vld [vmem:[#allocation7 + $0x858] sm:$0xff]  ;;  %v7685_v16 = vld [vmem:[%s7555_s30 + $0x240] sm:$0xff] }
  0xe8   : > { %1366 = vmatprep.mubr.f32.mxu0 %v338_v14  ;;  %5271 = vmatpush1.bf16.msra.mxu0 %v5270_v47  ;;  %v660_v11 = vld [vmem:[#allocation7 + $0x7e8] sm:$0xff]  ;;  %v666_v14 = vld [vmem:[#allocation7 + $0x818] sm:$0xff]  ;;  %v651_v17 = vld [vmem:[#allocation7 + $0x7a0] sm:$0xff] }
  0xe9   : > { %1110 = vmatmul.mubr.f32.gmra.mrb[28].mxu1 %v7645_v21  ;;  %5273 = vmatprep.subr.bf16.mxu0 %v5272_v55  ;;  %v659_v18 = vld [vmem:[#allocation7 + $0x7e0] sm:$0xff]  ;;  %v353_v19 = vld [vmem:[%s7555_s30 + $0x250] sm:$0xff]  ;;  %v7689_v20 = vld [vmem:[%s7555_s30 + $0x268] sm:$0xff]  ;;  %v5280_v22 = vpack.c.bf16 %v660_v11, %v652_v10 }
  0xea   : > { %1115 = vmatprep.mubr.f32.mxu1 %v7649_v25  ;;  %5151 = vmatpush1.bf16.msra.mxu1 %v5150_v43  ;;  %v358_v23 = vld [vmem:[%s7555_s30 + $0x278] sm:$0xff]  ;;  %v5282_v27 = vpack.c.bf16 %v659_v18, %v651_v17  ;;  %v676_v29 = vld [vmem:[#allocation7 + $0x868] sm:$0xff]  ;;  %v7695_v30 = vld [vmem:[%s7555_s30 + $0x260] sm:$0xff] }
  0xeb   : > { %1367 = vmatmul.mubr.f32.gmra.mrb[28].mxu0 %v337_v24  ;;  %5153 = vmatprep.subr.bf16.mxu1 %v5152_v57  ;;  %v5156_v24 = vpack.c.bf16 %v674_v15, %v666_v14  ;;  %v357_v31 = vld [vmem:[%s7555_s30 + $0x270] sm:$0xff]  ;;  %v7699_v32 = vld [vmem:[%s7555_s30 + $0x288] sm:$0xff]  ;;  %v362_v34 = vld [vmem:[%s7555_s30 + $0x298] sm:$0xff] }
  0xec   : > { %1372 = vmatprep.mubr.f32.mxu0 %v342_v28  ;;  %5275 = vmatpush1.bf16.msra.mxu0 %v5274_v61  ;;  %v668_v28 = vld [vmem:[#allocation7 + $0x828] sm:$0xff]  ;;  %v7705_v36 = vld [vmem:[%s7555_s30 + $0x280] sm:$0xff]  ;;  %v361_v37 = vld [vmem:[%s7555_s30 + $0x290] sm:$0xff] }
  0xed   : > { %1116 = vmatmul.mubr.f32.gmra.mrb[30].mxu1 %v7655_v35  ;;  %5277 = vmatprep.subr.bf16.mxu0 %v5276_v6  ;;  %v5284_v33 = vpack.c.bf16 %v676_v29, %v668_v28  ;;  %v366_v40 = vld [vmem:[%s7555_s30 + $0x2b8] sm:$0xff]  ;;  %v365_v43 = vld [vmem:[%s7555_s30 + $0x2b0] sm:$0xff]  ;;  %v7719_v44 = vld [vmem:[%s7555_s30 + $0x2c8] sm:$0xff] }
  0xee   : > { %1121 = vmatprep.mubr.f32.mxu1 %v7659_v39  ;;  %5155 = vmatpush1.bf16.msra.mxu1 %v5154_v9  ;;  %v370_v45 = vld [vmem:[%s7555_s30 + $0x2d8] sm:$0xff]  ;;  %v7725_v47 = vld [vmem:[%s7555_s30 + $0x2c0] sm:$0xff]  ;;  %v369_v48 = vld [vmem:[%s7555_s30 + $0x2d0] sm:$0xff] }
  0xef   : > { %1373 = vmatmul.mubr.f32.gmra.mrb[30].mxu0 %v341_v38  ;;  %5157 = vmatprep.subr.bf16.mxu1 %v5156_v24  ;;  %v7709_v38 = vld [vmem:[%s7555_s30 + $0x2a8] sm:$0xff]  ;;  %v374_v51 = vld [vmem:[%s7555_s30 + $0x2f8] sm:$0xff]  ;;  %v7735_v52 = vld [vmem:[%s7555_s30 + $0x2e0] sm:$0xff] }
  0xf0   : > { %1378 = vmatprep.mubr.f32.mxu0 %v346_v41  ;;  %5279 = vmatpush1.bf16.msra.mxu0 %v5278_v13  ;;  %v7715_v41 = vld [vmem:[%s7555_s30 + $0x2a0] sm:$0xff]  ;;  %v7729_v49 = vld [vmem:[%s7555_s30 + $0x2e8] sm:$0xff]  ;;  %v377_v59 = vld [vmem:[%s7555_s30 + $0x310] sm:$0xff] }
  0xf1   : > { %1122 = vmatmul.mubr.f32.gmra.mrb[32].mxu1 %v7665_v50  ;;  %5281 = vmatprep.subr.bf16.mxu0 %v5280_v22  ;;  %v7739_v55 = vld [vmem:[%s7555_s30 + $0x308] sm:$0xff]  ;;  %v7745_v57 = vld [vmem:[%s7555_s30 + $0x300] sm:$0xff]  ;;  %v382_v61 = vld [vmem:[%s7555_s30 + $0x338] sm:$0xff] }
  0xf2   : > { %1127 = vmatprep.mubr.f32.mxu1 %v7669_v54  ;;  %v7749_v60 = vld [vmem:[%s7555_s30 + $0x328] sm:$0xff]  ;;  %v7755_v63 = vld [vmem:[%s7555_s30 + $0x320] sm:$0xff]  ;;  %v381_v0 = vld [vmem:[%s7555_s30 + $0x330] sm:$0xff] }
  0xf3   : > { %1379 = vmatmul.mubr.f32.gmra.mrb[32].mxu0 %v345_v53  ;;  %v373_v53 = vld [vmem:[%s7555_s30 + $0x2f0] sm:$0xff]  ;;  %v7759_v2 = vld [vmem:[%s7555_s30 + $0x348] sm:$0xff]  ;;  %v386_v3 = vld [vmem:[%s7555_s30 + $0x358] sm:$0xff] }
  0xf4   : > { %1384 = vmatprep.mubr.f32.mxu0 %v350_v56  ;;  %5283 = vmatpush1.bf16.msra.mxu0 %v5282_v27  ;;  %v378_v56 = vld [vmem:[%s7555_s30 + $0x318] sm:$0xff]  ;;  %v385_v6 = vld [vmem:[%s7555_s30 + $0x350] sm:$0xff]  ;;  %v7775_v10 = vld [vmem:[%s7555_s30 + $0x360] sm:$0xff] }
  0xf5   : > { %1128 = vmatmul.mubr.f32.gmra.mrb[34].mxu1 %v7675_v1  ;;  %5285 = vmatprep.subr.bf16.mxu0 %v5284_v33  ;;  %v390_v9 = vld [vmem:[%s7555_s30 + $0x378] sm:$0xff]  ;;  %v389_v11 = vld [vmem:[%s7555_s30 + $0x370] sm:$0xff]  ;;  %v7779_v13 = vld [vmem:[%s7555_s30 + $0x388] sm:$0xff] }
  0xf6   : > { %1133 = vmatprep.mubr.f32.mxu1 %v7679_v5  ;;  %v394_v14 = vld [vmem:[%s7555_s30 + $0x398] sm:$0xff]  ;;  %v7785_v15 = vld [vmem:[%s7555_s30 + $0x380] sm:$0xff]  ;;  %v393_v17 = vld [vmem:[%s7555_s30 + $0x390] sm:$0xff] }
  0xf7   : > { %1385 = vmatmul.mubr.f32.gmra.mrb[34].mxu0 %v349_v4  ;;  %v7765_v4 = vld [vmem:[%s7555_s30 + $0x340] sm:$0xff]  ;;  %v7789_v18 = vld [vmem:[%s7555_s30 + $0x3a8] sm:$0xff]  ;;  %v402_v27 = vld [vmem:[%s7555_s30 + $0x3d8] sm:$0xff] }
  0xf8   : > { %1390 = vmatprep.mubr.f32.mxu0 %v354_v7  ;;  %v7769_v7 = vld [vmem:[%s7555_s30 + $0x368] sm:$0xff]  ;;  %v7795_v22 = vld [vmem:[%s7555_s30 + $0x3a0] sm:$0xff]  ;;  %v401_v29 = vld [vmem:[%s7555_s30 + $0x3d0] sm:$0xff] }
  0xf9   : > { %1134 = vmatmul.mubr.f32.gmra.mrb[36].mxu1 %v7685_v16  ;;  %v7799_v24 = vld [vmem:[%s7555_s30 + $0x3c8] sm:$0xff]  ;;  %v7805_v28 = vld [vmem:[%s7555_s30 + $0x3c0] sm:$0xff]  ;;  %v406_v33 = vld [vmem:[%s7555_s30 + $0x3f8] sm:$0xff] }
  0xfa   : > { %1139 = vmatprep.mubr.f32.mxu1 %v7689_v20  ;;  %9574 = vst [vmem:[#allocation12_spill] sm:$0xff] %v7805_v28 }
  0xfb   : > { %1391 = vmatmul.mubr.f32.gmra.mrb[36].mxu0 %v353_v19  ;;  %v398_v19 = vld [vmem:[%s7555_s30 + $0x3b8] sm:$0xff] }
  0xfc   : > { %1396 = vmatprep.mubr.f32.mxu0 %v358_v23  ;;  %v397_v23 = vld [vmem:[%s7555_s30 + $0x3b0] sm:$0xff] }
  0xfd   : > { %1140 = vmatmul.mubr.f32.gmra.mrb[38].mxu1 %v7695_v30 }
  0xfe   : > { %1145 = vmatprep.mubr.f32.mxu1 %v7699_v32 }
  0xff   : > { %1397 = vmatmul.mubr.f32.gmra.mrb[38].mxu0 %v357_v31  ;;  %v7809_v31 = vld [vmem:[%s7555_s30 + $0x3e8] sm:$0xff] }
 0x100   : > { %1402 = vmatprep.mubr.f32.mxu0 %v362_v34  ;;  %9575 = vst [vmem:[#allocation13_spill] sm:$0xff] %v7809_v31  ;;  %v7815_v34 = vld [vmem:[%s7555_s30 + $0x3e0] sm:$0xff] }
 0x101   : > { %1146 = vmatmul.mubr.f32.gmra.mrb[40].mxu1 %v7705_v36  ;;  %9576 = vst [vmem:[#allocation14_spill] sm:$0xff] %v7815_v34 }
 0x102   : > { %1151 = vmatprep.mubr.f32.mxu1 %v7709_v38 }
 0x103   : > { %1403 = vmatmul.mubr.f32.gmra.mrb[40].mxu0 %v361_v37  ;;  %v405_v37 = vld [vmem:[%s7555_s30 + $0x3f0] sm:$0xff] }
 0x104   : > { %1408 = vmatprep.mubr.f32.mxu0 %v366_v40  ;;  %v665_v40 = vld [vmem:[#allocation7 + $0x810] sm:$0xff] }
 0x105   : > { %1152 = vmatmul.mubr.f32.gmra.mrb[42].mxu1 %v7715_v41 }
 0x106   : > { %1157 = vmatprep.mubr.f32.mxu1 %v7719_v44 }
 0x107   : > { %1409 = vmatmul.mubr.f32.gmra.mrb[42].mxu0 %v365_v43  ;;  %v673_v43 = vld [vmem:[#allocation7 + $0x850] sm:$0xff] }
 0x108   : > { %1414 = vmatprep.mubr.f32.mxu0 %v370_v45  ;;  %v682_v45 = vld [vmem:[#allocation7 + $0x898] sm:$0xff] }
 0x109   : > { %1158 = vmatmul.mubr.f32.gmra.mrb[44].mxu1 %v7725_v47 }
 0x10a   : > { %1163 = vmatprep.mubr.f32.mxu1 %v7729_v49 }
 0x10b   : > { %1415 = vmatmul.mubr.f32.gmra.mrb[44].mxu0 %v369_v48  ;;  %v690_v48 = vld [vmem:[#allocation7 + $0x8d8] sm:$0xff] }
 0x10c   : > { %1420 = vmatprep.mubr.f32.mxu0 %v374_v51  ;;  %v667_v51 = vld [vmem:[#allocation7 + $0x820] sm:$0xff] }
 0x10d   : > { %1164 = vmatmul.mubr.f32.gmra.mrb[46].mxu1 %v7735_v52 }
 0x10e   : > { %1169 = vmatprep.mubr.f32.mxu1 %v7739_v55 }
 0x10f   : > { %1421 = vmatmul.mubr.f32.gmra.mrb[46].mxu0 %v373_v53  ;;  %v675_v53 = vld [vmem:[#allocation7 + $0x860] sm:$0xff] }
 0x110   : > { %1426 = vmatprep.mubr.f32.mxu0 %v378_v56  ;;  %v7013_v56 = vld [vmem:[%s7555_s30 + $0x8] sm:$0xff] }
 0x111   : > { %1170 = vmatmul.mubr.f32.gmra.mrb[48].mxu1 %v7745_v57 }
 0x112   : > { %1175 = vmatprep.mubr.f32.mxu1 %v7749_v60 }
 0x113   : > { %1427 = vmatmul.mubr.f32.gmra.mrb[48].mxu0 %v377_v59  ;;  %v5158_v59 = vpack.c.bf16 %v673_v43, %v665_v40  ;;  %v7015_v40 = vld [vmem:[%s7555_s30 + $0x28] sm:$0xff] }
 0x114   : > { %1432 = vmatprep.mubr.f32.mxu0 %v382_v61  ;;  %v684_v61 = vld [vmem:[#allocation7 + $0x8a8] sm:$0xff] }
 0x115   : > { %1176 = vmatmul.mubr.f32.gmra.mrb[50].mxu1 %v7755_v63 }
 0x116   : > { %1181 = vmatprep.mubr.f32.mxu1 %v7759_v2 }
 0x117   : > { %1433 = vmatmul.mubr.f32.gmra.mrb[50].mxu0 %v381_v0  ;;  %v692_v0 = vld [vmem:[#allocation7 + $0x8e8] sm:$0xff] }
 0x118   : > { %1438 = vmatprep.mubr.f32.mxu0 %v386_v3  ;;  %v5160_v3 = vpack.c.bf16 %v690_v48, %v682_v45  ;;  %v697_v48 = vld [vmem:[#allocation7 + $0x910] sm:$0xff] }
 0x119   : > { %1182 = vmatmul.mubr.f32.gmra.mrb[52].mxu1 %v7765_v4 }
 0x11a   : > { %1187 = vmatprep.mubr.f32.mxu1 %v7769_v7 }
 0x11b   : > { %1439 = vmatmul.mubr.f32.gmra.mrb[52].mxu0 %v385_v6  ;;  %v681_v6 = vld [vmem:[#allocation7 + $0x890] sm:$0xff] }
 0x11c   : > { %1444 = vmatprep.mubr.f32.mxu0 %v390_v9  ;;  %v689_v9 = vld [vmem:[#allocation7 + $0x8d0] sm:$0xff] }
 0x11d   : > { %1188 = vmatmul.mubr.f32.gmra.mrb[54].mxu1 %v7775_v10  ;;  %v5162_v43 = vpack.c.bf16 %v689_v9, %v681_v6  ;;  %v716_v6 = vld [vmem:[#allocation7 + $0x9a8] sm:$0xff] }
 0x11e   : > { %1193 = vmatprep.mubr.f32.mxu1 %v7779_v13  ;;  %v724_v9 = vld [vmem:[#allocation7 + $0x9e8] sm:$0xff] }
 0x11f   : > { %1445 = vmatmul.mubr.f32.gmra.mrb[54].mxu0 %v389_v11  ;;  %v698_v11 = vld [vmem:[#allocation7 + $0x918] sm:$0xff] }
 0x120   : > { %1450 = vmatprep.mubr.f32.mxu0 %v394_v14  ;;  %v5286_v14 = vpack.c.bf16 %v675_v53, %v667_v51  ;;  %v705_v51 = vld [vmem:[#allocation7 + $0x950] sm:$0xff]  ;;  %v714_v53 = vld [vmem:[#allocation7 + $0x998] sm:$0xff] }
 0x121   : > { %1194 = vmatmul.mubr.f32.gmra.mrb[56].mxu1 %v7785_v15 }
 0x122   : > { %1199 = vmatprep.mubr.f32.mxu1 %v7789_v18 }
 0x123   : > { %1451 = vmatmul.mubr.f32.gmra.mrb[56].mxu0 %v393_v17  ;;  %v7014_v17 = vld [vmem:[%s7555_s30] sm:$0xff] }
 0x124   : > { %1456 = vmatprep.mubr.f32.mxu0 %v398_v19  ;;  %v706_v19 = vld [vmem:[#allocation7 + $0x958] sm:$0xff] }
 0x125   : > { %1200 = vmatmul.mubr.f32.gmra.mrb[58].mxu1 %v7795_v22  ;;  %v5164_v45 = vpack.c.bf16 %v706_v19, %v698_v11  ;;  %v721_v19 = vld [vmem:[#allocation7 + $0x9d0] sm:$0xff] }
 0x126   : > { %1205 = vmatprep.mubr.f32.mxu1 %v7799_v24 }
 0x127   : > { %1457 = vmatmul.mubr.f32.gmra.mrb[58].mxu0 %v397_v23  ;;  %v5288_v23 = vpack.c.bf16 %v692_v0, %v684_v61  ;;  %v7016_v61 = vld [vmem:[%s7555_s30 + $0x20] sm:$0xff]  ;;  %v722_v0 = vld [vmem:[#allocation7 + $0x9d8] sm:$0xff] }
 0x128   : > { %1462 = vmatprep.mubr.f32.mxu0 %v402_v27  ;;  %v683_v27 = vld [vmem:[#allocation7 + $0x8a0] sm:$0xff]  ;;  %v5168_v11 = vpack.c.bf16 %v722_v0, %v714_v53  ;;  %v737_v53 = vld [vmem:[#allocation7 + $0xa50] sm:$0xff] }
 0x129   : > { %1206 = vmatmul.mubr.f32.gmra.mrb[60].mxu1 %v7805_v28  ;;  %v7033_v28 = vld [vmem:[%s7555_s30 + $0x148] sm:$0xff] }
 0x12a   : > { %1211 = vmatprep.mubr.f32.mxu1 %v7809_v31  ;;  %v7017_v31 = vld [vmem:[%s7555_s30 + $0x48] sm:$0xff] }
 0x12b   : > { %1463 = vmatmul.mubr.f32.gmra.mrb[60].mxu0 %v401_v29  ;;  %v691_v29 = vld [vmem:[#allocation7 + $0x8e0] sm:$0xff] }
 0x12c   : > { %1468 = vmatprep.mubr.f32.mxu0 %v406_v33  ;;  %v700_v33 = vld [vmem:[#allocation7 + $0x928] sm:$0xff] }
 0x12d   : > { %1212 = vmatmul.mubr.f32.gmra.mrb[62].mxu1 %v7815_v34  ;;  %v707_v34 = vld [vmem:[#allocation7 + $0x960] sm:$0xff] }
 0x12e   : > { %1539 = vmatprep.mubr.f32.mxu1 %v7013_v56 }
 0x12f   : > { %1469 = vmatmul.mubr.f32.gmra.mrb[62].mxu0 %v405_v37  ;;  %v708_v37 = vld [vmem:[#allocation7 + $0x968] sm:$0xff] }
 0x130   : > { %2053 = vmatprep.mubr.f32.mxu0 %v7013_v56  ;;  %v5290_v56 = vpack.c.bf16 %v691_v29, %v683_v27  ;;  %v730_v27 = vld [vmem:[#allocation7 + $0xa18] sm:$0xff]  ;;  %v7018_v29 = vld [vmem:[%s7555_s30 + $0x40] sm:$0xff] }
 0x131   : > { %1540 = vmatmul.mubr.f32.vlgmr.msra.gmra.mrb[64].mxu1 %v7014_v17 }
 0x132   : > { %5159 = vmatpush1.bf16.msra.mxu1 %v5158_v59  ;;  %1545 = vmatprep.mubr.f32.mxu1 %v7015_v40  ;;  %v699_v59 = vld [vmem:[#allocation7 + $0x920] sm:$0xff] }
 0x133   : > { %2054 = vmatmul.mubr.f32.vlgmr.msra.gmra.mrb[64].mxu0 %v7014_v17  ;;  %5161 = vmatprep.subr.bf16.mxu1 %v5160_v3  ;;  %v5292_v17 = vpack.c.bf16 %v708_v37, %v700_v33  ;;  %v5166_v3 = vpack.c.bf16 %v705_v51, %v697_v48  ;;  %v738_v33 = vld [vmem:[#allocation7 + $0xa58] sm:$0xff]  ;;  %v5296_v37 = vpack.c.bf16 %v724_v9, %v716_v6  ;;  %v740_v48 = vld [vmem:[#allocation7 + $0xa68] sm:$0xff]  ;;  %v731_v9 = vld [vmem:[#allocation7 + $0xa20] sm:$0xff] }
 0x134   : > { %2059 = vmatprep.mubr.f32.mxu0 %v7015_v40  ;;  %5287 = vmatpush1.bf16.msra.mxu0 %v5286_v14  ;;  %v713_v14 = vld [vmem:[#allocation7 + $0x990] sm:$0xff]  ;;  %v715_v40 = vld [vmem:[#allocation7 + $0x9a0] sm:$0xff]  ;;  %v5172_v51 = vpack.c.bf16 %v738_v33, %v730_v27  ;;  %v762_v33 = vld [vmem:[#allocation7 + $0xb18] sm:$0xff] }
 0x135   : > { %1546 = vmatmul.mubr.f32.gmra.mrb[66].mxu1 %v7016_v61  ;;  %5289 = vmatprep.subr.bf16.mxu0 %v5288_v23  ;;  %v5294_v23 = vpack.c.bf16 %v707_v34, %v699_v59  ;;  %v729_v34 = vld [vmem:[#allocation7 + $0xa10] sm:$0xff]  ;;  %v754_v59 = vld [vmem:[#allocation7 + $0xad8] sm:$0xff] }
 0x136   : > { %1551 = vmatprep.mubr.f32.mxu1 %v7017_v31  ;;  %5163 = vmatpush1.bf16.msra.mxu1 %v5162_v43  ;;  %v732_v43 = vld [vmem:[#allocation7 + $0xa28] sm:$0xff]  ;;  %v745_v27 = vld [vmem:[#allocation7 + $0xa90] sm:$0xff] }
 0x137   : > { %2060 = vmatmul.mubr.f32.gmra.mrb[66].mxu0 %v7016_v61  ;;  %5165 = vmatprep.subr.bf16.mxu1 %v5164_v45  ;;  %v723_v61 = vld [vmem:[#allocation7 + $0x9e0] sm:$0xff]  ;;  %v5170_v45 = vpack.c.bf16 %v721_v19, %v713_v14  ;;  %v5300_v6 = vpack.c.bf16 %v740_v48, %v732_v43  ;;  %v756_v14 = vld [vmem:[#allocation7 + $0xae8] sm:$0xff] }
 0x138   : > { %2065 = vmatprep.mubr.f32.mxu0 %v7017_v31  ;;  %5291 = vmatpush1.bf16.msra.mxu0 %v5290_v56  ;;  %v7019_v31 = vld [vmem:[%s7555_s30 + $0x68] sm:$0xff]  ;;  %v746_v56 = vld [vmem:[#allocation7 + $0xa98] sm:$0xff]  ;;  %v5298_v0 = vpack.c.bf16 %v723_v61, %v715_v40  ;;  %v7022_v40 = vld [vmem:[%s7555_s30 + $0x80] sm:$0xff] }
 0x139   : > { %1552 = vmatmul.mubr.f32.gmra.mrb[68].mxu1 %v7018_v29  ;;  %5293 = vmatprep.subr.bf16.mxu0 %v5292_v17  ;;  %v7020_v17 = vld [vmem:[%s7555_s30 + $0x60] sm:$0xff]  ;;  %v5176_v19 = vpack.c.bf16 %v754_v59, %v746_v56  ;;  %v770_v61 = vld [vmem:[#allocation7 + $0xb58] sm:$0xff]  ;;  %v761_v56 = vld [vmem:[#allocation7 + $0xb10] sm:$0xff] }
 0x13a   : > { %1557 = vmatprep.mubr.f32.mxu1 %v7019_v31  ;;  %5167 = vmatpush1.bf16.msra.mxu1 %v5166_v3  ;;  %v748_v3 = vld [vmem:[#allocation7 + $0xaa8] sm:$0xff]  ;;  %v747_v48 = vld [vmem:[#allocation7 + $0xaa0] sm:$0xff]  ;;  %v778_v59 = vld [vmem:[#allocation7 + $0xb98] sm:$0xff] }
 0x13b   : > { %2066 = vmatmul.mubr.f32.gmra.mrb[68].mxu0 %v7018_v29  ;;  %5169 = vmatprep.subr.bf16.mxu1 %v5168_v11  ;;  %v739_v29 = vld [vmem:[#allocation7 + $0xa60] sm:$0xff]  ;;  %v5174_v11 = vpack.c.bf16 %v737_v53, %v729_v34  ;;  %v5304_v43 = vpack.c.bf16 %v756_v14, %v748_v3  ;;  %v772_v34 = vld [vmem:[#allocation7 + $0xb68] sm:$0xff]  ;;  %v5180_v53 = vpack.c.bf16 %v770_v61, %v762_v33  ;;  %v777_v33 = vld [vmem:[#allocation7 + $0xb90] sm:$0xff] }
 0x13c   : > { %2071 = vmatprep.mubr.f32.mxu0 %v7019_v31  ;;  %5295 = vmatpush1.bf16.msra.mxu0 %v5294_v23  ;;  %v7021_v31 = vld [vmem:[%s7555_s30 + $0x88] sm:$0xff]  ;;  %v753_v23 = vld [vmem:[#allocation7 + $0xad0] sm:$0xff]  ;;  %v763_v14 = vld [vmem:[#allocation7 + $0xb20] sm:$0xff] }
 0x13d   : > { %1558 = vmatmul.mubr.f32.gmra.mrb[70].mxu1 %v7020_v17  ;;  %5297 = vmatprep.subr.bf16.mxu0 %v5296_v37  ;;  %v5302_v37 = vpack.c.bf16 %v739_v29, %v731_v9  ;;  %v7024_v9 = vld [vmem:[%s7555_s30 + $0xa0] sm:$0xff]  ;;  %v786_v29 = vld [vmem:[#allocation7 + $0xbd8] sm:$0xff] }
 0x13e   : > { %1563 = vmatprep.mubr.f32.mxu1 %v7021_v31  ;;  %5171 = vmatpush1.bf16.msra.mxu1 %v5170_v45  ;;  %v764_v45 = vld [vmem:[#allocation7 + $0xb28] sm:$0xff]  ;;  %v794_v61 = vld [vmem:[#allocation7 + $0xc18] sm:$0xff] }
 0x13f   : > { %2072 = vmatmul.mubr.f32.gmra.mrb[70].mxu0 %v7020_v17  ;;  %5173 = vmatprep.subr.bf16.mxu1 %v5172_v51  ;;  %v755_v17 = vld [vmem:[#allocation7 + $0xae0] sm:$0xff]  ;;  %v5178_v51 = vpack.c.bf16 %v753_v23, %v745_v27  ;;  %v5308_v3 = vpack.c.bf16 %v772_v34, %v764_v45  ;;  %v788_v27 = vld [vmem:[#allocation7 + $0xbe8] sm:$0xff]  ;;  %v5184_v23 = vpack.c.bf16 %v786_v29, %v778_v59  ;;  %v793_v59 = vld [vmem:[#allocation7 + $0xc10] sm:$0xff] }
 0x140   : > { %2077 = vmatprep.mubr.f32.mxu0 %v7021_v31  ;;  %5299 = vmatpush1.bf16.msra.mxu0 %v5298_v0  ;;  %v7023_v31 = vld [vmem:[%s7555_s30 + $0xa8] sm:$0xff]  ;;  %v769_v0 = vld [vmem:[#allocation7 + $0xb50] sm:$0xff]  ;;  %v779_v34 = vld [vmem:[#allocation7 + $0xba0] sm:$0xff] }
 0x141   : > { %1564 = vmatmul.mubr.f32.gmra.mrb[72].mxu1 %v7022_v40  ;;  %5301 = vmatprep.subr.bf16.mxu0 %v5300_v6  ;;  %v5306_v6 = vpack.c.bf16 %v755_v17, %v747_v48  ;;  %v7026_v48 = vld [vmem:[%s7555_s30 + $0xc0] sm:$0xff]  ;;  %v802_v17 = vld [vmem:[#allocation7 + $0xc58] sm:$0xff] }
 0x142   : > { %1569 = vmatprep.mubr.f32.mxu1 %v7023_v31  ;;  %5175 = vmatpush1.bf16.msra.mxu1 %v5174_v11  ;;  %v780_v11 = vld [vmem:[#allocation7 + $0xba8] sm:$0xff]  ;;  %v810_v29 = vld [vmem:[#allocation7 + $0xc98] sm:$0xff] }
 0x143   : > { %2078 = vmatmul.mubr.f32.gmra.mrb[72].mxu0 %v7022_v40  ;;  %5177 = vmatprep.subr.bf16.mxu1 %v5176_v19  ;;  %v771_v40 = vld [vmem:[#allocation7 + $0xb60] sm:$0xff]  ;;  %v5182_v19 = vpack.c.bf16 %v769_v0, %v761_v56  ;;  %v5312_v45 = vpack.c.bf16 %v788_v27, %v780_v11  ;;  %v804_v56 = vld [vmem:[#allocation7 + $0xc68] sm:$0xff]  ;;  %v5188_v0 = vpack.c.bf16 %v802_v17, %v794_v61  ;;  %v809_v61 = vld [vmem:[#allocation7 + $0xc90] sm:$0xff] }
 0x144   : > { %2083 = vmatprep.mubr.f32.mxu0 %v7023_v31  ;;  %5303 = vmatpush1.bf16.msra.mxu0 %v5302_v37  ;;  %v7025_v31 = vld [vmem:[%s7555_s30 + $0xc8] sm:$0xff]  ;;  %v785_v37 = vld [vmem:[#allocation7 + $0xbd0] sm:$0xff]  ;;  %v795_v27 = vld [vmem:[#allocation7 + $0xc20] sm:$0xff] }
 0x145   : > { %1570 = vmatmul.mubr.f32.gmra.mrb[74].mxu1 %v7024_v9  ;;  %5305 = vmatprep.subr.bf16.mxu0 %v5304_v43  ;;  %v5310_v43 = vpack.c.bf16 %v771_v40, %v763_v14  ;;  %v7028_v14 = vld [vmem:[%s7555_s30 + $0xe0] sm:$0xff]  ;;  %v818_v40 = vld [vmem:[#allocation7 + $0xcd8] sm:$0xff] }
 0x146   : > { %1575 = vmatprep.mubr.f32.mxu1 %v7025_v31  ;;  %5179 = vmatpush1.bf16.msra.mxu1 %v5178_v51  ;;  %v796_v51 = vld [vmem:[#allocation7 + $0xc28] sm:$0xff]  ;;  %v826_v17 = vld [vmem:[#allocation7 + $0xd18] sm:$0xff] }
 0x147   : > { %2084 = vmatmul.mubr.f32.gmra.mrb[74].mxu0 %v7024_v9  ;;  %5181 = vmatprep.subr.bf16.mxu1 %v5180_v53  ;;  %v787_v9 = vld [vmem:[#allocation7 + $0xbe0] sm:$0xff]  ;;  %v5186_v53 = vpack.c.bf16 %v785_v37, %v777_v33  ;;  %v5316_v11 = vpack.c.bf16 %v804_v56, %v796_v51  ;;  %v820_v33 = vld [vmem:[#allocation7 + $0xce8] sm:$0xff]  ;;  %v5192_v37 = vpack.c.bf16 %v818_v40, %v810_v29  ;;  %v825_v29 = vld [vmem:[#allocation7 + $0xd10] sm:$0xff] }
 0x148   : > { %2089 = vmatprep.mubr.f32.mxu0 %v7025_v31  ;;  %5307 = vmatpush1.bf16.msra.mxu0 %v5306_v6  ;;  %v7027_v31 = vld [vmem:[%s7555_s30 + $0xe8] sm:$0xff]  ;;  %v801_v6 = vld [vmem:[#allocation7 + $0xc50] sm:$0xff]  ;;  %v811_v56 = vld [vmem:[#allocation7 + $0xca0] sm:$0xff] }
 0x149   : > { %1576 = vmatmul.mubr.f32.gmra.mrb[76].mxu1 %v7026_v48  ;;  %5309 = vmatprep.subr.bf16.mxu0 %v5308_v3  ;;  %v5314_v3 = vpack.c.bf16 %v787_v9, %v779_v34  ;;  %v7030_v34 = vld [vmem:[%s7555_s30 + $0x100] sm:$0xff]  ;;  %v834_v9 = vld [vmem:[#allocation7 + $0xd58] sm:$0xff] }
 0x14a   : > { %1581 = vmatprep.mubr.f32.mxu1 %v7027_v31  ;;  %5183 = vmatpush1.bf16.msra.mxu1 %v5182_v19  ;;  %v812_v19 = vld [vmem:[#allocation7 + $0xca8] sm:$0xff]  ;;  %v842_v40 = vld [vmem:[#allocation7 + $0xd98] sm:$0xff] }
 0x14b   : > { %2090 = vmatmul.mubr.f32.gmra.mrb[76].mxu0 %v7026_v48  ;;  %5185 = vmatprep.subr.bf16.mxu1 %v5184_v23  ;;  %v803_v48 = vld [vmem:[#allocation7 + $0xc60] sm:$0xff]  ;;  %v5190_v23 = vpack.c.bf16 %v801_v6, %v793_v59  ;;  %v5320_v51 = vpack.c.bf16 %v820_v33, %v812_v19  ;;  %v836_v59 = vld [vmem:[#allocation7 + $0xd68] sm:$0xff]  ;;  %v5196_v6 = vpack.c.bf16 %v834_v9, %v826_v17  ;;  %v841_v17 = vld [vmem:[#allocation7 + $0xd90] sm:$0xff] }
 0x14c   : > { %2095 = vmatprep.mubr.f32.mxu0 %v7027_v31  ;;  %5311 = vmatpush1.bf16.msra.mxu0 %v5310_v43  ;;  %v7029_v31 = vld [vmem:[%s7555_s30 + $0x108] sm:$0xff]  ;;  %v817_v43 = vld [vmem:[#allocation7 + $0xcd0] sm:$0xff]  ;;  %v827_v33 = vld [vmem:[#allocation7 + $0xd20] sm:$0xff] }
 0x14d   : > { %1582 = vmatmul.mubr.f32.gmra.mrb[78].mxu1 %v7028_v14  ;;  %5313 = vmatprep.subr.bf16.mxu0 %v5312_v45  ;;  %v5318_v45 = vpack.c.bf16 %v803_v48, %v795_v27  ;;  %v7032_v27 = vld [vmem:[%s7555_s30 + $0x120] sm:$0xff]  ;;  %v850_v48 = vld [vmem:[#allocation7 + $0xdd8] sm:$0xff] }
 0x14e   : > { %1587 = vmatprep.mubr.f32.mxu1 %v7029_v31  ;;  %5187 = vmatpush1.bf16.msra.mxu1 %v5186_v53  ;;  %v828_v53 = vld [vmem:[#allocation7 + $0xd28] sm:$0xff]  ;;  %v858_v9 = vld [vmem:[#allocation7 + $0xe18] sm:$0xff] }
 0x14f   : > { %2096 = vmatmul.mubr.f32.gmra.mrb[78].mxu0 %v7028_v14  ;;  %5189 = vmatprep.subr.bf16.mxu1 %v5188_v0  ;;  %v819_v14 = vld [vmem:[#allocation7 + $0xce0] sm:$0xff]  ;;  %v5194_v0 = vpack.c.bf16 %v817_v43, %v809_v61  ;;  %v5324_v19 = vpack.c.bf16 %v836_v59, %v828_v53  ;;  %v852_v61 = vld [vmem:[#allocation7 + $0xde8] sm:$0xff]  ;;  %v5200_v43 = vpack.c.bf16 %v850_v48, %v842_v40  ;;  %v857_v40 = vld [vmem:[#allocation7 + $0xe10] sm:$0xff] }
 0x150   : > { %2101 = vmatprep.mubr.f32.mxu0 %v7029_v31  ;;  %5315 = vmatpush1.bf16.msra.mxu0 %v5314_v3  ;;  %v7031_v31 = vld [vmem:[%s7555_s30 + $0x128] sm:$0xff]  ;;  %v833_v3 = vld [vmem:[#allocation7 + $0xd50] sm:$0xff]  ;;  %v851_v53 = vld [vmem:[#allocation7 + $0xde0] sm:$0xff] }
 0x151   : > { %1588 = vmatmul.mubr.f32.gmra.mrb[80].mxu1 %v7030_v34  ;;  %5317 = vmatprep.subr.bf16.mxu0 %v5316_v11  ;;  %v5322_v11 = vpack.c.bf16 %v819_v14, %v811_v56  ;;  %v866_v56 = vld [vmem:[#allocation7 + $0xe58] sm:$0xff]  ;;  %v7034_v59 = vld [vmem:[%s7555_s30 + $0x140] sm:$0xff] }
 0x152   : > { %1593 = vmatprep.mubr.f32.mxu1 %v7031_v31  ;;  %5191 = vmatpush1.bf16.msra.mxu1 %v5190_v23  ;;  %v844_v23 = vld [vmem:[#allocation7 + $0xda8] sm:$0xff]  ;;  %v882_v48 = vld [vmem:[#allocation7 + $0xed8] sm:$0xff] }
 0x153   : > { %2102 = vmatmul.mubr.f32.gmra.mrb[80].mxu0 %v7030_v34  ;;  %5193 = vmatprep.subr.bf16.mxu1 %v5192_v37  ;;  %v835_v34 = vld [vmem:[#allocation7 + $0xd60] sm:$0xff]  ;;  %v5198_v37 = vpack.c.bf16 %v833_v3, %v825_v29  ;;  %v5328_v14 = vpack.c.bf16 %v852_v61, %v844_v23  ;;  %v868_v29 = vld [vmem:[#allocation7 + $0xe68] sm:$0xff]  ;;  %v5204_v3 = vpack.c.bf16 %v866_v56, %v858_v9  ;;  %v881_v9 = vld [vmem:[#allocation7 + $0xed0] sm:$0xff] }
 0x154   : > { %2107 = vmatprep.mubr.f32.mxu0 %v7031_v31  ;;  %5319 = vmatpush1.bf16.msra.mxu0 %v5318_v45  ;;  %v849_v45 = vld [vmem:[#allocation7 + $0xdd0] sm:$0xff]  ;;  %v843_v31 = vld [vmem:[#allocation7 + $0xda0] sm:$0xff]  ;;  %v876_v61 = vld [vmem:[#allocation7 + $0xea8] sm:$0xff] }
 0x155   : > { %1594 = vmatmul.mubr.f32.gmra.mrb[82].mxu1 %v7032_v27  ;;  %5321 = vmatprep.subr.bf16.mxu0 %v5320_v51  ;;  %v5326_v51 = vpack.c.bf16 %v835_v34, %v827_v33  ;;  %v859_v33 = vld [vmem:[#allocation7 + $0xe20] sm:$0xff]  ;;  %v898_v56 = vld [vmem:[#allocation7 + $0xf58] sm:$0xff] }
 0x156   : > { %1599 = vmatprep.mubr.f32.mxu1 %v7033_v28  ;;  %5195 = vmatpush1.bf16.msra.mxu1 %v5194_v0  ;;  %v860_v0 = vld [vmem:[#allocation7 + $0xe28] sm:$0xff]  ;;  %v867_v34 = vld [vmem:[#allocation7 + $0xe60] sm:$0xff] }
 0x157   : > { %2108 = vmatmul.mubr.f32.gmra.mrb[82].mxu0 %v7032_v27  ;;  %5197 = vmatprep.subr.bf16.mxu1 %v5196_v6  ;;  %v5202_v6 = vpack.c.bf16 %v849_v45, %v841_v17  ;;  %v5330_v27 = vpack.c.bf16 %v851_v53, %v843_v31  ;;  %v7036_v23 = vld [vmem:[%s7555_s30 + $0x160] sm:$0xff]  ;;  %v873_v45 = vld [vmem:[#allocation7 + $0xe90] sm:$0xff] }
 0x158   : > { %2113 = vmatprep.mubr.f32.mxu0 %v7033_v28  ;;  %5323 = vmatpush1.bf16.msra.mxu0 %v5322_v11  ;;  %v7035_v28 = vld [vmem:[%s7555_s30 + $0x168] sm:$0xff]  ;;  %v865_v11 = vld [vmem:[#allocation7 + $0xe50] sm:$0xff]  ;;  %v875_v31 = vld [vmem:[#allocation7 + $0xea0] sm:$0xff] }
 0x159   : > { %1600 = vmatmul.mubr.f32.gmra.mrb[84].mxu1 %v7608_v26  ;;  %5325 = vmatprep.subr.bf16.mxu0 %v5324_v19  ;;  %v874_v26 = vld [vmem:[#allocation7 + $0xe98] sm:$0xff]  ;;  %v5332_v19 = vpack.c.bf16 %v868_v29, %v860_v0  ;;  %v883_v53 = vld [vmem:[#allocation7 + $0xee0] sm:$0xff]  ;;  %v889_v29 = vld [vmem:[#allocation7 + $0xf10] sm:$0xff] }
 0x15a   : > { %1605 = vmatprep.mubr.f32.mxu1 %v7035_v28  ;;  %5199 = vmatpush1.bf16.msra.mxu1 %v5198_v37  ;;  %v884_v37 = vld [vmem:[#allocation7 + $0xee8] sm:$0xff]  ;;  %v5208_v17 = vpack.c.bf16 %v882_v48, %v874_v26 }
 0x15b   : > { %2114 = vmatmul.mubr.f32.gmra.mrb[84].mxu0 %v7034_v59  ;;  %5201 = vmatprep.subr.bf16.mxu1 %v5200_v43  ;;  %v5206_v43 = vpack.c.bf16 %v865_v11, %v857_v40  ;;  %v900_v59 = vld [vmem:[#allocation7 + $0xf68] sm:$0xff]  ;;  %v891_v40 = vld [vmem:[#allocation7 + $0xf20] sm:$0xff]  ;;  %v906_v11 = vld [vmem:[#allocation7 + $0xf98] sm:$0xff] }
 0x15c   : > { %2119 = vmatprep.mubr.f32.mxu0 %v7035_v28  ;;  %5327 = vmatpush1.bf16.msra.mxu0 %v5326_v51  ;;  %v5334_v51 = vpack.c.bf16 %v867_v34, %v859_v33  ;;  %v5210_v28 = vpack.c.bf16 %v881_v9, %v873_v45  ;;  %v916_v48 = vld [vmem:[#allocation7 + $0xfe8] sm:$0xff]  ;;  %v905_v34 = vld [vmem:[#allocation7 + $0xf90] sm:$0xff]  ;;  %v422_v45 = vld [vmem:[#allocation7 + $0x78] sm:$0xff] }
 0x15d   : > { %1606 = vmatmul.mubr.f32.gmra.mrb[86].mxu1 %v7615_v42  ;;  %5329 = vmatprep.subr.bf16.mxu0 %v5328_v14  ;;  %v890_v42 = vld [vmem:[#allocation7 + $0xf18] sm:$0xff]  ;;  %v5336_v14 = vpack.c.bf16 %v884_v37, %v876_v61  ;;  %v907_v37 = vld [vmem:[#allocation7 + $0xfa0] sm:$0xff] }
 0x15e   : > { %1611 = vmatprep.mubr.f32.mxu1 %v7619_v46  ;;  %5203 = vmatpush1.bf16.msra.mxu1 %v5202_v6  ;;  %v5212_v0 = vpack.c.bf16 %v898_v56, %v890_v42  ;;  %v897_v6 = vld [vmem:[#allocation7 + $0xf50] sm:$0xff] }
 0x15f   : > { %2120 = vmatmul.mubr.f32.gmra.mrb[86].mxu0 %v7036_v23  ;;  %5205 = vmatprep.subr.bf16.mxu1 %v5204_v3  ;;  %v5338_v3 = vpack.c.bf16 %v883_v53, %v875_v31  ;;  %v913_v23 = vld [vmem:[#allocation7 + $0xfd0] sm:$0xff] }
 0x160   : > { %2125 = vmatprep.mubr.f32.mxu0 %v7619_v46  ;;  %5331 = vmatpush1.bf16.msra.mxu0 %v5330_v27  ;;  %v892_v46 = vld [vmem:[#allocation7 + $0xf28] sm:$0xff]  ;;  %v899_v27 = vld [vmem:[#allocation7 + $0xf60] sm:$0xff] }
 0x161   : > { %1612 = vmatmul.mubr.f32.gmra.mrb[88].mxu1 %v7625_v58  ;;  %5333 = vmatprep.subr.bf16.mxu0 %v5332_v19  ;;  %v5340_v26 = vpack.c.bf16 %v900_v59, %v892_v46  ;;  %v5214_v19 = vpack.c.bf16 %v897_v6, %v889_v29  ;;  %v5342_v61 = vpack.c.bf16 %v899_v27, %v891_v40 }
 0x162   : > { %1617 = vmatprep.mubr.f32.mxu1 %v7629_v62  ;;  %5207 = vmatpush1.bf16.msra.mxu1 %v5206_v43 }
 0x163   : > { %2126 = vmatmul.mubr.f32.gmra.mrb[88].mxu0 %v7625_v58  ;;  %5209 = vmatprep.subr.bf16.mxu1 %v5208_v17  ;;  %v914_v58 = vld [vmem:[#allocation7 + $0xfd8] sm:$0xff] }
 0x164   : > { %2131 = vmatprep.mubr.f32.mxu0 %v7629_v62  ;;  %5335 = vmatpush1.bf16.msra.mxu0 %v5334_v51  ;;  %v908_v62 = vld [vmem:[#allocation7 + $0xfa8] sm:$0xff]  ;;  %v5216_v33 = vpack.c.bf16 %v914_v58, %v906_v11  ;;  %v414_v17 = vld [vmem:[#allocation7 + $0x38] sm:$0xff] }
 0x165   : > { %1618 = vmatmul.mubr.f32.gmra.mrb[90].mxu1 %v7635_v8  ;;  %5337 = vmatprep.subr.bf16.mxu0 %v5336_v14  ;;  %v5344_v43 = vpack.c.bf16 %v916_v48, %v908_v62  ;;  %v5348_v42 = vpack.c.bf16 %v422_v45, %v414_v17 }
 0x166   : > { %1623 = vmatprep.mubr.f32.mxu1 %v7639_v12  ;;  %5211 = vmatpush1.bf16.msra.mxu1 %v5210_v28 }
 0x167   : > { %2132 = vmatmul.mubr.f32.gmra.mrb[90].mxu0 %v7635_v8  ;;  %5213 = vmatprep.subr.bf16.mxu1 %v5212_v0  ;;  %v915_v8 = vld [vmem:[#allocation7 + $0xfe0] sm:$0xff] }
 0x168   : > { %2137 = vmatprep.mubr.f32.mxu0 %v7639_v12  ;;  %5339 = vmatpush1.bf16.msra.mxu0 %v5338_v3  ;;  %v5218_v12 = vpack.c.bf16 %v913_v23, %v905_v34  ;;  %v5346_v9 = vpack.c.bf16 %v915_v8, %v907_v37 }
 0x169   : > { %1624 = vmatmul.mubr.f32.gmra.mrb[92].mxu1 %v7645_v21  ;;  %5341 = vmatprep.subr.bf16.mxu0 %v5340_v26 }
 0x16a   : > { %1629 = vmatprep.mubr.f32.mxu1 %v7649_v25  ;;  %5215 = vmatpush1.bf16.msra.mxu1 %v5214_v19 }
 0x16b   : > { %2138 = vmatmul.mubr.f32.gmra.mrb[92].mxu0 %v7645_v21  ;;  %5217 = vmatprep.subr.bf16.mxu1 %v5216_v33  ;;  %v921_v21 = vlaneseq }
 0x16c   : > { %2143 = vmatprep.mubr.f32.mxu0 %v7649_v25  ;;  %5343 = vmatpush1.bf16.msra.mxu0 %v5342_v61 }
 0x16d   : > { %1630 = vmatmul.mubr.f32.gmra.mrb[94].mxu1 %v7655_v35  ;;  %5345 = vmatprep.subr.bf16.mxu0 %v5344_v43  ;;  %v7872_v25 = vshrl.u32 %v921_v21, 7 }
 0x16e   : > { %1635 = vmatprep.mubr.f32.mxu1 %v7659_v39  ;;  %5219 = vmatpush1.bf16.msra.mxu1 %v5218_v12 }
 0x16f   : > { %2144 = vmatmul.mubr.f32.gmra.mrb[94].mxu0 %v7655_v35  ;;  %5349 = vmatprep.subr.bf16.mxu1 %v5348_v42  ;;  %9577 = vst [vmem:[#allocation15_spill] sm:$0xff] %v7872_v25  ;;  %v923_v35 = vsub.s32 0, %v7872_v25 }
 0x170   : > { %2149 = vmatprep.mubr.f32.mxu0 %v7659_v39  ;;  %5347 = vmatpush1.bf16.msra.mxu0 %v5346_v9  ;;  %v919_v39 = vld [vmem:[#allocation9] sm:$0xff] }
 0x171   : > { %1636 = vmatmul.mubr.f32.gmra.mrb[96].mxu1 %v7665_v50 }
 0x172   : > { %1641 = vmatprep.mubr.f32.mxu1 %v7669_v54 }
 0x173   : > { %2150 = vmatmul.mubr.f32.gmra.mrb[96].mxu0 %v7665_v50  ;;  %v927_v50 = vsub.s32 1, %v7872_v25 }
 0x174   : > { %2155 = vmatprep.mubr.f32.mxu0 %v7669_v54  ;;  %v7884_v54 = vrot.slane %v919_v39, %v923_v35 }
 0x175   : > { %1642 = vmatmul.mubr.f32.gmra.mrb[98].mxu1 %v7675_v1 }
 0x176   : > { %1647 = vmatprep.mubr.f32.mxu1 %v7679_v5 }
 0x177   : > { %2156 = vmatmul.mubr.f32.gmra.mrb[98].mxu0 %v7675_v1  ;;  %v7888_v1 = vrot.slane %v919_v39, %v927_v50 }
 0x178   : > { %2161 = vmatprep.mubr.f32.mxu0 %v7679_v5 }
 0x179   : > { %1648 = vmatmul.mubr.f32.gmra.mrb[100].mxu1 %v7685_v16 }
 0x17a   : > { %1653 = vmatprep.mubr.f32.mxu1 %v7689_v20 }
 0x17b   : > { %2162 = vmatmul.mubr.f32.gmra.mrb[100].mxu0 %v7685_v16 }
 0x17c   : > { %2167 = vmatprep.mubr.f32.mxu0 %v7689_v20 }
 0x17d   : > { %1654 = vmatmul.mubr.f32.gmra.mrb[102].mxu1 %v7695_v30 }
 0x17e   : > { %1659 = vmatprep.mubr.f32.mxu1 %v7699_v32 }
 0x17f   : > { %2168 = vmatmul.mubr.f32.gmra.mrb[102].mxu0 %v7695_v30 }
 0x180   : > { %2173 = vmatprep.mubr.f32.mxu0 %v7699_v32 }
 0x181   : > { %1660 = vmatmul.mubr.f32.gmra.mrb[104].mxu1 %v7705_v36 }
 0x182   : > { %1665 = vmatprep.mubr.f32.mxu1 %v7709_v38 }
 0x183   : > { %2174 = vmatmul.mubr.f32.gmra.mrb[104].mxu0 %v7705_v36 }
 0x184   : > { %2179 = vmatprep.mubr.f32.mxu0 %v7709_v38  ;;  %v1027_v5 = vpop.f32.mrb[0].mxu1 }
 0x185   : > { %v1028_v16 = vadd.f32 %v1027_v5, %v7884_v54  ;;  %v1029_v20 = vpop.f32.mrb[1].mxu1  ;;  %1666 = vmatmul.mubr.f32.gmra.mrb[106].mxu1 %v7715_v41 }
 0x186   : > { %v1284_v30 = vpop.f32.mrb[0].mxu0  ;;  %v1030_v32 = vadd.f32 %v1029_v20, %v7888_v1  ;;  %1671 = vmatprep.mubr.f32.mxu1 %v7719_v44 }
 0x187   : > { %2180 = vmatmul.mubr.f32.gmra.mrb[106].mxu0 %v7715_v41  ;;  %v1286_v51 = vpop.f32.mrb[1].mxu0  ;;  %v7896_v36 = vadd.f32 %v1284_v30, %v1028_v16 }
 0x188   : > { %2185 = vmatprep.mubr.f32.mxu0 %v7719_v44  ;;  %v7899_v56 = vadd.f32 %v1286_v51, %v1030_v32  ;;  %v1033_v38 = vpop.f32.mrb[2].mxu1 }
 0x189   : > { %v1034_v14 = vadd.f32 %v1033_v38, %v7884_v54  ;;  %v1035_v31 = vpop.f32.mrb[3].mxu1  ;;  %1672 = vmatmul.mubr.f32.gmra.mrb[108].mxu1 %v7725_v47 }
 0x18a   : > { %v1290_v53 = vpop.f32.mrb[2].mxu0  ;;  %v1036_v46 = vadd.f32 %v1035_v31, %v7888_v1  ;;  %1677 = vmatprep.mubr.f32.mxu1 %v7729_v49 }
 0x18b   : > { %2186 = vmatmul.mubr.f32.gmra.mrb[108].mxu0 %v7725_v47  ;;  %v1292_v41 = vpop.f32.mrb[3].mxu0  ;;  %v7906_v59 = vadd.f32 %v1290_v53, %v1034_v14 }
 0x18c   : > { %2191 = vmatprep.mubr.f32.mxu0 %v7729_v49  ;;  %v7909_v44 = vadd.f32 %v1292_v41, %v1036_v46  ;;  %v1039_v28 = vpop.f32.mrb[4].mxu1 }
 0x18d   : > { %v1040_v0 = vadd.f32 %v1039_v28, %v7884_v54  ;;  %v1041_v29 = vpop.f32.mrb[5].mxu1  ;;  %1678 = vmatmul.mubr.f32.gmra.mrb[110].mxu1 %v7735_v52 }
 0x18e   : > { %v1296_v6 = vpop.f32.mrb[4].mxu0  ;;  %v1042_v3 = vadd.f32 %v1041_v29, %v7888_v1  ;;  %1683 = vmatprep.mubr.f32.mxu1 %v7739_v55 }
 0x18f   : > { %2192 = vmatmul.mubr.f32.gmra.mrb[110].mxu0 %v7735_v52  ;;  %v1298_v47 = vpop.f32.mrb[5].mxu0  ;;  %v7916_v40 = vadd.f32 %v1296_v6, %v1040_v0 }
 0x190   : > { %2197 = vmatprep.mubr.f32.mxu0 %v7739_v55  ;;  %v7919_v49 = vadd.f32 %v1298_v47, %v1042_v3  ;;  %v1045_v11 = vpop.f32.mrb[6].mxu1  ;;  %v9578_v3 = vld [vmem:[#allocation12_spill] sm:$0xff] }
 0x191   : > { %v1046_v58 = vadd.f32 %v1045_v11, %v7884_v54  ;;  %v1047_v26 = vpop.f32.mrb[7].mxu1  ;;  %1684 = vmatmul.mubr.f32.gmra.mrb[112].mxu1 %v7745_v57 }
 0x192   : > { %v1302_v27 = vpop.f32.mrb[6].mxu0  ;;  %v1048_v62 = vadd.f32 %v1047_v26, %v7888_v1  ;;  %1689 = vmatprep.mubr.f32.mxu1 %v7749_v60 }
 0x193   : > { %2198 = vmatmul.mubr.f32.gmra.mrb[112].mxu0 %v7745_v57  ;;  %v1304_v52 = vpop.f32.mrb[7].mxu0  ;;  %v7926_v48 = vadd.f32 %v1302_v27, %v1046_v58  ;;  %v9579_v58 = vld [vmem:[#allocation13_spill] sm:$0xff] }
 0x194   : > { %2203 = vmatprep.mubr.f32.mxu0 %v7749_v60  ;;  %v7929_v55 = vadd.f32 %v1304_v52, %v1048_v62  ;;  %v1051_v19 = vpop.f32.mrb[8].mxu1  ;;  %v421_v27 = vld [vmem:[#allocation7 + $0x70] sm:$0xff] }
 0x195   : > { %v1052_v33 = vadd.f32 %v1051_v19, %v7884_v54  ;;  %v1053_v34 = vpop.f32.mrb[9].mxu1  ;;  %1690 = vmatmul.mubr.f32.gmra.mrb[114].mxu1 %v7755_v63 }
 0x196   : > { %v1308_v23 = vpop.f32.mrb[8].mxu0  ;;  %v1054_v61 = vadd.f32 %v1053_v34, %v7888_v1  ;;  %1695 = vmatprep.mubr.f32.mxu1 %v7759_v2  ;;  %v9580_v34 = vld [vmem:[#allocation14_spill] sm:$0xff] }
 0x197   : > { %2204 = vmatmul.mubr.f32.gmra.mrb[114].mxu0 %v7755_v63  ;;  %v1310_v57 = vpop.f32.mrb[9].mxu0  ;;  %v7936_v37 = vadd.f32 %v1308_v23, %v1052_v33 }
 0x198   : > { %2209 = vmatprep.mubr.f32.mxu0 %v7759_v2  ;;  %v7939_v60 = vadd.f32 %v1310_v57, %v1054_v61  ;;  %v1057_v43 = vpop.f32.mrb[10].mxu1  ;;  %v430_v61 = vld [vmem:[#allocation7 + $0xb8] sm:$0xff] }
 0x199   : > { %v1058_v8 = vadd.f32 %v1057_v43, %v7884_v54  ;;  %v1059_v17 = vpop.f32.mrb[11].mxu1  ;;  %1696 = vmatmul.mubr.f32.gmra.mrb[116].mxu1 %v7765_v4  ;;  %v438_v57 = vld [vmem:[#allocation7 + $0xf8] sm:$0xff] }
 0x19a   : > { %v1314_v45 = vpop.f32.mrb[10].mxu0  ;;  %v1060_v12 = vadd.f32 %v1059_v17, %v7888_v1  ;;  %1701 = vmatprep.mubr.f32.mxu1 %v7769_v7  ;;  %v7037_v17 = vld [vmem:[%s7555_s30 + $0x18] sm:$0xff] }
 0x19b   : > { %2210 = vmatmul.mubr.f32.gmra.mrb[116].mxu0 %v7765_v4  ;;  %v1316_v63 = vpop.f32.mrb[11].mxu0  ;;  %v7946_v9 = vadd.f32 %v1314_v45, %v1058_v8 }
 0x19c   : > { %2215 = vmatprep.mubr.f32.mxu0 %v7769_v7  ;;  %v7949_v2 = vadd.f32 %v1316_v63, %v1060_v12  ;;  %v1063_v42 = vpop.f32.mrb[12].mxu1 }
 0x19d   : > { %v1064_v21 = vadd.f32 %v1063_v42, %v7884_v54  ;;  %v1065_v35 = vpop.f32.mrb[13].mxu1  ;;  %1702 = vmatmul.mubr.f32.gmra.mrb[118].mxu1 %v7775_v10 }
 0x19e   : > { %v1320_v39 = vpop.f32.mrb[12].mxu0  ;;  %v1066_v50 = vadd.f32 %v1065_v35, %v7888_v1  ;;  %1707 = vmatprep.mubr.f32.mxu1 %v7779_v13  ;;  %v429_v35 = vld [vmem:[#allocation7 + $0xb0] sm:$0xff] }
 0x19f   : > { %2216 = vmatmul.mubr.f32.gmra.mrb[118].mxu0 %v7775_v10  ;;  %v1322_v4 = vpop.f32.mrb[13].mxu0  ;;  %v7956_v5 = vadd.f32 %v1320_v39, %v1064_v21  ;;  %v5352_v21 = vpack.c.bf16 %v438_v57, %v430_v61  ;;  %v437_v39 = vld [vmem:[#allocation7 + $0xf0] sm:$0xff] }
 0x1a0   : > { %2221 = vmatprep.mubr.f32.mxu0 %v7779_v13  ;;  %v7959_v7 = vadd.f32 %v1322_v4, %v1066_v50  ;;  %v1069_v16 = vpop.f32.mrb[14].mxu1  ;;  %v461_v57 = vld [vmem:[#allocation7 + $0x1b0] sm:$0xff] }
 0x1a1   : > { %v1070_v20 = vadd.f32 %v1069_v16, %v7884_v54  ;;  %v1071_v30 = vpop.f32.mrb[15].mxu1  ;;  %1708 = vmatmul.mubr.f32.gmra.mrb[120].mxu1 %v7785_v15  ;;  %v7038_v16 = vld [vmem:[%s7555_s30 + $0x10] sm:$0xff] }
 0x1a2   : > { %v1326_v32 = vpop.f32.mrb[14].mxu0  ;;  %v1072_v51 = vadd.f32 %v1071_v30, %v7888_v1  ;;  %1713 = vmatprep.mubr.f32.mxu1 %v7789_v18  ;;  %v446_v30 = vld [vmem:[#allocation7 + $0x138] sm:$0xff] }
 0x1a3   : > { %2222 = vmatmul.mubr.f32.gmra.mrb[120].mxu0 %v7785_v15  ;;  %v1328_v10 = vpop.f32.mrb[15].mxu0  ;;  %v7966_v38 = vadd.f32 %v1326_v32, %v1070_v20  ;;  %v454_v32 = vld [vmem:[#allocation7 + $0x178] sm:$0xff] }
 0x1a4   : > { %2227 = vmatprep.mubr.f32.mxu0 %v7789_v18  ;;  %v7969_v13 = vadd.f32 %v1328_v10, %v1072_v51  ;;  %v1075_v14 = vpop.f32.mrb[16].mxu1 }
 0x1a5   : > { %v1076_v31 = vadd.f32 %v1075_v14, %v7884_v54  ;;  %v1077_v53 = vpop.f32.mrb[17].mxu1  ;;  %1714 = vmatmul.mubr.f32.gmra.mrb[122].mxu1 %v7795_v22 }
 0x1a6   : > { %v1332_v46 = vpop.f32.mrb[16].mxu0  ;;  %v1078_v41 = vadd.f32 %v1077_v53, %v7888_v1  ;;  %1719 = vmatprep.mubr.f32.mxu1 %v7799_v24  ;;  %v5354_v53 = vpack.c.bf16 %v437_v39, %v429_v35  ;;  %v486_v35 = vld [vmem:[#allocation7 + $0x278] sm:$0xff] }
 0x1a7   : > { %2228 = vmatmul.mubr.f32.gmra.mrb[122].mxu0 %v7795_v22  ;;  %v1334_v15 = vpop.f32.mrb[17].mxu0  ;;  %v7976_v28 = vadd.f32 %v1332_v46, %v1076_v31  ;;  %v7039_v31 = vld [vmem:[%s7555_s30 + $0x38] sm:$0xff] }
 0x1a8   : > { %2233 = vmatprep.mubr.f32.mxu0 %v7799_v24  ;;  %v7979_v18 = vadd.f32 %v1334_v15, %v1078_v41  ;;  %v1081_v0 = vpop.f32.mrb[18].mxu1  ;;  %v413_v24 = vld [vmem:[#allocation7 + $0x30] sm:$0xff]  ;;  %v5356_v15 = vpack.c.bf16 %v454_v32, %v446_v30 }
 0x1a9   : > { %v1082_v29 = vadd.f32 %v1081_v0, %v7884_v54  ;;  %v1083_v6 = vpop.f32.mrb[19].mxu1  ;;  %1720 = vmatmul.mubr.f32.gmra.mrb[124].mxu1 %v9578_v3  ;;  %v5350_v45 = vpack.c.bf16 %v421_v27, %v413_v24  ;;  %v445_v0 = vld [vmem:[#allocation7 + $0x130] sm:$0xff] }
 0x1aa   : > { %v1338_v47 = vpop.f32.mrb[18].mxu0  ;;  %v1084_v11 = vadd.f32 %v1083_v6, %v7888_v1  ;;  %1725 = vmatprep.mubr.f32.mxu1 %v9579_v58 }
 0x1ab   : > { %2234 = vmatmul.mubr.f32.gmra.mrb[124].mxu0 %v9578_v3  ;;  %v1340_v22 = vpop.f32.mrb[19].mxu0  ;;  %v7986_v26 = vadd.f32 %v1338_v47, %v1082_v29  ;;  %v453_v29 = vld [vmem:[#allocation7 + $0x170] sm:$0xff] }
 0x1ac   : > { %2239 = vmatprep.mubr.f32.mxu0 %v9579_v58  ;;  %v7989_v62 = vadd.f32 %v1340_v22, %v1084_v11  ;;  %v1087_v52 = vpop.f32.mrb[20].mxu1  ;;  %v7040_v47 = vld [vmem:[%s7555_s30 + $0x30] sm:$0xff]  ;;  %v462_v22 = vld [vmem:[#allocation7 + $0x1b8] sm:$0xff] }
 0x1ad   : > { %v1088_v19 = vadd.f32 %v1087_v52, %v7884_v54  ;;  %v1089_v33 = vpop.f32.mrb[21].mxu1  ;;  %1726 = vmatmul.mubr.f32.gmra.mrb[126].mxu1 %v9580_v34  ;;  %v470_v58 = vld [vmem:[#allocation7 + $0x1f8] sm:$0xff] }
 0x1ae   : > { %v1344_v23 = vpop.f32.mrb[20].mxu0  ;;  %v1090_v43 = vadd.f32 %v1089_v33, %v7888_v1  ;;  %1796 = vmatprep.mubr.f32.mxu1 %v7037_v17  ;;  %v7041_v52 = vld [vmem:[%s7555_s30 + $0x58] sm:$0xff]  ;;  %v5358_v33 = vpack.c.bf16 %v453_v29, %v445_v0  ;;  %v5360_v61 = vpack.c.bf16 %v470_v58, %v462_v22 }
 0x1af   : > { %2240 = vmatmul.mubr.f32.gmra.mrb[126].mxu0 %v9580_v34  ;;  %v1346_v8 = vpop.f32.mrb[21].mxu0  ;;  %v7996_v12 = vadd.f32 %v1344_v23, %v1088_v19  ;;  %v494_v29 = vld [vmem:[#allocation7 + $0x2b8] sm:$0xff] }
 0x1b0   : > { %2310 = vmatprep.mubr.f32.mxu0 %v7037_v17  ;;  %v7998_v63 = vadd.f32 %v1346_v8, %v1090_v43  ;;  %v1093_v42 = vpop.f32.mrb[22].mxu1  ;;  %v469_v43 = vld [vmem:[#allocation7 + $0x1f0] sm:$0xff] }
 0x1b1   : > { %v1094_v50 = vadd.f32 %v1093_v42, %v7884_v54  ;;  %v1095_v4 = vpop.f32.mrb[23].mxu1  ;;  %1797 = vmatmul.mubr.f32.vlgmr.msra.gmra.mrb[64].mxu1 %v7038_v16 }
 0x1b2   : > { %v1350_v20 = vpop.f32.mrb[22].mxu0  ;;  %v1096_v51 = vadd.f32 %v1095_v4, %v7888_v1  ;;  %5351 = vmatpush1.bf16.msra.mxu1 %v5350_v45  ;;  %1802 = vmatprep.mubr.f32.mxu1 %v7039_v31  ;;  %v7042_v45 = vld [vmem:[%s7555_s30 + $0x50] sm:$0xff]  ;;  %v7043_v4 = vld [vmem:[%s7555_s30 + $0x78] sm:$0xff] }
 0x1b3   : > { %2311 = vmatmul.mubr.f32.vlgmr.msra.gmra.mrb[64].mxu0 %v7038_v16  ;;  %v1352_v10 = vpop.f32.mrb[23].mxu0  ;;  %v8003_v14 = vadd.f32 %v1350_v20, %v1094_v50  ;;  %5353 = vmatprep.subr.bf16.mxu1 %v5352_v21  ;;  %v478_v21 = vld [vmem:[#allocation7 + $0x238] sm:$0xff]  ;;  %v5362_v20 = vpack.c.bf16 %v469_v43, %v461_v57  ;;  %v7046_v43 = vld [vmem:[%s7555_s30 + $0x90] sm:$0xff] }
 0x1b4   : > { %2316 = vmatprep.mubr.f32.mxu0 %v7039_v31  ;;  %v8006_v46 = vadd.f32 %v1352_v10, %v1096_v51  ;;  %v1099_v41 = vpop.f32.mrb[24].mxu1  ;;  %v5364_v51 = vpack.c.bf16 %v486_v35, %v478_v21  ;;  %v477_v10 = vld [vmem:[#allocation7 + $0x230] sm:$0xff]  ;;  %v7047_v35 = vld [vmem:[%s7555_s30 + $0xb8] sm:$0xff] }
 0x1b5   : > { %v1100_v6 = vadd.f32 %v1099_v41, %v7884_v54  ;;  %v1101_v3 = vpop.f32.mrb[25].mxu1  ;;  %1803 = vmatmul.mubr.f32.gmra.mrb[66].mxu1 %v7040_v47  ;;  %v485_v31 = vld [vmem:[#allocation7 + $0x270] sm:$0xff] }
 0x1b6   : > { %v1356_v11 = vpop.f32.mrb[24].mxu0  ;;  %v1102_v24 = vadd.f32 %v1101_v3, %v7888_v1  ;;  %1808 = vmatprep.mubr.f32.mxu1 %v7041_v52  ;;  %5355 = vmatpush1.bf16.msra.mxu1 %v5354_v53  ;;  %v5366_v58 = vpack.c.bf16 %v485_v31, %v477_v10  ;;  %v517_v10 = vld [vmem:[#allocation7 + $0x370] sm:$0xff] }
 0x1b7   : > { %2317 = vmatmul.mubr.f32.gmra.mrb[66].mxu0 %v7040_v47  ;;  %v1358_v27 = vpop.f32.mrb[25].mxu0  ;;  %v8012_v19 = vadd.f32 %v1356_v11, %v1100_v6  ;;  %5357 = vmatprep.subr.bf16.mxu1 %v5356_v15  ;;  %v7044_v15 = vld [vmem:[%s7555_s30 + $0x70] sm:$0xff]  ;;  %v502_v6 = vld [vmem:[#allocation7 + $0x2f8] sm:$0xff] }
 0x1b8   : > { %2322 = vmatprep.mubr.f32.mxu0 %v7041_v52  ;;  %v8014_v34 = vadd.f32 %v1358_v27, %v1102_v24  ;;  %v1105_v23 = vpop.f32.mrb[26].mxu1  ;;  %v7045_v11 = vld [vmem:[%s7555_s30 + $0x98] sm:$0xff]  ;;  %v5368_v52 = vpack.c.bf16 %v502_v6, %v494_v29 }
 0x1b9   : > { %v1106_v8 = vadd.f32 %v1105_v23, %v7884_v54  ;;  %v1107_v17 = vpop.f32.mrb[27].mxu1  ;;  %1809 = vmatmul.mubr.f32.gmra.mrb[68].mxu1 %v7042_v45  ;;  %v501_v23 = vld [vmem:[#allocation7 + $0x2f0] sm:$0xff]  ;;  %v534_v29 = vld [vmem:[#allocation7 + $0x3f8] sm:$0xff] }
 0x1ba   : > { %v1362_v42 = vpop.f32.mrb[26].mxu0  ;;  %v1108_v39 = vadd.f32 %v1107_v17, %v7888_v1  ;;  %1814 = vmatprep.mubr.f32.mxu1 %v7043_v4  ;;  %5359 = vmatpush1.bf16.msra.mxu1 %v5358_v33  ;;  %v493_v33 = vld [vmem:[#allocation7 + $0x2b0] sm:$0xff]  ;;  %v510_v17 = vld [vmem:[#allocation7 + $0x338] sm:$0xff] }
 0x1bb   : > { %2323 = vmatmul.mubr.f32.gmra.mrb[68].mxu0 %v7042_v45  ;;  %v1364_v50 = vpop.f32.mrb[27].mxu0  ;;  %v8020_v16 = vadd.f32 %v1362_v42, %v1106_v8  ;;  %5361 = vmatprep.subr.bf16.mxu1 %v5360_v61  ;;  %v518_v45 = vld [vmem:[#allocation7 + $0x378] sm:$0xff] }
 0x1bc   : > { %2328 = vmatprep.mubr.f32.mxu0 %v7043_v4  ;;  %v8022_v30 = vadd.f32 %v1364_v50, %v1108_v39  ;;  %v1111_v32 = vpop.f32.mrb[28].mxu1  ;;  %v5370_v50 = vpack.c.bf16 %v501_v23, %v493_v33  ;;  %v525_v23 = vld [vmem:[#allocation7 + $0x3b0] sm:$0xff] }
 0x1bd   : > { %v1112_v53 = vadd.f32 %v1111_v32, %v7884_v54  ;;  %v1113_v41 = vpop.f32.mrb[29].mxu1  ;;  %1815 = vmatmul.mubr.f32.gmra.mrb[70].mxu1 %v7044_v15  ;;  %v5372_v32 = vpack.c.bf16 %v518_v45, %v510_v17  ;;  %v542_v45 = vld [vmem:[#allocation7 + $0x438] sm:$0xff] }
 0x1be   : > { %v1368_v0 = vpop.f32.mrb[28].mxu0  ;;  %v1114_v3 = vadd.f32 %v1113_v41, %v7888_v1  ;;  %1820 = vmatprep.mubr.f32.mxu1 %v7045_v11  ;;  %5363 = vmatpush1.bf16.msra.mxu1 %v5362_v20  ;;  %v7048_v41 = vld [vmem:[%s7555_s30 + $0xb0] sm:$0xff] }
 0x1bf   : > { %2329 = vmatmul.mubr.f32.gmra.mrb[70].mxu0 %v7044_v15  ;;  %v1370_v47 = vpop.f32.mrb[29].mxu0  ;;  %v8028_v22 = vadd.f32 %v1368_v0, %v1112_v53  ;;  %5365 = vmatprep.subr.bf16.mxu1 %v5364_v51  ;;  %v509_v51 = vld [vmem:[#allocation7 + $0x330] sm:$0xff]  ;;  %v526_v0 = vld [vmem:[#allocation7 + $0x3b8] sm:$0xff] }
 0x1c0   : > { %2334 = vmatprep.mubr.f32.mxu0 %v7045_v11  ;;  %v8030_v24 = vadd.f32 %v1370_v47, %v1114_v3  ;;  %v1117_v27 = vpop.f32.mrb[30].mxu1  ;;  %v7049_v47 = vld [vmem:[%s7555_s30 + $0xd8] sm:$0xff]  ;;  %v5376_v33 = vpack.c.bf16 %v534_v29, %v526_v0  ;;  %v7052_v29 = vld [vmem:[%s7555_s30 + $0xf0] sm:$0xff] }
 0x1c1   : > { %v1118_v61 = vadd.f32 %v1117_v27, %v7884_v54  ;;  %v1119_v57 = vpop.f32.mrb[31].mxu1  ;;  %1821 = vmatmul.mubr.f32.gmra.mrb[72].mxu1 %v7046_v43 }
 0x1c2   : > { %v1374_v8 = vpop.f32.mrb[30].mxu0  ;;  %v1120_v42 = vadd.f32 %v1119_v57, %v7888_v1  ;;  %1826 = vmatprep.mubr.f32.mxu1 %v7047_v35  ;;  %5367 = vmatpush1.bf16.msra.mxu1 %v5366_v58  ;;  %v5374_v58 = vpack.c.bf16 %v517_v10, %v509_v51 }
 0x1c3   : > { %2335 = vmatmul.mubr.f32.gmra.mrb[72].mxu0 %v7046_v43  ;;  %v1376_v21 = vpop.f32.mrb[31].mxu0  ;;  %v8036_v39 = vadd.f32 %v1374_v8, %v1118_v61  ;;  %5369 = vmatprep.subr.bf16.mxu1 %v5368_v52  ;;  %v533_v61 = vld [vmem:[#allocation7 + $0x3f0] sm:$0xff] }
 0x1c4   : > { %2340 = vmatprep.mubr.f32.mxu0 %v7047_v35  ;;  %v8038_v4 = vadd.f32 %v1376_v21, %v1120_v42  ;;  %v1123_v20 = vpop.f32.mrb[32].mxu1  ;;  %v7050_v8 = vld [vmem:[%s7555_s30 + $0xd0] sm:$0xff]  ;;  %v550_v42 = vld [vmem:[#allocation7 + $0x478] sm:$0xff] }
 0x1c5   : > { %v1124_v31 = vadd.f32 %v1123_v20, %v7884_v54  ;;  %v1125_v53 = vpop.f32.mrb[33].mxu1  ;;  %1827 = vmatmul.mubr.f32.gmra.mrb[74].mxu1 %v7048_v41 }
 0x1c6   : > { %v1380_v15 = vpop.f32.mrb[32].mxu0  ;;  %v1126_v6 = vadd.f32 %v1125_v53, %v7888_v1  ;;  %1832 = vmatprep.mubr.f32.mxu1 %v7049_v47  ;;  %5371 = vmatpush1.bf16.msra.mxu1 %v5370_v50  ;;  %v7051_v50 = vld [vmem:[%s7555_s30 + $0xf8] sm:$0xff]  ;;  %v541_v53 = vld [vmem:[#allocation7 + $0x430] sm:$0xff] }
 0x1c7   : > { %2341 = vmatmul.mubr.f32.gmra.mrb[74].mxu0 %v7048_v41  ;;  %v1382_v3 = vpop.f32.mrb[33].mxu0  ;;  %v8044_v11 = vadd.f32 %v1380_v15, %v1124_v31  ;;  %5373 = vmatprep.subr.bf16.mxu1 %v5372_v32  ;;  %v5378_v32 = vpack.c.bf16 %v533_v61, %v525_v23  ;;  %v5380_v31 = vpack.c.bf16 %v550_v42, %v542_v45  ;;  %v549_v41 = vld [vmem:[#allocation7 + $0x470] sm:$0xff]  ;;  %v7053_v23 = vld [vmem:[%s7555_s30 + $0x118] sm:$0xff] }
 0x1c8   : > { %2346 = vmatprep.mubr.f32.mxu0 %v7049_v47  ;;  %v8046_v27 = vadd.f32 %v1382_v3, %v1126_v6  ;;  %v1129_v52 = vpop.f32.mrb[34].mxu1  ;;  %v558_v3 = vld [vmem:[#allocation7 + $0x4b8] sm:$0xff]  ;;  %v565_v45 = vld [vmem:[#allocation7 + $0x4f0] sm:$0xff] }
 0x1c9   : > { %v1130_v57 = vadd.f32 %v1129_v52, %v7884_v54  ;;  %v1131_v43 = vpop.f32.mrb[35].mxu1  ;;  %1833 = vmatmul.mubr.f32.gmra.mrb[76].mxu1 %v7050_v8  ;;  %v566_v47 = vld [vmem:[#allocation7 + $0x4f8] sm:$0xff] }
 0x1ca   : > { %v1386_v17 = vpop.f32.mrb[34].mxu0  ;;  %v1132_v21 = vadd.f32 %v1131_v43, %v7888_v1  ;;  %1838 = vmatprep.mubr.f32.mxu1 %v7051_v50  ;;  %5375 = vmatpush1.bf16.msra.mxu1 %v5374_v58 }
 0x1cb   : > { %2347 = vmatmul.mubr.f32.gmra.mrb[76].mxu0 %v7050_v8  ;;  %v1388_v35 = vpop.f32.mrb[35].mxu0  ;;  %v8052_v20 = vadd.f32 %v1386_v17, %v1130_v57  ;;  %5377 = vmatprep.subr.bf16.mxu1 %v5376_v33  ;;  %v5382_v33 = vpack.c.bf16 %v549_v41, %v541_v53  ;;  %v5384_v8 = vpack.c.bf16 %v566_v47, %v558_v3  ;;  %v557_v17 = vld [vmem:[#allocation7 + $0x4b0] sm:$0xff]  ;;  %v7055_v53 = vld [vmem:[%s7555_s30 + $0x138] sm:$0xff] }
 0x1cc   : > { %2352 = vmatprep.mubr.f32.mxu0 %v7051_v50  ;;  %v8054_v51 = vadd.f32 %v1388_v35, %v1132_v21  ;;  %v1135_v10 = vpop.f32.mrb[36].mxu1  ;;  %v7054_v35 = vld [vmem:[%s7555_s30 + $0x110] sm:$0xff] }
 0x1cd   : > { %v1136_v15 = vadd.f32 %v1135_v10, %v7884_v54  ;;  %v1137_v0 = vpop.f32.mrb[37].mxu1  ;;  %1839 = vmatmul.mubr.f32.gmra.mrb[78].mxu1 %v7052_v29  ;;  %v574_v10 = vld [vmem:[#allocation7 + $0x538] sm:$0xff]  ;;  %v573_v47 = vld [vmem:[#allocation7 + $0x530] sm:$0xff] }
 0x1ce   : > { %v1392_v6 = vpop.f32.mrb[36].mxu0  ;;  %v1138_v52 = vadd.f32 %v1137_v0, %v7888_v1  ;;  %1844 = vmatprep.mubr.f32.mxu1 %v7053_v23  ;;  %5379 = vmatpush1.bf16.msra.mxu1 %v5378_v32 }
 0x1cf   : > { %2353 = vmatmul.mubr.f32.gmra.mrb[78].mxu0 %v7052_v29  ;;  %v1394_v58 = vpop.f32.mrb[37].mxu0  ;;  %v8060_v61 = vadd.f32 %v1392_v6, %v1136_v15  ;;  %5381 = vmatprep.subr.bf16.mxu1 %v5380_v31  ;;  %v582_v15 = vld [vmem:[#allocation7 + $0x578] sm:$0xff]  ;;  %v5386_v31 = vpack.c.bf16 %v565_v45, %v557_v17 }
 0x1d0   : > { %2358 = vmatprep.mubr.f32.mxu0 %v7053_v23  ;;  %v8062_v57 = vadd.f32 %v1394_v58, %v1138_v52  ;;  %v1141_v43 = vpop.f32.mrb[38].mxu1  ;;  %v5388_v3 = vpack.c.bf16 %v582_v15, %v574_v10  ;;  %v581_v52 = vld [vmem:[#allocation7 + $0x570] sm:$0xff]  ;;  %v7057_v17 = vld [vmem:[%s7555_s30 + $0x158] sm:$0xff] }
 0x1d1   : > { %v1142_v42 = vadd.f32 %v1141_v43, %v7884_v54  ;;  %v1143_v21 = vpop.f32.mrb[39].mxu1  ;;  %1845 = vmatmul.mubr.f32.gmra.mrb[80].mxu1 %v7054_v35  ;;  %v7056_v43 = vld [vmem:[%s7555_s30 + $0x130] sm:$0xff] }
 0x1d2   : > { %v1398_v50 = vpop.f32.mrb[38].mxu0  ;;  %v1144_v0 = vadd.f32 %v1143_v21, %v7888_v1  ;;  %1850 = vmatprep.mubr.f32.mxu1 %v7055_v53  ;;  %5383 = vmatpush1.bf16.msra.mxu1 %v5382_v33 }
 0x1d3   : > { %2359 = vmatmul.mubr.f32.gmra.mrb[80].mxu0 %v7054_v35  ;;  %v1400_v32 = vpop.f32.mrb[39].mxu0  ;;  %v8068_v41 = vadd.f32 %v1398_v50, %v1142_v42  ;;  %5385 = vmatprep.subr.bf16.mxu1 %v5384_v8  ;;  %v590_v35 = vld [vmem:[#allocation7 + $0x5b8] sm:$0xff]  ;;  %v5390_v8 = vpack.c.bf16 %v581_v52, %v573_v47 }
 0x1d4   : > { %2364 = vmatprep.mubr.f32.mxu0 %v7055_v53  ;;  %v8070_v29 = vadd.f32 %v1400_v32, %v1144_v0  ;;  %v1147_v6 = vpop.f32.mrb[40].mxu1  ;;  %v598_v42 = vld [vmem:[#allocation7 + $0x5f8] sm:$0xff]  ;;  %v589_v32 = vld [vmem:[#allocation7 + $0x5b0] sm:$0xff] }
 0x1d5   : > { %9581 = vst [vmem:[#allocation12_spill] sm:$0xff] %v8068_v41  ;;  %v1148_v58 = vadd.f32 %v1147_v6, %v7884_v54  ;;  %v1149_v23 = vpop.f32.mrb[41].mxu1  ;;  %1851 = vmatmul.mubr.f32.gmra.mrb[82].mxu1 %v7056_v43  ;;  %v5392_v0 = vpack.c.bf16 %v598_v42, %v590_v35  ;;  %v597_v53 = vld [vmem:[#allocation7 + $0x5f0] sm:$0xff]  ;;  %v606_v41 = vld [vmem:[#allocation7 + $0x638] sm:$0xff] }
 0x1d6   : > { %9582 = vst [vmem:[#allocation13_spill] sm:$0xff] %v8070_v29  ;;  %v1404_v21 = vpop.f32.mrb[40].mxu0  ;;  %v1150_v50 = vadd.f32 %v1149_v23, %v7888_v1  ;;  %1856 = vmatprep.mubr.f32.mxu1 %v7057_v17  ;;  %5387 = vmatpush1.bf16.msra.mxu1 %v5386_v31  ;;  %v7059_v47 = vld [vmem:[%s7555_s30 + $0x178] sm:$0xff] }
 0x1d7   : > { %2365 = vmatmul.mubr.f32.gmra.mrb[82].mxu0 %v7056_v43  ;;  %v1406_v33 = vpop.f32.mrb[41].mxu0  ;;  %v8076_v45 = vadd.f32 %v1404_v21, %v1148_v58  ;;  %5389 = vmatprep.subr.bf16.mxu1 %v5388_v3  ;;  %v7058_v43 = vld [vmem:[%s7555_s30 + $0x150] sm:$0xff]  ;;  %v614_v58 = vld [vmem:[#allocation7 + $0x678] sm:$0xff]  ;;  %v5394_v3 = vpack.c.bf16 %v597_v53, %v589_v32 }
 0x1d8   : > { %2370 = vmatprep.mubr.f32.mxu0 %v7057_v17  ;;  %v8078_v10 = vadd.f32 %v1406_v33, %v1150_v50  ;;  %v1153_v15 = vpop.f32.mrb[42].mxu1  ;;  %v5396_v50 = vpack.c.bf16 %v614_v58, %v606_v41  ;;  %v605_v33 = vld [vmem:[#allocation7 + $0x630] sm:$0xff]  ;;  %v7061_v32 = vld [vmem:[%s7555_s30 + $0x198] sm:$0xff] }
 0x1d9   : > { %9583 = vst [vmem:[#allocation14_spill] sm:$0xff] %v8076_v45  ;;  %v1154_v6 = vadd.f32 %v1153_v15, %v7884_v54  ;;  %v1155_v23 = vpop.f32.mrb[43].mxu1  ;;  %1857 = vmatmul.mubr.f32.gmra.mrb[84].mxu1 %v7058_v43  ;;  %v613_v17 = vld [vmem:[#allocation7 + $0x670] sm:$0xff]  ;;  %v622_v45 = vld [vmem:[#allocation7 + $0x6b8] sm:$0xff] }
 0x1da   : > { %9584 = vst [vmem:[#allocation16_spill] sm:$0xff] %v8078_v10  ;;  %v1410_v29 = vpop.f32.mrb[42].mxu0  ;;  %v1156_v21 = vadd.f32 %v1155_v23, %v7888_v1  ;;  %1862 = vmatprep.mubr.f32.mxu1 %v7059_v47  ;;  %5391 = vmatpush1.bf16.msra.mxu1 %v5390_v8  ;;  %v5398_v41 = vpack.c.bf16 %v613_v17, %v605_v33  ;;  %v7063_v33 = vld [vmem:[%s7555_s30 + $0x1b8] sm:$0xff] }
 0x1db   : > { %2371 = vmatmul.mubr.f32.gmra.mrb[84].mxu0 %v7058_v43  ;;  %v1412_v31 = vpop.f32.mrb[43].mxu0  ;;  %v8084_v52 = vadd.f32 %v1410_v29, %v1154_v6  ;;  %5393 = vmatprep.subr.bf16.mxu1 %v5392_v0  ;;  %v7060_v43 = vld [vmem:[%s7555_s30 + $0x170] sm:$0xff]  ;;  %v630_v29 = vld [vmem:[#allocation7 + $0x6f8] sm:$0xff] }
 0x1dc   : > { %2376 = vmatprep.mubr.f32.mxu0 %v7059_v47  ;;  %v8086_v35 = vadd.f32 %v1412_v31, %v1156_v21  ;;  %v1159_v42 = vpop.f32.mrb[44].mxu1  ;;  %v5400_v21 = vpack.c.bf16 %v630_v29, %v622_v45  ;;  %v621_v31 = vld [vmem:[#allocation7 + $0x6b0] sm:$0xff] }
 0x1dd   : > { %9585 = vst [vmem:[#allocation17_spill] sm:$0xff] %v8084_v52  ;;  %v1160_v15 = vadd.f32 %v1159_v42, %v7884_v54  ;;  %v1161_v23 = vpop.f32.mrb[45].mxu1  ;;  %1863 = vmatmul.mubr.f32.gmra.mrb[86].mxu1 %v7060_v43  ;;  %v629_v47 = vld [vmem:[#allocation7 + $0x6f0] sm:$0xff]  ;;  %v638_v52 = vld [vmem:[#allocation7 + $0x738] sm:$0xff] }
 0x1de   : > { %9586 = vst [vmem:[#allocation18_spill] sm:$0xff] %v8086_v35  ;;  %v1416_v10 = vpop.f32.mrb[44].mxu0  ;;  %v1162_v6 = vadd.f32 %v1161_v23, %v7888_v1  ;;  %1868 = vmatprep.mubr.f32.mxu1 %v7061_v32  ;;  %5395 = vmatpush1.bf16.msra.mxu1 %v5394_v3  ;;  %v5402_v45 = vpack.c.bf16 %v629_v47, %v621_v31  ;;  %v7064_v31 = vld [vmem:[%s7555_s30 + $0x1b0] sm:$0xff] }
 0x1df   : > { %2377 = vmatmul.mubr.f32.gmra.mrb[86].mxu0 %v7060_v43  ;;  %v1418_v8 = vpop.f32.mrb[45].mxu0  ;;  %v8092_v53 = vadd.f32 %v1416_v10, %v1160_v15  ;;  %5397 = vmatprep.subr.bf16.mxu1 %v5396_v50  ;;  %v7062_v43 = vld [vmem:[%s7555_s30 + $0x190] sm:$0xff]  ;;  %v646_v10 = vld [vmem:[#allocation7 + $0x778] sm:$0xff] }
 0x1e0   : > { %2382 = vmatprep.mubr.f32.mxu0 %v7061_v32  ;;  %v8094_v0 = vadd.f32 %v1418_v8, %v1162_v6  ;;  %v1165_v58 = vpop.f32.mrb[46].mxu1  ;;  %v637_v50 = vld [vmem:[#allocation7 + $0x730] sm:$0xff]  ;;  %v5404_v8 = vpack.c.bf16 %v646_v10, %v638_v52 }
 0x1e1   : > { %9587 = vst [vmem:[#allocation19_spill] sm:$0xff] %v8092_v53  ;;  %v1166_v42 = vadd.f32 %v1165_v58, %v7884_v54  ;;  %v1167_v23 = vpop.f32.mrb[47].mxu1  ;;  %1869 = vmatmul.mubr.f32.gmra.mrb[88].mxu1 %v7062_v43  ;;  %v645_v32 = vld [vmem:[#allocation7 + $0x770] sm:$0xff]  ;;  %v4041_v58 = vld [vmem:[%s9547_s4] sm:$0xff] }
 0x1e2   : > { %9588 = vst [vmem:[#allocation20_spill] sm:$0xff] %v8094_v0  ;;  %v1422_v35 = vpop.f32.mrb[46].mxu0  ;;  %v1168_v15 = vadd.f32 %v1167_v23, %v7888_v1  ;;  %1874 = vmatprep.mubr.f32.mxu1 %v7063_v33  ;;  %5399 = vmatpush1.bf16.msra.mxu1 %v5398_v41  ;;  %v654_v23 = vld [vmem:[#allocation7 + $0x7b8] sm:$0xff]  ;;  %v661_v53 = vld [vmem:[#allocation7 + $0x7f0] sm:$0xff] }
 0x1e3   : > { %2383 = vmatmul.mubr.f32.gmra.mrb[88].mxu0 %v7062_v43  ;;  %v1424_v3 = vpop.f32.mrb[47].mxu0  ;;  %v8100_v17 = vadd.f32 %v1422_v35, %v1166_v42  ;;  %5401 = vmatprep.subr.bf16.mxu1 %v5400_v21  ;;  %v4042_v35 = vld [vmem:[%s9547_s4 + $0x8] sm:$0xff]  ;;  %v662_v43 = vld [vmem:[#allocation7 + $0x7f8] sm:$0xff] }
 0x1e4   : > { %2388 = vmatprep.mubr.f32.mxu0 %v7063_v33  ;;  %v8102_v29 = vadd.f32 %v1424_v3, %v1168_v15  ;;  %v1171_v6 = vpop.f32.mrb[48].mxu1  ;;  %v5477_v21 = vpack.c.bf16 %v4042_v35, %v4041_v58  ;;  %v7065_v15 = vld [vmem:[%s7555_s30 + $0x1d8] sm:$0xff]  ;;  %v5406_v33 = vpack.c.bf16 %v645_v32, %v637_v50  ;;  %v5408_v0 = vpack.c.bf16 %v662_v43, %v654_v23  ;;  %v4043_v35 = vld [vmem:[%s9547_s4 + $0x10] sm:$0xff] }
 0x1e5   : > { %9589 = vst [vmem:[#allocation21_spill] sm:$0xff] %v8100_v17  ;;  %v1172_v42 = vadd.f32 %v1171_v6, %v7884_v54  ;;  %v1173_v41 = vpop.f32.mrb[49].mxu1  ;;  %1875 = vmatmul.mubr.f32.gmra.mrb[90].mxu1 %v7064_v31  ;;  %v653_v6 = vld [vmem:[#allocation7 + $0x7b0] sm:$0xff]  ;;  %v9559_v58 = vmov 0.0|0.0  }
 0x1e6   : > { %9590 = vst [vmem:[#allocation22_spill] sm:$0xff] %v8102_v29  ;;  %v1428_v47 = vpop.f32.mrb[48].mxu0  ;;  %v1174_v52 = vadd.f32 %v1173_v41, %v7888_v1  ;;  %1880 = vmatprep.mubr.f32.mxu1 %v7065_v15  ;;  %5403 = vmatpush1.bf16.msra.mxu1 %v5402_v45  ;;  %v4044_v45 = vld [vmem:[%s9547_s4 + $0x18] sm:$0xff] }
 0x1e7   : > { %2389 = vmatmul.mubr.f32.gmra.mrb[90].mxu0 %v7064_v31  ;;  %v1430_v10 = vpop.f32.mrb[49].mxu0  ;;  %v8114_v3 = vadd.f32 %v1428_v47, %v1172_v42  ;;  %5405 = vmatprep.subr.bf16.mxu1 %v5404_v8  ;;  %v7066_v42 = vld [vmem:[%s7555_s30 + $0x1d0] sm:$0xff]  ;;  %v670_v41 = vld [vmem:[#allocation7 + $0x838] sm:$0xff]  ;;  %v5480_v47 = vpack.c.bf16 %v4044_v45, %v4043_v35  ;;  %v4046_v45 = vld [vmem:[%s9547_s4 + $0x28] sm:$0xff] }
 0x1e8   : > { %2394 = vmatprep.mubr.f32.mxu0 %v7065_v15  ;;  %v8116_v29 = vadd.f32 %v1430_v10, %v1174_v52  ;;  %v1177_v17 = vpop.f32.mrb[50].mxu1  ;;  %5476 = vmatprep.subr.bf16.mxu0 %v9559_v58  ;;  %v678_v31 = vld [vmem:[#allocation7 + $0x878] sm:$0xff] }
 0x1e9   : > { %v1178_v50 = vadd.f32 %v1177_v17, %v7884_v54  ;;  %v1179_v32 = vpop.f32.mrb[51].mxu1  ;;  %1881 = vmatmul.mubr.f32.gmra.mrb[92].mxu1 %v7066_v42  ;;  %5478 = vmatpush1.bf16.msra.mxu0 %v5477_v21  ;;  %v7067_v52 = vld [vmem:[%s7555_s30 + $0x1f8] sm:$0xff]  ;;  %v5410_v17 = vpack.c.bf16 %v661_v53, %v653_v6  ;;  %v9592_v21 = vmov 0.0|0.0   ;;  %v7068_v53 = vld [vmem:[%s7555_s30 + $0x1f0] sm:$0xff] }
 0x1ea   : > { %9591 = vst [vmem:[#allocation23_spill] sm:$0xff] %v8116_v29  ;;  %v1434_v8 = vpop.f32.mrb[50].mxu0  ;;  %v1180_v23 = vadd.f32 %v1179_v32, %v7888_v1  ;;  %1886 = vmatprep.mubr.f32.mxu1 %v7067_v52  ;;  %5407 = vmatpush1.bf16.msra.mxu1 %v5406_v33  ;;  %v5412_v29 = vpack.c.bf16 %v678_v31, %v670_v41  ;;  %v4045_v35 = vld [vmem:[%s9547_s4 + $0x20] sm:$0xff] }
 0x1eb   : > { %2395 = vmatmul.mubr.f32.gmra.mrb[92].mxu0 %v7066_v42  ;;  %v1436_v43 = vpop.f32.mrb[51].mxu0  ;;  %v8129_v10 = vadd.f32 %v1434_v8, %v1178_v50  ;;  %5409 = vmatprep.subr.bf16.mxu1 %v5408_v0  ;;  %v5483_v32 = vpack.c.bf16 %v4046_v45, %v4045_v35  ;;  %v7069_v8 = vld [vmem:[%s7555_s30 + $0x218] sm:$0xff]  ;;  %v7070_v35 = vld [vmem:[%s7555_s30 + $0x210] sm:$0xff] }
 0x1ec   : > { %2400 = vmatprep.mubr.f32.mxu0 %v7067_v52  ;;  %v8131_v15 = vadd.f32 %v1436_v43, %v1180_v23  ;;  %v1183_v58 = vpop.f32.mrb[52].mxu1  ;;  %5479 = vmatprep.subr.bf16.mxu0 %v9592_v21  ;;  %v4048_v23 = vld [vmem:[%s9547_s4 + $0x38] sm:$0xff] }
 0x1ed   : > { %v1184_v50 = vadd.f32 %v1183_v58, %v7884_v54  ;;  %v1185_v33 = vpop.f32.mrb[53].mxu1  ;;  %1887 = vmatmul.mubr.f32.gmra.mrb[94].mxu1 %v7068_v53  ;;  %5481 = vmatpush1.bf16.msra.mxu0 %v5480_v47  ;;  %v4047_v47 = vld [vmem:[%s9547_s4 + $0x30] sm:$0xff] }
 0x1ee   : > { %v1440_v6 = vpop.f32.mrb[52].mxu0  ;;  %v1186_v0 = vadd.f32 %v1185_v33, %v7888_v1  ;;  %1892 = vmatprep.mubr.f32.mxu1 %v7069_v8  ;;  %5411 = vmatpush1.bf16.msra.mxu1 %v5410_v17  ;;  %v5486_v45 = vpack.c.bf16 %v4048_v23, %v4047_v47  ;;  %v7071_v33 = vld [vmem:[%s7555_s30 + $0x238] sm:$0xff]  ;;  %v7072_v47 = vld [vmem:[%s7555_s30 + $0x230] sm:$0xff] }
 0x1ef   : > { %2401 = vmatmul.mubr.f32.gmra.mrb[94].mxu0 %v7068_v53  ;;  %v1442_v42 = vpop.f32.mrb[53].mxu0  ;;  %v8144_v41 = vadd.f32 %v1440_v6, %v1184_v50  ;;  %5413 = vmatprep.subr.bf16.mxu1 %v5412_v29 }
 0x1f0   : > { %2406 = vmatprep.mubr.f32.mxu0 %v7069_v8  ;;  %v8146_v31 = vadd.f32 %v1442_v42, %v1186_v0  ;;  %v1189_v58 = vpop.f32.mrb[54].mxu1  ;;  %5482 = vmatprep.subr.bf16.mxu0 %v9592_v21  ;;  %v4050_v42 = vld [vmem:[%s9547_s4 + $0x48] sm:$0xff] }
 0x1f1   : > { %v1190_v43 = vadd.f32 %v1189_v58, %v7884_v54  ;;  %v1191_v52 = vpop.f32.mrb[55].mxu1  ;;  %1893 = vmatmul.mubr.f32.gmra.mrb[96].mxu1 %v7070_v35  ;;  %5484 = vmatpush1.bf16.msra.mxu0 %v5483_v32  ;;  %v4049_v32 = vld [vmem:[%s9547_s4 + $0x40] sm:$0xff] }
 0x1f2   : > { %v1446_v17 = vpop.f32.mrb[54].mxu0  ;;  %v1192_v29 = vadd.f32 %v1191_v52, %v7888_v1  ;;  %1898 = vmatprep.mubr.f32.mxu1 %v7071_v33  ;;  %5485 = vmatprep.subr.bf16.mxu0 %v9592_v21 }
 0x1f3   : > { %2407 = vmatmul.mubr.f32.gmra.mrb[96].mxu0 %v7070_v35  ;;  %v1448_v50 = vpop.f32.mrb[55].mxu0  ;;  %v8159_v53 = vadd.f32 %v1446_v17, %v1190_v43  ;;  %v5489_v43 = vpack.c.bf16 %v4050_v42, %v4049_v32  ;;  %v7073_v17 = vld [vmem:[%s7555_s30 + $0x258] sm:$0xff] }
 0x1f4   : > { %2412 = vmatprep.mubr.f32.mxu0 %v7071_v33  ;;  %v8162_v6 = vadd.f32 %v1448_v50, %v1192_v29  ;;  %v1195_v0 = vpop.f32.mrb[56].mxu1 }
 0x1f5   : > { %9593 = vst [vmem:[#allocation24_spill] sm:$0xff] %v8159_v53  ;;  %v1196_v8 = vadd.f32 %v1195_v0, %v7884_v54  ;;  %v1197_v58 = vpop.f32.mrb[57].mxu1  ;;  %1899 = vmatmul.mubr.f32.gmra.mrb[98].mxu1 %v7072_v47  ;;  %5487 = vmatpush1.bf16.msra.mxu0 %v5486_v45  ;;  %v4051_v45 = vld [vmem:[%s9547_s4 + $0x50] sm:$0xff]  ;;  %v4052_v0 = vld [vmem:[%s9547_s4 + $0x58] sm:$0xff] }
 0x1f6   : > { %9594 = vst [vmem:[#allocation25_spill] sm:$0xff] %v8162_v6  ;;  %v1452_v23 = vpop.f32.mrb[56].mxu0  ;;  %v1198_v52 = vadd.f32 %v1197_v58, %v7888_v1  ;;  %1904 = vmatprep.mubr.f32.mxu1 %v7073_v17  ;;  %5488 = vmatprep.subr.bf16.mxu0 %v9592_v21  ;;  %v733_v6 = vld [vmem:[#allocation7 + $0xa30] sm:$0xff] }
 0x1f7   : > { %2413 = vmatmul.mubr.f32.gmra.mrb[98].mxu0 %v7072_v47  ;;  %v1454_v35 = vpop.f32.mrb[57].mxu0  ;;  %v8174_v29 = vadd.f32 %v1452_v23, %v1196_v8  ;;  %v7074_v8 = vld [vmem:[%s7555_s30 + $0x250] sm:$0xff]  ;;  %v5492_v47 = vpack.c.bf16 %v4052_v0, %v4051_v45  ;;  %v4054_v45 = vld [vmem:[%s9547_s4 + $0x68] sm:$0xff] }
 0x1f8   : > { %2418 = vmatprep.mubr.f32.mxu0 %v7073_v17  ;;  %v8177_v50 = vadd.f32 %v1454_v35, %v1198_v52  ;;  %v1201_v33 = vpop.f32.mrb[58].mxu1  ;;  %v7075_v35 = vld [vmem:[%s7555_s30 + $0x278] sm:$0xff] }
 0x1f9   : > { %9595 = vst [vmem:[#allocation26_spill] sm:$0xff] %v8174_v29  ;;  %v1202_v32 = vadd.f32 %v1201_v33, %v7884_v54  ;;  %v1203_v42 = vpop.f32.mrb[59].mxu1  ;;  %1905 = vmatmul.mubr.f32.gmra.mrb[100].mxu1 %v7074_v8  ;;  %5490 = vmatpush1.bf16.msra.mxu0 %v5489_v43  ;;  %v4053_v43 = vld [vmem:[%s9547_s4 + $0x60] sm:$0xff]  ;;  %v7103_v29 = vld [vmem:[%s7555_s30 + $0x28] sm:$0xff] }
 0x1fa   : > { %9596 = vst [vmem:[#allocation27_spill] sm:$0xff] %v8177_v50  ;;  %v1458_v58 = vpop.f32.mrb[58].mxu0  ;;  %v1204_v23 = vadd.f32 %v1203_v42, %v7888_v1  ;;  %1910 = vmatprep.mubr.f32.mxu1 %v7075_v35  ;;  %5491 = vmatprep.subr.bf16.mxu0 %v9592_v21 }
 0x1fb   : > { %2419 = vmatmul.mubr.f32.gmra.mrb[100].mxu0 %v7074_v8  ;;  %v1460_v52 = vpop.f32.mrb[59].mxu0  ;;  %v8189_v17 = vadd.f32 %v1458_v58, %v1202_v32  ;;  %v7076_v32 = vld [vmem:[%s7555_s30 + $0x270] sm:$0xff]  ;;  %v5495_v58 = vpack.c.bf16 %v4054_v45, %v4053_v43 }
 0x1fc   : > { %2424 = vmatprep.mubr.f32.mxu0 %v7075_v35  ;;  %v8192_v33 = vadd.f32 %v1460_v52, %v1204_v23  ;;  %v1207_v50 = vpop.f32.mrb[60].mxu1  ;;  %v7077_v35 = vld [vmem:[%s7555_s30 + $0x298] sm:$0xff] }
 0x1fd   : > { %9597 = vst [vmem:[#allocation28_spill] sm:$0xff] %v8189_v17  ;;  %v1208_v0 = vadd.f32 %v1207_v50, %v7884_v54  ;;  %v1209_v42 = vpop.f32.mrb[61].mxu1  ;;  %1911 = vmatmul.mubr.f32.gmra.mrb[102].mxu1 %v7076_v32  ;;  %5493 = vmatpush1.bf16.msra.mxu0 %v5492_v47  ;;  %v4055_v47 = vld [vmem:[%s9547_s4 + $0x70] sm:$0xff]  ;;  %v4056_v43 = vld [vmem:[%s9547_s4 + $0x78] sm:$0xff] }
 0x1fe   : > { %9598 = vst [vmem:[#allocation29_spill] sm:$0xff] %v8192_v33  ;;  %v1464_v8 = vpop.f32.mrb[60].mxu0  ;;  %v1210_v23 = vadd.f32 %v1209_v42, %v7888_v1  ;;  %1916 = vmatprep.mubr.f32.mxu1 %v7077_v35  ;;  %5494 = vmatprep.subr.bf16.mxu0 %v9592_v21 }
 0x1ff   : > { %2425 = vmatmul.mubr.f32.gmra.mrb[102].mxu0 %v7076_v32  ;;  %v1466_v52 = vpop.f32.mrb[61].mxu0  ;;  %v8204_v33 = vadd.f32 %v1464_v8, %v1208_v0  ;;  %v7078_v0 = vld [vmem:[%s7555_s30 + $0x290] sm:$0xff]  ;;  %v5498_v8 = vpack.c.bf16 %v4056_v43, %v4055_v47  ;;  %v7081_v43 = vld [vmem:[%s7555_s30 + $0x2d8] sm:$0xff] }
 0x200   : > { %2430 = vmatprep.mubr.f32.mxu0 %v7077_v35  ;;  %v8207_v50 = vadd.f32 %v1466_v52, %v1210_v23  ;;  %v1213_v17 = vpop.f32.mrb[62].mxu1  ;;  %v7079_v35 = vld [vmem:[%s7555_s30 + $0x2b8] sm:$0xff] }
 0x201   : > { %9599 = vst [vmem:[#allocation30_spill] sm:$0xff] %v8204_v33  ;;  %v1214_v45 = vadd.f32 %v1213_v17, %v7884_v54  ;;  %v1215_v42 = vpop.f32.mrb[63].mxu1  ;;  %1917 = vmatmul.mubr.f32.gmra.mrb[104].mxu1 %v7078_v0  ;;  %5496 = vmatpush1.bf16.msra.mxu0 %v5495_v58  ;;  %v4057_v17 = vld [vmem:[%s9547_s4 + $0x80] sm:$0xff]  ;;  %v7080_v58 = vld [vmem:[%s7555_s30 + $0x2b0] sm:$0xff] }
 0x202   : > { %9600 = vst [vmem:[#allocation31_spill] sm:$0xff] %v8207_v50  ;;  %v1470_v32 = vpop.f32.mrb[62].mxu0  ;;  %v1216_v23 = vadd.f32 %v1215_v42, %v7888_v1  ;;  %1922 = vmatprep.mubr.f32.mxu1 %v7079_v35  ;;  %5497 = vmatprep.subr.bf16.mxu0 %v9592_v21  ;;  %v4058_v1 = vld [vmem:[%s9547_s4 + $0x88] sm:$0xff]  ;;  %v4060_v42 = vld [vmem:[%s9547_s4 + $0x98] sm:$0xff] }
 0x203   : > { %2431 = vmatmul.mubr.f32.gmra.mrb[104].mxu0 %v7078_v0  ;;  %v1472_v52 = vpop.f32.mrb[63].mxu0  ;;  %v8219_v50 = vadd.f32 %v1470_v32, %v1214_v45  ;;  %v5501_v47 = vpack.c.bf16 %v4058_v1, %v4057_v17  ;;  %v4059_v45 = vld [vmem:[%s9547_s4 + $0x90] sm:$0xff]  ;;  %v7085_v1 = vld [vmem:[%s7555_s30 + $0x318] sm:$0xff]  ;;  %v7102_v33 = vld [vmem:[%s7555_s30] sm:$0xff] }
 0x204   : > { %2436 = vmatprep.mubr.f32.mxu0 %v7079_v35  ;;  %v8222_v54 = vadd.f32 %v1472_v52, %v1216_v23  ;;  %v7082_v0 = vld [vmem:[%s7555_s30 + $0x2d0] sm:$0xff]  ;;  %v5504_v32 = vpack.c.bf16 %v4060_v42, %v4059_v45  ;;  %v4061_v23 = vld [vmem:[%s9547_s4 + $0xa0] sm:$0xff]  ;;  %v4062_v52 = vld [vmem:[%s9547_s4 + $0xa8] sm:$0xff] }
 0x205   : > { %9601 = vst [vmem:[#allocation32_spill] sm:$0xff] %v8219_v50  ;;  %1923 = vmatmul.mubr.f32.gmra.mrb[106].mxu1 %v7080_v58  ;;  %5499 = vmatpush1.bf16.msra.mxu0 %v5498_v8  ;;  %v7083_v8 = vld [vmem:[%s7555_s30 + $0x2f8] sm:$0xff]  ;;  %v7084_v35 = vld [vmem:[%s7555_s30 + $0x2f0] sm:$0xff]  ;;  %v5507_v17 = vpack.c.bf16 %v4062_v52, %v4061_v23 }
 0x206   : > { %9602 = vst [vmem:[#allocation33_spill] sm:$0xff] %v8222_v54  ;;  %1928 = vmatprep.mubr.f32.mxu1 %v7081_v43  ;;  %5500 = vmatprep.subr.bf16.mxu0 %v9592_v21  ;;  %v4064_v45 = vld [vmem:[%s9547_s4 + $0xb8] sm:$0xff]  ;;  %v4065_v52 = vld [vmem:[%s9547_s4 + $0xc0] sm:$0xff] }
 0x207   : > { %2437 = vmatmul.mubr.f32.gmra.mrb[106].mxu0 %v7080_v58  ;;  %v7086_v58 = vld [vmem:[%s7555_s30 + $0x310] sm:$0xff]  ;;  %v7091_v23 = vld [vmem:[%s7555_s30 + $0x378] sm:$0xff] }
 0x208   : > { %2442 = vmatprep.mubr.f32.mxu0 %v7081_v43  ;;  %v4063_v43 = vld [vmem:[%s9547_s4 + $0xb0] sm:$0xff]  ;;  %v702_v54 = vld [vmem:[#allocation7 + $0x938] sm:$0xff] }
 0x209   : > { %1929 = vmatmul.mubr.f32.gmra.mrb[108].mxu1 %v7082_v0  ;;  %5502 = vmatpush1.bf16.msra.mxu0 %v5501_v47  ;;  %v7087_v47 = vld [vmem:[%s7555_s30 + $0x338] sm:$0xff]  ;;  %v5510_v42 = vpack.c.bf16 %v4064_v45, %v4063_v43  ;;  %v7094_v45 = vld [vmem:[%s7555_s30 + $0x390] sm:$0xff] }
 0x20a   : > { %1934 = vmatprep.mubr.f32.mxu1 %v7083_v8  ;;  %5503 = vmatprep.subr.bf16.mxu0 %v9592_v21  ;;  %v4068_v43 = vld [vmem:[%s9547_s4 + $0xd8] sm:$0xff] }
 0x20b   : > { %2443 = vmatmul.mubr.f32.gmra.mrb[108].mxu0 %v7082_v0  ;;  %v7088_v0 = vld [vmem:[%s7555_s30 + $0x330] sm:$0xff]  ;;  %v710_v50 = vld [vmem:[#allocation7 + $0x978] sm:$0xff] }
 0x20c   : > { %2448 = vmatprep.mubr.f32.mxu0 %v7083_v8  ;;  %v7090_v8 = vld [vmem:[%s7555_s30 + $0x350] sm:$0xff] }
 0x20d   : > { %1935 = vmatmul.mubr.f32.gmra.mrb[110].mxu1 %v7084_v35  ;;  %5505 = vmatpush1.bf16.msra.mxu0 %v5504_v32  ;;  %v7089_v32 = vld [vmem:[%s7555_s30 + $0x358] sm:$0xff] }
 0x20e   : > { %1940 = vmatprep.mubr.f32.mxu1 %v7085_v1  ;;  %5506 = vmatprep.subr.bf16.mxu0 %v9592_v21 }
 0x20f   : > { %2449 = vmatmul.mubr.f32.gmra.mrb[110].mxu0 %v7084_v35  ;;  %v4066_v35 = vld [vmem:[%s9547_s4 + $0xc8] sm:$0xff] }
 0x210   : > { %2454 = vmatprep.mubr.f32.mxu0 %v7085_v1  ;;  %v7092_v1 = vld [vmem:[%s7555_s30 + $0x370] sm:$0xff] }
 0x211   : > { %1941 = vmatmul.mubr.f32.gmra.mrb[112].mxu1 %v7086_v58  ;;  %5508 = vmatpush1.bf16.msra.mxu0 %v5507_v17  ;;  %v5513_v17 = vpack.c.bf16 %v4066_v35, %v4065_v52  ;;  %v4070_v52 = vld [vmem:[%s9547_s4 + $0xe8] sm:$0xff] }
 0x212   : > { %1946 = vmatprep.mubr.f32.mxu1 %v7087_v47  ;;  %5509 = vmatprep.subr.bf16.mxu0 %v9592_v21 }
 0x213   : > { %2455 = vmatmul.mubr.f32.gmra.mrb[112].mxu0 %v7086_v58  ;;  %v7093_v58 = vld [vmem:[%s7555_s30 + $0x398] sm:$0xff] }
 0x214   : > { %2460 = vmatprep.mubr.f32.mxu0 %v7087_v47  ;;  %v4067_v47 = vld [vmem:[%s9547_s4 + $0xd0] sm:$0xff] }
 0x215   : > { %1947 = vmatmul.mubr.f32.gmra.mrb[114].mxu1 %v7088_v0  ;;  %5511 = vmatpush1.bf16.msra.mxu0 %v5510_v42  ;;  %v5516_v42 = vpack.c.bf16 %v4068_v43, %v4067_v47  ;;  %v677_v47 = vld [vmem:[#allocation7 + $0x870] sm:$0xff] }
 0x216   : > { %1952 = vmatprep.mubr.f32.mxu1 %v7089_v32  ;;  %5512 = vmatprep.subr.bf16.mxu0 %v9592_v21  ;;  %v4071_v43 = vld [vmem:[%s9547_s4 + $0xf0] sm:$0xff] }
 0x217   : > { %2461 = vmatmul.mubr.f32.gmra.mrb[114].mxu0 %v7088_v0  ;;  %v7095_v0 = vld [vmem:[%s7555_s30 + $0x3b8] sm:$0xff] }
 0x218   : > { %2466 = vmatprep.mubr.f32.mxu0 %v7089_v32  ;;  %v7096_v32 = vld [vmem:[%s7555_s30 + $0x3b0] sm:$0xff] }
 0x219   : > { %1953 = vmatmul.mubr.f32.gmra.mrb[116].mxu1 %v7090_v8  ;;  %5514 = vmatpush1.bf16.msra.mxu0 %v5513_v17  ;;  %v7098_v17 = vld [vmem:[%s7555_s30 + $0x3d0] sm:$0xff] }
 0x21a   : > { %1958 = vmatprep.mubr.f32.mxu1 %v7091_v23  ;;  %5515 = vmatprep.subr.bf16.mxu0 %v9592_v21 }
 0x21b   : > { %2467 = vmatmul.mubr.f32.gmra.mrb[116].mxu0 %v7090_v8  ;;  %v7097_v8 = vld [vmem:[%s7555_s30 + $0x3d8] sm:$0xff] }
 0x21c   : > { %2472 = vmatprep.mubr.f32.mxu0 %v7091_v23  ;;  %v4069_v23 = vld [vmem:[%s9547_s4 + $0xe0] sm:$0xff] }
 0x21d   : > { %1959 = vmatmul.mubr.f32.gmra.mrb[118].mxu1 %v7092_v1  ;;  %5517 = vmatpush1.bf16.msra.mxu0 %v5516_v42  ;;  %v5519_v35 = vpack.c.bf16 %v4070_v52, %v4069_v23  ;;  %v694_v42 = vld [vmem:[#allocation7 + $0x8f8] sm:$0xff]  ;;  %v7101_v23 = vld [vmem:[%s7555_s30 + $0x8] sm:$0xff] }
 0x21e   : > { %1964 = vmatprep.mubr.f32.mxu1 %v7093_v58  ;;  %5518 = vmatprep.subr.bf16.mxu0 %v9592_v21 }
 0x21f   : > { %2473 = vmatmul.mubr.f32.gmra.mrb[118].mxu0 %v7092_v1  ;;  %v7099_v1 = vld [vmem:[%s7555_s30 + $0x3f8] sm:$0xff] }
 0x220   : > { %2478 = vmatprep.mubr.f32.mxu0 %v7093_v58  ;;  %v669_v58 = vld [vmem:[#allocation7 + $0x830] sm:$0xff] }
 0x221   : > { %1965 = vmatmul.mubr.f32.gmra.mrb[120].mxu1 %v7094_v45  ;;  %5520 = vmatpush1.bf16.msra.mxu0 %v5519_v35  ;;  %v5414_v52 = vpack.c.bf16 %v677_v47, %v669_v58  ;;  %v709_v58 = vld [vmem:[#allocation7 + $0x970] sm:$0xff]  ;;  %v718_v47 = vld [vmem:[#allocation7 + $0x9b8] sm:$0xff] }
 0x222   : > { %1970 = vmatprep.mubr.f32.mxu1 %v7095_v0  ;;  %5521 = vmatprep.subr.bf16.mxu0 %v9592_v21 }
 0x223   : > { %2479 = vmatmul.mubr.f32.gmra.mrb[120].mxu0 %v7094_v45  ;;  %v686_v45 = vld [vmem:[#allocation7 + $0x8b8] sm:$0xff] }
 0x224   : > { %2484 = vmatprep.mubr.f32.mxu0 %v7095_v0  ;;  %v4072_v0 = vld [vmem:[%s9547_s4 + $0xf8] sm:$0xff]  ;;  %v5416_v35 = vpack.c.bf16 %v694_v42, %v686_v45  ;;  %v7104_v42 = vld [vmem:[%s7555_s30 + $0x20] sm:$0xff] }
 0x225   : > { %1971 = vmatmul.mubr.f32.gmra.mrb[122].mxu1 %v7096_v32  ;;  %v726_v45 = vld [vmem:[#allocation7 + $0x9f8] sm:$0xff] }
 0x226   : > { %1976 = vmatprep.mubr.f32.mxu1 %v7097_v8 }
 0x227   : > { %2485 = vmatmul.mubr.f32.gmra.mrb[122].mxu0 %v7096_v32  ;;  %v7100_v32 = vld [vmem:[%s7555_s30 + $0x3f0] sm:$0xff] }
 0x228   : > { %2490 = vmatprep.mubr.f32.mxu0 %v7097_v8  ;;  %v5522_v8 = vpack.c.bf16 %v4072_v0, %v4071_v43  ;;  %v5420_v0 = vpack.c.bf16 %v710_v50, %v702_v54  ;;  %v742_v50 = vld [vmem:[#allocation7 + $0xa78] sm:$0xff]  ;;  %v7106_v54 = vld [vmem:[%s7555_s30 + $0x40] sm:$0xff] }
 0x229   : > { %1977 = vmatmul.mubr.f32.gmra.mrb[124].mxu1 %v7098_v17 }
 0x22a   : > { %1982 = vmatprep.mubr.f32.mxu1 %v7099_v1  ;;  %5523 = vmatpush1.bf16.msra.mxu0 %v5522_v8  ;;  %v7105_v8 = vld [vmem:[%s7555_s30 + $0x48] sm:$0xff] }
 0x22b   : > { %2491 = vmatmul.mubr.f32.gmra.mrb[124].mxu0 %v7098_v17  ;;  %v685_v17 = vld [vmem:[#allocation7 + $0x8b0] sm:$0xff]  ;;  %5524 = vmatprep.subr.bf16.mxu0 %v9592_v21 }
 0x22c   : > { %2496 = vmatprep.mubr.f32.mxu0 %v7099_v1  ;;  %v693_v1 = vld [vmem:[#allocation7 + $0x8f0] sm:$0xff] }
 0x22d   : > { %1983 = vmatmul.mubr.f32.gmra.mrb[126].mxu1 %v7100_v32  ;;  %v5418_v43 = vpack.c.bf16 %v693_v1, %v685_v17  ;;  %v734_v17 = vld [vmem:[#allocation7 + $0xa38] sm:$0xff] }
 0x22e   : > { %2567 = vmatprep.mubr.f32.mxu1 %v7101_v23 }
 0x22f   : > { %2497 = vmatmul.mubr.f32.gmra.mrb[126].mxu0 %v7100_v32  ;;  %v701_v32 = vld [vmem:[#allocation7 + $0x930] sm:$0xff] }
 0x230   : > { %v5422_v23 = vpack.c.bf16 %v709_v58, %v701_v32  ;;  %v750_v32 = vld [vmem:[#allocation7 + $0xab8] sm:$0xff]  ;;  %v7108_v58 = vld [vmem:[%s7555_s30 + $0x60] sm:$0xff] }
 0x231   : > { %2568 = vmatmul.mubr.f32.vlgmr.msra.gmra.mrb[128].mxu1 %v7102_v33  ;;  %v5424_v33 = vpack.c.bf16 %v726_v45, %v718_v47  ;;  %v7109_v47 = vld [vmem:[%s7555_s30 + $0x88] sm:$0xff] }
 0x232   : > { %5415 = vmatpush1.bf16.msra.mxu1 %v5414_v52  ;;  %2573 = vmatprep.mubr.f32.mxu1 %v7103_v29  ;;  %v717_v52 = vld [vmem:[#allocation7 + $0x9b0] sm:$0xff] }
 0x233   : > { %5417 = vmatprep.subr.bf16.mxu1 %v5416_v35  ;;  %v725_v29 = vld [vmem:[#allocation7 + $0x9f0] sm:$0xff]  ;;  %v7107_v35 = vld [vmem:[%s7555_s30 + $0x68] sm:$0xff] }
 0x234   : > { %v5426_v1 = vpack.c.bf16 %v725_v29, %v717_v52  ;;  %v766_v52 = vld [vmem:[#allocation7 + $0xb38] sm:$0xff]  ;;  %v7110_v29 = vld [vmem:[%s7555_s30 + $0x80] sm:$0xff] }
 0x235   : > { %2574 = vmatmul.mubr.f32.gmra.mrb[130].mxu1 %v7104_v42  ;;  %v5428_v42 = vpack.c.bf16 %v742_v50, %v734_v17  ;;  %v7111_v17 = vld [vmem:[%s7555_s30 + $0xa8] sm:$0xff] }
 0x236   : > { %2579 = vmatprep.mubr.f32.mxu1 %v7105_v8  ;;  %5419 = vmatpush1.bf16.msra.mxu1 %v5418_v43  ;;  %v741_v43 = vld [vmem:[#allocation7 + $0xa70] sm:$0xff] }
 0x237   : > { %5421 = vmatprep.subr.bf16.mxu1 %v5420_v0  ;;  %v758_v0 = vld [vmem:[#allocation7 + $0xaf8] sm:$0xff]  ;;  %v5430_v45 = vpack.c.bf16 %v741_v43, %v733_v6  ;;  %v7112_v43 = vld [vmem:[%s7555_s30 + $0xa0] sm:$0xff] }
 0x238   : > { %v5432_v8 = vpack.c.bf16 %v758_v0, %v750_v32  ;;  %v782_v6 = vld [vmem:[#allocation7 + $0xbb8] sm:$0xff]  ;;  %v7113_v32 = vld [vmem:[%s7555_s30 + $0xc8] sm:$0xff] }
 0x239   : > { %2580 = vmatmul.mubr.f32.gmra.mrb[132].mxu1 %v7106_v54  ;;  %v749_v54 = vld [vmem:[#allocation7 + $0xab0] sm:$0xff] }
 0x23a   : > { %2585 = vmatprep.mubr.f32.mxu1 %v7107_v35  ;;  %5423 = vmatpush1.bf16.msra.mxu1 %v5422_v23  ;;  %v757_v23 = vld [vmem:[#allocation7 + $0xaf0] sm:$0xff] }
 0x23b   : > { %5425 = vmatprep.subr.bf16.mxu1 %v5424_v33  ;;  %v774_v33 = vld [vmem:[#allocation7 + $0xb78] sm:$0xff]  ;;  %v5434_v50 = vpack.c.bf16 %v757_v23, %v749_v54  ;;  %v7114_v23 = vld [vmem:[%s7555_s30 + $0xc0] sm:$0xff] }
 0x23c   : > { %v5436_v35 = vpack.c.bf16 %v774_v33, %v766_v52  ;;  %v798_v54 = vld [vmem:[#allocation7 + $0xc38] sm:$0xff]  ;;  %v7115_v52 = vld [vmem:[%s7555_s30 + $0xe8] sm:$0xff] }
 0x23d   : > { %2586 = vmatmul.mubr.f32.gmra.mrb[134].mxu1 %v7108_v58  ;;  %v765_v58 = vld [vmem:[#allocation7 + $0xb30] sm:$0xff] }
 0x23e   : > { %2591 = vmatprep.mubr.f32.mxu1 %v7109_v47  ;;  %5427 = vmatpush1.bf16.msra.mxu1 %v5426_v1  ;;  %v773_v1 = vld [vmem:[#allocation7 + $0xb70] sm:$0xff] }
 0x23f   : > { %5429 = vmatprep.subr.bf16.mxu1 %v5428_v42  ;;  %v790_v42 = vld [vmem:[#allocation7 + $0xbf8] sm:$0xff]  ;;  %v5438_v0 = vpack.c.bf16 %v773_v1, %v765_v58  ;;  %v7116_v1 = vld [vmem:[%s7555_s30 + $0xe0] sm:$0xff] }
 0x240   : > { %v5440_v47 = vpack.c.bf16 %v790_v42, %v782_v6  ;;  %v814_v58 = vld [vmem:[#allocation7 + $0xcb8] sm:$0xff]  ;;  %v7117_v6 = vld [vmem:[%s7555_s30 + $0x108] sm:$0xff] }
 0x241   : > { %2592 = vmatmul.mubr.f32.gmra.mrb[136].mxu1 %v7110_v29  ;;  %v781_v29 = vld [vmem:[#allocation7 + $0xbb0] sm:$0xff] }
 0x242   : > { %2597 = vmatprep.mubr.f32.mxu1 %v7111_v17  ;;  %5431 = vmatpush1.bf16.msra.mxu1 %v5430_v45  ;;  %v789_v45 = vld [vmem:[#allocation7 + $0xbf0] sm:$0xff] }
 0x243   : > { %5433 = vmatprep.subr.bf16.mxu1 %v5432_v8  ;;  %v806_v8 = vld [vmem:[#allocation7 + $0xc78] sm:$0xff]  ;;  %v5442_v33 = vpack.c.bf16 %v789_v45, %v781_v29  ;;  %v7118_v45 = vld [vmem:[%s7555_s30 + $0x100] sm:$0xff] }
 0x244   : > { %v5444_v17 = vpack.c.bf16 %v806_v8, %v798_v54  ;;  %v830_v29 = vld [vmem:[#allocation7 + $0xd38] sm:$0xff]  ;;  %v7119_v54 = vld [vmem:[%s7555_s30 + $0x128] sm:$0xff] }
 0x245   : > { %2598 = vmatmul.mubr.f32.gmra.mrb[138].mxu1 %v7112_v43  ;;  %v797_v43 = vld [vmem:[#allocation7 + $0xc30] sm:$0xff] }
 0x246   : > { %2603 = vmatprep.mubr.f32.mxu1 %v7113_v32  ;;  %5435 = vmatpush1.bf16.msra.mxu1 %v5434_v50  ;;  %v805_v50 = vld [vmem:[#allocation7 + $0xc70] sm:$0xff] }
 0x247   : > { %5437 = vmatprep.subr.bf16.mxu1 %v5436_v35  ;;  %v822_v35 = vld [vmem:[#allocation7 + $0xcf8] sm:$0xff]  ;;  %v5446_v42 = vpack.c.bf16 %v805_v50, %v797_v43  ;;  %v7120_v50 = vld [vmem:[%s7555_s30 + $0x120] sm:$0xff] }
 0x248   : > { %v5448_v32 = vpack.c.bf16 %v822_v35, %v814_v58  ;;  %v846_v43 = vld [vmem:[#allocation7 + $0xdb8] sm:$0xff]  ;;  %v7121_v58 = vld [vmem:[%s7555_s30 + $0x148] sm:$0xff] }
 0x249   : > { %2604 = vmatmul.mubr.f32.gmra.mrb[140].mxu1 %v7114_v23  ;;  %v813_v23 = vld [vmem:[#allocation7 + $0xcb0] sm:$0xff] }
 0x24a   : > { %2609 = vmatprep.mubr.f32.mxu1 %v7115_v52  ;;  %5439 = vmatpush1.bf16.msra.mxu1 %v5438_v0  ;;  %v821_v0 = vld [vmem:[#allocation7 + $0xcf0] sm:$0xff] }
 0x24b   : > { %5441 = vmatprep.subr.bf16.mxu1 %v5440_v47  ;;  %v838_v47 = vld [vmem:[#allocation7 + $0xd78] sm:$0xff]  ;;  %v5450_v8 = vpack.c.bf16 %v821_v0, %v813_v23  ;;  %v7122_v0 = vld [vmem:[%s7555_s30 + $0x140] sm:$0xff] }
 0x24c   : > { %v5452_v52 = vpack.c.bf16 %v838_v47, %v830_v29  ;;  %v862_v23 = vld [vmem:[#allocation7 + $0xe38] sm:$0xff]  ;;  %v7123_v29 = vld [vmem:[%s7555_s30 + $0x168] sm:$0xff] }
 0x24d   : > { %2610 = vmatmul.mubr.f32.gmra.mrb[142].mxu1 %v7116_v1  ;;  %v829_v1 = vld [vmem:[#allocation7 + $0xd30] sm:$0xff] }
 0x24e   : > { %2615 = vmatprep.mubr.f32.mxu1 %v7117_v6  ;;  %5443 = vmatpush1.bf16.msra.mxu1 %v5442_v33  ;;  %v837_v33 = vld [vmem:[#allocation7 + $0xd70] sm:$0xff] }
 0x24f   : > { %5445 = vmatprep.subr.bf16.mxu1 %v5444_v17  ;;  %v854_v17 = vld [vmem:[#allocation7 + $0xdf8] sm:$0xff]  ;;  %v5454_v35 = vpack.c.bf16 %v837_v33, %v829_v1  ;;  %v7124_v33 = vld [vmem:[%s7555_s30 + $0x160] sm:$0xff] }
 0x250   : > { %v5456_v6 = vpack.c.bf16 %v854_v17, %v846_v43  ;;  %v878_v1 = vld [vmem:[#allocation7 + $0xeb8] sm:$0xff]  ;;  %v7125_v43 = vld [vmem:[%s7555_s30 + $0x188] sm:$0xff] }
 0x251   : > { %2616 = vmatmul.mubr.f32.gmra.mrb[144].mxu1 %v7118_v45  ;;  %v845_v45 = vld [vmem:[#allocation7 + $0xdb0] sm:$0xff] }
 0x252   : > { %2621 = vmatprep.mubr.f32.mxu1 %v7119_v54  ;;  %5447 = vmatpush1.bf16.msra.mxu1 %v5446_v42  ;;  %v853_v42 = vld [vmem:[#allocation7 + $0xdf0] sm:$0xff] }
 0x253   : > { %5449 = vmatprep.subr.bf16.mxu1 %v5448_v32  ;;  %v870_v32 = vld [vmem:[#allocation7 + $0xe78] sm:$0xff]  ;;  %v5458_v47 = vpack.c.bf16 %v853_v42, %v845_v45  ;;  %v7126_v42 = vld [vmem:[%s7555_s30 + $0x180] sm:$0xff] }
 0x254   : > { %v5460_v54 = vpack.c.bf16 %v870_v32, %v862_v23  ;;  %v894_v45 = vld [vmem:[#allocation7 + $0xf38] sm:$0xff]  ;;  %v7127_v23 = vld [vmem:[%s7555_s30 + $0x1a8] sm:$0xff] }
 0x255   : > { %2622 = vmatmul.mubr.f32.gmra.mrb[146].mxu1 %v7120_v50  ;;  %v861_v50 = vld [vmem:[#allocation7 + $0xe30] sm:$0xff] }
 0x256   : > { %2627 = vmatprep.mubr.f32.mxu1 %v7121_v58  ;;  %5451 = vmatpush1.bf16.msra.mxu1 %v5450_v8  ;;  %v869_v8 = vld [vmem:[#allocation7 + $0xe70] sm:$0xff] }
 0x257   : > { %5453 = vmatprep.subr.bf16.mxu1 %v5452_v52  ;;  %v886_v52 = vld [vmem:[#allocation7 + $0xef8] sm:$0xff]  ;;  %v5462_v17 = vpack.c.bf16 %v869_v8, %v861_v50  ;;  %v7128_v8 = vld [vmem:[%s7555_s30 + $0x1a0] sm:$0xff] }
 0x258   : > { %v5464_v58 = vpack.c.bf16 %v886_v52, %v878_v1  ;;  %v918_v50 = vld [vmem:[#allocation7 + $0xff8] sm:$0xff]  ;;  %v7129_v1 = vld [vmem:[%s7555_s30 + $0x1c8] sm:$0xff] }
 0x259   : > { %2628 = vmatmul.mubr.f32.gmra.mrb[148].mxu1 %v7122_v0  ;;  %v877_v0 = vld [vmem:[#allocation7 + $0xeb0] sm:$0xff] }
 0x25a   : > { %2633 = vmatprep.mubr.f32.mxu1 %v7123_v29  ;;  %5455 = vmatpush1.bf16.msra.mxu1 %v5454_v35  ;;  %v885_v35 = vld [vmem:[#allocation7 + $0xef0] sm:$0xff] }
 0x25b   : > { %5457 = vmatprep.subr.bf16.mxu1 %v5456_v6  ;;  %v902_v6 = vld [vmem:[#allocation7 + $0xf78] sm:$0xff]  ;;  %v5466_v32 = vpack.c.bf16 %v885_v35, %v877_v0  ;;  %v7130_v0 = vld [vmem:[%s7555_s30 + $0x1c0] sm:$0xff]  ;;  %v7131_v35 = vld [vmem:[%s7555_s30 + $0x1e8] sm:$0xff] }
 0x25c   : > { %v5468_v29 = vpack.c.bf16 %v902_v6, %v894_v45  ;;  %v7132_v6 = vld [vmem:[%s7555_s30 + $0x1e0] sm:$0xff] }
 0x25d   : > { %2634 = vmatmul.mubr.f32.gmra.mrb[150].mxu1 %v7124_v33  ;;  %v893_v33 = vld [vmem:[#allocation7 + $0xf30] sm:$0xff] }
 0x25e   : > { %2639 = vmatprep.mubr.f32.mxu1 %v7125_v43  ;;  %5459 = vmatpush1.bf16.msra.mxu1 %v5458_v47  ;;  %v901_v47 = vld [vmem:[#allocation7 + $0xf70] sm:$0xff] }
 0x25f   : > { %5461 = vmatprep.subr.bf16.mxu1 %v5460_v54  ;;  %v910_v54 = vld [vmem:[#allocation7 + $0xfb8] sm:$0xff]  ;;  %v5470_v52 = vpack.c.bf16 %v901_v47, %v893_v33  ;;  %v7137_v33 = vld [vmem:[%s7555_s30 + $0x248] sm:$0xff]  ;;  %v7138_v47 = vld [vmem:[%s7555_s30 + $0x240] sm:$0xff] }
 0x260   : > { %v5472_v43 = vpack.c.bf16 %v918_v50, %v910_v54  ;;  %v7139_v54 = vld [vmem:[%s7555_s30 + $0x268] sm:$0xff]  ;;  %v7140_v50 = vld [vmem:[%s7555_s30 + $0x260] sm:$0xff] }
 0x261   : > { %2640 = vmatmul.mubr.f32.gmra.mrb[152].mxu1 %v7126_v42  ;;  %v7133_v42 = vld [vmem:[%s7555_s30 + $0x208] sm:$0xff] }
 0x262   : > { %2645 = vmatprep.mubr.f32.mxu1 %v7127_v23  ;;  %5463 = vmatpush1.bf16.msra.mxu1 %v5462_v17  ;;  %v909_v17 = vld [vmem:[#allocation7 + $0xfb0] sm:$0xff]  ;;  %v7134_v23 = vld [vmem:[%s7555_s30 + $0x200] sm:$0xff] }
 0x263   : > { %5465 = vmatprep.subr.bf16.mxu1 %v5464_v58  ;;  %v917_v58 = vld [vmem:[#allocation7 + $0xff0] sm:$0xff] }
 0x264   : > { %v5474_v45 = vpack.c.bf16 %v917_v58, %v909_v17  ;;  %v7143_v17 = vld [vmem:[#allocation9] sm:$0xff] }
 0x265   : > { %2646 = vmatmul.mubr.f32.gmra.mrb[154].mxu1 %v7128_v8  ;;  %v7141_v8 = vld [vmem:[%s7555_s30 + $0x288] sm:$0xff] }
 0x266   : > { %2651 = vmatprep.mubr.f32.mxu1 %v7129_v1  ;;  %5467 = vmatpush1.bf16.msra.mxu1 %v5466_v32  ;;  %v7135_v32 = vld [vmem:[%s7555_s30 + $0x228] sm:$0xff]  ;;  %v939_v1 = vsub.s32 4, %v7872_v25 }
 0x267   : > { %5469 = vmatprep.subr.bf16.mxu1 %v5468_v29  ;;  %v7136_v29 = vld [vmem:[%s7555_s30 + $0x220] sm:$0xff] }
 0x268   : > { %v8346_v58 = vrot.slane %v7143_v17, %v939_v1 }
 0x269   : > { %2652 = vmatmul.mubr.f32.gmra.mrb[156].mxu1 %v7130_v0  ;;  %v7144_v0 = vld [vmem:[%s7555_s30 + $0x2a8] sm:$0xff] }
 0x26a   : > { %2657 = vmatprep.mubr.f32.mxu1 %v7131_v35  ;;  %5471 = vmatpush1.bf16.msra.mxu1 %v5470_v52  ;;  %v943_v52 = vsub.s32 5, %v7872_v25 }
 0x26b   : > { %5473 = vmatprep.subr.bf16.mxu1 %v5472_v43  ;;  %v7142_v43 = vld [vmem:[%s7555_s30 + $0x280] sm:$0xff] }
 0x26c   : > { %v8349_v35 = vrot.slane %v7143_v17, %v943_v52 }
 0x26d   : > { %2658 = vmatmul.mubr.f32.gmra.mrb[158].mxu1 %v7132_v6 }
 0x26e   : > { %2663 = vmatprep.mubr.f32.mxu1 %v7133_v42  ;;  %5475 = vmatpush1.bf16.msra.mxu1 %v5474_v45 }
 0x271   : > { %2664 = vmatmul.mubr.f32.gmra.mrb[160].mxu1 %v7134_v23  ;;  %v7145_v23 = vld [vmem:[%s7555_s30 + $0x2a0] sm:$0xff] }
 0x272   : > { %2669 = vmatprep.mubr.f32.mxu1 %v7135_v32 }
 0x275   : > { %2670 = vmatmul.mubr.f32.gmra.mrb[162].mxu1 %v7136_v29 }
 0x276   : > { %2675 = vmatprep.mubr.f32.mxu1 %v7137_v33  ;;  %v7146_v33 = vld [vmem:[%s7555_s30 + $0x2c8] sm:$0xff] }
 0x279   : > { %2676 = vmatmul.mubr.f32.gmra.mrb[164].mxu1 %v7138_v47 }
 0x27a   : > { %2681 = vmatprep.mubr.f32.mxu1 %v7139_v54 }
 0x27d   : > { %2682 = vmatmul.mubr.f32.gmra.mrb[166].mxu1 %v7140_v50 }
 0x27e   : > { %2687 = vmatprep.mubr.f32.mxu1 %v7141_v8 }
 0x281   : > { %2688 = vmatmul.mubr.f32.gmra.mrb[168].mxu1 %v7142_v43  ;;  %v7147_v43 = vld [vmem:[%s7555_s30 + $0x2c0] sm:$0xff] }
 0x282   : > { %2693 = vmatprep.mubr.f32.mxu1 %v7144_v0 }
 0x284   : > { %v8351_v45 = vpop.f32.mrb[64].mxu1 }
 0x285   : > { %9603 = vst [vmem:[#allocation34_spill] sm:$0xff] %v8351_v45  ;;  %v8353_v42 = vpop.f32.mrb[65].mxu1  ;;  %2694 = vmatmul.mubr.f32.gmra.mrb[170].mxu1 %v7145_v23  ;;  %v7159_v45 = vld [vmem:[%s7555_s30 + $0x380] sm:$0xff] }
 0x286   : > { %v2312_v6 = vpop.f32.mrb[64].mxu0  ;;  %9604 = vst [vmem:[#allocation35_spill] sm:$0xff] %v8353_v42  ;;  %2699 = vmatprep.mubr.f32.mxu1 %v7146_v33 }
 0x287   : > { %v5764_v32 = vadd.f32 %v2312_v6, %v8346_v58  ;;  %v2314_v29 = vpop.f32.mrb[65].mxu0  ;;  %v7148_v6 = vld [vmem:[%s7555_s30 + $0x2e8] sm:$0xff] }
 0x288   : > { %v5765_v47 = vadd.f32 %v2314_v29, %v8349_v35  ;;  %v8359_v50 = vpop.f32.mrb[66].mxu1 }
 0x289   : > { %v4830_v54 = vmul.f32 -1.442695, %v5764_v32  ;;  %9605 = vst [vmem:[#allocation36_spill] sm:$0xff] %v8359_v50  ;;  %v8361_v52 = vpop.f32.mrb[67].mxu1  ;;  %2700 = vmatmul.mubr.f32.gmra.mrb[172].mxu1 %v7147_v43  ;;  %v7150_v43 = vld [vmem:[%s7555_s30 + $0x308] sm:$0xff] }
 0x28a   : > { %v4831_v8 = vmul.f32 -1.442695, %v5765_v47  ;;  %v2318_v1 = vpop.f32.mrb[66].mxu0  ;;  %9606 = vst [vmem:[#allocation37_spill] sm:$0xff] %v8361_v52  ;;  %2705 = vmatprep.mubr.f32.mxu1 %v7148_v6  ;;  %v7149_v52 = vld [vmem:[%s7555_s30 + $0x2e0] sm:$0xff] }
 0x28b   : > { %6245 = vpow2.f32 %v4830_v54  ;;  %v5766_v17 = vadd.f32 %v2318_v1, %v8346_v58  ;;  %v2320_v0 = vpop.f32.mrb[67].mxu0 }
 0x28c   : > { %6247 = vpow2.f32 %v4831_v8  ;;  %v5767_v23 = vadd.f32 %v2320_v0, %v8349_v35  ;;  %v8367_v29 = vpop.f32.mrb[68].mxu1 }
 0x28d   : > { %v4834_v32 = vmul.f32 -1.442695, %v5766_v17  ;;  %9607 = vst [vmem:[#allocation38_spill] sm:$0xff] %v8367_v29  ;;  %v8369_v50 = vpop.f32.mrb[69].mxu1  ;;  %2706 = vmatmul.mubr.f32.gmra.mrb[174].mxu1 %v7149_v52 }
 0x28e   : > { %v4835_v33 = vmul.f32 -1.442695, %v5767_v23  ;;  %v2324_v47 = vpop.f32.mrb[68].mxu0  ;;  %9608 = vst [vmem:[#allocation39_spill] sm:$0xff] %v8369_v50  ;;  %2711 = vmatprep.mubr.f32.mxu1 %v7150_v43  ;;  %v7152_v43 = vld [vmem:[%s7555_s30 + $0x328] sm:$0xff] }
 0x28f   : > { %6249 = vpow2.f32 %v4834_v32  ;;  %v5768_v54 = vadd.f32 %v2324_v47, %v8346_v58  ;;  %v2326_v1 = vpop.f32.mrb[69].mxu0  ;;  %v7151_v32 = vld [vmem:[%s7555_s30 + $0x300] sm:$0xff] }
 0x290   : > { %6251 = vpow2.f32 %v4835_v33  ;;  %v5769_v8 = vadd.f32 %v2326_v1, %v8349_v35  ;;  %v8376_v0 = vpop.f32.mrb[70].mxu1 }
 0x291   : > { %6253 = vtanh.f32 %v7896_v36  ;;  %v4838_v17 = vmul.f32 -1.442695, %v5768_v54  ;;  %9609 = vst [vmem:[#allocation40_spill] sm:$0xff] %v8376_v0  ;;  %v8379_v52 = vpop.f32.mrb[71].mxu1  ;;  %2712 = vmatmul.mubr.f32.gmra.mrb[176].mxu1 %v7151_v32  ;;  %v7153_v0 = vld [vmem:[%s7555_s30 + $0x320] sm:$0xff] }
 0x292   : > { %6255 = vtanh.f32 %v7899_v56  ;;  %v4839_v6 = vmul.f32 -1.442695, %v5769_v8  ;;  %v2330_v23 = vpop.f32.mrb[70].mxu0  ;;  %9610 = vst [vmem:[#allocation41_spill] sm:$0xff] %v8379_v52  ;;  %2717 = vmatprep.mubr.f32.mxu1 %v7152_v43 }
 0x293   : > { %6257 = vpow2.f32 %v4838_v17  ;;  %v5770_v47 = vadd.f32 %v2330_v23, %v8346_v58  ;;  %v2332_v33 = vpop.f32.mrb[71].mxu0 }
 0x294   : > { %6259 = vpow2.f32 %v4839_v6  ;;  %v5771_v36 = vadd.f32 %v2332_v33, %v8349_v35  ;;  %v8386_v1 = vpop.f32.mrb[72].mxu1 }
 0x295   : > { %v6246_v54 = vpop.eup %6245  ;;  %6261 = vtanh.f32 %v7906_v59  ;;  %v4842_v56 = vmul.f32 -1.442695, %v5770_v47  ;;  %9611 = vst [vmem:[#allocation42_spill] sm:$0xff] %v8386_v1  ;;  %v8389_v52 = vpop.f32.mrb[73].mxu1  ;;  %2718 = vmatmul.mubr.f32.gmra.mrb[178].mxu1 %v7153_v0  ;;  %v7154_v59 = vld [vmem:[%s7555_s30 + $0x348] sm:$0xff]  ;;  %v7155_v1 = vld [vmem:[%s7555_s30 + $0x340] sm:$0xff] }
 0x296   : > { %v6248_v8 = vpop.eup %6247  ;;  %6263 = vtanh.f32 %v7909_v44  ;;  %v3529_v17 = vadd.f32 1.0, %v6246_v54  ;;  %v4843_v32 = vmul.f32 -1.442695, %v5771_v36  ;;  %v2336_v23 = vpop.f32.mrb[72].mxu0  ;;  %9612 = vst [vmem:[#allocation43_spill] sm:$0xff] %v8389_v52  ;;  %2723 = vmatprep.mubr.f32.mxu1 %v7154_v59 }
 0x297   : > { %v3530_v6 = vadd.f32 1.0, %v6248_v8  ;;  %6265 = vpow2.f32 %v4842_v56  ;;  %v5772_v33 = vadd.f32 %v2336_v23, %v8346_v58  ;;  %v2338_v43 = vpop.f32.mrb[73].mxu0 }
 0x298   : > { %6267 = vrcp.f32 %v3529_v17  ;;  %v8394_v44 = vpop.f32.mrb[74].mxu1  ;;  %v5773_v0 = vadd.f32 %v2338_v43, %v8349_v35 }
 0x299   : > { %v6250_v47 = vpop.eup %6249  ;;  %6269 = vrcp.f32 %v3530_v6  ;;  %9613 = vst [vmem:[#allocation44_spill] sm:$0xff] %v8394_v44  ;;  %v4846_v52 = vmul.f32 -1.442695, %v5772_v33  ;;  %v8397_v56 = vpop.f32.mrb[75].mxu1  ;;  %2724 = vmatmul.mubr.f32.gmra.mrb[180].mxu1 %v7155_v1  ;;  %v7156_v6 = vld [vmem:[%s7555_s30 + $0x368] sm:$0xff] }
 0x29a   : > { %v6252_v36 = vpop.eup %6251  ;;  %v3533_v54 = vadd.f32 1.0, %v6250_v47  ;;  %6271 = vpow2.f32 %v4843_v32  ;;  %v2342_v8 = vpop.f32.mrb[74].mxu0  ;;  %9614 = vst [vmem:[#allocation45_spill] sm:$0xff] %v8397_v56  ;;  %2729 = vmatprep.mubr.f32.mxu1 %v7156_v6  ;;  %v4847_v1 = vmul.f32 -1.442695, %v5773_v0 }
 0x29b   : > { %v6254_v23 = vpop.eup %6253  ;;  %6273 = vtanh.f32 %v7916_v40  ;;  %v3534_v17 = vadd.f32 1.0, %v6252_v36  ;;  %v2344_v59 = vpop.f32.mrb[75].mxu0  ;;  %v5774_v32 = vadd.f32 %v2342_v8, %v8346_v58  ;;  %v7157_v36 = vld [vmem:[%s7555_s30 + $0x360] sm:$0xff] }
 0x29c   : > { %v6256_v44 = vpop.eup %6255  ;;  %6275 = vrcp.f32 %v3533_v54  ;;  %v8403_v33 = vpop.f32.mrb[76].mxu1 }
 0x29d   : > { %v6258_v47 = vpop.eup %6257  ;;  %6277 = vrcp.f32 %v3534_v17  ;;  %9615 = vst [vmem:[#allocation46_spill] sm:$0xff] %v8403_v33  ;;  %v8405_v40 = vpop.f32.mrb[77].mxu1  ;;  %2730 = vmatmul.mubr.f32.gmra.mrb[182].mxu1 %v7157_v36  ;;  %v7158_v17 = vld [vmem:[%s7555_s30 + $0x388] sm:$0xff]  ;;  %v5775_v33 = vadd.f32 %v2344_v59, %v8349_v35  ;;  %v4850_v0 = vmul.f32 -1.442695, %v5774_v32 }
 0x29e   : > { %v6260_v43 = vpop.eup %6259  ;;  %v3537_v56 = vadd.f32 1.0, %v6258_v47  ;;  %6279 = vpow2.f32 %v4846_v52  ;;  %v2348_v50 = vpop.f32.mrb[76].mxu0  ;;  %9616 = vst [vmem:[#allocation47_spill] sm:$0xff] %v8405_v40  ;;  %2735 = vmatprep.mubr.f32.mxu1 %v7158_v17  ;;  %v7160_v59 = vld [vmem:[%s7555_s30 + $0x3a8] sm:$0xff] }
 0x29f   : > { %v6262_v29 = vpop.eup %6261  ;;  %6281 = vtanh.f32 %v7919_v49  ;;  %v3538_v54 = vadd.f32 1.0, %v6260_v43  ;;  %v2350_v6 = vpop.f32.mrb[77].mxu0  ;;  %v5776_v49 = vadd.f32 %v2348_v50, %v8346_v58 }
 0x2a0   : > { %v6264_v8 = vpop.eup %6263  ;;  %6283 = vrcp.f32 %v3537_v56  ;;  %v8411_v47 = vpop.f32.mrb[78].mxu1  ;;  %v5777_v50 = vadd.f32 %v2350_v6, %v8349_v35 }
 0x2a1   : > { %v6266_v52 = vpop.eup %6265  ;;  %6285 = vrcp.f32 %v3538_v54  ;;  %9617 = vst [vmem:[#allocation48_spill] sm:$0xff] %v8411_v47  ;;  %v8414_v42 = vpop.f32.mrb[79].mxu1  ;;  %2736 = vmatmul.mubr.f32.gmra.mrb[184].mxu1 %v7159_v45  ;;  %v4851_v47 = vmul.f32 -1.442695, %v5775_v33 }
 0x2a2   : > { %v6268_v40 = vpop.eup %6267  ;;  %v3541_v36 = vadd.f32 1.0, %v6266_v52  ;;  %6287 = vpow2.f32 %v4847_v1  ;;  %v2354_v43 = vpop.f32.mrb[78].mxu0  ;;  %9618 = vst [vmem:[#allocation49_spill] sm:$0xff] %v8414_v42  ;;  %2741 = vmatprep.mubr.f32.mxu1 %v7160_v59 }
 0x2a3   : > { %v6270_v17 = vpop.eup %6269  ;;  %6289 = vtanh.f32 %v7926_v48  ;;  %v2356_v56 = vpop.f32.mrb[79].mxu0  ;;  %v3913_v54 = vmul.f32 %v6268_v40, %v6254_v23  ;;  %v4854_v48 = vmul.f32 -1.442695, %v5776_v49  ;;  %v7161_v40 = vld [vmem:[%s7555_s30 + $0x3a0] sm:$0xff] }
 0x2a4   : > { %v6272_v32 = vpop.eup %6271  ;;  %6291 = vrcp.f32 %v3541_v36  ;;  %v3914_v52 = vmul.f32 %v6270_v17, %v6256_v44  ;;  %v8420_v42 = vpop.f32.mrb[80].mxu1  ;;  %v7162_v36 = vld [vmem:[%s7555_s30 + $0x3c8] sm:$0xff]  ;;  %v5778_v17 = vadd.f32 %v2354_v43, %v8346_v58 }
 0x2a5   : > { %v6274_v1 = vpop.eup %6273  ;;  %v3542_v25 = vadd.f32 1.0, %v6272_v32  ;;  %6293 = vpow2.f32 %v4850_v0  ;;  %v8423_v23 = vpop.f32.mrb[81].mxu1  ;;  %2742 = vmatmul.mubr.f32.gmra.mrb[186].mxu1 %v7161_v40  ;;  %v4855_v32 = vmul.f32 -1.442695, %v5777_v50 }
 0x2a6   : > { %v6276_v45 = vpop.eup %6275  ;;  %6295 = vtanh.f32 %v7929_v55  ;;  %v2360_v53 = vpop.f32.mrb[80].mxu0  ;;  %4176 = vmatprep.mubr.f32.mxu0 %v3914_v52  ;;  %2747 = vmatprep.mubr.f32.mxu1 %v7162_v36 }
 0x2a7   : > { %v6278_v33 = vpop.eup %6277  ;;  %6297 = vrcp.f32 %v3542_v25  ;;  %v2362_v44 = vpop.f32.mrb[81].mxu0  ;;  %4177 = vmatmul.mubr.f32.vlgmr.msra.gmra.mrb[128].mxu0 %v3913_v54  ;;  %v3917_v6 = vmul.f32 %v6276_v45, %v6262_v29  ;;  %v7163_v29 = vld [vmem:[%s7555_s30 + $0x3c0] sm:$0xff] }
 0x2a8   : > { %v6280_v0 = vpop.eup %6279  ;;  %6299 = vpow2.f32 %v4851_v47  ;;  %v3918_v55 = vmul.f32 %v6278_v33, %v6264_v8  ;;  %v8429_v52 = vpop.f32.mrb[82].mxu1  ;;  %v5779_v8 = vadd.f32 %v2356_v56, %v8349_v35  ;;  %v5780_v56 = vadd.f32 %v2360_v53, %v8346_v58 }
 0x2a9   : > { %v6282_v49 = vpop.eup %6281  ;;  %6301 = vtanh.f32 %v7936_v37  ;;  %v3545_v59 = vadd.f32 1.0, %v6280_v0  ;;  %v8431_v40 = vpop.f32.mrb[83].mxu1  ;;  %2748 = vmatmul.mubr.f32.gmra.mrb[188].mxu1 %v7163_v29  ;;  %v7164_v37 = vld [vmem:[%s7555_s30 + $0x3e8] sm:$0xff] }
 0x2aa   : > { %v6284_v25 = vpop.eup %6283  ;;  %6303 = vpow2.f32 %v4854_v48  ;;  %v2366_v54 = vpop.f32.mrb[82].mxu0  ;;  %4181 = vmatprep.mubr.f32.mxu0 %v3918_v55  ;;  %2753 = vmatprep.mubr.f32.mxu1 %v7164_v37  ;;  %v4858_v48 = vmul.f32 -1.442695, %v5778_v17  ;;  %v4859_v17 = vmul.f32 -1.442695, %v5779_v8  ;;  %v5781_v37 = vadd.f32 %v2362_v44, %v8349_v35 }
 0x2ab   : > { %v6286_v47 = vpop.eup %6285  ;;  %6305 = vrcp.f32 %v3545_v59  ;;  %v8435_v43 = vpop.f32.mrb[83].mxu0  ;;  %4182 = vmatmul.mubr.f32.gmra.mrb[130].mxu0 %v3917_v6  ;;  %v3921_v50 = vmul.f32 %v6284_v25, %v6274_v1  ;;  %v7165_v25 = vld [vmem:[%s7555_s30 + $0x3e0] sm:$0xff]  ;;  %v4862_v8 = vmul.f32 -1.442695, %v5780_v56  ;;  %v5782_v56 = vadd.f32 %v2366_v54, %v8346_v58 }
 0x2ac   : > { %v6288_v45 = vpop.eup %6287  ;;  %6307 = vtanh.f32 %v7939_v60  ;;  %v3922_v33 = vmul.f32 %v6286_v47, %v6282_v49  ;;  %v8439_v55 = vpop.f32.mrb[84].mxu1  ;;  %v5783_v54 = vadd.f32 %v8435_v43, %v8349_v35 }
 0x2ad   : > { %v6290_v36 = vpop.eup %6289  ;;  %v3546_v0 = vadd.f32 1.0, %v6288_v45  ;;  %6309 = vpow2.f32 %v4855_v32  ;;  %v8445_v1 = vpop.f32.mrb[85].mxu1  ;;  %2754 = vmatmul.mubr.f32.gmra.mrb[190].mxu1 %v7165_v25  ;;  %v7166_v32 = vld [vmem:[%s7555_s30 + $0x18] sm:$0xff] }
 0x2ae   : > { %v6292_v59 = vpop.eup %6291  ;;  %6311 = vtanh.f32 %v7946_v9  ;;  %v8443_v6 = vpop.f32.mrb[84].mxu0  ;;  %4186 = vmatprep.mubr.f32.mxu0 %v3922_v33  ;;  %2824 = vmatprep.mubr.f32.mxu1 %v7166_v32 }
 0x2af   : > { %v6294_v60 = vpop.eup %6293  ;;  %6313 = vrcp.f32 %v3546_v0  ;;  %v8448_v49 = vpop.f32.mrb[85].mxu0  ;;  %4187 = vmatmul.mubr.f32.gmra.mrb[132].mxu0 %v3921_v50  ;;  %v3925_v29 = vmul.f32 %v6292_v59, %v6290_v36  ;;  %v7167_v36 = vld [vmem:[%s7555_s30 + $0x10] sm:$0xff]  ;;  %v5784_v43 = vadd.f32 %v8443_v6, %v8346_v58 }
 0x2b0   : > { %v6296_v9 = vpop.eup %6295  ;;  %v3549_v47 = vadd.f32 1.0, %v6294_v60  ;;  %6315 = vpow2.f32 %v4858_v48  ;;  %v8453_v45 = vpop.f32.mrb[86].mxu1 }
 0x2b1   : > { %v6298_v53 = vpop.eup %6297  ;;  %6317 = vtanh.f32 %v7949_v2  ;;  %v8457_v25 = vpop.f32.mrb[87].mxu1  ;;  %2825 = vmatmul.mubr.f32.vlgmr.msra.gmra.mrb[128].mxu1 %v7167_v36  ;;  %v7168_v2 = vld [vmem:[%s7555_s30 + $0x38] sm:$0xff] }
 0x2b2   : > { %v6300_v33 = vpop.eup %6299  ;;  %6319 = vrcp.f32 %v3549_v47  ;;  %v8455_v0 = vpop.f32.mrb[86].mxu0  ;;  %v3926_v50 = vmul.f32 %v6298_v53, %v6296_v9  ;;  %9619 = vst [vmem:[#allocation50_spill] sm:$0xff] %v8457_v25  ;;  %2830 = vmatprep.mubr.f32.mxu1 %v7168_v2  ;;  %v4863_v47 = vmul.f32 -1.442695, %v5781_v37  ;;  %v7169_v2 = vld [vmem:[%s7555_s30 + $0x30] sm:$0xff] }
 0x2b3   : > { %v6302_v59 = vpop.eup %6301  ;;  %v3550_v48 = vadd.f32 1.0, %v6300_v33  ;;  %6321 = vpow2.f32 %v4859_v17  ;;  %v8460_v60 = vpop.f32.mrb[87].mxu0 }
 0x2b4   : > { %v6304_v44 = vpop.eup %6303  ;;  %6323 = vtanh.f32 %v7956_v5  ;;  %4191 = vmatprep.mubr.f32.mxu0 %v3926_v50  ;;  %v8465_v53 = vpop.f32.mrb[88].mxu1 }
 0x2b5   : > { %v6306_v32 = vpop.eup %6305  ;;  %6325 = vrcp.f32 %v3550_v48  ;;  %v3553_v9 = vadd.f32 1.0, %v6304_v44  ;;  %4192 = vmatmul.mubr.f32.gmra.mrb[134].mxu0 %v3925_v29  ;;  %v8469_v36 = vpop.f32.mrb[89].mxu1  ;;  %2831 = vmatmul.mubr.f32.gmra.mrb[130].mxu1 %v7169_v2  ;;  %v7170_v29 = vld [vmem:[%s7555_s30 + $0x58] sm:$0xff]  ;;  %v4866_v48 = vmul.f32 -1.442695, %v5782_v56 }
 0x2b6   : > { %v6308_v17 = vpop.eup %6307  ;;  %6327 = vpow2.f32 %v4862_v8  ;;  %v8467_v33 = vpop.f32.mrb[88].mxu0  ;;  %9620 = vst [vmem:[#allocation51_spill] sm:$0xff] %v8469_v36  ;;  %v3929_v5 = vmul.f32 %v6306_v32, %v6302_v59  ;;  %2836 = vmatprep.mubr.f32.mxu1 %v7170_v29  ;;  %v7171_v29 = vld [vmem:[%s7555_s30 + $0x50] sm:$0xff]  ;;  %v4867_v56 = vmul.f32 -1.442695, %v5783_v54 }
 0x2b7   : > { %v6310_v25 = vpop.eup %6309  ;;  %6329 = vrcp.f32 %v3553_v9  ;;  %v8474_v50 = vpop.f32.mrb[89].mxu0 }
 0x2b8   : > { %v6312_v37 = vpop.eup %6311  ;;  %6331 = vtanh.f32 %v7959_v7  ;;  %v3554_v8 = vadd.f32 1.0, %v6310_v25  ;;  %v8478_v2 = vpop.f32.mrb[90].mxu1 }
 0x2b9   : > { %v6314_v44 = vpop.eup %6313  ;;  %6333 = vpow2.f32 %v4863_v47  ;;  %9621 = vst [vmem:[#allocation52_spill] sm:$0xff] %v8478_v2  ;;  %v8484_v36 = vpop.f32.mrb[91].mxu1  ;;  %2837 = vmatmul.mubr.f32.gmra.mrb[132].mxu1 %v7171_v29  ;;  %v7172_v2 = vld [vmem:[%s7555_s30 + $0x78] sm:$0xff] }
 0x2ba   : > { %v6316_v59 = vpop.eup %6315  ;;  %6335 = vrcp.f32 %v3554_v8  ;;  %v3930_v32 = vmul.f32 %v6314_v44, %v6308_v17  ;;  %v8482_v9 = vpop.f32.mrb[90].mxu0  ;;  %9622 = vst [vmem:[#allocation53_spill] sm:$0xff] %v8484_v36  ;;  %2842 = vmatprep.mubr.f32.mxu1 %v7172_v2  ;;  %v5785_v17 = vadd.f32 %v8448_v49, %v8349_v35  ;;  %v7174_v49 = vld [vmem:[%s7555_s30 + $0x98] sm:$0xff] }
 0x2bb   : > { %v6318_v7 = vpop.eup %6317  ;;  %6337 = vtanh.f32 %v7966_v38  ;;  %v3557_v25 = vadd.f32 1.0, %v6316_v59  ;;  %v8488_v47 = vpop.f32.mrb[91].mxu0  ;;  %v4870_v59 = vmul.f32 -1.442695, %v5784_v43 }
 0x2bc   : > { %v6320_v8 = vpop.eup %6319  ;;  %6339 = vpow2.f32 %v4866_v48  ;;  %4196 = vmatprep.mubr.f32.mxu0 %v3930_v32  ;;  %v8493_v29 = vpop.f32.mrb[92].mxu1  ;;  %v7173_v48 = vld [vmem:[%s7555_s30 + $0x70] sm:$0xff] }
 0x2bd   : > { %v6322_v6 = vpop.eup %6321  ;;  %6341 = vrcp.f32 %v3557_v25  ;;  %4197 = vmatmul.mubr.f32.gmra.mrb[136].mxu0 %v3929_v5  ;;  %v3933_v44 = vmul.f32 %v6320_v8, %v6312_v37  ;;  %9623 = vst [vmem:[#allocation54_spill] sm:$0xff] %v8493_v29  ;;  %v8498_v36 = vpop.f32.mrb[93].mxu1  ;;  %2843 = vmatmul.mubr.f32.gmra.mrb[134].mxu1 %v7173_v48 }
 0x2be   : > { %v6324_v38 = vpop.eup %6323  ;;  %6343 = vtanh.f32 %v7969_v13  ;;  %v3558_v54 = vadd.f32 1.0, %v6322_v6  ;;  %v8496_v2 = vpop.f32.mrb[92].mxu0  ;;  %9624 = vst [vmem:[#allocation55_spill] sm:$0xff] %v8498_v36  ;;  %2848 = vmatprep.mubr.f32.mxu1 %v7174_v49  ;;  %v5786_v13 = vadd.f32 %v8455_v0, %v8346_v58  ;;  %v4871_v6 = vmul.f32 -1.442695, %v5785_v17  ;;  %v7176_v17 = vld [vmem:[%s7555_s30 + $0xb8] sm:$0xff] }
 0x2bf   : > { %v6326_v32 = vpop.eup %6325  ;;  %6345 = vpow2.f32 %v4867_v56  ;;  %v8501_v25 = vpop.f32.mrb[93].mxu0 }
 0x2c0   : > { %v6328_v5 = vpop.eup %6327  ;;  %6347 = vrcp.f32 %v3558_v54  ;;  %v3934_v37 = vmul.f32 %v6326_v32, %v6318_v7  ;;  %v8507_v48 = vpop.f32.mrb[94].mxu1  ;;  %v7175_v54 = vld [vmem:[%s7555_s30 + $0x90] sm:$0xff]  ;;  %v4874_v32 = vmul.f32 -1.442695, %v5786_v13 }
 0x2c1   : > { %v6330_v43 = vpop.eup %6329  ;;  %6349 = vtanh.f32 %v7976_v28  ;;  %v3561_v8 = vadd.f32 1.0, %v6328_v5  ;;  %v8511_v29 = vpop.f32.mrb[95].mxu1  ;;  %2849 = vmatmul.mubr.f32.gmra.mrb[136].mxu1 %v7175_v54  ;;  %v5787_v28 = vadd.f32 %v8460_v60, %v8349_v35  ;;  %v5788_v60 = vadd.f32 %v8467_v33, %v8346_v58 }
 0x2c2   : > { %v6332_v56 = vpop.eup %6331  ;;  %6351 = vpow2.f32 %v4870_v59  ;;  %4201 = vmatprep.mubr.f32.mxu0 %v3934_v37  ;;  %v3937_v36 = vmul.f32 %v6330_v43, %v6324_v38  ;;  %v8509_v49 = vpop.f32.mrb[94].mxu0  ;;  %2854 = vmatprep.mubr.f32.mxu1 %v7176_v17  ;;  %v7177_v17 = vld [vmem:[%s7555_s30 + $0xb0] sm:$0xff] }
 0x2c3   : > { %v6334_v0 = vpop.eup %6333  ;;  %6353 = vrcp.f32 %v3561_v8  ;;  %4202 = vmatmul.mubr.f32.gmra.mrb[138].mxu0 %v3933_v44  ;;  %v8516_v7 = vpop.f32.mrb[95].mxu0 }
 0x2c4   : > { %v6336_v59 = vpop.eup %6335  ;;  %6355 = vtanh.f32 %v7979_v18  ;;  %v3562_v38 = vadd.f32 1.0, %v6334_v0  ;;  %v8520_v43 = vpop.f32.mrb[96].mxu1  ;;  %v7178_v0 = vld [vmem:[%s7555_s30 + $0xd8] sm:$0xff] }
 0x2c5   : > { %v6338_v5 = vpop.eup %6337  ;;  %6357 = vpow2.f32 %v4871_v6  ;;  %v3938_v37 = vmul.f32 %v6336_v59, %v6332_v56  ;;  %v8526_v54 = vpop.f32.mrb[97].mxu1  ;;  %2855 = vmatmul.mubr.f32.gmra.mrb[138].mxu1 %v7177_v17  ;;  %v4875_v6 = vmul.f32 -1.442695, %v5787_v28  ;;  %v5789_v17 = vadd.f32 %v8474_v50, %v8349_v35 }
 0x2c6   : > { %v6340_v8 = vpop.eup %6339  ;;  %6359 = vrcp.f32 %v3562_v38  ;;  %v8524_v44 = vpop.f32.mrb[96].mxu0  ;;  %9625 = vst [vmem:[#allocation56_spill] sm:$0xff] %v8526_v54  ;;  %2860 = vmatprep.mubr.f32.mxu1 %v7178_v0 }
 0x2c7   : > { %v6342_v18 = vpop.eup %6341  ;;  %6361 = vtanh.f32 %v7986_v26  ;;  %v3565_v13 = vadd.f32 1.0, %v6340_v8  ;;  %4206 = vmatprep.mubr.f32.mxu0 %v3938_v37  ;;  %v8530_v56 = vpop.f32.mrb[97].mxu0  ;;  %v4878_v37 = vmul.f32 -1.442695, %v5788_v60 }
 0x2c8   : > { %v6344_v59 = vpop.eup %6343  ;;  %6363 = vpow2.f32 %v4874_v32  ;;  %4207 = vmatmul.mubr.f32.gmra.mrb[140].mxu0 %v3937_v36  ;;  %v3941_v33 = vmul.f32 %v6342_v18, %v6338_v5  ;;  %v8535_v54 = vpop.f32.mrb[98].mxu1  ;;  %v7179_v32 = vld [vmem:[%s7555_s30 + $0xd0] sm:$0xff] }
 0x2c9   : > { %v6346_v38 = vpop.eup %6345  ;;  %6365 = vrcp.f32 %v3565_v13  ;;  %v8540_v0 = vpop.f32.mrb[99].mxu1  ;;  %2861 = vmatmul.mubr.f32.gmra.mrb[140].mxu1 %v7179_v32  ;;  %v7180_v13 = vld [vmem:[%s7555_s30 + $0xf8] sm:$0xff] }
 0x2ca   : > { %v6348_v26 = vpop.eup %6347  ;;  %6367 = vtanh.f32 %v7989_v62  ;;  %v3566_v28 = vadd.f32 1.0, %v6346_v38  ;;  %v8538_v8 = vpop.f32.mrb[98].mxu0  ;;  %9626 = vst [vmem:[#allocation57_spill] sm:$0xff] %v8540_v0  ;;  %2866 = vmatprep.mubr.f32.mxu1 %v7180_v13  ;;  %v5790_v62 = vadd.f32 %v8482_v9, %v8346_v58  ;;  %v4879_v0 = vmul.f32 -1.442695, %v5789_v17  ;;  %v7182_v17 = vld [vmem:[%s7555_s30 + $0x118] sm:$0xff] }
 0x2cb   : > { %v6350_v36 = vpop.eup %6349  ;;  %6369 = vpow2.f32 %v4875_v6  ;;  %v3942_v5 = vmul.f32 %v6348_v26, %v6344_v59  ;;  %v8543_v18 = vpop.f32.mrb[99].mxu0 }
 0x2cc   : > { %v6352_v50 = vpop.eup %6351  ;;  %6371 = vrcp.f32 %v3566_v28  ;;  %v8549_v32 = vpop.f32.mrb[100].mxu1  ;;  %v7181_v28 = vld [vmem:[%s7555_s30 + $0xf0] sm:$0xff] }
 0x2cd   : > { %v6354_v60 = vpop.eup %6353  ;;  %6373 = vtanh.f32 %v7996_v12  ;;  %v3569_v38 = vadd.f32 1.0, %v6352_v50  ;;  %4211 = vmatprep.mubr.f32.mxu0 %v3942_v5  ;;  %9627 = vst [vmem:[#allocation58_spill] sm:$0xff] %v8549_v32  ;;  %v8553_v13 = vpop.f32.mrb[101].mxu1  ;;  %2867 = vmatmul.mubr.f32.gmra.mrb[142].mxu1 %v7181_v28  ;;  %v5791_v12 = vadd.f32 %v8488_v47, %v8349_v35  ;;  %v5792_v47 = vadd.f32 %v8496_v2, %v8346_v58 }
 0x2ce   : > { %v6356_v6 = vpop.eup %6355  ;;  %6375 = vpow2.f32 %v4878_v37  ;;  %4212 = vmatmul.mubr.f32.gmra.mrb[142].mxu0 %v3941_v33  ;;  %v3945_v59 = vmul.f32 %v6354_v60, %v6350_v36  ;;  %v8551_v26 = vpop.f32.mrb[100].mxu0  ;;  %9628 = vst [vmem:[#allocation59_spill] sm:$0xff] %v8553_v13  ;;  %2872 = vmatprep.mubr.f32.mxu1 %v7182_v17  ;;  %v4882_v37 = vmul.f32 -1.442695, %v5790_v62  ;;  %v7183_v17 = vld [vmem:[%s7555_s30 + $0x110] sm:$0xff] }
 0x2cf   : > { %v6358_v9 = vpop.eup %6357  ;;  %6377 = vrcp.f32 %v3569_v38  ;;  %v8558_v50 = vpop.f32.mrb[101].mxu0 }
 0x2d0   : > { %v6360_v5 = vpop.eup %6359  ;;  %6379 = vtanh.f32 %v7998_v63  ;;  %v3570_v33 = vadd.f32 1.0, %v6358_v9  ;;  %v8562_v28 = vpop.f32.mrb[102].mxu1  ;;  %v7184_v9 = vld [vmem:[%s7555_s30 + $0x138] sm:$0xff] }
 0x2d1   : > { %v6362_v36 = vpop.eup %6361  ;;  %6381 = vpow2.f32 %v4879_v0  ;;  %v3946_v60 = vmul.f32 %v6360_v5, %v6356_v6  ;;  %v8568_v32 = vpop.f32.mrb[103].mxu1  ;;  %2873 = vmatmul.mubr.f32.gmra.mrb[144].mxu1 %v7183_v17  ;;  %v4883_v0 = vmul.f32 -1.442695, %v5791_v12  ;;  %v5793_v17 = vadd.f32 %v8501_v25, %v8349_v35 }
 0x2d2   : > { %v6364_v38 = vpop.eup %6363  ;;  %6383 = vrcp.f32 %v3570_v33  ;;  %v8566_v13 = vpop.f32.mrb[102].mxu0  ;;  %9629 = vst [vmem:[#allocation60_spill] sm:$0xff] %v8568_v32  ;;  %2878 = vmatprep.mubr.f32.mxu1 %v7184_v9 }
 0x2d3   : > { %v6366_v63 = vpop.eup %6365  ;;  %6385 = vtanh.f32 %v8003_v14  ;;  %v3573_v62 = vadd.f32 1.0, %v6364_v38  ;;  %4216 = vmatprep.mubr.f32.mxu0 %v3946_v60  ;;  %v8572_v6 = vpop.f32.mrb[103].mxu0  ;;  %v4886_v60 = vmul.f32 -1.442695, %v5792_v47 }
 0x2d4   : > { %v6368_v5 = vpop.eup %6367  ;;  %6387 = vpow2.f32 %v4882_v37  ;;  %4217 = vmatmul.mubr.f32.gmra.mrb[144].mxu0 %v3945_v59  ;;  %v3949_v2 = vmul.f32 %v6366_v63, %v6362_v36  ;;  %v8577_v32 = vpop.f32.mrb[104].mxu1  ;;  %v7185_v37 = vld [vmem:[%s7555_s30 + $0x130] sm:$0xff] }
 0x2d5   : > { %v6370_v33 = vpop.eup %6369  ;;  %6389 = vrcp.f32 %v3573_v62  ;;  %9630 = vst [vmem:[#allocation61_spill] sm:$0xff] %v8577_v32  ;;  %v8582_v9 = vpop.f32.mrb[105].mxu1  ;;  %2879 = vmatmul.mubr.f32.gmra.mrb[146].mxu1 %v7185_v37  ;;  %v7186_v62 = vld [vmem:[%s7555_s30 + $0x158] sm:$0xff] }
 0x2d6   : > { %v6372_v14 = vpop.eup %6371  ;;  %6391 = vtanh.f32 %v8006_v46  ;;  %v3574_v12 = vadd.f32 1.0, %v6370_v33  ;;  %v8580_v38 = vpop.f32.mrb[104].mxu0  ;;  %9631 = vst [vmem:[#allocation62_spill] sm:$0xff] %v8582_v9  ;;  %2884 = vmatprep.mubr.f32.mxu1 %v7186_v62  ;;  %v5794_v46 = vadd.f32 %v8509_v49, %v8346_v58  ;;  %v4887_v9 = vmul.f32 -1.442695, %v5793_v17  ;;  %v7188_v17 = vld [vmem:[%s7555_s30 + $0x178] sm:$0xff] }
 0x2d7   : > { %v6374_v59 = vpop.eup %6373  ;;  %6393 = vpow2.f32 %v4883_v0  ;;  %v3950_v36 = vmul.f32 %v6372_v14, %v6368_v5  ;;  %v8585_v63 = vpop.f32.mrb[105].mxu0 }
 0x2d8   : > { %v6376_v25 = vpop.eup %6375  ;;  %6395 = vrcp.f32 %v3574_v12  ;;  %v8591_v37 = vpop.f32.mrb[106].mxu1  ;;  %v7187_v12 = vld [vmem:[%s7555_s30 + $0x150] sm:$0xff] }
 0x2d9   : > { %v6378_v47 = vpop.eup %6377  ;;  %6397 = vtanh.f32 %v8012_v19  ;;  %v3577_v33 = vadd.f32 1.0, %v6376_v25  ;;  %4221 = vmatprep.mubr.f32.mxu0 %v3950_v36  ;;  %9632 = vst [vmem:[#allocation63_spill] sm:$0xff] %v8591_v37  ;;  %v8595_v62 = vpop.f32.mrb[107].mxu1  ;;  %2885 = vmatmul.mubr.f32.gmra.mrb[148].mxu1 %v7187_v12  ;;  %v5795_v19 = vadd.f32 %v8516_v7, %v8349_v35  ;;  %v5796_v7 = vadd.f32 %v8524_v44, %v8346_v58 }
 0x2da   : > { %v6380_v0 = vpop.eup %6379  ;;  %6399 = vpow2.f32 %v4886_v60  ;;  %4222 = vmatmul.mubr.f32.gmra.mrb[146].mxu0 %v3949_v2  ;;  %v3953_v5 = vmul.f32 %v6378_v47, %v6374_v59  ;;  %v8593_v14 = vpop.f32.mrb[106].mxu0  ;;  %9633 = vst [vmem:[#allocation64_spill] sm:$0xff] %v8595_v62  ;;  %2890 = vmatprep.mubr.f32.mxu1 %v7188_v17  ;;  %v4890_v60 = vmul.f32 -1.442695, %v5794_v46  ;;  %v7189_v17 = vld [vmem:[%s7555_s30 + $0x170] sm:$0xff] }
 0x2db   : > { %v6382_v49 = vpop.eup %6381  ;;  %6401 = vrcp.f32 %v3577_v33  ;;  %v8600_v25 = vpop.f32.mrb[107].mxu0 }
 0x2dc   : > { %v6384_v36 = vpop.eup %6383  ;;  %6403 = vtanh.f32 %v8014_v34  ;;  %v3578_v2 = vadd.f32 1.0, %v6382_v49  ;;  %v8604_v62 = vpop.f32.mrb[108].mxu1  ;;  %v4073_v34 = vld [vmem:[%s9547_s4 + $0x100] sm:$0xff]  ;;  %v4891_v49 = vmul.f32 -1.442695, %v5795_v19 }
 0x2dd   : > { %v6386_v59 = vpop.eup %6385  ;;  %6405 = vpow2.f32 %v4887_v9  ;;  %v3954_v47 = vmul.f32 %v6384_v36, %v6380_v0  ;;  %9634 = vst [vmem:[#allocation65_spill] sm:$0xff] %v8604_v62  ;;  %v8610_v37 = vpop.f32.mrb[109].mxu1  ;;  %2891 = vmatmul.mubr.f32.gmra.mrb[150].mxu1 %v7189_v17  ;;  %v4074_v9 = vld [vmem:[%s9547_s4 + $0x108] sm:$0xff]  ;;  %v7190_v36 = vld [vmem:[%s7555_s30 + $0x198] sm:$0xff]  ;;  %v4075_v62 = vld [vmem:[%s9547_s4 + $0x110] sm:$0xff] }
 0x2de   : > { %v6388_v33 = vpop.eup %6387  ;;  %6407 = vrcp.f32 %v3578_v2  ;;  %v8608_v12 = vpop.f32.mrb[108].mxu0  ;;  %9635 = vst [vmem:[#allocation66_spill] sm:$0xff] %v8610_v37  ;;  %2896 = vmatprep.mubr.f32.mxu1 %v7190_v36  ;;  %v5525_v37 = vpack.c.bf16 %v4074_v9, %v4073_v34 }
 0x2df   : > { %v6390_v46 = vpop.eup %6389  ;;  %6409 = vtanh.f32 %v8020_v16  ;;  %v3581_v0 = vadd.f32 1.0, %v6388_v33  ;;  %4226 = vmatprep.mubr.f32.mxu0 %v3954_v47  ;;  %v8620_v44 = vpop.f32.mrb[109].mxu0  ;;  %v4076_v16 = vld [vmem:[%s9547_s4 + $0x118] sm:$0xff]  ;;  %v5797_v47 = vadd.f32 %v8530_v56, %v8349_v35 }
 0x2e0   : > { %v6392_v2 = vpop.eup %6391  ;;  %6411 = vpow2.f32 %v4890_v60  ;;  %4227 = vmatmul.mubr.f32.gmra.mrb[148].mxu0 %v3953_v5  ;;  %v3957_v17 = vmul.f32 %v6390_v46, %v6386_v59  ;;  %v8631_v33 = vpop.f32.mrb[110].mxu1  ;;  %v4894_v59 = vmul.f32 -1.442695, %v5796_v7  ;;  %v7191_v46 = vld [vmem:[%s7555_s30 + $0x190] sm:$0xff]  ;;  %v7192_v56 = vld [vmem:[%s7555_s30 + $0x1b8] sm:$0xff]  ;;  %v5798_v7 = vadd.f32 %v8538_v8, %v8346_v58  ;;  %v4078_v8 = vld [vmem:[%s9547_s4 + $0x128] sm:$0xff] }
 0x2e1   : > { %v6394_v19 = vpop.eup %6393  ;;  %6413 = vrcp.f32 %v3581_v0  ;;  %9636 = vst [vmem:[#allocation67_spill] sm:$0xff] %v8631_v33  ;;  %v8636_v9 = vpop.f32.mrb[111].mxu1  ;;  %2897 = vmatmul.mubr.f32.gmra.mrb[152].mxu1 %v7191_v46  ;;  %5526 = vmatpush1.bf16.msra.mxu0 %v5525_v37  ;;  %v5528_v33 = vpack.c.bf16 %v4076_v16, %v4075_v62  ;;  %v4895_v46 = vmul.f32 -1.442695, %v5797_v47 }
 0x2e2   : > { %v6396_v60 = vpop.eup %6395  ;;  %6415 = vtanh.f32 %v8022_v30  ;;  %v3582_v5 = vadd.f32 1.0, %v6394_v19  ;;  %v8634_v34 = vpop.f32.mrb[110].mxu0  ;;  %9637 = vst [vmem:[#allocation68_spill] sm:$0xff] %v8636_v9  ;;  %2902 = vmatprep.mubr.f32.mxu1 %v7192_v56  ;;  %5527 = vmatprep.subr.bf16.mxu0 %v9592_v21 }
 0x2e3   : > { %v6398_v36 = vpop.eup %6397  ;;  %6417 = vpow2.f32 %v4891_v49  ;;  %v3958_v0 = vmul.f32 %v6396_v60, %v6392_v2  ;;  %v8639_v32 = vpop.f32.mrb[111].mxu0 }
 0x2e4   : > { %v6400_v30 = vpop.eup %6399  ;;  %6419 = vrcp.f32 %v3582_v5  ;;  %v8646_v49 = vpop.f32.mrb[112].mxu1  ;;  %v7193_v5 = vld [vmem:[%s7555_s30 + $0x1b0] sm:$0xff] }
 0x2e5   : > { %v6402_v19 = vpop.eup %6401  ;;  %6421 = vtanh.f32 %v8028_v22  ;;  %v3585_v37 = vadd.f32 1.0, %v6400_v30  ;;  %4231 = vmatprep.mubr.f32.mxu0 %v3958_v0  ;;  %9638 = vst [vmem:[#allocation69_spill] sm:$0xff] %v8646_v49  ;;  %v8650_v16 = vpop.f32.mrb[113].mxu1  ;;  %2903 = vmatmul.mubr.f32.gmra.mrb[154].mxu1 %v7193_v5  ;;  %v4077_v22 = vld [vmem:[%s9547_s4 + $0x120] sm:$0xff]  ;;  %v4898_v30 = vmul.f32 -1.442695, %v5798_v7 }
 0x2e6   : > { %v6404_v2 = vpop.eup %6403  ;;  %6423 = vpow2.f32 %v4894_v59  ;;  %4232 = vmatmul.mubr.f32.gmra.mrb[150].mxu0 %v3957_v17  ;;  %v3961_v60 = vmul.f32 %v6402_v19, %v6398_v36  ;;  %v8648_v62 = vpop.f32.mrb[112].mxu0  ;;  %9639 = vst [vmem:[#allocation70_spill] sm:$0xff] %v8650_v16  ;;  %v5799_v17 = vadd.f32 %v8543_v18, %v8349_v35  ;;  %v7194_v36 = vld [vmem:[%s7555_s30 + $0x1d8] sm:$0xff]  ;;  %v5531_v16 = vpack.c.bf16 %v4078_v8, %v4077_v22  ;;  %v4079_v7 = vld [vmem:[%s9547_s4 + $0x130] sm:$0xff] }
 0x2e7   : > { %v6406_v47 = vpop.eup %6405  ;;  %6425 = vrcp.f32 %v3585_v37  ;;  %v8661_v59 = vpop.f32.mrb[113].mxu0  ;;  %2908 = vmatprep.mubr.f32.mxu1 %v7194_v36  ;;  %5529 = vmatpush1.bf16.msra.mxu0 %v5528_v33  ;;  %v5800_v37 = vadd.f32 %v8551_v26, %v8346_v58  ;;  %v4080_v26 = vld [vmem:[%s9547_s4 + $0x138] sm:$0xff] }
 0x2e8   : > { %v6408_v0 = vpop.eup %6407  ;;  %6427 = vtanh.f32 %v8030_v24  ;;  %v3586_v56 = vadd.f32 1.0, %v6406_v47  ;;  %5530 = vmatprep.subr.bf16.mxu0 %v9592_v21  ;;  %v8668_v18 = vpop.f32.mrb[114].mxu1  ;;  %v7195_v24 = vld [vmem:[%s7555_s30 + $0x1d0] sm:$0xff]  ;;  %v4899_v22 = vmul.f32 -1.442695, %v5799_v17  ;;  %v7196_v47 = vld [vmem:[%s7555_s30 + $0x1f8] sm:$0xff] }
 0x2e9   : > { %v6410_v19 = vpop.eup %6409  ;;  %6429 = vpow2.f32 %v4895_v46  ;;  %v3962_v5 = vmul.f32 %v6408_v0, %v6404_v2  ;;  %9640 = vst [vmem:[#allocation71_spill] sm:$0xff] %v8668_v18  ;;  %v8672_v49 = vpop.f32.mrb[115].mxu1  ;;  %2909 = vmatmul.mubr.f32.gmra.mrb[156].mxu1 %v7195_v24  ;;  %v5801_v18 = vadd.f32 %v8558_v50, %v8349_v35  ;;  %v4081_v50 = vld [vmem:[%s9547_s4 + $0x140] sm:$0xff] }
 0x2ea   : > { %v6412_v36 = vpop.eup %6411  ;;  %6431 = vrcp.f32 %v3586_v56  ;;  %v8670_v33 = vpop.f32.mrb[114].mxu0  ;;  %9641 = vst [vmem:[#allocation72_spill] sm:$0xff] %v8672_v49  ;;  %2914 = vmatprep.mubr.f32.mxu1 %v7196_v47  ;;  %v4902_v49 = vmul.f32 -1.442695, %v5800_v37 }
 0x2eb   : > { %v6414_v46 = vpop.eup %6413  ;;  %6433 = vtanh.f32 %v8036_v39  ;;  %v3589_v2 = vadd.f32 1.0, %v6412_v36  ;;  %4236 = vmatprep.mubr.f32.mxu0 %v3962_v5  ;;  %v8682_v8 = vpop.f32.mrb[115].mxu0  ;;  %5532 = vmatpush1.bf16.msra.mxu0 %v5531_v16  ;;  %v5534_v39 = vpack.c.bf16 %v4080_v26, %v4079_v7  ;;  %v4082_v16 = vld [vmem:[%s9547_s4 + $0x148] sm:$0xff]  ;;  %v7198_v7 = vld [vmem:[%s7555_s30 + $0x218] sm:$0xff] }
 0x2ec   : > { %v6416_v0 = vpop.eup %6415  ;;  %6435 = vpow2.f32 %v4898_v30  ;;  %4237 = vmatmul.mubr.f32.gmra.mrb[152].mxu0 %v3961_v60  ;;  %v3965_v56 = vmul.f32 %v6414_v46, %v6410_v19  ;;  %v8687_v9 = vpop.f32.mrb[116].mxu1  ;;  %v7197_v60 = vld [vmem:[%s7555_s30 + $0x1f0] sm:$0xff]  ;;  %5533 = vmatprep.subr.bf16.mxu0 %v9592_v21  ;;  %v5802_v46 = vadd.f32 %v8566_v13, %v8346_v58 }
 0x2ed   : > { %v6418_v24 = vpop.eup %6417  ;;  %6437 = vrcp.f32 %v3589_v2  ;;  %v8692_v30 = vpop.f32.mrb[117].mxu1  ;;  %2915 = vmatmul.mubr.f32.gmra.mrb[158].mxu1 %v7197_v60  ;;  %v7199_v13 = vld [vmem:[%s7555_s30 + $0x210] sm:$0xff] }
 0x2ee   : > { %v6420_v17 = vpop.eup %6419  ;;  %6439 = vtanh.f32 %v8038_v4  ;;  %v3590_v5 = vadd.f32 1.0, %v6418_v24  ;;  %v8690_v36 = vpop.f32.mrb[116].mxu0  ;;  %2920 = vmatprep.mubr.f32.mxu1 %v7198_v7  ;;  %v4903_v24 = vmul.f32 -1.442695, %v5801_v18  ;;  %v4084_v18 = vld [vmem:[%s9547_s4 + $0x158] sm:$0xff] }
 0x2ef   : > { %v6422_v19 = vpop.eup %6421  ;;  %6441 = vpow2.f32 %v4899_v22  ;;  %v3966_v4 = vmul.f32 %v6420_v17, %v6416_v0  ;;  %v8702_v37 = vpop.f32.mrb[117].mxu0  ;;  %5535 = vmatpush1.bf16.msra.mxu0 %v5534_v39  ;;  %v5537_v22 = vpack.c.bf16 %v4082_v16, %v4081_v50  ;;  %v7200_v50 = vld [vmem:[%s7555_s30 + $0x238] sm:$0xff] }
 0x2f0   : > { %v6424_v26 = vpop.eup %6423  ;;  %6443 = vrcp.f32 %v3590_v5  ;;  %v8708_v60 = vpop.f32.mrb[118].mxu1  ;;  %5536 = vmatprep.subr.bf16.mxu0 %v9592_v21 }
 0x2f1   : > { %v6426_v2 = vpop.eup %6425  ;;  %6445 = vtanh.f32 %v8044_v11  ;;  %v3593_v47 = vadd.f32 1.0, %v6424_v26  ;;  %4241 = vmatprep.mubr.f32.mxu0 %v3966_v4  ;;  %9642 = vst [vmem:[#allocation73_spill] sm:$0xff] %v8708_v60  ;;  %v8712_v7 = vpop.f32.mrb[119].mxu1  ;;  %2921 = vmatmul.mubr.f32.gmra.mrb[160].mxu1 %v7199_v13  ;;  %v4083_v11 = vld [vmem:[%s9547_s4 + $0x150] sm:$0xff]  ;;  %v4906_v4 = vmul.f32 -1.442695, %v5802_v46 }
 0x2f2   : > { %v6428_v0 = vpop.eup %6427  ;;  %6447 = vpow2.f32 %v4902_v49  ;;  %4242 = vmatmul.mubr.f32.gmra.mrb[154].mxu0 %v3965_v56  ;;  %v3969_v17 = vmul.f32 %v6426_v2, %v6422_v19  ;;  %v8710_v5 = vpop.f32.mrb[118].mxu0  ;;  %9643 = vst [vmem:[#allocation74_spill] sm:$0xff] %v8712_v7  ;;  %v5803_v49 = vadd.f32 %v8572_v6, %v8349_v35  ;;  %2926 = vmatprep.mubr.f32.mxu1 %v7200_v50  ;;  %v4086_v46 = vld [vmem:[%s9547_s4 + $0x168] sm:$0xff] }
 0x2f3   : > { %v6430_v39 = vpop.eup %6429  ;;  %6449 = vrcp.f32 %v3593_v47  ;;  %v8723_v56 = vpop.f32.mrb[119].mxu0  ;;  %v5804_v2 = vadd.f32 %v8580_v38, %v8346_v58  ;;  %5538 = vmatpush1.bf16.msra.mxu0 %v5537_v22  ;;  %v5540_v6 = vpack.c.bf16 %v4084_v18, %v4083_v11  ;;  %v4085_v38 = vld [vmem:[%s9547_s4 + $0x160] sm:$0xff] }
 0x2f4   : > { %v6432_v16 = vpop.eup %6431  ;;  %6451 = vtanh.f32 %v8046_v27  ;;  %v3594_v19 = vadd.f32 1.0, %v6430_v39  ;;  %v8730_v13 = vpop.f32.mrb[120].mxu1  ;;  %v7201_v27 = vld [vmem:[%s7555_s30 + $0x230] sm:$0xff]  ;;  %5539 = vmatprep.subr.bf16.mxu0 %v9592_v21  ;;  %v7202_v18 = vld [vmem:[%s7555_s30 + $0x258] sm:$0xff] }
 0x2f5   : > { %v6434_v26 = vpop.eup %6433  ;;  %6453 = vpow2.f32 %v4903_v24  ;;  %v3970_v47 = vmul.f32 %v6432_v16, %v6428_v0  ;;  %9644 = vst [vmem:[#allocation75_spill] sm:$0xff] %v8730_v13  ;;  %v8734_v60 = vpop.f32.mrb[121].mxu1  ;;  %2927 = vmatmul.mubr.f32.gmra.mrb[162].mxu1 %v7201_v27  ;;  %v4907_v0 = vmul.f32 -1.442695, %v5803_v49  ;;  %v4910_v27 = vmul.f32 -1.442695, %v5804_v2 }
 0x2f6   : > { %v6436_v50 = vpop.eup %6435  ;;  %6455 = vrcp.f32 %v3594_v19  ;;  %v8732_v7 = vpop.f32.mrb[120].mxu0  ;;  %9645 = vst [vmem:[#allocation76_spill] sm:$0xff] %v8734_v60  ;;  %2932 = vmatprep.mubr.f32.mxu1 %v7202_v18  ;;  %v5805_v60 = vadd.f32 %v8585_v63, %v8349_v35  ;;  %v4087_v63 = vld [vmem:[%s9547_s4 + $0x170] sm:$0xff] }
 0x2f7   : > { %v6438_v24 = vpop.eup %6437  ;;  %6457 = vtanh.f32 %v8052_v20  ;;  %v3597_v22 = vadd.f32 1.0, %v6436_v50  ;;  %4246 = vmatprep.mubr.f32.mxu0 %v3970_v47  ;;  %v8745_v11 = vpop.f32.mrb[121].mxu0  ;;  %5541 = vmatpush1.bf16.msra.mxu0 %v5540_v6  ;;  %v5543_v20 = vpack.c.bf16 %v4086_v46, %v4085_v38  ;;  %v7204_v38 = vld [vmem:[%s7555_s30 + $0x278] sm:$0xff] }
 0x2f8   : > { %v6440_v39 = vpop.eup %6439  ;;  %6459 = vpow2.f32 %v4906_v4  ;;  %4247 = vmatmul.mubr.f32.gmra.mrb[156].mxu0 %v3969_v17  ;;  %v3973_v16 = vmul.f32 %v6438_v24, %v6434_v26  ;;  %v8750_v13 = vpop.f32.mrb[122].mxu1  ;;  %v7203_v17 = vld [vmem:[%s7555_s30 + $0x250] sm:$0xff]  ;;  %5542 = vmatprep.subr.bf16.mxu0 %v9592_v21  ;;  %v5806_v24 = vadd.f32 %v8593_v14, %v8346_v58 }
 0x2f9   : > { %v6442_v19 = vpop.eup %6441  ;;  %6461 = vrcp.f32 %v3597_v22  ;;  %v8755_v4 = vpop.f32.mrb[123].mxu1  ;;  %2933 = vmatmul.mubr.f32.gmra.mrb[164].mxu1 %v7203_v17  ;;  %v4088_v26 = vld [vmem:[%s9547_s4 + $0x178] sm:$0xff] }
 0x2fa   : > { %v6444_v49 = vpop.eup %6443  ;;  %6463 = vtanh.f32 %v8054_v51  ;;  %v3598_v47 = vadd.f32 1.0, %v6442_v19  ;;  %v8753_v50 = vpop.f32.mrb[122].mxu0  ;;  %9646 = vst [vmem:[#allocation77_spill] sm:$0xff] %v8755_v4  ;;  %2938 = vmatprep.mubr.f32.mxu1 %v7204_v38  ;;  %v4911_v19 = vmul.f32 -1.442695, %v5805_v60  ;;  %v7205_v14 = vld [vmem:[%s7555_s30 + $0x270] sm:$0xff] }
 0x2fb   : > { %v6446_v2 = vpop.eup %6445  ;;  %6465 = vpow2.f32 %v4907_v0  ;;  %v3974_v51 = vmul.f32 %v6444_v49, %v6440_v39  ;;  %v8765_v6 = vpop.f32.mrb[123].mxu0  ;;  %5544 = vmatpush1.bf16.msra.mxu0 %v5543_v20  ;;  %v5546_v0 = vpack.c.bf16 %v4088_v26, %v4087_v63  ;;  %v4090_v60 = vld [vmem:[%s9547_s4 + $0x188] sm:$0xff]  ;;  %v7206_v63 = vld [vmem:[%s7555_s30 + $0x298] sm:$0xff]  ;;  %v7209_v4 = vld [vmem:[%s7555_s30 + $0x2b0] sm:$0xff] }
 0x2fc   : > { %v6448_v46 = vpop.eup %6447  ;;  %6467 = vrcp.f32 %v3598_v47  ;;  %v8771_v17 = vpop.f32.mrb[124].mxu1  ;;  %5545 = vmatprep.subr.bf16.mxu0 %v9592_v21 }
 0x2fd   : > { %v6450_v22 = vpop.eup %6449  ;;  %6469 = vtanh.f32 %v8060_v61  ;;  %v3601_v18 = vadd.f32 1.0, %v6448_v46  ;;  %4251 = vmatprep.mubr.f32.mxu0 %v3974_v51  ;;  %9647 = vst [vmem:[#allocation78_spill] sm:$0xff] %v8771_v17  ;;  %v8775_v38 = vpop.f32.mrb[125].mxu1  ;;  %2939 = vmatmul.mubr.f32.gmra.mrb[166].mxu1 %v7205_v14  ;;  %v4089_v61 = vld [vmem:[%s9547_s4 + $0x180] sm:$0xff]  ;;  %v4914_v51 = vmul.f32 -1.442695, %v5806_v24 }
 0x2fe   : > { %v6452_v39 = vpop.eup %6451  ;;  %6471 = vpow2.f32 %v4910_v27  ;;  %4252 = vmatmul.mubr.f32.gmra.mrb[158].mxu0 %v3973_v16  ;;  %v3977_v49 = vmul.f32 %v6450_v22, %v6446_v2  ;;  %v8773_v47 = vpop.f32.mrb[124].mxu0  ;;  %9648 = vst [vmem:[#allocation79_spill] sm:$0xff] %v8775_v38  ;;  %v5807_v16 = vadd.f32 %v8600_v25, %v8349_v35  ;;  %2944 = vmatprep.mubr.f32.mxu1 %v7206_v63  ;;  %v4091_v24 = vld [vmem:[%s9547_s4 + $0x190] sm:$0xff] }
 0x2ff   : > { %v6454_v20 = vpop.eup %6453  ;;  %6473 = vrcp.f32 %v3601_v18  ;;  %v8786_v27 = vpop.f32.mrb[125].mxu0  ;;  %5547 = vmatpush1.bf16.msra.mxu0 %v5546_v0  ;;  %v5549_v18 = vpack.c.bf16 %v4090_v60, %v4089_v61  ;;  %v5808_v63 = vadd.f32 %v8608_v12, %v8346_v58 }
 0x300   : > { %v6456_v26 = vpop.eup %6455  ;;  %6475 = vtanh.f32 %v8062_v57  ;;  %v3602_v2 = vadd.f32 1.0, %v6454_v20  ;;  %v8791_v14 = vpop.f32.mrb[126].mxu1  ;;  %v7207_v57 = vld [vmem:[%s7555_s30 + $0x290] sm:$0xff]  ;;  %5548 = vmatprep.subr.bf16.mxu0 %v9592_v21  ;;  %v4915_v61 = vmul.f32 -1.442695, %v5807_v16  ;;  %v7208_v20 = vld [vmem:[%s7555_s30 + $0x2b8] sm:$0xff] }
 0x301   : > { %v6458_v46 = vpop.eup %6457  ;;  %6477 = vpow2.f32 %v4911_v19  ;;  %v3978_v22 = vmul.f32 %v6456_v26, %v6452_v39  ;;  %9649 = vst [vmem:[#allocation80_spill] sm:$0xff] %v8791_v14  ;;  %v8797_v17 = vpop.f32.mrb[127].mxu1  ;;  %2945 = vmatmul.mubr.f32.gmra.mrb[168].mxu1 %v7207_v57  ;;  %v4092_v19 = vld [vmem:[%s9547_s4 + $0x198] sm:$0xff]  ;;  %v9651_v39 = vld [vmem:[#allocation12_spill] sm:$0xff]  ;;  %v4918_v14 = vmul.f32 -1.442695, %v5808_v63 }
 0x302   : > { %v6460_v25 = vpop.eup %6459  ;;  %6479 = vrcp.f32 %v3602_v2  ;;  %v8795_v38 = vpop.f32.mrb[126].mxu0  ;;  %9650 = vst [vmem:[#allocation81_spill] sm:$0xff] %v8797_v17  ;;  %2950 = vmatprep.mubr.f32.mxu1 %v7208_v20  ;;  %v5809_v17 = vadd.f32 %v8620_v44, %v8349_v35  ;;  %v9652_v16 = vld [vmem:[#allocation13_spill] sm:$0xff] }
 0x303   : > { %v6462_v0 = vpop.eup %6461  ;;  %6481 = vtanh.f32 %v9651_v39  ;;  %v3605_v12 = vadd.f32 1.0, %v6460_v25  ;;  %4256 = vmatprep.mubr.f32.mxu0 %v3978_v22  ;;  %v8808_v60 = vpop.f32.mrb[127].mxu0  ;;  %5550 = vmatpush1.bf16.msra.mxu0 %v5549_v18  ;;  %v5552_v39 = vpack.c.bf16 %v4092_v19, %v4091_v24  ;;  %v7210_v18 = vld [vmem:[%s7555_s30 + $0x2d8] sm:$0xff] }
 0x304   : > { %v6464_v26 = vpop.eup %6463  ;;  %6483 = vpow2.f32 %v4914_v51  ;;  %4257 = vmatmul.mubr.f32.gmra.mrb[160].mxu0 %v3977_v49  ;;  %v3981_v2 = vmul.f32 %v6462_v0, %v6458_v46  ;;  %5551 = vmatprep.subr.bf16.mxu0 %v9592_v21  ;;  %v4093_v49 = vld [vmem:[%s9547_s4 + $0x1a0] sm:$0xff]  ;;  %v4094_v51 = vld [vmem:[%s9547_s4 + $0x1a8] sm:$0xff] }
 0x305   : > { %v6466_v57 = vpop.eup %6465  ;;  %6485 = vrcp.f32 %v3605_v12  ;;  %2951 = vmatmul.mubr.f32.gmra.mrb[170].mxu1 %v7209_v4  ;;  %v5810_v4 = vadd.f32 %v8634_v34, %v8346_v58  ;;  %v9653_v19 = vld [vmem:[#allocation14_spill] sm:$0xff]  ;;  %v4919_v12 = vmul.f32 -1.442695, %v5809_v17  ;;  %v5555_v20 = vpack.c.bf16 %v4094_v51, %v4093_v49 }
 0x306   : > { %v6468_v25 = vpop.eup %6467  ;;  %6487 = vtanh.f32 %v9652_v16  ;;  %v3606_v22 = vadd.f32 1.0, %v6466_v57  ;;  %2956 = vmatprep.mubr.f32.mxu1 %v7210_v18  ;;  %v4096_v34 = vld [vmem:[%s9547_s4 + $0x1b8] sm:$0xff]  ;;  %v5811_v17 = vadd.f32 %v8639_v32, %v8349_v35  ;;  %v5812_v32 = vadd.f32 %v8648_v62, %v8346_v58 }
 0x307   : > { %v6470_v44 = vpop.eup %6469  ;;  %6489 = vpow2.f32 %v4915_v61  ;;  %v3982_v46 = vmul.f32 %v6468_v25, %v6464_v26  ;;  %5553 = vmatpush1.bf16.msra.mxu0 %v5552_v39  ;;  %v7211_v26 = vld [vmem:[%s7555_s30 + $0x2d0] sm:$0xff]  ;;  %v7212_v39 = vld [vmem:[%s7555_s30 + $0x2f8] sm:$0xff]  ;;  %v4922_v49 = vmul.f32 -1.442695, %v5810_v4  ;;  %v5813_v62 = vadd.f32 %v8661_v59, %v8349_v35 }
 0x308   : > { %v6472_v24 = vpop.eup %6471  ;;  %6491 = vrcp.f32 %v3606_v22  ;;  %v4095_v25 = vld [vmem:[%s9547_s4 + $0x1b0] sm:$0xff]  ;;  %5554 = vmatprep.subr.bf16.mxu0 %v9592_v21  ;;  %v4923_v4 = vmul.f32 -1.442695, %v5811_v17  ;;  %v4926_v17 = vmul.f32 -1.442695, %v5812_v32  ;;  %v5814_v59 = vadd.f32 %v8670_v33, %v8346_v58 }
 0x309   : > { %v6474_v63 = vpop.eup %6473  ;;  %6493 = vtanh.f32 %v9653_v19  ;;  %v3609_v0 = vadd.f32 1.0, %v6472_v24  ;;  %4261 = vmatprep.mubr.f32.mxu0 %v3982_v46  ;;  %2957 = vmatmul.mubr.f32.gmra.mrb[172].mxu1 %v7211_v26  ;;  %v5558_v46 = vpack.c.bf16 %v4096_v34, %v4095_v25  ;;  %v7213_v24 = vld [vmem:[%s7555_s30 + $0x2f0] sm:$0xff]  ;;  %v9656_v34 = vld [vmem:[#allocation18_spill] sm:$0xff] }
 0x30a   : > { %v6476_v57 = vpop.eup %6475  ;;  %6495 = vpow2.f32 %v4918_v14  ;;  %4262 = vmatmul.mubr.f32.gmra.mrb[162].mxu0 %v3981_v2  ;;  %v3985_v61 = vmul.f32 %v6474_v63, %v6470_v44  ;;  %2962 = vmatprep.mubr.f32.mxu1 %v7212_v39  ;;  %v9654_v2 = vld [vmem:[#allocation16_spill] sm:$0xff]  ;;  %v9655_v19 = vld [vmem:[#allocation17_spill] sm:$0xff] }
 0x30b   : > { %v6478_v16 = vpop.eup %6477  ;;  %6497 = vrcp.f32 %v3609_v0  ;;  %5556 = vmatpush1.bf16.msra.mxu0 %v5555_v20  ;;  %v7215_v39 = vld [vmem:[%s7555_s30 + $0x310] sm:$0xff] }
 0x30c   : > { %v6480_v14 = vpop.eup %6479  ;;  %6499 = vtanh.f32 %v9654_v2  ;;  %v3610_v22 = vadd.f32 1.0, %v6478_v16  ;;  %5557 = vmatprep.subr.bf16.mxu0 %v9592_v21  ;;  %v7216_v2 = vld [vmem:[%s7555_s30 + $0x338] sm:$0xff] }
 0x30d   : > { %v6482_v51 = vpop.eup %6481  ;;  %6501 = vpow2.f32 %v4919_v12  ;;  %v3986_v44 = vmul.f32 %v6480_v14, %v6476_v57  ;;  %2963 = vmatmul.mubr.f32.gmra.mrb[174].mxu1 %v7213_v24  ;;  %v7214_v12 = vld [vmem:[%s7555_s30 + $0x318] sm:$0xff]  ;;  %v7217_v24 = vld [vmem:[%s7555_s30 + $0x330] sm:$0xff] }
 0x30e   : > { %v6484_v18 = vpop.eup %6483  ;;  %6503 = vrcp.f32 %v3610_v22  ;;  %2968 = vmatprep.mubr.f32.mxu1 %v7214_v12 }
 0x30f   : > { %v6486_v63 = vpop.eup %6485  ;;  %6505 = vtanh.f32 %v9655_v19  ;;  %v3613_v0 = vadd.f32 1.0, %v6484_v18  ;;  %4266 = vmatprep.mubr.f32.mxu0 %v3986_v44  ;;  %5559 = vmatpush1.bf16.msra.mxu0 %v5558_v46  ;;  %v4927_v46 = vmul.f32 -1.442695, %v5813_v62  ;;  %v5815_v19 = vadd.f32 %v8682_v8, %v8349_v35 }
 0x310   : > { %v6488_v20 = vpop.eup %6487  ;;  %6507 = vpow2.f32 %v4922_v49  ;;  %4267 = vmatmul.mubr.f32.gmra.mrb[164].mxu0 %v3985_v61  ;;  %v3989_v57 = vmul.f32 %v6486_v63, %v6482_v51  ;;  %5560 = vmatprep.subr.bf16.mxu0 %v9592_v21  ;;  %v9657_v51 = vld [vmem:[#allocation19_spill] sm:$0xff] }
 0x311   : > { %v6490_v26 = vpop.eup %6489  ;;  %6509 = vrcp.f32 %v3613_v0  ;;  %2969 = vmatmul.mubr.f32.gmra.mrb[176].mxu1 %v7215_v39  ;;  %v7218_v0 = vld [vmem:[%s7555_s30 + $0x358] sm:$0xff] }
 0x312   : > { %v6492_v25 = vpop.eup %6491  ;;  %6511 = vtanh.f32 %v9656_v34  ;;  %v3614_v16 = vadd.f32 1.0, %v6490_v26  ;;  %2974 = vmatprep.mubr.f32.mxu1 %v7216_v2  ;;  %v4098_v26 = vld [vmem:[%s9547_s4 + $0x1c8] sm:$0xff]  ;;  %v4931_v2 = vmul.f32 -1.442695, %v5815_v19 }
 0x313   : > { %v6494_v14 = vpop.eup %6493  ;;  %6513 = vpow2.f32 %v4923_v4  ;;  %v3990_v61 = vmul.f32 %v6492_v25, %v6488_v20  ;;  %v9658_v4 = vld [vmem:[#allocation20_spill] sm:$0xff]  ;;  %v4930_v20 = vmul.f32 -1.442695, %v5814_v59 }
 0x314   : > { %v6496_v22 = vpop.eup %6495  ;;  %6515 = vrcp.f32 %v3614_v16  ;;  %v5816_v16 = vadd.f32 %v8690_v36, %v8346_v58  ;;  %v5817_v36 = vadd.f32 %v8702_v37, %v8349_v35  ;;  %v5818_v37 = vadd.f32 %v8710_v5, %v8346_v58 }
 0x315   : > { %v6498_v49 = vpop.eup %6497  ;;  %6517 = vtanh.f32 %v9657_v51  ;;  %v3617_v44 = vadd.f32 1.0, %v6496_v22  ;;  %4271 = vmatprep.mubr.f32.mxu0 %v3990_v61  ;;  %2975 = vmatmul.mubr.f32.gmra.mrb[178].mxu1 %v7217_v24  ;;  %v7220_v22 = vld [vmem:[%s7555_s30 + $0x378] sm:$0xff] }
 0x316   : > { %v6500_v18 = vpop.eup %6499  ;;  %6519 = vpow2.f32 %v4926_v17  ;;  %4272 = vmatmul.mubr.f32.gmra.mrb[166].mxu0 %v3989_v57  ;;  %v3993_v32 = vmul.f32 %v6498_v49, %v6494_v14  ;;  %2980 = vmatprep.mubr.f32.mxu1 %v7218_v0  ;;  %v4097_v57 = vld [vmem:[%s9547_s4 + $0x1c0] sm:$0xff]  ;;  %v7219_v17 = vld [vmem:[%s7555_s30 + $0x350] sm:$0xff]  ;;  %v4934_v24 = vmul.f32 -1.442695, %v5816_v16  ;;  %v5819_v16 = vadd.f32 %v8723_v56, %v8349_v35 }
 0x317   : > { %v6502_v63 = vpop.eup %6501  ;;  %6521 = vrcp.f32 %v3617_v44  ;;  %v5561_v25 = vpack.c.bf16 %v4098_v26, %v4097_v57  ;;  %v9659_v14 = vld [vmem:[#allocation21_spill] sm:$0xff]  ;;  %v7222_v0 = vld [vmem:[%s7555_s30 + $0x398] sm:$0xff]  ;;  %v4935_v26 = vmul.f32 -1.442695, %v5817_v36 }
 0x318   : > { %v6504_v33 = vpop.eup %6503  ;;  %6523 = vtanh.f32 %v9658_v4  ;;  %v3618_v12 = vadd.f32 1.0, %v6502_v63  ;;  %v7221_v63 = vld [vmem:[%s7555_s30 + $0x370] sm:$0xff] }
 0x319   : > { %v6506_v62 = vpop.eup %6505  ;;  %6525 = vpow2.f32 %v4927_v46  ;;  %v3994_v8 = vmul.f32 %v6504_v33, %v6500_v18  ;;  %2981 = vmatmul.mubr.f32.gmra.mrb[180].mxu1 %v7219_v17  ;;  %5562 = vmatpush1.bf16.msra.mxu0 %v5561_v25  ;;  %v9660_v46 = vld [vmem:[#allocation22_spill] sm:$0xff]  ;;  %v4099_v4 = vld [vmem:[%s9547_s4 + $0x1d0] sm:$0xff] }
 0x31a   : > { %v6508_v34 = vpop.eup %6507  ;;  %6527 = vrcp.f32 %v3618_v12  ;;  %2986 = vmatprep.mubr.f32.mxu1 %v7220_v22  ;;  %5563 = vmatprep.subr.bf16.mxu0 %v9592_v21  ;;  %v4100_v12 = vld [vmem:[%s9547_s4 + $0x1d8] sm:$0xff] }
 0x31b   : > { %v6510_v39 = vpop.eup %6509  ;;  %6529 = vtanh.f32 %v9659_v14  ;;  %v3621_v61 = vadd.f32 1.0, %v6508_v34  ;;  %4276 = vmatprep.mubr.f32.mxu0 %v3994_v8  ;;  %v7223_v25 = vld [vmem:[%s7555_s30 + $0x390] sm:$0xff]  ;;  %v7224_v17 = vld [vmem:[%s7555_s30 + $0x3b8] sm:$0xff] }
 0x31c   : > { %v6512_v59 = vpop.eup %6511  ;;  %6531 = vpow2.f32 %v4930_v20  ;;  %4277 = vmatmul.mubr.f32.gmra.mrb[168].mxu0 %v3993_v32  ;;  %v3997_v49 = vmul.f32 %v6510_v39, %v6506_v62  ;;  %v5564_v62 = vpack.c.bf16 %v4100_v12, %v4099_v4  ;;  %v9661_v39 = vld [vmem:[#allocation23_spill] sm:$0xff]  ;;  %v7225_v56 = vld [vmem:[%s7555_s30 + $0x3b0] sm:$0xff] }
 0x31d   : > { %v6514_v51 = vpop.eup %6513  ;;  %6533 = vrcp.f32 %v3621_v61  ;;  %2987 = vmatmul.mubr.f32.gmra.mrb[182].mxu1 %v7221_v63  ;;  %v4938_v61 = vmul.f32 -1.442695, %v5818_v37  ;;  %v4102_v37 = vld [vmem:[%s9547_s4 + $0x1e8] sm:$0xff] }
 0x31e   : > { %v6516_v44 = vpop.eup %6515  ;;  %6535 = vtanh.f32 %v9660_v46  ;;  %v3622_v18 = vadd.f32 1.0, %v6514_v51  ;;  %2992 = vmatprep.mubr.f32.mxu1 %v7222_v0  ;;  %5565 = vmatpush1.bf16.msra.mxu0 %v5564_v62  ;;  %v7226_v46 = vld [vmem:[%s7555_s30 + $0x3d8] sm:$0xff]  ;;  %v7227_v0 = vld [vmem:[%s7555_s30 + $0x3d0] sm:$0xff] }
 0x31f   : > { %v6518_v19 = vpop.eup %6517  ;;  %6537 = vpow2.f32 %v4931_v2  ;;  %v3998_v32 = vmul.f32 %v6516_v44, %v6512_v59  ;;  %5566 = vmatprep.subr.bf16.mxu0 %v9592_v21  ;;  %v4939_v44 = vmul.f32 -1.442695, %v5819_v16 }
 0x320   : > { %v6520_v33 = vpop.eup %6519  ;;  %6539 = vrcp.f32 %v3622_v18 }
 0x321   : > { %v6522_v20 = vpop.eup %6521  ;;  %6541 = vtanh.f32 %v8114_v3  ;;  %v3625_v57 = vadd.f32 1.0, %v6520_v33  ;;  %4281 = vmatprep.mubr.f32.mxu0 %v3998_v32  ;;  %2993 = vmatmul.mubr.f32.gmra.mrb[184].mxu1 %v7223_v25  ;;  %v4101_v33 = vld [vmem:[%s9547_s4 + $0x1e0] sm:$0xff] }
 0x322   : > { %v6524_v8 = vpop.eup %6523  ;;  %6543 = vpow2.f32 %v4934_v24  ;;  %4282 = vmatmul.mubr.f32.gmra.mrb[170].mxu0 %v3997_v49  ;;  %v4001_v5 = vmul.f32 %v6522_v20, %v6518_v19  ;;  %2998 = vmatprep.mubr.f32.mxu1 %v7224_v17  ;;  %v5820_v49 = vadd.f32 %v8732_v7, %v8346_v58  ;;  %v5821_v7 = vadd.f32 %v8745_v11, %v8349_v35  ;;  %v7228_v20 = vld [vmem:[%s7555_s30 + $0x3f8] sm:$0xff] }
 0x323   : > { %v6526_v34 = vpop.eup %6525  ;;  %6545 = vrcp.f32 %v3625_v57  ;;  %v5567_v11 = vpack.c.bf16 %v4102_v37, %v4101_v33  ;;  %v5822_v57 = vadd.f32 %v8753_v50, %v8346_v58  ;;  %v5823_v17 = vadd.f32 %v8765_v6, %v8349_v35  ;;  %v9664_v33 = vld [vmem:[#allocation26_spill] sm:$0xff] }
 0x324   : > { %v6528_v3 = vpop.eup %6527  ;;  %6547 = vtanh.f32 %v9661_v39  ;;  %v3626_v14 = vadd.f32 1.0, %v6526_v34  ;;  %v4942_v32 = vmul.f32 -1.442695, %v5820_v49  ;;  %v7229_v34 = vld [vmem:[%s7555_s30 + $0x3f0] sm:$0xff] }
 0x325   : > { %v6530_v2 = vpop.eup %6529  ;;  %6549 = vpow2.f32 %v4935_v26  ;;  %v4002_v22 = vmul.f32 %v6528_v3, %v6524_v8  ;;  %2999 = vmatmul.mubr.f32.gmra.mrb[186].mxu1 %v7225_v56  ;;  %v4943_v8 = vmul.f32 -1.442695, %v5821_v7  ;;  %5568 = vmatpush1.bf16.msra.mxu0 %v5567_v11  ;;  %v4946_v3 = vmul.f32 -1.442695, %v5822_v57  ;;  %v9665_v57 = vld [vmem:[#allocation27_spill] sm:$0xff] }
 0x326   : > { %v6532_v59 = vpop.eup %6531  ;;  %6551 = vrcp.f32 %v3626_v14  ;;  %3004 = vmatprep.mubr.f32.mxu1 %v7226_v46  ;;  %5569 = vmatprep.subr.bf16.mxu0 %v9592_v21  ;;  %v5824_v21 = vadd.f32 %v8773_v47, %v8346_v58  ;;  %v4947_v56 = vmul.f32 -1.442695, %v5823_v17  ;;  %v5825_v46 = vadd.f32 %v8786_v27, %v8349_v35 }
 0x327   : > { %v6534_v51 = vpop.eup %6533  ;;  %6553 = vtanh.f32 %v8129_v10  ;;  %v3629_v36 = vadd.f32 1.0, %v6532_v59  ;;  %4286 = vmatprep.mubr.f32.mxu0 %v4002_v22  ;;  %v9662_v59 = vld [vmem:[#allocation24_spill] sm:$0xff]  ;;  %v5827_v11 = vadd.f32 %v8808_v60, %v8349_v35 }
 0x328   : > { %v6536_v18 = vpop.eup %6535  ;;  %6555 = vpow2.f32 %v4938_v61  ;;  %4287 = vmatmul.mubr.f32.gmra.mrb[172].mxu0 %v4001_v5  ;;  %v4005_v24 = vmul.f32 %v6534_v51, %v6530_v2  ;;  %v4103_v61 = vld [vmem:[%s9547_s4 + $0x1f0] sm:$0xff]  ;;  %v4104_v2 = vld [vmem:[%s9547_s4 + $0x1f8] sm:$0xff] }
 0x329   : > { %v6538_v63 = vpop.eup %6537  ;;  %6557 = vrcp.f32 %v3629_v36  ;;  %3005 = vmatmul.mubr.f32.gmra.mrb[188].mxu1 %v7227_v0  ;;  %v5570_v6 = vpack.c.bf16 %v4104_v2, %v4103_v61 }
 0x32a   : > { %v6540_v19 = vpop.eup %6539  ;;  %6559 = vtanh.f32 %v8131_v15  ;;  %v3630_v10 = vadd.f32 1.0, %v6538_v63  ;;  %3010 = vmatprep.mubr.f32.mxu1 %v7228_v20  ;;  %v4950_v63 = vmul.f32 -1.442695, %v5824_v21 }
 0x32b   : > { %v6542_v4 = vpop.eup %6541  ;;  %6561 = vpow2.f32 %v4939_v44  ;;  %v4006_v12 = vmul.f32 %v6540_v19, %v6536_v18  ;;  %5571 = vmatpush1.bf16.msra.mxu0 %v5570_v6  ;;  %v9668_v6 = vld [vmem:[#allocation30_spill] sm:$0xff] }
 0x32c   : > { %v6544_v15 = vpop.eup %6543  ;;  %6563 = vrcp.f32 %v3630_v10 }
 0x32d   : > { %v6546_v26 = vpop.eup %6545  ;;  %6565 = vtanh.f32 %v8144_v41  ;;  %v3633_v62 = vadd.f32 1.0, %v6544_v15  ;;  %4291 = vmatprep.mubr.f32.mxu0 %v4006_v12  ;;  %3011 = vmatmul.mubr.f32.gmra.mrb[190].mxu1 %v7229_v34 }
 0x32e   : > { %v6548_v5 = vpop.eup %6547  ;;  %6567 = vpow2.f32 %v4942_v32  ;;  %4292 = vmatmul.mubr.f32.gmra.mrb[174].mxu0 %v4005_v24  ;;  %v4009_v25 = vmul.f32 %v6546_v26, %v6542_v4  ;;  %v9663_v24 = vld [vmem:[#allocation25_spill] sm:$0xff]  ;;  %v5826_v32 = vadd.f32 %v8795_v38, %v8346_v58  ;;  %v4951_v4 = vmul.f32 -1.442695, %v5825_v46 }
 0x32f   : > { %v6550_v16 = vpop.eup %6549  ;;  %6569 = vrcp.f32 %v3633_v62 }
 0x330   : > { %v6552_v50 = vpop.eup %6551  ;;  %6571 = vtanh.f32 %v8146_v31  ;;  %v3634_v41 = vadd.f32 1.0, %v6550_v16  ;;  %v4954_v58 = vmul.f32 -1.442695, %v5826_v32  ;;  %v4955_v16 = vmul.f32 -1.442695, %v5827_v11 }
 0x331   : > { %v6554_v39 = vpop.eup %6553  ;;  %6573 = vpow2.f32 %v4943_v8  ;;  %v4010_v14 = vmul.f32 %v6552_v50, %v6548_v5 }
 0x332   : > { %v6556_v22 = vpop.eup %6555  ;;  %6575 = vrcp.f32 %v3634_v41  ;;  %v9667_v41 = vld [vmem:[#allocation29_spill] sm:$0xff] }
 0x333   : > { %v6558_v31 = vpop.eup %6557  ;;  %6577 = vtanh.f32 %v9662_v59  ;;  %v3637_v49 = vadd.f32 1.0, %v6556_v22  ;;  %4296 = vmatprep.mubr.f32.mxu0 %v4010_v14 }
 0x334   : > { %v6560_v51 = vpop.eup %6559  ;;  %6579 = vpow2.f32 %v4946_v3  ;;  %4297 = vmatmul.mubr.f32.gmra.mrb[176].mxu0 %v4009_v25  ;;  %v4013_v36 = vmul.f32 %v6558_v31, %v6554_v39  ;;  %v9666_v25 = vld [vmem:[#allocation28_spill] sm:$0xff] }
 0x335   : > { %v6562_v44 = vpop.eup %6561  ;;  %6581 = vrcp.f32 %v3637_v49 }
 0x336   : > { %v6564_v18 = vpop.eup %6563  ;;  %6583 = vtanh.f32 %v9663_v24  ;;  %v3638_v47 = vadd.f32 1.0, %v6562_v44 }
 0x337   : > { %v6566_v7 = vpop.eup %6565  ;;  %6585 = vpow2.f32 %v4947_v56  ;;  %v4014_v19 = vmul.f32 %v6564_v18, %v6560_v51  ;;  %v9670_v18 = vld [vmem:[#allocation15_spill] sm:$0xff] }
 0x338   : > { %v6568_v10 = vpop.eup %6567  ;;  %6587 = vrcp.f32 %v3638_v47  ;;  %v931_v24 = vsub.s32 2, %v9670_v18 }
 0x339   : > { %v6570_v0 = vpop.eup %6569  ;;  %6589 = vtanh.f32 %v9664_v33  ;;  %v3641_v37 = vadd.f32 1.0, %v6568_v10  ;;  %4301 = vmatprep.mubr.f32.mxu0 %v4014_v19  ;;  %v9671_v10 = vld [vmem:[#allocation32_spill] sm:$0xff] }
 0x33a   : > { %v6572_v27 = vpop.eup %6571  ;;  %6591 = vpow2.f32 %v4950_v63  ;;  %4302 = vmatmul.mubr.f32.gmra.mrb[178].mxu0 %v4013_v36  ;;  %v4017_v12 = vmul.f32 %v6570_v0, %v6566_v7  ;;  %v9669_v36 = vld [vmem:[#allocation31_spill] sm:$0xff]  ;;  %v935_v63 = vsub.s32 3, %v9670_v18 }
 0x33b   : > { %v6574_v20 = vpop.eup %6573  ;;  %6593 = vrcp.f32 %v3641_v37  ;;  %v8939_v37 = vld [vmem:[#allocation9] sm:$0xff] }
 0x33c   : > { %v6576_v15 = vpop.eup %6575  ;;  %6595 = vtanh.f32 %v9665_v57  ;;  %v3642_v26 = vadd.f32 1.0, %v6574_v20  ;;  %v8946_v20 = vrot.slane %v8939_v37, %v935_v63  ;;  %v9685_v63 = vld [vmem:[#allocation45_spill] sm:$0xff] }
 0x33d   : > { %v6578_v38 = vpop.eup %6577  ;;  %6597 = vpow2.f32 %v4951_v4  ;;  %v4018_v62 = vmul.f32 %v6576_v15, %v6572_v27  ;;  %v8942_v4 = vrot.slane %v8939_v37, %v931_v24  ;;  %v9684_v24 = vld [vmem:[#allocation44_spill] sm:$0xff] }
 0x33e   : > { %v6580_v8 = vpop.eup %6579  ;;  %6599 = vrcp.f32 %v3642_v26  ;;  %9673 = vst [vmem:[#allocation12_spill] sm:$0xff] %v8946_v20  ;;  %v9674_v26 = vld [vmem:[#allocation34_spill] sm:$0xff] }
 0x33f   : > { %v6582_v5 = vpop.eup %6581  ;;  %6601 = vtanh.f32 %v9666_v25  ;;  %v3645_v34 = vadd.f32 1.0, %v6580_v8  ;;  %4306 = vmatprep.mubr.f32.mxu0 %v4018_v62  ;;  %v9675_v8 = vld [vmem:[#allocation35_spill] sm:$0xff] }
 0x340   : > { %v6584_v17 = vpop.eup %6583  ;;  %6603 = vpow2.f32 %v4954_v58  ;;  %4307 = vmatmul.mubr.f32.gmra.mrb[180].mxu0 %v4017_v12  ;;  %v4021_v35 = vmul.f32 %v6582_v5, %v6578_v38  ;;  %v9672_v12 = vld [vmem:[#allocation33_spill] sm:$0xff]  ;;  %v5700_v58 = vadd.f32 %v9674_v26, %v8942_v4  ;;  %v5701_v5 = vadd.f32 %v9675_v8, %v8946_v20 }
 0x341   : > { %v6586_v60 = vpop.eup %6585  ;;  %6605 = vrcp.f32 %v3645_v34  ;;  %v9676_v34 = vld [vmem:[#allocation36_spill] sm:$0xff] }
 0x342   : > { %v6588_v50 = vpop.eup %6587  ;;  %6607 = vtanh.f32 %v9667_v41  ;;  %v3646_v3 = vadd.f32 1.0, %v6586_v60  ;;  %v9678_v41 = vld [vmem:[#allocation38_spill] sm:$0xff] }
 0x343   : > { %v6590_v39 = vpop.eup %6589  ;;  %6609 = vpow2.f32 %v4955_v16  ;;  %v4022_v14 = vmul.f32 %v6588_v50, %v6584_v17  ;;  %v5702_v16 = vadd.f32 %v9676_v34, %v8942_v4  ;;  %v9677_v17 = vld [vmem:[#allocation37_spill] sm:$0xff]  ;;  %v5719_v34 = vadd.f32 %v8431_v40, %v8946_v20  ;;  %v9690_v40 = vld [vmem:[#allocation50_spill] sm:$0xff] }
 0x344   : > { %v6592_v61 = vpop.eup %6591  ;;  %6611 = vrcp.f32 %v3646_v3  ;;  %v5704_v3 = vadd.f32 %v9678_v41, %v8942_v4 }
 0x345   : > { %v6594_v2 = vpop.eup %6593  ;;  %v3649_v22 = vadd.f32 1.0, %v6592_v61  ;;  %4311 = vmatprep.mubr.f32.mxu0 %v4022_v14  ;;  %6613 = vtanh.f32 %v9668_v6  ;;  %v9679_v14 = vld [vmem:[#allocation39_spill] sm:$0xff] }
 0x346   : > { %v6596_v21 = vpop.eup %6595  ;;  %4312 = vmatmul.mubr.f32.gmra.mrb[182].mxu0 %v4021_v35  ;;  %v4025_v31 = vmul.f32 %v6594_v2, %v6590_v39  ;;  %v5703_v35 = vadd.f32 %v9677_v17, %v8946_v20  ;;  %v5705_v61 = vadd.f32 %v9679_v14, %v8946_v20  ;;  %v9680_v2 = vld [vmem:[#allocation40_spill] sm:$0xff] }
 0x347   : > { %v6598_v59 = vpop.eup %6597  ;;  %6615 = vrcp.f32 %v3649_v22  ;;  %v5706_v22 = vadd.f32 %v9680_v2, %v8942_v4 }
 0x348   : > { %v6600_v49 = vpop.eup %6599  ;;  %v3650_v56 = vadd.f32 1.0, %v6598_v59  ;;  %6617 = vtanh.f32 %v9669_v36  ;;  %v9683_v36 = vld [vmem:[#allocation43_spill] sm:$0xff] }
 0x349   : > { %v6602_v51 = vpop.eup %6601  ;;  %v4026_v44 = vmul.f32 %v6600_v49, %v6596_v21 }
 0x34a   : > { %v6604_v46 = vpop.eup %6603  ;;  %6619 = vrcp.f32 %v3650_v56  ;;  %v9682_v56 = vld [vmem:[#allocation42_spill] sm:$0xff] }
 0x34b   : > { %v6606_v47 = vpop.eup %6605  ;;  %v3653_v7 = vadd.f32 1.0, %v6604_v46  ;;  %4316 = vmatprep.mubr.f32.mxu0 %v4026_v44  ;;  %6621 = vtanh.f32 %v9671_v10  ;;  %v5709_v44 = vadd.f32 %v9683_v36, %v8946_v20  ;;  %v5730_v36 = vadd.f32 %v8507_v48, %v8942_v4 }
 0x34c   : > { %v6608_v19 = vpop.eup %6607  ;;  %4317 = vmatmul.mubr.f32.gmra.mrb[184].mxu0 %v4025_v31  ;;  %v4029_v32 = vmul.f32 %v6606_v47, %v6602_v51  ;;  %v9681_v31 = vld [vmem:[#allocation41_spill] sm:$0xff]  ;;  %v5708_v51 = vadd.f32 %v9682_v56, %v8942_v4  ;;  %v5710_v47 = vadd.f32 %v9684_v24, %v8942_v4  ;;  %v5734_v48 = vadd.f32 %v8535_v54, %v8942_v4 }
 0x34d   : > { %v6610_v0 = vpop.eup %6609  ;;  %6623 = vrcp.f32 %v3653_v7  ;;  %v5707_v59 = vadd.f32 %v9681_v31, %v8946_v20  ;;  %v5711_v7 = vadd.f32 %v9685_v63, %v8946_v20  ;;  %v5738_v54 = vadd.f32 %v8562_v28, %v8942_v4  ;;  %v9703_v28 = vld [vmem:[#allocation63_spill] sm:$0xff] }
 0x34e   : > { %v6612_v33 = vpop.eup %6611  ;;  %v3654_v27 = vadd.f32 1.0, %v6610_v0  ;;  %6625 = vtanh.f32 %v9672_v12 }
 0x34f   : > { %v4030_v11 = vmul.f32 %v6612_v33, %v6608_v19  ;;  %v6614_v15 = vpop.eup %6613  ;;  %v9686_v19 = vld [vmem:[#allocation46_spill] sm:$0xff] }
 0x350   : > { %6627 = vrcp.f32 %v3654_v27  ;;  %v5712_v10 = vadd.f32 %v9686_v19, %v8942_v4  ;;  %v9688_v27 = vld [vmem:[#allocation48_spill] sm:$0xff] }
 0x351   : > { %v6616_v57 = vpop.eup %6615  ;;  %4321 = vmatprep.mubr.f32.mxu0 %v4030_v11  ;;  %6629 = vtanh.f32 %v5700_v58  ;;  %v5714_v12 = vadd.f32 %v9688_v27, %v8942_v4  ;;  %v5716_v58 = vadd.f32 %v8420_v42, %v8942_v4  ;;  %v5720_v42 = vadd.f32 %v8439_v55, %v8942_v4 }
 0x352   : > { %4322 = vmatmul.mubr.f32.gmra.mrb[186].mxu0 %v4029_v32  ;;  %v4033_v38 = vmul.f32 %v6616_v57, %v6614_v15  ;;  %v6618_v62 = vpop.eup %6617  ;;  %6631 = vtanh.f32 %v5701_v5  ;;  %v9687_v32 = vld [vmem:[#allocation47_spill] sm:$0xff]  ;;  %v9689_v15 = vld [vmem:[#allocation49_spill] sm:$0xff]  ;;  %v5718_v5 = vadd.f32 %v8429_v52, %v8942_v4  ;;  %v5722_v52 = vadd.f32 %v8453_v45, %v8942_v4  ;;  %v9692_v45 = vld [vmem:[#allocation52_spill] sm:$0xff] }
 0x353   : > { %6633 = vtanh.f32 %v5702_v16  ;;  %v5713_v0 = vadd.f32 %v9687_v32, %v8946_v20  ;;  %v5715_v57 = vadd.f32 %v9689_v15, %v8946_v20  ;;  %v5724_v55 = vadd.f32 %v8465_v53, %v8942_v4  ;;  %v9694_v53 = vld [vmem:[#allocation54_spill] sm:$0xff] }
 0x354   : > { %v6620_v25 = vpop.eup %6619  ;;  %6635 = vtanh.f32 %v5703_v35  ;;  %v5728_v31 = vadd.f32 %v9694_v53, %v8942_v4 }
 0x355   : > { %v4034_v60 = vmul.f32 %v6620_v25, %v6618_v62  ;;  %v6622_v50 = vpop.eup %6621  ;;  %6637 = vtanh.f32 %v5704_v3  ;;  %v5717_v62 = vadd.f32 %v8423_v23, %v8946_v20  ;;  %v5721_v23 = vadd.f32 %v8445_v1, %v8946_v20  ;;  %v9691_v1 = vld [vmem:[#allocation51_spill] sm:$0xff] }
 0x356   : > { %6639 = vtanh.f32 %v5705_v61  ;;  %v5726_v61 = vadd.f32 %v9692_v45, %v8942_v4  ;;  %v5742_v45 = vadd.f32 %v9703_v28, %v8942_v4  ;;  %v9711_v28 = vld [vmem:[#allocation71_spill] sm:$0xff] }
 0x357   : > { %v6624_v39 = vpop.eup %6623  ;;  %4326 = vmatprep.mubr.f32.mxu0 %v4034_v60  ;;  %6641 = vtanh.f32 %v5706_v22  ;;  %v9693_v22 = vld [vmem:[#allocation53_spill] sm:$0xff] }
 0x358   : > { %4327 = vmatmul.mubr.f32.gmra.mrb[188].mxu0 %v4033_v38  ;;  %v4037_v21 = vmul.f32 %v6624_v39, %v6622_v50  ;;  %v6626_v6 = vpop.eup %6625  ;;  %6643 = vtanh.f32 %v5707_v59  ;;  %v5723_v50 = vadd.f32 %v9690_v40, %v8946_v20  ;;  %v5725_v39 = vadd.f32 %v9691_v1, %v8946_v20 }
 0x359   : > { %6645 = vtanh.f32 %v5708_v51 }
 0x35a   : > { %v6628_v49 = vpop.eup %6627  ;;  %6647 = vtanh.f32 %v5709_v44 }
 0x35b   : > { %v4038_v46 = vmul.f32 %v6628_v49, %v6626_v6  ;;  %v8976_v33 = vpop.eup %6629  ;;  %6649 = vtanh.f32 %v5710_v47  ;;  %v9695_v49 = vld [vmem:[#allocation55_spill] sm:$0xff]  ;;  %v5732_v47 = vadd.f32 %v8520_v43, %v8942_v4  ;;  %v9698_v43 = vld [vmem:[#allocation58_spill] sm:$0xff] }
 0x35c   : > { %v8980_v11 = vpop.eup %6631  ;;  %6651 = vtanh.f32 %v5711_v7  ;;  %v5729_v56 = vadd.f32 %v9695_v49, %v8946_v20  ;;  %v9696_v7 = vld [vmem:[#allocation56_spill] sm:$0xff] }
 0x35d   : > { %4331 = vmatprep.mubr.f32.mxu0 %v4038_v46  ;;  %v8984_v26 = vpop.eup %6633  ;;  %6653 = vtanh.f32 %v5712_v10  ;;  %v5731_v46 = vadd.f32 %v8511_v29, %v8946_v20  ;;  %v5733_v19 = vadd.f32 %v9696_v7, %v8946_v20  ;;  %v9697_v29 = vld [vmem:[#allocation57_spill] sm:$0xff]  ;;  %v951_v7 = vsub.s32 7, %v9670_v18 }
 0x35e   : > { %4332 = vmatmul.mubr.f32.gmra.mrb[190].mxu0 %v4037_v21  ;;  %v8988_v38 = vpop.eup %6635  ;;  %6655 = vtanh.f32 %v5713_v0  ;;  %v5727_v21 = vadd.f32 %v9693_v22, %v8946_v20  ;;  %v5735_v0 = vadd.f32 %v9697_v29, %v8946_v20  ;;  %v9704_v22 = vld [vmem:[#allocation64_spill] sm:$0xff] }
 0x35f   : > { %v8992_v8 = vpop.eup %6637  ;;  %6657 = vtanh.f32 %v5714_v12  ;;  %v5736_v12 = vadd.f32 %v9698_v43, %v8942_v4  ;;  %v9708_v43 = vld [vmem:[#allocation68_spill] sm:$0xff] }
 0x360   : > { %v8996_v25 = vpop.eup %6639  ;;  %6659 = vtanh.f32 %v5715_v57  ;;  %v9699_v57 = vld [vmem:[#allocation59_spill] sm:$0xff] }
 0x361   : > { %v9000_v16 = vpop.eup %6641  ;;  %6661 = vtanh.f32 %v5716_v58  ;;  %v5737_v58 = vadd.f32 %v9699_v57, %v8946_v20 }
 0x362   : > { %v9004_v17 = vpop.eup %6643  ;;  %6663 = vtanh.f32 %v5717_v62 }
 0x363   : > { %v9008_v35 = vpop.eup %6645  ;;  %6665 = vtanh.f32 %v5718_v5 }
 0x364   : > { %v9012_v60 = vpop.eup %6647  ;;  %6667 = vtanh.f32 %v5719_v34  ;;  %v9700_v34 = vld [vmem:[#allocation60_spill] sm:$0xff] }
 0x365   : > { %v9016_v41 = vpop.eup %6649  ;;  %6669 = vtanh.f32 %v5720_v42  ;;  %v5739_v42 = vadd.f32 %v9700_v34, %v8946_v20 }
 0x366   : > { %v9020_v3 = vpop.eup %6651  ;;  %6671 = vtanh.f32 %v5721_v23 }
 0x367   : > { %v9024_v14 = vpop.eup %6653  ;;  %6673 = vtanh.f32 %v5722_v52  ;;  %v9701_v52 = vld [vmem:[#allocation61_spill] sm:$0xff] }
 0x368   : > { %v9028_v2 = vpop.eup %6655  ;;  %6675 = vtanh.f32 %v5723_v50  ;;  %v5740_v40 = vadd.f32 %v9701_v52, %v8942_v4  ;;  %v9710_v52 = vld [vmem:[#allocation70_spill] sm:$0xff] }
 0x369   : > { %v9032_v6 = vpop.eup %6657  ;;  %6677 = vtanh.f32 %v5724_v55  ;;  %v9702_v55 = vld [vmem:[#allocation62_spill] sm:$0xff] }
 0x36a   : > { %v9036_v59 = vpop.eup %6659  ;;  %6679 = vtanh.f32 %v5725_v39  ;;  %v5741_v1 = vadd.f32 %v9702_v55, %v8946_v20  ;;  %v9126_v55 = vrot.slane %v8939_v37, %v951_v7 }
 0x36b   : > { %v9040_v51 = vpop.eup %6661  ;;  %6681 = vtanh.f32 %v5726_v61 }
 0x36c   : > { %v9044_v44 = vpop.eup %6663  ;;  %6683 = vtanh.f32 %v5727_v21  ;;  %v5743_v21 = vadd.f32 %v9704_v22, %v8946_v20 }
 0x36d   : > { %v9048_v24 = vpop.eup %6665  ;;  %6685 = vtanh.f32 %v5728_v31  ;;  %v9705_v31 = vld [vmem:[#allocation65_spill] sm:$0xff] }
 0x36e   : > { %v9052_v63 = vpop.eup %6667  ;;  %6687 = vtanh.f32 %v5729_v56  ;;  %v5744_v49 = vadd.f32 %v9705_v31, %v8942_v4  ;;  %v947_v56 = vsub.s32 6, %v9670_v18 }
 0x36f   : > { %v9056_v10 = vpop.eup %6669  ;;  %6689 = vtanh.f32 %v5730_v36 }
 0x370   : > { %v9060_v32 = vpop.eup %6671  ;;  %6691 = vtanh.f32 %v5731_v46  ;;  %v9706_v46 = vld [vmem:[#allocation66_spill] sm:$0xff]  ;;  %v9119_v34 = vrot.slane %v8939_v37, %v947_v56 }
 0x371   : > { %v9064_v27 = vpop.eup %6673  ;;  %6693 = vtanh.f32 %v5732_v47  ;;  %v5745_v47 = vadd.f32 %v9706_v46, %v8946_v20 }
 0x372   : > { %v9068_v15 = vpop.eup %6675  ;;  %6695 = vtanh.f32 %v5733_v19 }
 0x373   : > { %v9072_v62 = vpop.eup %6677  ;;  %6697 = vtanh.f32 %v5734_v48  ;;  %v9707_v48 = vld [vmem:[#allocation67_spill] sm:$0xff] }
 0x374   : > { %v9076_v5 = vpop.eup %6679  ;;  %6699 = vtanh.f32 %v5735_v0  ;;  %v5746_v29 = vadd.f32 %v9707_v48, %v8942_v4 }
 0x375   : > { %v9080_v23 = vpop.eup %6681  ;;  %6701 = vtanh.f32 %v5736_v12  ;;  %v5747_v12 = vadd.f32 %v9708_v43, %v8946_v20 }
 0x376   : > { %v9084_v50 = vpop.eup %6683  ;;  %6703 = vtanh.f32 %v5737_v58  ;;  %v9709_v58 = vld [vmem:[#allocation69_spill] sm:$0xff] }
 0x377   : > { %v9088_v39 = vpop.eup %6685  ;;  %6705 = vtanh.f32 %v5738_v54  ;;  %v5748_v54 = vadd.f32 %v9709_v58, %v8942_v4  ;;  %v5753_v58 = vadd.f32 %v8692_v30, %v8946_v20 }
 0x378   : > { %v9092_v61 = vpop.eup %6687  ;;  %6707 = vtanh.f32 %v5739_v42 }
 0x379   : > { %v9096_v53 = vpop.eup %6689  ;;  %6709 = vtanh.f32 %v5740_v40  ;;  %v5749_v40 = vadd.f32 %v9710_v52, %v8946_v20 }
 0x37a   : > { %v9101_v36 = vpop.eup %6691  ;;  %6711 = vtanh.f32 %v5741_v1 }
 0x37b   : > { %v9106_v19 = vpop.eup %6693  ;;  %6713 = vtanh.f32 %v5742_v45  ;;  %v5750_v45 = vadd.f32 %v9711_v28, %v8942_v4 }
 0x37c   : > { %v9110_v0 = vpop.eup %6695  ;;  %6715 = vtanh.f32 %v5743_v21  ;;  %v9712_v21 = vld [vmem:[#allocation72_spill] sm:$0xff] }
 0x37d   : > { %v9114_v57 = vpop.eup %6697  ;;  %6717 = vtanh.f32 %v5744_v49  ;;  %v5751_v31 = vadd.f32 %v9712_v21, %v8946_v20 }
 0x37e   : > { %v9121_v42 = vpop.eup %6699  ;;  %6719 = vtanh.f32 %v5745_v47 }
 0x37f   : > { %v9128_v1 = vpop.eup %6701  ;;  %6721 = vtanh.f32 %v5746_v29  ;;  %v5752_v29 = vadd.f32 %v8687_v9, %v8942_v4 }
 0x380   : > { %v9132_v22 = vpop.eup %6703  ;;  %6723 = vtanh.f32 %v5747_v12 }
 0x381   : > { %v9136_v56 = vpop.eup %6705  ;;  %6725 = vtanh.f32 %v5748_v54 }
 0x382   : > { %v9139_v47 = vpop.eup %6707  ;;  %6727 = vtanh.f32 %v5749_v40 }
 0x383   : > { %v9142_v48 = vpop.eup %6709  ;;  %6729 = vtanh.f32 %v5750_v45 }
 0x384   : > { %v2826_v49 = vpop.f32.mrb[128].mxu1  ;;  %v9146_v12 = vpop.eup %6711  ;;  %6731 = vtanh.f32 %v5751_v31  ;;  %v9716_v31 = vld [vmem:[#allocation73_spill] sm:$0xff] }
 0x385   : > { %v5828_v46 = vadd.f32 %v2826_v49, %v9119_v34  ;;  %v2828_v37 = vpop.f32.mrb[129].mxu1  ;;  %v9150_v28 = vpop.eup %6713 }
 0x386   : > { %v5829_v7 = vadd.f32 %v2828_v37, %v9126_v55  ;;  %9713 = vst [vmem:[#allocation13_spill] sm:$0xff] %v9150_v28  ;;  %v9153_v49 = vpop.eup %6715 }
 0x387   : > { %v4832_v43 = vmul.f32 -1.442695, %v5828_v46  ;;  %9714 = vst [vmem:[#allocation14_spill] sm:$0xff] %v9153_v49  ;;  %v9156_v45 = vpop.eup %6717  ;;  %v5754_v46 = vadd.f32 %v9716_v31, %v8942_v4 }
 0x388   : > { %v4833_v54 = vmul.f32 -1.442695, %v5829_v7  ;;  %v2832_v52 = vpop.f32.mrb[130].mxu1  ;;  %9715 = vst [vmem:[#allocation16_spill] sm:$0xff] %v9156_v45  ;;  %v9160_v37 = vpop.eup %6719  ;;  %v9718_v7 = vld [vmem:[#allocation74_spill] sm:$0xff] }
 0x389   : > { %6733 = vpow2.f32 %v4832_v43  ;;  %v5830_v40 = vadd.f32 %v2832_v52, %v9119_v34  ;;  %v2834_v21 = vpop.f32.mrb[131].mxu1  ;;  %9717 = vst [vmem:[#allocation17_spill] sm:$0xff] %v9160_v37  ;;  %v5755_v43 = vadd.f32 %v9718_v7, %v8946_v20  ;;  %v9164_v28 = vpop.eup %6721 }
 0x38a   : > { %6735 = vpow2.f32 %v4833_v54  ;;  %v5831_v9 = vadd.f32 %v2834_v21, %v9126_v55  ;;  %9719 = vst [vmem:[#allocation18_spill] sm:$0xff] %v9164_v28  ;;  %v9167_v45 = vpop.eup %6723 }
 0x38b   : > { %6737 = vtanh.f32 %v5752_v29  ;;  %v4836_v30 = vmul.f32 -1.442695, %v5830_v40  ;;  %9720 = vst [vmem:[#allocation19_spill] sm:$0xff] %v9167_v45  ;;  %v9170_v40 = vpop.eup %6725 }
 0x38c   : > { %6739 = vtanh.f32 %v5753_v58  ;;  %v4837_v52 = vmul.f32 -1.442695, %v5831_v9  ;;  %v2838_v18 = vpop.f32.mrb[132].mxu1  ;;  %9721 = vst [vmem:[#allocation20_spill] sm:$0xff] %v9170_v40  ;;  %v9722_v58 = vld [vmem:[#allocation75_spill] sm:$0xff]  ;;  %v9174_v9 = vpop.eup %6727 }
 0x38d   : > { %6741 = vpow2.f32 %v4836_v30  ;;  %v5832_v54 = vadd.f32 %v2838_v18, %v9119_v34  ;;  %v2840_v21 = vpop.f32.mrb[133].mxu1  ;;  %v5756_v31 = vadd.f32 %v9722_v58, %v8942_v4  ;;  %9723 = vst [vmem:[#allocation21_spill] sm:$0xff] %v9174_v9  ;;  %v9724_v30 = vld [vmem:[#allocation76_spill] sm:$0xff]  ;;  %v9178_v49 = vpop.eup %6729 }
 0x38e   : > { %6743 = vpow2.f32 %v4837_v52  ;;  %v5833_v29 = vadd.f32 %v2840_v21, %v9126_v55  ;;  %v5757_v28 = vadd.f32 %v9724_v30, %v8946_v20  ;;  %9725 = vst [vmem:[#allocation22_spill] sm:$0xff] %v9178_v49  ;;  %v9181_v40 = vpop.eup %6731 }
 0x38f   : > { %6745 = vtanh.f32 %v5754_v46  ;;  %v4840_v7 = vmul.f32 -1.442695, %v5832_v54  ;;  %9726 = vst [vmem:[#allocation23_spill] sm:$0xff] %v9181_v40 }
 0x390   : > { %6747 = vtanh.f32 %v5755_v43  ;;  %v4841_v18 = vmul.f32 -1.442695, %v5833_v29  ;;  %v2844_v37 = vpop.f32.mrb[134].mxu1 }
 0x391   : > { %6749 = vpow2.f32 %v4840_v7  ;;  %v5834_v52 = vadd.f32 %v2844_v37, %v9119_v34  ;;  %v2846_v21 = vpop.f32.mrb[135].mxu1 }
 0x392   : > { %6751 = vpow2.f32 %v4841_v18  ;;  %v5835_v46 = vadd.f32 %v2846_v21, %v9126_v55 }
 0x393   : > { %v6734_v54 = vpop.eup %6733  ;;  %6753 = vtanh.f32 %v5756_v31  ;;  %v4844_v58 = vmul.f32 -1.442695, %v5834_v52 }
 0x394   : > { %v6736_v43 = vpop.eup %6735  ;;  %6755 = vtanh.f32 %v5757_v28  ;;  %v3531_v9 = vadd.f32 1.0, %v6734_v54  ;;  %v4845_v30 = vmul.f32 -1.442695, %v5835_v46  ;;  %v2850_v29 = vpop.f32.mrb[136].mxu1 }
 0x395   : > { %v9184_v20 = vpop.eup %6737  ;;  %v3532_v49 = vadd.f32 1.0, %v6736_v43  ;;  %6757 = vpow2.f32 %v4844_v58  ;;  %v5836_v37 = vadd.f32 %v2850_v29, %v9119_v34  ;;  %v2852_v7 = vpop.f32.mrb[137].mxu1 }
 0x396   : > { %9727 = vst [vmem:[#allocation24_spill] sm:$0xff] %v9184_v20  ;;  %v9187_v45 = vpop.eup %6739  ;;  %6759 = vrcp.f32 %v3531_v9  ;;  %v5837_v18 = vadd.f32 %v2852_v7, %v9126_v55 }
 0x397   : > { %9728 = vst [vmem:[#allocation25_spill] sm:$0xff] %v9187_v45  ;;  %v6742_v21 = vpop.eup %6741  ;;  %6761 = vrcp.f32 %v3532_v49  ;;  %v4848_v31 = vmul.f32 -1.442695, %v5836_v37 }
 0x398   : > { %v6744_v52 = vpop.eup %6743  ;;  %v3535_v28 = vadd.f32 1.0, %v6742_v21  ;;  %6763 = vpow2.f32 %v4845_v30  ;;  %v4849_v46 = vmul.f32 -1.442695, %v5837_v18  ;;  %v2856_v54 = vpop.f32.mrb[138].mxu1 }
 0x399   : > { %v9190_v40 = vpop.eup %6745  ;;  %v3536_v43 = vadd.f32 1.0, %v6744_v52  ;;  %6765 = vpow2.f32 %v4848_v31  ;;  %v5838_v58 = vadd.f32 %v2856_v54, %v9119_v34  ;;  %v2858_v29 = vpop.f32.mrb[139].mxu1 }
 0x39a   : > { %9729 = vst [vmem:[#allocation26_spill] sm:$0xff] %v9190_v40  ;;  %v9193_v20 = vpop.eup %6747  ;;  %6767 = vrcp.f32 %v3535_v28  ;;  %v5839_v9 = vadd.f32 %v2858_v29, %v9126_v55 }
 0x39b   : > { %9730 = vst [vmem:[#allocation27_spill] sm:$0xff] %v9193_v20  ;;  %v6750_v7 = vpop.eup %6749  ;;  %6769 = vrcp.f32 %v3536_v43  ;;  %v4852_v49 = vmul.f32 -1.442695, %v5838_v58 }
 0x39c   : > { %v6752_v37 = vpop.eup %6751  ;;  %v3539_v21 = vadd.f32 1.0, %v6750_v7  ;;  %6771 = vpow2.f32 %v4849_v46  ;;  %v4853_v30 = vmul.f32 -1.442695, %v5839_v9  ;;  %v2862_v18 = vpop.f32.mrb[140].mxu1  ;;  %v5758_v46 = vadd.f32 %v8750_v13, %v8942_v4 }
 0x39d   : > { %v9196_v45 = vpop.eup %6753  ;;  %v3540_v52 = vadd.f32 1.0, %v6752_v37  ;;  %6773 = vpow2.f32 %v4852_v49  ;;  %v5840_v31 = vadd.f32 %v2862_v18, %v9119_v34  ;;  %v2864_v54 = vpop.f32.mrb[141].mxu1 }
 0x39e   : > { %9731 = vst [vmem:[#allocation28_spill] sm:$0xff] %v9196_v45  ;;  %v9199_v40 = vpop.eup %6755  ;;  %6775 = vrcp.f32 %v3539_v21  ;;  %v5841_v28 = vadd.f32 %v2864_v54, %v9126_v55 }
 0x39f   : > { %9732 = vst [vmem:[#allocation29_spill] sm:$0xff] %v9199_v40  ;;  %v6758_v29 = vpop.eup %6757  ;;  %6777 = vrcp.f32 %v3540_v52  ;;  %v4856_v43 = vmul.f32 -1.442695, %v5840_v31 }
 0x3a0   : > { %v6760_v58 = vpop.eup %6759  ;;  %v3543_v9 = vadd.f32 1.0, %v6758_v29  ;;  %6779 = vpow2.f32 %v4853_v30  ;;  %v4857_v7 = vmul.f32 -1.442695, %v5841_v28  ;;  %v2868_v37 = vpop.f32.mrb[142].mxu1 }
 0x3a1   : > { %v6762_v49 = vpop.eup %6761  ;;  %6781 = vpow2.f32 %v4856_v43  ;;  %v5842_v18 = vadd.f32 %v2868_v37, %v9119_v34  ;;  %v2870_v45 = vpop.f32.mrb[143].mxu1  ;;  %v3915_v21 = vmul.f32 %v6760_v58, %v8976_v33 }
 0x3a2   : > { %v6764_v40 = vpop.eup %6763  ;;  %6783 = vrcp.f32 %v3543_v9  ;;  %v5843_v52 = vadd.f32 %v2870_v45, %v9126_v55  ;;  %v3916_v31 = vmul.f32 %v6762_v49, %v8980_v11 }
 0x3a3   : > { %v6766_v54 = vpop.eup %6765  ;;  %v3544_v20 = vadd.f32 1.0, %v6764_v40  ;;  %6785 = vpow2.f32 %v4857_v7  ;;  %v4860_v13 = vmul.f32 -1.442695, %v5842_v18 }
 0x3a4   : > { %v6768_v30 = vpop.eup %6767  ;;  %6787 = vtanh.f32 %v5758_v46  ;;  %v3547_v28 = vadd.f32 1.0, %v6766_v54  ;;  %v4861_v29 = vmul.f32 -1.442695, %v5843_v52  ;;  %v2874_v43 = vpop.f32.mrb[144].mxu1  ;;  %4401 = vmatprep.mubr.f32.mxu0 %v3916_v31 }
 0x3a5   : > { %v6770_v37 = vpop.eup %6769  ;;  %6789 = vrcp.f32 %v3544_v20  ;;  %v5844_v33 = vadd.f32 %v2874_v43, %v9119_v34  ;;  %v2876_v58 = vpop.f32.mrb[145].mxu1  ;;  %4402 = vmatmul.mubr.f32.vlgmr.msra.gmra.mrb[128].mxu0 %v3915_v21  ;;  %v3919_v45 = vmul.f32 %v6768_v30, %v8984_v26 }
 0x3a6   : > { %v6772_v9 = vpop.eup %6771  ;;  %6791 = vrcp.f32 %v3547_v28  ;;  %v5845_v11 = vadd.f32 %v2876_v58, %v9126_v55  ;;  %v3920_v40 = vmul.f32 %v6770_v37, %v8988_v38 }
 0x3a7   : > { %v6774_v7 = vpop.eup %6773  ;;  %v3548_v46 = vadd.f32 1.0, %v6772_v9  ;;  %6793 = vpow2.f32 %v4860_v13  ;;  %v4864_v49 = vmul.f32 -1.442695, %v5844_v33 }
 0x3a8   : > { %v6776_v18 = vpop.eup %6775  ;;  %v3551_v52 = vadd.f32 1.0, %v6774_v7  ;;  %6795 = vpow2.f32 %v4861_v29  ;;  %v4865_v20 = vmul.f32 -1.442695, %v5845_v11  ;;  %v2880_v31 = vpop.f32.mrb[146].mxu1  ;;  %4406 = vmatprep.mubr.f32.mxu0 %v3920_v40 }
 0x3a9   : > { %v6778_v54 = vpop.eup %6777  ;;  %6797 = vrcp.f32 %v3548_v46  ;;  %v5846_v26 = vadd.f32 %v2880_v31, %v9119_v34  ;;  %v2882_v21 = vpop.f32.mrb[147].mxu1  ;;  %4407 = vmatmul.mubr.f32.gmra.mrb[130].mxu0 %v3919_v45  ;;  %v3923_v30 = vmul.f32 %v6776_v18, %v8992_v8 }
 0x3aa   : > { %v6780_v28 = vpop.eup %6779  ;;  %6799 = vrcp.f32 %v3551_v52  ;;  %v5847_v38 = vadd.f32 %v2882_v21, %v9126_v55  ;;  %v3924_v13 = vmul.f32 %v6778_v54, %v8996_v25 }
 0x3ab   : > { %v6782_v43 = vpop.eup %6781  ;;  %v3552_v37 = vadd.f32 1.0, %v6780_v28  ;;  %6801 = vpow2.f32 %v4864_v49  ;;  %v4868_v29 = vmul.f32 -1.442695, %v5846_v26 }
 0x3ac   : > { %v6784_v33 = vpop.eup %6783  ;;  %v3555_v58 = vadd.f32 1.0, %v6782_v43  ;;  %6803 = vpow2.f32 %v4865_v20  ;;  %v2886_v9 = vpop.f32.mrb[148].mxu1  ;;  %4411 = vmatprep.mubr.f32.mxu0 %v3924_v13  ;;  %v4869_v45 = vmul.f32 -1.442695, %v5847_v38 }
 0x3ad   : > { %v6786_v11 = vpop.eup %6785  ;;  %6805 = vrcp.f32 %v3552_v37  ;;  %v5848_v8 = vadd.f32 %v2886_v9, %v9119_v34  ;;  %v2888_v40 = vpop.f32.mrb[149].mxu1  ;;  %4412 = vmatmul.mubr.f32.gmra.mrb[132].mxu0 %v3923_v30  ;;  %v3927_v7 = vmul.f32 %v6784_v33, %v9000_v16 }
 0x3ae   : > { %v9218_v46 = vpop.eup %6787  ;;  %6807 = vrcp.f32 %v3555_v58  ;;  %v3556_v25 = vadd.f32 1.0, %v6786_v11  ;;  %v5849_v49 = vadd.f32 %v2888_v40, %v9126_v55 }
 0x3af   : > { %v6790_v18 = vpop.eup %6789  ;;  %6809 = vpow2.f32 %v4868_v29  ;;  %v4872_v52 = vmul.f32 -1.442695, %v5848_v8 }
 0x3b0   : > { %v6792_v20 = vpop.eup %6791  ;;  %6811 = vrcp.f32 %v3556_v25  ;;  %v4873_v31 = vmul.f32 -1.442695, %v5849_v49  ;;  %v2892_v54 = vpop.f32.mrb[150].mxu1  ;;  %v3928_v26 = vmul.f32 %v6790_v18, %v9004_v17 }
 0x3b1   : > { %v6794_v21 = vpop.eup %6793  ;;  %6813 = vpow2.f32 %v4869_v45  ;;  %v5850_v30 = vadd.f32 %v2892_v54, %v9119_v34  ;;  %v2894_v16 = vpop.f32.mrb[151].mxu1  ;;  %v3931_v28 = vmul.f32 %v6792_v20, %v9008_v35 }
 0x3b2   : > { %v6796_v38 = vpop.eup %6795  ;;  %v3559_v13 = vadd.f32 1.0, %v6794_v21  ;;  %6815 = vpow2.f32 %v4872_v52  ;;  %4416 = vmatprep.mubr.f32.mxu0 %v3928_v26  ;;  %v5851_v43 = vadd.f32 %v2894_v16, %v9126_v55 }
 0x3b3   : > { %v6798_v37 = vpop.eup %6797  ;;  %v3560_v29 = vadd.f32 1.0, %v6796_v38  ;;  %6817 = vpow2.f32 %v4873_v31  ;;  %v4876_v33 = vmul.f32 -1.442695, %v5850_v30  ;;  %4417 = vmatmul.mubr.f32.gmra.mrb[134].mxu0 %v3927_v7 }
 0x3b4   : > { %v6800_v58 = vpop.eup %6799  ;;  %6819 = vrcp.f32 %v3559_v13  ;;  %v4877_v17 = vmul.f32 -1.442695, %v5851_v43  ;;  %v2898_v9 = vpop.f32.mrb[152].mxu1  ;;  %v3932_v11 = vmul.f32 %v6798_v37, %v9012_v60 }
 0x3b5   : > { %v6802_v45 = vpop.eup %6801  ;;  %6821 = vrcp.f32 %v3560_v29  ;;  %v5852_v35 = vadd.f32 %v2898_v9, %v9119_v34  ;;  %v2900_v8 = vpop.f32.mrb[153].mxu1  ;;  %v3935_v40 = vmul.f32 %v6800_v58, %v9016_v41 }
 0x3b6   : > { %v6804_v25 = vpop.eup %6803  ;;  %v3563_v49 = vadd.f32 1.0, %v6802_v45  ;;  %6823 = vpow2.f32 %v4876_v33  ;;  %4421 = vmatprep.mubr.f32.mxu0 %v3932_v11  ;;  %v5853_v18 = vadd.f32 %v2900_v8, %v9126_v55 }
 0x3b7   : > { %v6806_v7 = vpop.eup %6805  ;;  %v3564_v52 = vadd.f32 1.0, %v6804_v25  ;;  %6825 = vpow2.f32 %v4877_v17  ;;  %v4880_v20 = vmul.f32 -1.442695, %v5852_v35  ;;  %4422 = vmatmul.mubr.f32.gmra.mrb[136].mxu0 %v3931_v28 }
 0x3b8   : > { %v6808_v31 = vpop.eup %6807  ;;  %6827 = vrcp.f32 %v3563_v49  ;;  %v4881_v60 = vmul.f32 -1.442695, %v5853_v18  ;;  %v2904_v54 = vpop.f32.mrb[154].mxu1  ;;  %v3936_v26 = vmul.f32 %v6806_v7, %v9020_v3 }
 0x3b9   : > { %v6810_v21 = vpop.eup %6809  ;;  %6829 = vrcp.f32 %v3564_v52  ;;  %v5854_v41 = vadd.f32 %v2904_v54, %v9119_v34  ;;  %v2906_v30 = vpop.f32.mrb[155].mxu1  ;;  %v3939_v16 = vmul.f32 %v6808_v31, %v9024_v14 }
 0x3ba   : > { %v6812_v38 = vpop.eup %6811  ;;  %v3567_v13 = vadd.f32 1.0, %v6810_v21  ;;  %6831 = vpow2.f32 %v4880_v20  ;;  %4426 = vmatprep.mubr.f32.mxu0 %v3936_v26  ;;  %v5855_v43 = vadd.f32 %v2906_v30, %v9126_v55 }
 0x3bb   : > { %v6814_v28 = vpop.eup %6813  ;;  %6833 = vpow2.f32 %v4881_v60  ;;  %v4884_v37 = vmul.f32 -1.442695, %v5854_v41  ;;  %4427 = vmatmul.mubr.f32.gmra.mrb[138].mxu0 %v3935_v40  ;;  %v3940_v29 = vmul.f32 %v6812_v38, %v9028_v2 }
 0x3bc   : > { %v6816_v3 = vpop.eup %6815  ;;  %6835 = vrcp.f32 %v3567_v13  ;;  %v3568_v33 = vadd.f32 1.0, %v6814_v28  ;;  %v2910_v58 = vpop.f32.mrb[156].mxu1  ;;  %v4885_v14 = vmul.f32 -1.442695, %v5855_v43 }
 0x3bd   : > { %v6818_v17 = vpop.eup %6817  ;;  %v3571_v9 = vadd.f32 1.0, %v6816_v3  ;;  %6837 = vpow2.f32 %v4884_v37  ;;  %v5856_v11 = vadd.f32 %v2910_v58, %v9119_v34  ;;  %4431 = vmatprep.mubr.f32.mxu0 %v3940_v29  ;;  %v2912_v45 = vpop.f32.mrb[157].mxu1 }
 0x3be   : > { %v6820_v35 = vpop.eup %6819  ;;  %6839 = vrcp.f32 %v3568_v33  ;;  %v3572_v8 = vadd.f32 1.0, %v6818_v17  ;;  %v5857_v25 = vadd.f32 %v2912_v45, %v9126_v55 }
 0x3bf   : > { %v6822_v40 = vpop.eup %6821  ;;  %6841 = vrcp.f32 %v3571_v9  ;;  %v4888_v2 = vmul.f32 -1.442695, %v5856_v11  ;;  %4432 = vmatmul.mubr.f32.gmra.mrb[140].mxu0 %v3939_v16  ;;  %v3943_v49 = vmul.f32 %v6820_v35, %v9032_v6 }
 0x3c0   : > { %v6824_v18 = vpop.eup %6823  ;;  %6843 = vrcp.f32 %v3572_v8  ;;  %v2916_v7 = vpop.f32.mrb[158].mxu1  ;;  %v3944_v52 = vmul.f32 %v6822_v40, %v9036_v59  ;;  %v4889_v60 = vmul.f32 -1.442695, %v5857_v25 }
 0x3c1   : > { %v6826_v20 = vpop.eup %6825  ;;  %v3575_v31 = vadd.f32 1.0, %v6824_v18  ;;  %6845 = vpow2.f32 %v4885_v14  ;;  %v5858_v54 = vadd.f32 %v2916_v7, %v9119_v34  ;;  %v2918_v26 = vpop.f32.mrb[159].mxu1 }
 0x3c2   : > { %v6828_v21 = vpop.eup %6827  ;;  %v3576_v41 = vadd.f32 1.0, %v6826_v20  ;;  %6847 = vpow2.f32 %v4888_v2  ;;  %4436 = vmatprep.mubr.f32.mxu0 %v3944_v52  ;;  %v5859_v30 = vadd.f32 %v2918_v26, %v9126_v55 }
 0x3c3   : > { %v6830_v16 = vpop.eup %6829  ;;  %6849 = vrcp.f32 %v3575_v31  ;;  %v4892_v6 = vmul.f32 -1.442695, %v5858_v54  ;;  %4437 = vmatmul.mubr.f32.gmra.mrb[142].mxu0 %v3943_v49  ;;  %v3947_v38 = vmul.f32 %v6828_v21, %v9040_v51 }
 0x3c4   : > { %v6832_v59 = vpop.eup %6831  ;;  %6851 = vrcp.f32 %v3576_v41  ;;  %v2922_v13 = vpop.f32.mrb[160].mxu1  ;;  %v3948_v43 = vmul.f32 %v6830_v16, %v9044_v44  ;;  %v4893_v29 = vmul.f32 -1.442695, %v5859_v30 }
 0x3c5   : > { %v6834_v28 = vpop.eup %6833  ;;  %v3579_v37 = vadd.f32 1.0, %v6832_v59  ;;  %6853 = vpow2.f32 %v4889_v60  ;;  %v5860_v3 = vadd.f32 %v2922_v13, %v9119_v34  ;;  %v2924_v33 = vpop.f32.mrb[161].mxu1 }
 0x3c6   : > { %v6836_v58 = vpop.eup %6835  ;;  %v3580_v17 = vadd.f32 1.0, %v6834_v28  ;;  %6855 = vpow2.f32 %v4892_v6  ;;  %4441 = vmatprep.mubr.f32.mxu0 %v3948_v43  ;;  %v5861_v9 = vadd.f32 %v2924_v33, %v9126_v55 }
 0x3c7   : > { %v6838_v14 = vpop.eup %6837  ;;  %6857 = vrcp.f32 %v3579_v37  ;;  %v4896_v51 = vmul.f32 -1.442695, %v5860_v3  ;;  %4442 = vmatmul.mubr.f32.gmra.mrb[144].mxu0 %v3947_v38  ;;  %v3951_v11 = vmul.f32 %v6836_v58, %v9048_v24 }
 0x3c8   : > { %v6840_v44 = vpop.eup %6839  ;;  %6859 = vrcp.f32 %v3580_v17  ;;  %v3583_v45 = vadd.f32 1.0, %v6838_v14  ;;  %v4897_v35 = vmul.f32 -1.442695, %v5861_v9  ;;  %v2928_v8 = vpop.f32.mrb[162].mxu1 }
 0x3c9   : > { %v6842_v25 = vpop.eup %6841  ;;  %6861 = vpow2.f32 %v4893_v29  ;;  %v5862_v40 = vadd.f32 %v2928_v8, %v9119_v34  ;;  %v3952_v2 = vmul.f32 %v6840_v44, %v9052_v63  ;;  %v2930_v49 = vpop.f32.mrb[163].mxu1 }
 0x3ca   : > { %v6844_v18 = vpop.eup %6843  ;;  %6863 = vrcp.f32 %v3583_v45  ;;  %v5863_v7 = vadd.f32 %v2930_v49, %v9126_v55  ;;  %v3955_v52 = vmul.f32 %v6842_v25, %v9056_v10 }
 0x3cb   : > { %v6846_v20 = vpop.eup %6845  ;;  %6865 = vpow2.f32 %v4896_v51  ;;  %v4900_v24 = vmul.f32 -1.442695, %v5862_v40  ;;  %4446 = vmatprep.mubr.f32.mxu0 %v3952_v2  ;;  %v3956_v31 = vmul.f32 %v6844_v18, %v9060_v32 }
 0x3cc   : > { %v6848_v60 = vpop.eup %6847  ;;  %v3584_v54 = vadd.f32 1.0, %v6846_v20  ;;  %6867 = vpow2.f32 %v4897_v35  ;;  %v4901_v26 = vmul.f32 -1.442695, %v5863_v7  ;;  %4447 = vmatmul.mubr.f32.gmra.mrb[146].mxu0 %v3951_v11  ;;  %v2934_v21 = vpop.f32.mrb[164].mxu1 }
 0x3cd   : > { %v6850_v63 = vpop.eup %6849  ;;  %v3587_v41 = vadd.f32 1.0, %v6848_v60  ;;  %6869 = vpow2.f32 %v4900_v24  ;;  %v5864_v30 = vadd.f32 %v2934_v21, %v9119_v34  ;;  %4451 = vmatprep.mubr.f32.mxu0 %v3956_v31  ;;  %v2936_v16 = vpop.f32.mrb[165].mxu1 }
 0x3ce   : > { %v6852_v10 = vpop.eup %6851  ;;  %6871 = vrcp.f32 %v3584_v54  ;;  %v5865_v6 = vadd.f32 %v2936_v16, %v9126_v55  ;;  %v3959_v38 = vmul.f32 %v6850_v63, %v9064_v27 }
 0x3cf   : > { %v6854_v32 = vpop.eup %6853  ;;  %6873 = vrcp.f32 %v3587_v41  ;;  %v4904_v59 = vmul.f32 -1.442695, %v5864_v30  ;;  %v3960_v13 = vmul.f32 %v6852_v10, %v9068_v15 }
 0x3d0   : > { %v6856_v43 = vpop.eup %6855  ;;  %v3588_v28 = vadd.f32 1.0, %v6854_v32  ;;  %6875 = vpow2.f32 %v4901_v26  ;;  %v4905_v37 = vmul.f32 -1.442695, %v5865_v6  ;;  %4452 = vmatmul.mubr.f32.gmra.mrb[148].mxu0 %v3955_v52  ;;  %v2940_v29 = vpop.f32.mrb[166].mxu1 }
 0x3d1   : > { %v6858_v3 = vpop.eup %6857  ;;  %v3591_v33 = vadd.f32 1.0, %v6856_v43  ;;  %6877 = vpow2.f32 %v4904_v59  ;;  %v5866_v58 = vadd.f32 %v2940_v29, %v9119_v34  ;;  %4456 = vmatprep.mubr.f32.mxu0 %v3960_v13  ;;  %v2942_v17 = vpop.f32.mrb[167].mxu1 }
 0x3d2   : > { %v6860_v9 = vpop.eup %6859  ;;  %6879 = vrcp.f32 %v3588_v28  ;;  %v5867_v27 = vadd.f32 %v2942_v17, %v9126_v55  ;;  %v3963_v14 = vmul.f32 %v6858_v3, %v9072_v62 }
 0x3d3   : > { %v6862_v15 = vpop.eup %6861  ;;  %6881 = vrcp.f32 %v3591_v33  ;;  %v4908_v51 = vmul.f32 -1.442695, %v5866_v58  ;;  %v3964_v11 = vmul.f32 %v6860_v9, %v9076_v5 }
 0x3d4   : > { %v6864_v44 = vpop.eup %6863  ;;  %v3592_v45 = vadd.f32 1.0, %v6862_v15  ;;  %6883 = vpow2.f32 %v4905_v37  ;;  %v4909_v35 = vmul.f32 -1.442695, %v5867_v27  ;;  %4457 = vmatmul.mubr.f32.gmra.mrb[150].mxu0 %v3959_v38  ;;  %v2946_v8 = vpop.f32.mrb[168].mxu1 }
 0x3d5   : > { %v6866_v25 = vpop.eup %6865  ;;  %6885 = vpow2.f32 %v4908_v51  ;;  %v5868_v40 = vadd.f32 %v2946_v8, %v9119_v34  ;;  %4461 = vmatprep.mubr.f32.mxu0 %v3964_v11  ;;  %v2948_v2 = vpop.f32.mrb[169].mxu1  ;;  %v3967_v49 = vmul.f32 %v6864_v44, %v9080_v23 }
 0x3d6   : > { %v6868_v62 = vpop.eup %6867  ;;  %6887 = vrcp.f32 %v3592_v45  ;;  %v3595_v18 = vadd.f32 1.0, %v6866_v25  ;;  %v5869_v7 = vadd.f32 %v2948_v2, %v9126_v55 }
 0x3d7   : > { %v6870_v5 = vpop.eup %6869  ;;  %v3596_v52 = vadd.f32 1.0, %v6868_v62  ;;  %6889 = vpow2.f32 %v4909_v35  ;;  %v4912_v20 = vmul.f32 -1.442695, %v5868_v40 }
 0x3d8   : > { %v6872_v24 = vpop.eup %6871  ;;  %6891 = vrcp.f32 %v3595_v18  ;;  %v3599_v31 = vadd.f32 1.0, %v6870_v5  ;;  %v4913_v60 = vmul.f32 -1.442695, %v5869_v7  ;;  %4462 = vmatmul.mubr.f32.gmra.mrb[152].mxu0 %v3963_v14  ;;  %v2952_v54 = vpop.f32.mrb[170].mxu1 }
 0x3d9   : > { %v6874_v26 = vpop.eup %6873  ;;  %6893 = vrcp.f32 %v3596_v52  ;;  %v5870_v21 = vadd.f32 %v2952_v54, %v9119_v34  ;;  %v3968_v23 = vmul.f32 %v6872_v24, %v9084_v50  ;;  %v2954_v63 = vpop.f32.mrb[171].mxu1 }
 0x3da   : > { %v6876_v41 = vpop.eup %6875  ;;  %6895 = vrcp.f32 %v3599_v31  ;;  %v5871_v30 = vadd.f32 %v2954_v63, %v9126_v55  ;;  %v3971_v16 = vmul.f32 %v6874_v26, %v9088_v39 }
 0x3db   : > { %v6878_v10 = vpop.eup %6877  ;;  %v3600_v6 = vadd.f32 1.0, %v6876_v41  ;;  %6897 = vpow2.f32 %v4912_v20  ;;  %v4916_v38 = vmul.f32 -1.442695, %v5870_v21  ;;  %4466 = vmatprep.mubr.f32.mxu0 %v3968_v23 }
 0x3dc   : > { %v6880_v32 = vpop.eup %6879  ;;  %v3603_v59 = vadd.f32 1.0, %v6878_v10  ;;  %6899 = vpow2.f32 %v4913_v60  ;;  %v4917_v13 = vmul.f32 -1.442695, %v5871_v30  ;;  %4467 = vmatmul.mubr.f32.gmra.mrb[154].mxu0 %v3967_v49  ;;  %v2958_v43 = vpop.f32.mrb[172].mxu1 }
 0x3dd   : > { %v6882_v28 = vpop.eup %6881  ;;  %6901 = vrcp.f32 %v3600_v6  ;;  %v5872_v50 = vadd.f32 %v2958_v43, %v9119_v34  ;;  %v3972_v37 = vmul.f32 %v6880_v32, %v9092_v61  ;;  %v2960_v29 = vpop.f32.mrb[173].mxu1 }
 0x3de   : > { %v6884_v3 = vpop.eup %6883  ;;  %6903 = vrcp.f32 %v3603_v59  ;;  %v5873_v39 = vadd.f32 %v2960_v29, %v9126_v55  ;;  %v3975_v33 = vmul.f32 %v6882_v28, %v9096_v53 }
 0x3df   : > { %v6886_v58 = vpop.eup %6885  ;;  %v3604_v17 = vadd.f32 1.0, %v6884_v3  ;;  %6905 = vpow2.f32 %v4916_v38  ;;  %v4920_v9 = vmul.f32 -1.442695, %v5872_v50  ;;  %4471 = vmatprep.mubr.f32.mxu0 %v3972_v37 }
 0x3e0   : > { %v6888_v27 = vpop.eup %6887  ;;  %v3607_v14 = vadd.f32 1.0, %v6886_v58  ;;  %6907 = vpow2.f32 %v4917_v13  ;;  %4472 = vmatmul.mubr.f32.gmra.mrb[156].mxu0 %v3971_v16  ;;  %v2964_v15 = vpop.f32.mrb[174].mxu1  ;;  %v4921_v61 = vmul.f32 -1.442695, %v5873_v39 }
 0x3e1   : > { %v6890_v51 = vpop.eup %6889  ;;  %6909 = vrcp.f32 %v3604_v17  ;;  %v5874_v11 = vadd.f32 %v2964_v15, %v9119_v34  ;;  %v3976_v44 = vmul.f32 %v6888_v27, %v9101_v36  ;;  %v2966_v45 = vpop.f32.mrb[175].mxu1 }
 0x3e2   : > { %v6892_v35 = vpop.eup %6891  ;;  %6911 = vrcp.f32 %v3607_v14  ;;  %v3608_v53 = vadd.f32 1.0, %v6890_v51  ;;  %v5875_v8 = vadd.f32 %v2966_v45, %v9126_v55 }
 0x3e3   : > { %v6894_v25 = vpop.eup %6893  ;;  %6913 = vpow2.f32 %v4920_v9  ;;  %v4924_v40 = vmul.f32 -1.442695, %v5874_v11  ;;  %4476 = vmatprep.mubr.f32.mxu0 %v3976_v44  ;;  %v3979_v2 = vmul.f32 %v6892_v35, %v9106_v19 }
 0x3e4   : > { %v6896_v49 = vpop.eup %6895  ;;  %6915 = vrcp.f32 %v3608_v53  ;;  %v4925_v62 = vmul.f32 -1.442695, %v5875_v8  ;;  %4477 = vmatmul.mubr.f32.gmra.mrb[158].mxu0 %v3975_v33  ;;  %v2970_v18 = vpop.f32.mrb[176].mxu1  ;;  %v3980_v7 = vmul.f32 %v6894_v25, %v9110_v0 }
 0x3e5   : > { %v6898_v36 = vpop.eup %6897  ;;  %6917 = vpow2.f32 %v4921_v61  ;;  %v5876_v5 = vadd.f32 %v2970_v18, %v9119_v34  ;;  %v2972_v52 = vpop.f32.mrb[177].mxu1  ;;  %v3983_v20 = vmul.f32 %v6896_v49, %v9114_v57 }
 0x3e6   : > { %v6900_v24 = vpop.eup %6899  ;;  %v3611_v31 = vadd.f32 1.0, %v6898_v36  ;;  %6919 = vpow2.f32 %v4924_v40  ;;  %4481 = vmatprep.mubr.f32.mxu0 %v3980_v7  ;;  %v5877_v19 = vadd.f32 %v2972_v52, %v9126_v55 }
 0x3e7   : > { %v6902_v60 = vpop.eup %6901  ;;  %v3612_v54 = vadd.f32 1.0, %v6900_v24  ;;  %6921 = vpow2.f32 %v4925_v62  ;;  %v4928_v26 = vmul.f32 -1.442695, %v5876_v5 }
 0x3e8   : > { %v6904_v21 = vpop.eup %6903  ;;  %6923 = vrcp.f32 %v3611_v31  ;;  %v4929_v0 = vmul.f32 -1.442695, %v5877_v19  ;;  %4482 = vmatmul.mubr.f32.gmra.mrb[160].mxu0 %v3979_v2  ;;  %v2976_v23 = vpop.f32.mrb[178].mxu1  ;;  %v3984_v63 = vmul.f32 %v6902_v60, %v9121_v42  ;;  %v9733_v19 = vld [vmem:[#allocation13_spill] sm:$0xff] }
 0x3e9   : > { %v6906_v41 = vpop.eup %6905  ;;  %6925 = vrcp.f32 %v3612_v54  ;;  %v5878_v57 = vadd.f32 %v2976_v23, %v9119_v34  ;;  %v2978_v30 = vpop.f32.mrb[179].mxu1  ;;  %v3987_v16 = vmul.f32 %v6904_v21, %v9128_v1 }
 0x3ea   : > { %v6908_v10 = vpop.eup %6907  ;;  %v3615_v6 = vadd.f32 1.0, %v6906_v41  ;;  %6927 = vpow2.f32 %v4928_v26  ;;  %4486 = vmatprep.mubr.f32.mxu0 %v3984_v63  ;;  %v5879_v38 = vadd.f32 %v2978_v30, %v9126_v55  ;;  %v9734_v26 = vld [vmem:[#allocation14_spill] sm:$0xff] }
 0x3eb   : > { %v6910_v32 = vpop.eup %6909  ;;  %v3616_v59 = vadd.f32 1.0, %v6908_v10  ;;  %6929 = vpow2.f32 %v4929_v0  ;;  %v4932_v13 = vmul.f32 -1.442695, %v5878_v57 }
 0x3ec   : > { %v6912_v43 = vpop.eup %6911  ;;  %6931 = vrcp.f32 %v3615_v6  ;;  %v4933_v42 = vmul.f32 -1.442695, %v5879_v38  ;;  %4487 = vmatmul.mubr.f32.gmra.mrb[162].mxu0 %v3983_v20  ;;  %v2982_v28 = vpop.f32.mrb[180].mxu1  ;;  %v3988_v50 = vmul.f32 %v6910_v32, %v9132_v22  ;;  %v9735_v32 = vld [vmem:[#allocation16_spill] sm:$0xff] }
 0x3ed   : > { %v6914_v37 = vpop.eup %6913  ;;  %6933 = vrcp.f32 %v3616_v59  ;;  %v5880_v1 = vadd.f32 %v2982_v28, %v9119_v34  ;;  %v2984_v29 = vpop.f32.mrb[181].mxu1  ;;  %v3991_v3 = vmul.f32 %v6912_v43, %v9136_v56 }
 0x3ee   : > { %v6916_v39 = vpop.eup %6915  ;;  %v3619_v33 = vadd.f32 1.0, %v6914_v37  ;;  %6935 = vpow2.f32 %v4932_v13  ;;  %4491 = vmatprep.mubr.f32.mxu0 %v3988_v50  ;;  %v5881_v58 = vadd.f32 %v2984_v29, %v9126_v55 }
 0x3ef   : > { %v6918_v17 = vpop.eup %6917  ;;  %6937 = vpow2.f32 %v4933_v42  ;;  %v4936_v9 = vmul.f32 -1.442695, %v5880_v1  ;;  %v3992_v27 = vmul.f32 %v6916_v39, %v9139_v47  ;;  %v9736_v1 = vld [vmem:[#allocation17_spill] sm:$0xff] }
 0x3f0   : > { %v6920_v14 = vpop.eup %6919  ;;  %6939 = vrcp.f32 %v3619_v33  ;;  %v3620_v22 = vadd.f32 1.0, %v6918_v17  ;;  %4492 = vmatmul.mubr.f32.gmra.mrb[164].mxu0 %v3987_v16  ;;  %v2988_v15 = vpop.f32.mrb[182].mxu1  ;;  %v4937_v56 = vmul.f32 -1.442695, %v5881_v58  ;;  %v9737_v58 = vld [vmem:[#allocation18_spill] sm:$0xff] }
 0x3f1   : > { %v6922_v51 = vpop.eup %6921  ;;  %v3623_v61 = vadd.f32 1.0, %v6920_v14  ;;  %6941 = vpow2.f32 %v4936_v9  ;;  %v5882_v11 = vadd.f32 %v2988_v15, %v9119_v34  ;;  %4496 = vmatprep.mubr.f32.mxu0 %v3992_v27  ;;  %v2990_v44 = vpop.f32.mrb[183].mxu1  ;;  %v9738_v14 = vld [vmem:[#allocation19_spill] sm:$0xff] }
 0x3f2   : > { %v6924_v45 = vpop.eup %6923  ;;  %6943 = vrcp.f32 %v3620_v22  ;;  %v3624_v35 = vadd.f32 1.0, %v6922_v51  ;;  %v5883_v53 = vadd.f32 %v2990_v44, %v9126_v55 }
 0x3f3   : > { %v6926_v8 = vpop.eup %6925  ;;  %6945 = vrcp.f32 %v3623_v61  ;;  %v4940_v47 = vmul.f32 -1.442695, %v5882_v11  ;;  %v3995_v25 = vmul.f32 %v6924_v45, %v9142_v48 }
 0x3f4   : > { %v6928_v40 = vpop.eup %6927  ;;  %6947 = vrcp.f32 %v3624_v35  ;;  %4497 = vmatmul.mubr.f32.gmra.mrb[166].mxu0 %v3991_v3  ;;  %v2994_v2 = vpop.f32.mrb[184].mxu1  ;;  %v3996_v49 = vmul.f32 %v6926_v8, %v9146_v12  ;;  %v4941_v7 = vmul.f32 -1.442695, %v5883_v53 }
 0x3f5   : > { %v6930_v62 = vpop.eup %6929  ;;  %v3627_v18 = vadd.f32 1.0, %v6928_v40  ;;  %6949 = vpow2.f32 %v4937_v56  ;;  %v5884_v36 = vadd.f32 %v2994_v2, %v9119_v34  ;;  %v2996_v5 = vpop.f32.mrb[185].mxu1 }
 0x3f6   : > { %v6932_v52 = vpop.eup %6931  ;;  %v3628_v20 = vadd.f32 1.0, %v6930_v62  ;;  %6951 = vpow2.f32 %v4940_v47  ;;  %4501 = vmatprep.mubr.f32.mxu0 %v3996_v49  ;;  %v5885_v24 = vadd.f32 %v2996_v5, %v9126_v55  ;;  %v9739_v47 = vld [vmem:[#allocation20_spill] sm:$0xff]  ;;  %v9740_v49 = vld [vmem:[#allocation21_spill] sm:$0xff] }
 0x3f7   : > { %v6934_v48 = vpop.eup %6933  ;;  %6953 = vrcp.f32 %v3627_v18  ;;  %v4944_v31 = vmul.f32 -1.442695, %v5884_v36  ;;  %v3999_v60 = vmul.f32 %v6932_v52, %v9733_v19  ;;  %v9742_v52 = vld [vmem:[#allocation77_spill] sm:$0xff] }
 0x3f8   : > { %v6936_v54 = vpop.eup %6935  ;;  %6955 = vrcp.f32 %v3628_v20  ;;  %4502 = vmatmul.mubr.f32.gmra.mrb[168].mxu0 %v3995_v25  ;;  %v3000_v12 = vpop.f32.mrb[186].mxu1  ;;  %v4000_v21 = vmul.f32 %v6934_v48, %v9734_v26  ;;  %v4945_v63 = vmul.f32 -1.442695, %v5885_v24  ;;  %v9743_v48 = vld [vmem:[#allocation22_spill] sm:$0xff] }
 0x3f9   : > { %v6938_v0 = vpop.eup %6937  ;;  %v3631_v23 = vadd.f32 1.0, %v6936_v54  ;;  %6957 = vpow2.f32 %v4941_v7  ;;  %v5886_v41 = vadd.f32 %v3000_v12, %v9119_v34  ;;  %v3002_v57 = vpop.f32.mrb[187].mxu1  ;;  %v9745_v12 = vld [vmem:[#allocation23_spill] sm:$0xff] }
 0x3fa   : > { %v6940_v30 = vpop.eup %6939  ;;  %v3632_v16 = vadd.f32 1.0, %v6938_v0  ;;  %6959 = vpow2.f32 %v4944_v31  ;;  %4506 = vmatprep.mubr.f32.mxu0 %v4000_v21  ;;  %v5887_v10 = vadd.f32 %v3002_v57, %v9126_v55 }
 0x3fb   : > { %v6942_v6 = vpop.eup %6941  ;;  %6961 = vrcp.f32 %v3631_v23  ;;  %v4948_v38 = vmul.f32 -1.442695, %v5886_v41  ;;  %v4003_v59 = vmul.f32 %v6940_v30, %v9735_v32 }
 0x3fc   : > { %v6944_v13 = vpop.eup %6943  ;;  %6963 = vrcp.f32 %v3632_v16  ;;  %v3635_v43 = vadd.f32 1.0, %v6942_v6  ;;  %v4949_v42 = vmul.f32 -1.442695, %v5887_v10  ;;  %4507 = vmatmul.mubr.f32.gmra.mrb[170].mxu0 %v3999_v60  ;;  %v3006_v28 = vpop.f32.mrb[188].mxu1  ;;  %v9744_v60 = vld [vmem:[#allocation78_spill] sm:$0xff]  ;;  %v9747_v10 = vld [vmem:[#allocation79_spill] sm:$0xff] }
 0x3fd   : > { %v6946_v50 = vpop.eup %6945  ;;  %6965 = vpow2.f32 %v4945_v63  ;;  %v5888_v37 = vadd.f32 %v3006_v28, %v9119_v34  ;;  %v4004_v29 = vmul.f32 %v6944_v13, %v9736_v1  ;;  %v3008_v3 = vpop.f32.mrb[189].mxu1  ;;  %v5760_v54 = vadd.f32 %v9744_v60, %v8942_v4  ;;  %v9746_v63 = vld [vmem:[#allocation24_spill] sm:$0xff]  ;;  %v9749_v28 = vld [vmem:[#allocation25_spill] sm:$0xff]  ;;  %v9750_v1 = vld [vmem:[#allocation26_spill] sm:$0xff] }
 0x3fe   : > { %v6948_v39 = vpop.eup %6947  ;;  %6967 = vrcp.f32 %v3635_v43  ;;  %v5889_v33 = vadd.f32 %v3008_v3, %v9126_v55  ;;  %v4007_v17 = vmul.f32 %v6946_v50, %v9737_v58  ;;  %v9751_v58 = vld [vmem:[#allocation81_spill] sm:$0xff] }
 0x3ff   : > { %v6950_v9 = vpop.eup %6949  ;;  %6969 = vpow2.f32 %v4948_v38  ;;  %v4952_v27 = vmul.f32 -1.442695, %v5888_v37  ;;  %4511 = vmatprep.mubr.f32.mxu0 %v4004_v29  ;;  %v4008_v22 = vmul.f32 %v6948_v39, %v9738_v14 }
 0x400   : > { %v6952_v15 = vpop.eup %6951  ;;  %v3636_v51 = vadd.f32 1.0, %v6950_v9  ;;  %6971 = vpow2.f32 %v4949_v42  ;;  %v4953_v61 = vmul.f32 -1.442695, %v5889_v33  ;;  %4512 = vmatmul.mubr.f32.gmra.mrb[172].mxu0 %v4003_v59  ;;  %v3012_v56 = vpop.f32.mrb[190].mxu1  ;;  %v9748_v59 = vld [vmem:[#allocation80_spill] sm:$0xff] }
 0x401   : > { %v6954_v11 = vpop.eup %6953  ;;  %v3639_v44 = vadd.f32 1.0, %v6952_v15  ;;  %6973 = vpow2.f32 %v4952_v27  ;;  %v5890_v45 = vadd.f32 %v3012_v56, %v9119_v34  ;;  %4516 = vmatprep.mubr.f32.mxu0 %v4008_v22  ;;  %v3014_v35 = vpop.f32.mrb[191].mxu1  ;;  %v9741_v34 = vld [vmem:[#allocation12_spill] sm:$0xff]  ;;  %v5762_v13 = vadd.f32 %v9748_v59, %v8942_v4  ;;  %v9752_v27 = vld [vmem:[#allocation27_spill] sm:$0xff] }
 0x402   : > { %v6956_v53 = vpop.eup %6955  ;;  %6975 = vrcp.f32 %v3636_v51  ;;  %v5891_v8 = vadd.f32 %v3014_v35, %v9126_v55  ;;  %v4011_v25 = vmul.f32 %v6954_v11, %v9739_v47  ;;  %v5759_v20 = vadd.f32 %v9742_v52, %v9741_v34  ;;  %v9753_v15 = vld [vmem:[#allocation28_spill] sm:$0xff] }
 0x403   : > { %v6958_v40 = vpop.eup %6957  ;;  %6977 = vrcp.f32 %v3639_v44  ;;  %v4956_v2 = vmul.f32 -1.442695, %v5890_v45  ;;  %v4012_v62 = vmul.f32 %v6956_v53, %v9740_v49  ;;  %v5761_v6 = vadd.f32 %v9747_v10, %v9741_v34  ;;  %v9754_v45 = vld [vmem:[#allocation29_spill] sm:$0xff] }
 0x404   : > { %v6960_v18 = vpop.eup %6959  ;;  %v3640_v7 = vadd.f32 1.0, %v6958_v40  ;;  %6979 = vpow2.f32 %v4953_v61  ;;  %v4957_v36 = vmul.f32 -1.442695, %v5891_v8  ;;  %4517 = vmatmul.mubr.f32.gmra.mrb[174].mxu0 %v4007_v17  ;;  %v5763_v4 = vadd.f32 %v9751_v58, %v9741_v34 }
 0x405   : > { %v6962_v5 = vpop.eup %6961  ;;  %v3643_v24 = vadd.f32 1.0, %v6960_v18  ;;  %6981 = vpow2.f32 %v4956_v2  ;;  %4521 = vmatprep.mubr.f32.mxu0 %v4012_v62 }
 0x406   : > { %v6964_v55 = vpop.eup %6963  ;;  %6983 = vrcp.f32 %v3640_v7  ;;  %v4015_v31 = vmul.f32 %v6962_v5, %v9743_v48 }
 0x407   : > { %v6966_v19 = vpop.eup %6965  ;;  %6985 = vrcp.f32 %v3643_v24  ;;  %v4016_v26 = vmul.f32 %v6964_v55, %v9745_v12  ;;  %v9755_v24 = vld [vmem:[#allocation15_spill] sm:$0xff] }
 0x408   : > { %v6968_v21 = vpop.eup %6967  ;;  %v3644_v0 = vadd.f32 1.0, %v6966_v19  ;;  %6987 = vpow2.f32 %v4957_v36  ;;  %4522 = vmatmul.mubr.f32.gmra.mrb[176].mxu0 %v4011_v25  ;;  %v4565_v48 = vadd.s32 8, %v9755_v24  ;;  %v9334_v19 = vld [vmem:[#allocation4] ss:$0 sm:$0xff]  ;;  %v4566_v12 = vadd.s32 16, %v9755_v24 }
 0x409   : > { %v6970_v23 = vpop.eup %6969  ;;  %6989 = vtanh.f32 %v5759_v20  ;;  %4526 = vmatprep.mubr.f32.mxu0 %v4016_v26  ;;  %v4019_v41 = vmul.f32 %v6968_v21, %v9746_v63  ;;  %v4568_v59 = vadd.s32 32, %v9755_v24 }
 0x40a   : > { %v6972_v57 = vpop.eup %6971  ;;  %6991 = vrcp.f32 %v3644_v0  ;;  %v3647_v30 = vadd.f32 1.0, %v6970_v23 }
 0x40b   : > { %v6974_v16 = vpop.eup %6973  ;;  %6993 = vtanh.f32 %v5760_v54  ;;  %v3648_v38 = vadd.f32 1.0, %v6972_v57 }
 0x40c   : > { %v6976_v32 = vpop.eup %6975  ;;  %6995 = vrcp.f32 %v3647_v30  ;;  %v3651_v43 = vadd.f32 1.0, %v6974_v16  ;;  %4527 = vmatmul.mubr.f32.gmra.mrb[178].mxu0 %v4015_v31  ;;  %v9332_v31 = vstv %s4629_s12  ;;  %v4567_v30 = vadd.s32 24, %v9755_v24 }
 0x40d   : > { %v6978_v42 = vpop.eup %6977  ;;  %6997 = vrcp.f32 %v3648_v38  ;;  %v4020_v50 = vmul.f32 %v6976_v32, %v9749_v28  ;;  %v4569_v28 = vadd.s32 40, %v9755_v24 }
 0x40e   : > { %v6980_v37 = vpop.eup %6979  ;;  %6999 = vrcp.f32 %v3651_v43  ;;  %v4023_v29 = vmul.f32 %v6978_v42, %v9750_v1 }
 0x40f   : > { %v6982_v3 = vpop.eup %6981  ;;  %7001 = vtanh.f32 %v5761_v6  ;;  %v3652_v39 = vadd.f32 1.0, %v6980_v37  ;;  %4531 = vmatprep.mubr.f32.mxu0 %v4020_v50 }
 0x410   : > { %v6984_v33 = vpop.eup %6983  ;;  %7003 = vtanh.f32 %v5762_v13  ;;  %v3655_v17 = vadd.f32 1.0, %v6982_v3  ;;  %4532 = vmatmul.mubr.f32.gmra.mrb[180].mxu0 %v4019_v41 }
 0x411   : > { %v6986_v9 = vpop.eup %6985  ;;  %7005 = vrcp.f32 %v3652_v39  ;;  %v4024_v14 = vmul.f32 %v6984_v33, %v9752_v27  ;;  %v4570_v39 = vadd.s32 48, %v9755_v24  ;;  %v4571_v27 = vadd.s32 56, %v9755_v24 }
 0x412   : > { %v6988_v22 = vpop.eup %6987  ;;  %7007 = vrcp.f32 %v3655_v17  ;;  %v4027_v51 = vmul.f32 %v6986_v9, %v9753_v15 }
 0x413   : > { %v6990_v61 = vpop.eup %6989  ;;  %v3656_v56 = vadd.f32 1.0, %v6988_v22  ;;  %4536 = vmatprep.mubr.f32.mxu0 %v4024_v14  ;;  %7009 = vtanh.f32 %v5763_v4 }
 0x414   : > { %v6992_v11 = vpop.eup %6991  ;;  %4537 = vmatmul.mubr.f32.gmra.mrb[182].mxu0 %v4023_v29 }
 0x415   : > { %v6994_v44 = vpop.eup %6993  ;;  %7011 = vrcp.f32 %v3656_v56  ;;  %v4028_v35 = vmul.f32 %v6992_v11, %v9754_v45  ;;  %v4572_v56 = vadd.s32 64, %v9755_v24 }
 0x416   : > { %v6996_v53 = vpop.eup %6995 }
 0x417   : > { %v6998_v8 = vpop.eup %6997  ;;  %4541 = vmatprep.mubr.f32.mxu0 %v4028_v35  ;;  %v4031_v47 = vmul.f32 %v6996_v53, %v9218_v46  ;;  %v9327_v46 = vstv %s4959_s7 }
 0x418   : > { %v7000_v25 = vpop.eup %6999  ;;  %4542 = vmatmul.mubr.f32.gmra.mrb[184].mxu0 %v4027_v51  ;;  %v4032_v40 = vmul.f32 %v6998_v8, %v6990_v61  ;;  %v4597_v55 = vadd.s32 %v9327_v46, %v9755_v24  ;;  %v4598_v54 = vadd.s32 %v9327_v46, %v4565_v48  ;;  %v4599_v63 = vadd.s32 %v9327_v46, %v4566_v12 }
 0x419   : > { %v7002_v2 = vpop.eup %7001  ;;  %v4035_v49 = vmul.f32 %v7000_v25, %v6994_v44  ;;  %v4600_v32 = vadd.s32 %v9327_v46, %v4567_v30  ;;  %v4601_v42 = vadd.s32 %v9327_v46, %v4568_v59  ;;  %v4602_v3 = vadd.s32 %v9327_v46, %v4569_v28 }
 0x41a   : > { %v7004_v62 = vpop.eup %7003  ;;  %4546 = vmatprep.mubr.f32.mxu0 %v4032_v40  ;;  %vm4631_vm0 = vcmp.lt.s32.totalorder %v4597_v55, %v9332_v31  ;;  %vm4632_vm2 = vcmp.lt.s32.totalorder %v4598_v54, %v9332_v31  ;;  %vm4633_vm3 = vcmp.lt.s32.totalorder %v4599_v63, %v9332_v31  ;;  %v4603_v9 = vadd.s32 %v9327_v46, %v4570_v39 }
 0x41b   : > { %v7006_v18 = vpop.eup %7005  ;;  %vm4634_vm4 = vcmp.lt.s32.totalorder %v4600_v32, %v9332_v31  ;;  %vm4635_vm5 = vcmp.lt.s32.totalorder %v4601_v42, %v9332_v31  ;;  %vm4636_vm6 = vcmp.lt.s32.totalorder %v4602_v3, %v9332_v31  ;;  %v4604_v61 = vadd.s32 %v9327_v46, %v4571_v27 }
 0x41c   : > { %v7008_v7 = vpop.eup %7007  ;;  %4547 = vmatmul.mubr.f32.gmra.mrb[186].mxu0 %v4031_v47  ;;  %v4036_v36 = vmul.f32 %v7006_v18, %v7002_v2  ;;  %vm4637_vm7 = vcmp.lt.s32.totalorder %v4603_v9, %v9332_v31  ;;  %v4605_v53 = vadd.s32 %v9327_v46, %v4572_v56  ;;  %v4573_v25 = vadd.s32 72, %v9755_v24 }
 0x41d   : > { %v4039_v5 = vmul.f32 %v7008_v7, %v7004_v62  ;;  %v7010_v34 = vpop.eup %7009  ;;  %vm4638_vm8 = vcmp.lt.s32.totalorder %v4604_v61, %v9332_v31  ;;  %v4574_v7 = vadd.s32 80, %v9755_v24  ;;  %v4576_v12 = vadd.s32 96, %v9755_v24 }
 0x41e   : > { %4551 = vmatprep.mubr.f32.mxu0 %v4036_v36  ;;  %vm4639_vm9 = vcmp.lt.s32.totalorder %v4605_v53, %v9332_v31  ;;  %v4606_v18 = vadd.s32 %v9327_v46, %v4573_v25  ;;  %v4579_v28 = vadd.s32 120, %v9755_v24  ;;  %v4580_v39 = vadd.s32 128, %v9755_v24 }
 0x41f   : > { %v7012_v52 = vpop.eup %7011  ;;  %v4609_v63 = vadd.s32 %v9327_v46, %v4576_v12  ;;  %v4581_v27 = vadd.s32 136, %v9755_v24  ;;  %v4582_v56 = vadd.s32 144, %v9755_v24  ;;  %v4586_v12 = vadd.s32 176, %v9755_v24 }
 0x420   : > { %4552 = vmatmul.mubr.f32.gmra.mrb[188].mxu0 %v4035_v49  ;;  %v4040_v20 = vmul.f32 %v7012_v52, %v7010_v34  ;;  %vm4640_vm10 = vcmp.lt.s32.totalorder %v4606_v18, %v9332_v31  ;;  %v4607_v34 = vadd.s32 %v9327_v46, %v4574_v7  ;;  %v4575_v52 = vadd.s32 88, %v9755_v24 }
 0x421   : > { %vm4643_vm13 = vcmp.lt.s32.totalorder %v4609_v63, %v9332_v31  ;;  %v4612_v3 = vadd.s32 %v9327_v46, %v4579_v28  ;;  %v4613_v9 = vadd.s32 %v9327_v46, %v4580_v39  ;;  %v4614_v61 = vadd.s32 %v9327_v46, %v4581_v27 }
 0x422   : > { %4556 = vmatprep.mubr.f32.mxu0 %v4040_v20  ;;  %vm4641_vm11 = vcmp.lt.s32.totalorder %v4607_v34, %v9332_v31  ;;  %v4608_v54 = vadd.s32 %v9327_v46, %v4575_v52  ;;  %v4615_v53 = vadd.s32 %v9327_v46, %v4582_v56  ;;  %v4585_v52 = vadd.s32 168, %v9755_v24 }
 0x423   : > { %v4619_v63 = vadd.s32 %v9327_v46, %v4586_v12  ;;  %v4589_v28 = vadd.s32 200, %v9755_v24  ;;  %v4590_v39 = vadd.s32 208, %v9755_v24  ;;  %v4591_v27 = vadd.s32 216, %v9755_v24 }
 0x424   : > { %4557 = vmatmul.mubr.f32.gmra.mrb[190].mxu0 %v4039_v5  ;;  %vm4642_vm12 = vcmp.lt.s32.totalorder %v4608_v54, %v9332_v31  ;;  %v4618_v54 = vadd.s32 %v9327_v46, %v4585_v52  ;;  %v4592_v56 = vadd.s32 224, %v9755_v24  ;;  %v4595_v52 = vadd.s32 248, %v9755_v24 }
 0x478   : > { %v4403_v60 = vpop.f32.mrb[128].mxu0 }
 0x479   : > { %v5892_v26 = vadd.f32 %v9334_v19, %v4403_v60  ;;  %v4405_v21 = vpop.f32.mrb[129].mxu0 }
 0x47b   : > { %v4663_v0 = vsel %vm4631_vm0, %v5892_v26, -1e+30  ;;  %vm4646_vm0 = vcmp.lt.s32.totalorder %v4612_v3, %v9332_v31  ;;  %v4622_v3 = vadd.s32 %v9327_v46, %v4589_v28 }
 0x47c   : > { %4696 = vst.msk [vmem:[%s9342_s16] sm:$0xff] %vm4695_vm1, %v4663_v0  ;;  %v4408_v23 = vpop.f32.mrb[130].mxu0 }
 0x47d   : > { %v5893_v41 = vadd.f32 %v9334_v19, %v4408_v23  ;;  %v4410_v57 = vpop.f32.mrb[131].mxu0 }
 0x47f   : > { %v4664_v16 = vsel %vm4632_vm2, %v5893_v41, -1e+30  ;;  %v4577_v41 = vadd.s32 104, %v9755_v24  ;;  %vm4647_vm2 = vcmp.lt.s32.totalorder %v4613_v9, %v9332_v31  ;;  %v4623_v9 = vadd.s32 %v9327_v46, %v4590_v39 }
 0x480   : > { %4697 = vst.msk [vmem:[%s9342_s16 + $0x8] sm:$0xff] %vm4695_vm1, %v4664_v16  ;;  %v4413_v10 = vpop.f32.mrb[132].mxu0 }
 0x481   : > { %v5894_v6 = vadd.f32 %v9334_v19, %v4413_v10  ;;  %v4415_v38 = vpop.f32.mrb[133].mxu0 }
 0x482   : > { %v4578_v38 = vadd.s32 112, %v9755_v24 }
 0x483   : > { %v4665_v13 = vsel %vm4633_vm3, %v5894_v6, -1e+30  ;;  %v4610_v6 = vadd.s32 %v9327_v46, %v4577_v41  ;;  %vm4648_vm3 = vcmp.lt.s32.totalorder %v4614_v61, %v9332_v31  ;;  %v4587_v41 = vadd.s32 184, %v9755_v24 }
 0x484   : > { %4698 = vst.msk [vmem:[%s9342_s16 + $0x10] sm:$0xff] %vm4695_vm1, %v4665_v13  ;;  %v4611_v42 = vadd.s32 %v9327_v46, %v4578_v38  ;;  %v4588_v38 = vadd.s32 192, %v9755_v24  ;;  %v4624_v61 = vadd.s32 %v9327_v46, %v4591_v27 }
 0x485   : > { %vm4644_vm14 = vcmp.lt.s32.totalorder %v4610_v6, %v9332_v31  ;;  %v4620_v6 = vadd.s32 %v9327_v46, %v4587_v41 }
 0x486   : > { %v4418_v43 = vpop.f32.mrb[134].mxu0  ;;  %vm4645_vm15 = vcmp.lt.s32.totalorder %v4611_v42, %v9332_v31  ;;  %v4621_v42 = vadd.s32 %v9327_v46, %v4588_v38 }
 0x487   : > { %v5895_v50 = vadd.f32 %v9334_v19, %v4418_v43  ;;  %v4420_v37 = vpop.f32.mrb[135].mxu0 }
 0x489   : > { %v4666_v1 = vsel %vm4634_vm4, %v5895_v50, -1e+30  ;;  %vm4649_vm4 = vcmp.lt.s32.totalorder %v4615_v53, %v9332_v31  ;;  %v4625_v53 = vadd.s32 %v9327_v46, %v4592_v56 }
 0x48a   : > { %4699 = vst.msk [vmem:[%s9342_s16 + $0x18] sm:$0xff] %vm4695_vm1, %v4666_v1  ;;  %v4423_v29 = vpop.f32.mrb[136].mxu0 }
 0x48b   : > { %v5896_v33 = vadd.f32 %v9334_v19, %v4423_v29  ;;  %v4425_v58 = vpop.f32.mrb[137].mxu0 }
 0x48d   : > { %v4667_v4 = vsel %vm4635_vm5, %v5896_v33, -1e+30 }
 0x48e   : > { %4700 = vst.msk [vmem:[%s9342_s16 + $0x20] sm:$0xff] %vm4695_vm1, %v4667_v4  ;;  %v4428_v17 = vpop.f32.mrb[138].mxu0 }
 0x48f   : > { %v5897_v14 = vadd.f32 %v9334_v19, %v4428_v17  ;;  %v4430_v22 = vpop.f32.mrb[139].mxu0 }
 0x491   : > { %v4668_v15 = vsel %vm4636_vm6, %v5897_v14, -1e+30 }
 0x492   : > { %4701 = vst.msk [vmem:[%s9342_s16 + $0x28] sm:$0xff] %vm4695_vm1, %v4668_v15  ;;  %v4433_v51 = vpop.f32.mrb[140].mxu0 }
 0x493   : > { %v5898_v11 = vadd.f32 %v9334_v19, %v4433_v51  ;;  %v4435_v44 = vpop.f32.mrb[141].mxu0 }
 0x495   : > { %v4669_v45 = vsel %vm4637_vm7, %v5898_v11, -1e+30  ;;  %vm4652_vm7 = vcmp.lt.s32.totalorder %v4618_v54, %v9332_v31  ;;  %v4628_v54 = vadd.s32 %v9327_v46, %v4595_v52 }
 0x496   : > { %4702 = vst.msk [vmem:[%s9342_s16 + $0x30] sm:$0xff] %vm4695_vm1, %v4669_v45  ;;  %v4438_v35 = vpop.f32.mrb[142].mxu0 }
 0x497   : > { %v5899_v8 = vadd.f32 %v9334_v19, %v4438_v35  ;;  %v4440_v47 = vpop.f32.mrb[143].mxu0 }
 0x499   : > { %v4670_v40 = vsel %vm4638_vm8, %v5899_v8, -1e+30  ;;  %v4583_v8 = vadd.s32 152, %v9755_v24  ;;  %vm4653_vm8 = vcmp.lt.s32.totalorder %v4619_v63, %v9332_v31 }
 0x49a   : > { %4703 = vst.msk [vmem:[%s9342_s16 + $0x38] sm:$0xff] %vm4695_vm1, %v4670_v40  ;;  %v4443_v2 = vpop.f32.mrb[144].mxu0 }
 0x49b   : > { %v5900_v49 = vadd.f32 %v9334_v19, %v4443_v2  ;;  %v4445_v62 = vpop.f32.mrb[145].mxu0 }
 0x49c   : > { %v4584_v62 = vadd.s32 160, %v9755_v24 }
 0x49d   : > { %v4671_v36 = vsel %vm4639_vm9, %v5900_v49, -1e+30  ;;  %v4616_v49 = vadd.s32 %v9327_v46, %v4583_v8  ;;  %vm4654_vm9 = vcmp.lt.s32.totalorder %v4620_v6, %v9332_v31  ;;  %v4593_v8 = vadd.s32 232, %v9755_v24 }
 0x49e   : > { %4704 = vst.msk [vmem:[%s9342_s16 + $0x40] sm:$0xff] %vm4695_vm1, %v4671_v36  ;;  %v4617_v34 = vadd.s32 %v9327_v46, %v4584_v62  ;;  %v4594_v62 = vadd.s32 240, %v9755_v24 }
 0x49f   : > { %v4448_v5 = vpop.f32.mrb[146].mxu0  ;;  %vm4650_vm5 = vcmp.lt.s32.totalorder %v4616_v49, %v9332_v31  ;;  %v4626_v49 = vadd.s32 %v9327_v46, %v4593_v8 }
 0x4a0   : > { %v5901_v20 = vadd.f32 %v9334_v19, %v4448_v5  ;;  %v4450_v55 = vpop.f32.mrb[147].mxu0  ;;  %vm4651_vm6 = vcmp.lt.s32.totalorder %v4617_v34, %v9332_v31  ;;  %v4627_v34 = vadd.s32 %v9327_v46, %v4594_v62 }
 0x4a2   : > { %v4672_v48 = vsel %vm4640_vm10, %v5901_v20, -1e+30  ;;  %vm4655_vm10 = vcmp.lt.s32.totalorder %v4621_v42, %v9332_v31 }
 0x4a3   : > { %4705 = vst.msk [vmem:[%s9342_s16 + $0x48] sm:$0xff] %vm4695_vm1, %v4672_v48  ;;  %v4453_v60 = vpop.f32.mrb[148].mxu0 }
 0x4a4   : > { %v5902_v26 = vadd.f32 %v9334_v19, %v4453_v60  ;;  %v4455_v21 = vpop.f32.mrb[149].mxu0 }
 0x4a6   : > { %v4673_v0 = vsel %vm4641_vm11, %v5902_v26, -1e+30  ;;  %vm4656_vm11 = vcmp.lt.s32.totalorder %v4622_v3, %v9332_v31 }
 0x4a7   : > { %4706 = vst.msk [vmem:[%s9342_s16 + $0x50] sm:$0xff] %vm4695_vm1, %v4673_v0  ;;  %v4458_v23 = vpop.f32.mrb[150].mxu0 }
 0x4a8   : > { %v5903_v57 = vadd.f32 %v9334_v19, %v4458_v23  ;;  %v4460_v30 = vpop.f32.mrb[151].mxu0 }
 0x4aa   : > { %v4674_v16 = vsel %vm4642_vm12, %v5903_v57, -1e+30  ;;  %vm4657_vm12 = vcmp.lt.s32.totalorder %v4623_v9, %v9332_v31 }
 0x4ab   : > { %4707 = vst.msk [vmem:[%s9342_s16 + $0x58] sm:$0xff] %vm4695_vm1, %v4674_v16  ;;  %v4463_v10 = vpop.f32.mrb[152].mxu0 }
 0x4ac   : > { %v5904_v32 = vadd.f32 %v9334_v19, %v4463_v10  ;;  %v4465_v59 = vpop.f32.mrb[153].mxu0 }
 0x4ae   : > { %v4675_v13 = vsel %vm4643_vm13, %v5904_v32, -1e+30  ;;  %vm4658_vm13 = vcmp.lt.s32.totalorder %v4624_v61, %v9332_v31 }
 0x4af   : > { %4708 = vst.msk [vmem:[%s9342_s16 + $0x60] sm:$0xff] %vm4695_vm1, %v4675_v13  ;;  %v4468_v43 = vpop.f32.mrb[154].mxu0 }
 0x4b0   : > { %v5905_v50 = vadd.f32 %v9334_v19, %v4468_v43  ;;  %v4470_v37 = vpop.f32.mrb[155].mxu0 }
 0x4b2   : > { %v4676_v1 = vsel %vm4644_vm14, %v5905_v50, -1e+30  ;;  %vm4659_vm14 = vcmp.lt.s32.totalorder %v4625_v53, %v9332_v31 }
 0x4b3   : > { %4709 = vst.msk [vmem:[%s9342_s16 + $0x68] sm:$0xff] %vm4695_vm1, %v4676_v1  ;;  %v4473_v29 = vpop.f32.mrb[156].mxu0 }
 0x4b4   : > { %v5906_v33 = vadd.f32 %v9334_v19, %v4473_v29  ;;  %v4475_v58 = vpop.f32.mrb[157].mxu0 }
 0x4b6   : > { %v4677_v4 = vsel %vm4645_vm15, %v5906_v33, -1e+30  ;;  %vm4660_vm15 = vcmp.lt.s32.totalorder %v4626_v49, %v9332_v31 }
 0x4b7   : > { %4710 = vst.msk [vmem:[%s9342_s16 + $0x70] sm:$0xff] %vm4695_vm1, %v4677_v4  ;;  %v4478_v17 = vpop.f32.mrb[158].mxu0 }
 0x4b8   : > { %v5907_v14 = vadd.f32 %v9334_v19, %v4478_v17  ;;  %v4480_v22 = vpop.f32.mrb[159].mxu0 }
 0x4ba   : > { %v4678_v15 = vsel %vm4646_vm0, %v5907_v14, -1e+30  ;;  %vm4661_vm0 = vcmp.lt.s32.totalorder %v4627_v34, %v9332_v31 }
 0x4bb   : > { %4711 = vst.msk [vmem:[%s9342_s16 + $0x78] sm:$0xff] %vm4695_vm1, %v4678_v15  ;;  %v4483_v51 = vpop.f32.mrb[160].mxu0 }
 0x4bc   : > { %v5908_v11 = vadd.f32 %v9334_v19, %v4483_v51  ;;  %v4485_v44 = vpop.f32.mrb[161].mxu0 }
 0x4be   : > { %v4679_v45 = vsel %vm4647_vm2, %v5908_v11, -1e+30  ;;  %vm4662_vm2 = vcmp.lt.s32.totalorder %v4628_v54, %v9332_v31 }
 0x4bf   : > { %4712 = vst.msk [vmem:[%s9342_s16 + $0x80] sm:$0xff] %vm4695_vm1, %v4679_v45  ;;  %v4488_v35 = vpop.f32.mrb[162].mxu0 }
 0x4c0   : > { %v5909_v47 = vadd.f32 %v9334_v19, %v4488_v35  ;;  %v4490_v25 = vpop.f32.mrb[163].mxu0 }
 0x4c2   : > { %v4680_v40 = vsel %vm4648_vm3, %v5909_v47, -1e+30 }
 0x4c3   : > { %4713 = vst.msk [vmem:[%s9342_s16 + $0x88] sm:$0xff] %vm4695_vm1, %v4680_v40  ;;  %v4493_v2 = vpop.f32.mrb[164].mxu0 }
 0x4c4   : > { %v5910_v18 = vadd.f32 %v9334_v19, %v4493_v2  ;;  %v4495_v7 = vpop.f32.mrb[165].mxu0 }
 0x4c6   : > { %v4681_v36 = vsel %vm4649_vm4, %v5910_v18, -1e+30 }
 0x4c7   : > { %4714 = vst.msk [vmem:[%s9342_s16 + $0x90] sm:$0xff] %vm4695_vm1, %v4681_v36  ;;  %v4498_v5 = vpop.f32.mrb[166].mxu0 }
 0x4c8   : > { %v5911_v20 = vadd.f32 %v9334_v19, %v4498_v5  ;;  %v4500_v55 = vpop.f32.mrb[167].mxu0 }
 0x4ca   : > { %v4682_v48 = vsel %vm4650_vm5, %v5911_v20, -1e+30 }
 0x4cb   : > { %4715 = vst.msk [vmem:[%s9342_s16 + $0x98] sm:$0xff] %vm4695_vm1, %v4682_v48  ;;  %v4503_v60 = vpop.f32.mrb[168].mxu0 }
 0x4cc   : > { %v5912_v26 = vadd.f32 %v9334_v19, %v4503_v60  ;;  %v4505_v21 = vpop.f32.mrb[169].mxu0 }
 0x4ce   : > { %v4683_v0 = vsel %vm4651_vm6, %v5912_v26, -1e+30 }
 0x4cf   : > { %4716 = vst.msk [vmem:[%s9342_s16 + $0xa0] sm:$0xff] %vm4695_vm1, %v4683_v0  ;;  %v4508_v23 = vpop.f32.mrb[170].mxu0 }
 0x4d0   : > { %v5913_v57 = vadd.f32 %v9334_v19, %v4508_v23  ;;  %v4510_v30 = vpop.f32.mrb[171].mxu0 }
 0x4d2   : > { %v4684_v16 = vsel %vm4652_vm7, %v5913_v57, -1e+30 }
 0x4d3   : > { %4717 = vst.msk [vmem:[%s9342_s16 + $0xa8] sm:$0xff] %vm4695_vm1, %v4684_v16  ;;  %v4513_v10 = vpop.f32.mrb[172].mxu0 }
 0x4d4   : > { %v5914_v32 = vadd.f32 %v9334_v19, %v4513_v10  ;;  %v4515_v59 = vpop.f32.mrb[173].mxu0 }
 0x4d6   : > { %v4685_v13 = vsel %vm4653_vm8, %v5914_v32, -1e+30 }
 0x4d7   : > { %4718 = vst.msk [vmem:[%s9342_s16 + $0xb0] sm:$0xff] %vm4695_vm1, %v4685_v13  ;;  %v4518_v43 = vpop.f32.mrb[174].mxu0 }
 0x4d8   : > { %v5915_v50 = vadd.f32 %v9334_v19, %v4518_v43  ;;  %v4520_v37 = vpop.f32.mrb[175].mxu0 }
 0x4da   : > { %v4686_v1 = vsel %vm4654_vm9, %v5915_v50, -1e+30 }
 0x4db   : > { %4719 = vst.msk [vmem:[%s9342_s16 + $0xb8] sm:$0xff] %vm4695_vm1, %v4686_v1  ;;  %v4523_v29 = vpop.f32.mrb[176].mxu0 }
 0x4dc   : > { %v5916_v33 = vadd.f32 %v9334_v19, %v4523_v29  ;;  %v4525_v58 = vpop.f32.mrb[177].mxu0 }
 0x4de   : > { %v4687_v4 = vsel %vm4655_vm10, %v5916_v33, -1e+30 }
 0x4df   : > { %4720 = vst.msk [vmem:[%s9342_s16 + $0xc0] sm:$0xff] %vm4695_vm1, %v4687_v4  ;;  %v4528_v17 = vpop.f32.mrb[178].mxu0 }
 0x4e0   : > { %v5917_v14 = vadd.f32 %v9334_v19, %v4528_v17  ;;  %v4530_v22 = vpop.f32.mrb[179].mxu0 }
 0x4e2   : > { %v4688_v15 = vsel %vm4656_vm11, %v5917_v14, -1e+30 }
 0x4e3   : > { %4721 = vst.msk [vmem:[%s9342_s16 + $0xc8] sm:$0xff] %vm4695_vm1, %v4688_v15  ;;  %v4533_v51 = vpop.f32.mrb[180].mxu0 }
 0x4e4   : > { %v5918_v11 = vadd.f32 %v9334_v19, %v4533_v51  ;;  %v4535_v44 = vpop.f32.mrb[181].mxu0 }
 0x4e6   : > { %v4689_v45 = vsel %vm4657_vm12, %v5918_v11, -1e+30 }
 0x4e7   : > { %4722 = vst.msk [vmem:[%s9342_s16 + $0xd0] sm:$0xff] %vm4695_vm1, %v4689_v45  ;;  %v4538_v35 = vpop.f32.mrb[182].mxu0 }
 0x4e8   : > { %v5919_v47 = vadd.f32 %v9334_v19, %v4538_v35  ;;  %v4540_v25 = vpop.f32.mrb[183].mxu0 }
 0x4ea   : > { %v4690_v40 = vsel %vm4658_vm13, %v5919_v47, -1e+30 }
 0x4eb   : > { %4723 = vst.msk [vmem:[%s9342_s16 + $0xd8] sm:$0xff] %vm4695_vm1, %v4690_v40  ;;  %v4543_v2 = vpop.f32.mrb[184].mxu0 }
 0x4ec   : > { %v5920_v18 = vadd.f32 %v9334_v19, %v4543_v2  ;;  %v4545_v7 = vpop.f32.mrb[185].mxu0 }
 0x4ee   : > { %v4691_v36 = vsel %vm4659_vm14, %v5920_v18, -1e+30 }
 0x4ef   : > { %4724 = vst.msk [vmem:[%s9342_s16 + $0xe0] sm:$0xff] %vm4695_vm1, %v4691_v36  ;;  %v4548_v5 = vpop.f32.mrb[186].mxu0 }
 0x4f0   : > { %v5921_v20 = vadd.f32 %v9334_v19, %v4548_v5  ;;  %v4550_v55 = vpop.f32.mrb[187].mxu0 }
 0x4f2   : > { %v4692_v48 = vsel %vm4660_vm15, %v5921_v20, -1e+30 }
 0x4f3   : > { %4725 = vst.msk [vmem:[%s9342_s16 + $0xe8] sm:$0xff] %vm4695_vm1, %v4692_v48  ;;  %v4553_v60 = vpop.f32.mrb[188].mxu0 }
 0x4f4   : > { %v5922_v12 = vadd.f32 %v9334_v19, %v4553_v60  ;;  %v4555_v26 = vpop.f32.mrb[189].mxu0 }
 0x4f6   : > { %v4693_v21 = vsel %vm4661_vm0, %v5922_v12, -1e+30 }
 0x4f7   : > { %4726 = vst.msk [vmem:[%s9342_s16 + $0xf0] sm:$0xff] %vm4695_vm1, %v4693_v21  ;;  %v4558_v0 = vpop.f32.mrb[190].mxu0 }
 0x4f8   : > { %v5923_v24 = vadd.f32 %v9334_v19, %v4558_v0  ;;  %v4560_v23 = vpop.f32.mrb[191].mxu0 }
 0x4fa   : > { %v4694_v63 = vsel %vm4662_vm2, %v5923_v24, -1e+30 }
 0x4fb   : > { %4727 = vst.msk [vmem:[%s9342_s16 + $0xf8] sm:$0xff] %vm4695_vm1, %v4694_v63 }
 0x4fc PF: > { %p20_p9 = scmp.ge.s32.totalorder %s7499_s15, 4   ;;  %s9756_s25 = smov %s7347_s26 }
 0x4fd   : > { %s9757_s26 = smov %s7351_s27  ;;  %s9758_s27 = smov %s7510_s18 }
 0x4fe   : > { %s9759_s28 = smov %s7499_s15  ;;  %22 = sbr.rel (!%p20_p9) target bundleno = 7 (0x7), region = 88 }
 0x505   :  { %4750 = vsyncpa [#allocation6], 1 }
 0x506   :  { %4752 = vsyncpa [#allocation6 + $0x1], 1 }
 0x507   :  { %4753 = vsyncpa [#allocation8], 1 }

</bundles_post_ra>
